<compile_context>
chip_gen: v5e
topology: v5e:2x2
jax: 0.10.0
libtpu: 0.0.40
codegen_flags: <defaults>
</compile_context>

<pallas_src>
import functools

import jax
import jax.numpy as jnp
import numpy as np
from jax.experimental import pallas as pl
from jax.experimental.pallas import tpu as pltpu


_SQRT_HALF = 0.7071067811865476


def _gelu(v):
    # exact (erf-based) GELU -- matches torch.nn.GELU() default
    return 0.5 * v * (1.0 + jax.lax.erf(v * _SQRT_HALF))


# ----------------------------------------------------------------------------
# Fused Pallas kernel: patch-embed -> num_blocks MixerBlocks -> mean -> proj
# ----------------------------------------------------------------------------
def mlp_mixer_fused_kernel(
    patches_ref, we_ref, be_ref,
    gamma_ref, beta_ref,
    wt1_ref, bt1_ref, wt2_ref, bt2_ref,
    wc1_ref, bc1_ref, wc2_ref, bc2_ref,
    wp_ref, bp_ref,
    o_ref,
    *, batch, tokens,
):
    B, T = batch, tokens

    # ---- patch embedding: (B*T, P) @ (P, H) + b ------------------------------
    x = (jnp.dot(patches_ref[...], we_ref[...],
                 preferred_element_type=jnp.float32)
         + be_ref[...])                                  # (B*T, H)

    num_blocks = wt1_ref.shape[0]
    for l in range(num_blocks):                          # static, unrolled
        gamma = gamma_ref[l]                             # (1, H)
        beta = beta_ref[l]                               # (1, H)

        def layer_norm(v):
            mu = jnp.mean(v, axis=-1, keepdims=True)
            var = jnp.mean((v - mu) ** 2, axis=-1, keepdims=True)
            return (v - mu) * jax.lax.rsqrt(var + 1e-5) * gamma + beta

        # -- token mixing (along the token axis, per batch element) -----------
        y = layer_norm(x)                                # (B*T, H)
        wt1 = wt1_ref[l]                                 # (M, T)
        bt1 = bt1_ref[l]                                 # (M, 1)
        wt2 = wt2_ref[l]                                 # (T, M)
        bt2 = bt2_ref[l]                                 # (T, 1)
        # out_b = wt2 @ gelu(wt1 @ y_b + bt1) + bt2  -> (T, H); no transposes,
        # the MXU consumes the operands directly.
        tok = []
        for b in range(B):                               # B is tiny, unrolled
            y_b = y[b * T:(b + 1) * T, :]                # static (T, H) slice
            h = _gelu(jnp.dot(wt1, y_b,
                              preferred_element_type=jnp.float32) + bt1)
            tok.append(jnp.dot(wt2, h,
                               preferred_element_type=jnp.float32) + bt2)
        y_tok = jnp.concatenate(tok, axis=0)             # (B*T, H)

        x = x + y_tok                                    # residual

        # -- channel mixing (LayerNorm of y_tok, as in the reference) ---------
        y2 = layer_norm(y_tok)                           # (B*T, H)
        h2 = _gelu(jnp.dot(y2, wc1_ref[l],
                           preferred_element_type=jnp.float32)
                   + bc1_ref[l])                         # (B*T, C)
        y2 = (jnp.dot(h2, wc2_ref[l],
                      preferred_element_type=jnp.float32)
              + bc2_ref[l])                              # (B*T, H)
        x = y2 + x

    # ---- head: per-batch token mean + linear projection ----------------------
    feat = jnp.concatenate(
        [jnp.mean(x[b * T:(b + 1) * T, :], axis=0, keepdims=True)
         for b in range(B)],
        axis=0)                                          # (B, H)
    o_ref[...] = (jnp.dot(feat, wp_ref[...],
                          preferred_element_type=jnp.float32)
                  + bp_ref[...])                         # (B, num_classes)


# ----------------------------------------------------------------------------
# Wrapper
# ----------------------------------------------------------------------------
def extract_patches(x, patch_size):
    # x: (B, C, H, W) NCHW -> (B, T, C*ph*pw), tokens row-major over patch grid
    B, C, H, W = x.shape
    ph, pw = patch_size
    Hp, Wp = H // ph, W // pw
    p = x.reshape(B, C, Hp, ph, Wp, pw)
    p = p.transpose(0, 2, 4, 1, 3, 5)                    # (B, Hp, Wp, C, ph, pw)
    return p.reshape(B, Hp * Wp, C * ph * pw)


def _prepare_fused_params(params):
    Hd = params["w_embed"].shape[0]
    we_t = params["w_embed"].reshape(Hd, -1).T           # (P, H)   -- Conv2d flatten
    be = params["b_embed"].reshape(1, Hd)
    blocks = params["blocks"]
    gamma = jnp.stack([b["ln_gamma"].reshape(1, Hd) for b in blocks])   # (L,1,H)
    beta = jnp.stack([b["ln_beta"].reshape(1, Hd) for b in blocks])     # (L,1,H)
    wt1 = jnp.stack([b["wt1"] for b in blocks])                         # (L,M,T)
    bt1 = jnp.stack([b["bt1"].reshape(-1, 1) for b in blocks])          # (L,M,1)
    wt2 = jnp.stack([b["wt2"] for b in blocks])                         # (L,T,M)
    bt2 = jnp.stack([b["bt2"].reshape(-1, 1) for b in blocks])          # (L,T,1)
    wc1 = jnp.stack([b["wc1"].T for b in blocks])                       # (L,H,C)
    bc1 = jnp.stack([b["bc1"].reshape(1, -1) for b in blocks])          # (L,1,C)
    wc2 = jnp.stack([b["wc2"].T for b in blocks])                       # (L,C,H)
    bc2 = jnp.stack([b["bc2"].reshape(1, -1) for b in blocks])          # (L,1,H)
    wp = params["w_proj"].T                                             # (H, classes)
    bp = params["b_proj"].reshape(1, -1)                                # (1, classes)
    return (we_t, be, gamma, beta, wt1, bt1, wt2, bt2,
            wc1, bc1, wc2, bc2, wp, bp)


@functools.partial(jax.jit, static_argnames=("patch_size",))
def mlp_mixer_forward(x, params, patch_size):
    B = x.shape[0]
    patches = extract_patches(x, patch_size)             # (B, T, P)
    _, T, P = patches.shape
    patches2d = patches.reshape(B * T, P)                # fold batch into M
    fused = _prepare_fused_params(params)
    num_classes = params["w_proj"].shape[0]

    kernel = functools.partial(mlp_mixer_fused_kernel, batch=B, tokens=T)
    vmem_spec = pl.BlockSpec(memory_space=pltpu.MemorySpace.VMEM)

    # TODO(synk): on v7x (2 TensorCores) one could split the (independent)
    # batch across a grid=(B,) parallel axis instead of fully folding it.
    return pl.pallas_call(
        kernel,
        out_shape=jax.ShapeDtypeStruct((B, num_classes), jnp.float32),
        in_specs=[vmem_spec] * (1 + len(fused)),
        out_specs=vmem_spec,
    )(patches2d, *fused)


# ----------------------------------------------------------------------------
# Pure-JAX reference (mirrors the PyTorch forward) for verification
# ----------------------------------------------------------------------------
def reference_forward(x, params, patch_size):
    patches = extract_patches(x, patch_size)
    Hd = params["w_embed"].shape[0]
    w_flat = params["w_embed"].reshape(Hd, -1)
    out = patches @ w_flat.T + params["b_embed"]

    def ln(v, g, b):
        mu = jnp.mean(v, axis=-1, keepdims=True)
        var = jnp.mean((v - mu) ** 2, axis=-1, keepdims=True)
        return (v - mu) / jnp.sqrt(var + 1e-5) * g + b

    def gelu(v):
        return 0.5 * v * (1.0 + jax.lax.erf(v * _SQRT_HALF))

    for blk in params["blocks"]:
        y = ln(out, blk["ln_gamma"], blk["ln_beta"])
        y = jnp.transpose(y, (0, 2, 1))
        y = gelu(y @ blk["wt1"].T + blk["bt1"]) @ blk["wt2"].T + blk["bt2"]
        y = jnp.transpose(y, (0, 2, 1))
        out = out + y
        y = ln(y, blk["ln_gamma"], blk["ln_beta"])
        y = gelu(y @ blk["wc1"].T + blk["bc1"]) @ blk["wc2"].T + blk["bc2"]
        out = y + out

    feat = out.mean(axis=1)
    return feat @ params["w_proj"].T + params["b_proj"]


# ----------------------------------------------------------------------------
# Deterministic parameter initialization (shapes follow the nn.Module __init__)
# ----------------------------------------------------------------------------
def init_params(key, *, patch_size, image_size, in_c, hidden_dim,
                tokens_mlp_dim, channels_mlp_dim, num_blocks, num_classes):
    token_dim = (image_size[0] // patch_size[0]) * (image_size[1] // patch_size[1])

    def trunc_normal(k, shape, std=0.02):
        return std * jax.random.truncated_normal(k, -2.0, 2.0, shape, jnp.float32)

    keys = jax.random.split(key, 2 + 4 * num_blocks)
    ki = iter(keys)

    # Conv2d(in_c, hidden_dim, kernel=stride=patch) -- kaiming_normal(fan_out)
    fan_out = hidden_dim * patch_size[0] * patch_size[1]
    std_conv = np.sqrt(2.0 / fan_out)
    w_embed = std_conv * jax.random.normal(
        next(ki), (hidden_dim, in_c, patch_size[0], patch_size[1]), jnp.float32)
    b_embed = jnp.zeros((hidden_dim,), jnp.float32)

    blocks = []
    for _ in range(num_blocks):
        blocks.append({
            "ln_gamma": jnp.ones((hidden_dim,), jnp.float32),
            "ln_beta": jnp.zeros((hidden_dim,), jnp.float32),
            "wt1": trunc_normal(next(ki), (tokens_mlp_dim, token_dim)),
            "bt1": jnp.zeros((tokens_mlp_dim,), jnp.float32),
            "wt2": trunc_normal(next(ki), (token_dim, tokens_mlp_dim)),
            "bt2": jnp.zeros((token_dim,), jnp.float32),
            "wc1": trunc_normal(next(ki), (channels_mlp_dim, hidden_dim)),
            "bc1": jnp.zeros((channels_mlp_dim,), jnp.float32),
            "wc2": trunc_normal(next(ki), (hidden_dim, channels_mlp_dim)),
            "bc2": jnp.zeros((hidden_dim,), jnp.float32),
        })

    w_proj = trunc_normal(next(ki), (num_classes, hidden_dim))
    b_proj = jnp.zeros((num_classes,), jnp.float32)

    return {"w_embed": w_embed, "b_embed": b_embed, "blocks": blocks,
            "w_proj": w_proj, "b_proj": b_proj}


# ----------------------------------------------------------------------------
if __name__ == "__main__":
    patch_size = (4, 4)
    image_size = (16, 16)
    in_c = 3
    hidden_dim = 128        # lane-friendly (multiple of 128)
    tokens_mlp_dim = 128
    channels_mlp_dim = 128
    num_blocks = 2
    num_classes = 10
    batch = 2

    key = jax.random.PRNGKey(0)
    kx, kp = jax.random.split(key)
    x = jax.random.normal(kx, (batch, in_c, *image_size), jnp.float32)

    params = init_params(
        kp, patch_size=patch_size, image_size=image_size, in_c=in_c,
        hidden_dim=hidden_dim, tokens_mlp_dim=tokens_mlp_dim,
        channels_mlp_dim=channels_mlp_dim, num_blocks=num_blocks,
        num_classes=num_classes)

    out = mlp_mixer_forward(x, params, patch_size)
    out = jax.block_until_ready(out)

    ref = reference_forward(x, params, patch_size)
    np.testing.assert_allclose(np.asarray(out), np.asarray(ref),
                               rtol=1e-4, atol=1e-4)

    print("KERNEL_OK")
</pallas_src>

<mosaic_0001>
module attributes {stable_mosaic.version = 11 : i64} {
  func.func @mlp_mixer_fused_kernel(%arg0: memref<32x48xf32, #tpu.memory_space<vmem>>, %arg1: memref<48x128xf32, #tpu.memory_space<vmem>>, %arg2: memref<1x128xf32, #tpu.memory_space<vmem>>, %arg3: memref<2x1x128xf32, #tpu.memory_space<vmem>>, %arg4: memref<2x1x128xf32, #tpu.memory_space<vmem>>, %arg5: memref<2x128x16xf32, #tpu.memory_space<vmem>>, %arg6: memref<2x128x1xf32, #tpu.memory_space<vmem>>, %arg7: memref<2x16x128xf32, #tpu.memory_space<vmem>>, %arg8: memref<2x16x1xf32, #tpu.memory_space<vmem>>, %arg9: memref<2x128x128xf32, #tpu.memory_space<vmem>>, %arg10: memref<2x1x128xf32, #tpu.memory_space<vmem>>, %arg11: memref<2x128x128xf32, #tpu.memory_space<vmem>>, %arg12: memref<2x1x128xf32, #tpu.memory_space<vmem>>, %arg13: memref<128x10xf32, #tpu.memory_space<vmem>>, %arg14: memref<1x10xf32, #tpu.memory_space<vmem>>, %arg15: memref<2x10xf32, #tpu.memory_space<vmem>>) attributes {dimension_semantics = [], scalar_prefetch = 0 : i64, scratch_operands = 0 : i64, tpu.core_type = #tpu.core_type<tc>} {
    %c0 = arith.constant 0 : index
    %c0_0 = arith.constant 0 : index
    %0 = vector.load %arg0[%c0, %c0_0] : memref<32x48xf32, #tpu.memory_space<vmem>>, vector<32x48xf32>
    %c0_1 = arith.constant 0 : index
    %c0_2 = arith.constant 0 : index
    %1 = vector.load %arg1[%c0_1, %c0_2] : memref<48x128xf32, #tpu.memory_space<vmem>>, vector<48x128xf32>
    %cst = arith.constant dense<0.000000e+00> : vector<32x128xf32>
    %2 = tpu.matmul %0, %1, %cst {dimension_numbers = #tpu.dot_dimension_numbers<[1], [0], [0], [1], [0, 0, 1, 1], [], []>} : vector<32x48xf32>, vector<48x128xf32>, vector<32x128xf32> -> vector<32x128xf32>
    %c0_3 = arith.constant 0 : index
    %c0_4 = arith.constant 0 : index
    %3 = vector.load %arg2[%c0_3, %c0_4] : memref<1x128xf32, #tpu.memory_space<vmem>>, vector<1x128xf32>
    %4 = vector.broadcast %3 : vector<1x128xf32> to vector<32x128xf32>
    %5 = arith.addf %2, %4 : vector<32x128xf32>
    %c0_5 = arith.constant 0 : index
    %c0_6 = arith.constant 0 : index
    %c0_7 = arith.constant 0 : index
    %6 = vector.load %arg3[%c0_5, %c0_6, %c0_7] : memref<2x1x128xf32, #tpu.memory_space<vmem>>, vector<1x1x128xf32>
    %7 = vector.shape_cast %6 : vector<1x1x128xf32> to vector<1x128xf32>
    %c0_8 = arith.constant 0 : index
    %c0_9 = arith.constant 0 : index
    %c0_10 = arith.constant 0 : index
    %8 = vector.load %arg4[%c0_8, %c0_9, %c0_10] : memref<2x1x128xf32, #tpu.memory_space<vmem>>, vector<1x1x128xf32>
    %9 = vector.shape_cast %8 : vector<1x1x128xf32> to vector<1x128xf32>
    %cst_11 = arith.constant dense<0.000000e+00> : vector<32xf32>
    %10 = vector.multi_reduction <add>, %5, %cst_11 [1] : vector<32x128xf32> to vector<32xf32>
    %11 = vector.shape_cast %10 : vector<32xf32> to vector<32x1xf32>
    %cst_12 = arith.constant 1.280000e+02 : f32
    %12 = vector.broadcast %cst_12 : f32 to vector<32x1xf32>
    %13 = arith.divf %11, %12 : vector<32x1xf32>
    %14 = vector.broadcast %13 : vector<32x1xf32> to vector<32x128xf32>
    %15 = arith.subf %5, %14 : vector<32x128xf32>
    %16 = arith.mulf %15, %15 : vector<32x128xf32>
    %cst_13 = arith.constant dense<0.000000e+00> : vector<32xf32>
    %17 = vector.multi_reduction <add>, %16, %cst_13 [1] : vector<32x128xf32> to vector<32xf32>
    %18 = vector.shape_cast %17 : vector<32xf32> to vector<32x1xf32>
    %cst_14 = arith.constant 1.280000e+02 : f32
    %19 = vector.broadcast %cst_14 : f32 to vector<32x1xf32>
    %20 = arith.divf %18, %19 : vector<32x1xf32>
    %21 = vector.broadcast %13 : vector<32x1xf32> to vector<32x128xf32>
    %22 = arith.subf %5, %21 : vector<32x128xf32>
    %cst_15 = arith.constant 9.99999974E-6 : f32
    %23 = vector.broadcast %cst_15 : f32 to vector<32x1xf32>
    %24 = arith.addf %20, %23 : vector<32x1xf32>
    %25 = math.rsqrt %24 : vector<32x1xf32>
    %26 = vector.broadcast %25 : vector<32x1xf32> to vector<32x128xf32>
    %27 = arith.mulf %22, %26 : vector<32x128xf32>
    %28 = vector.broadcast %7 : vector<1x128xf32> to vector<32x128xf32>
    %29 = arith.mulf %27, %28 : vector<32x128xf32>
    %30 = vector.broadcast %9 : vector<1x128xf32> to vector<32x128xf32>
    %31 = arith.addf %29, %30 : vector<32x128xf32>
    %c0_16 = arith.constant 0 : index
    %c0_17 = arith.constant 0 : index
    %c0_18 = arith.constant 0 : index
    %32 = vector.load %arg5[%c0_16, %c0_17, %c0_18] : memref<2x128x16xf32, #tpu.memory_space<vmem>>, vector<1x128x16xf32>
    %33 = vector.shape_cast %32 : vector<1x128x16xf32> to vector<128x16xf32>
    %c0_19 = arith.constant 0 : index
    %c0_20 = arith.constant 0 : index
    %c0_21 = arith.constant 0 : index
    %34 = vector.load %arg6[%c0_19, %c0_20, %c0_21] : memref<2x128x1xf32, #tpu.memory_space<vmem>>, vector<1x128x1xf32>
    %35 = vector.shape_cast %34 : vector<1x128x1xf32> to vector<128x1xf32>
    %c0_22 = arith.constant 0 : index
    %c0_23 = arith.constant 0 : index
    %c0_24 = arith.constant 0 : index
    %36 = vector.load %arg7[%c0_22, %c0_23, %c0_24] : memref<2x16x128xf32, #tpu.memory_space<vmem>>, vector<1x16x128xf32>
    %37 = vector.shape_cast %36 : vector<1x16x128xf32> to vector<16x128xf32>
    %c0_25 = arith.constant 0 : index
    %c0_26 = arith.constant 0 : index
    %c0_27 = arith.constant 0 : index
    %38 = vector.load %arg8[%c0_25, %c0_26, %c0_27] : memref<2x16x1xf32, #tpu.memory_space<vmem>>, vector<1x16x1xf32>
    %39 = vector.shape_cast %38 : vector<1x16x1xf32> to vector<16x1xf32>
    %40 = vector.extract_strided_slice %31 {offsets = [0, 0], sizes = [16, 128], strides = [1, 1]} : vector<32x128xf32> to vector<16x128xf32>
    %cst_28 = arith.constant dense<0.000000e+00> : vector<128x128xf32>
    %41 = tpu.matmul %33, %40, %cst_28 {dimension_numbers = #tpu.dot_dimension_numbers<[1], [0], [0], [1], [0, 0, 1, 1], [], []>} : vector<128x16xf32>, vector<16x128xf32>, vector<128x128xf32> -> vector<128x128xf32>
    %42 = vector.broadcast %35 : vector<128x1xf32> to vector<128x128xf32>
    %43 = arith.addf %41, %42 : vector<128x128xf32>
    %cst_29 = arith.constant 5.000000e-01 : f32
    %44 = vector.broadcast %cst_29 : f32 to vector<128x128xf32>
    %45 = arith.mulf %44, %43 : vector<128x128xf32>
    %cst_30 = arith.constant 0.707106769 : f32
    %46 = vector.broadcast %cst_30 : f32 to vector<128x128xf32>
    %47 = arith.mulf %43, %46 : vector<128x128xf32>
    %48 = math.erf %47 : vector<128x128xf32>
    %cst_31 = arith.constant 1.000000e+00 : f32
    %49 = vector.broadcast %cst_31 : f32 to vector<128x128xf32>
    %50 = arith.addf %49, %48 : vector<128x128xf32>
    %51 = arith.mulf %45, %50 : vector<128x128xf32>
    %cst_32 = arith.constant dense<0.000000e+00> : vector<16x128xf32>
    %52 = tpu.matmul %37, %51, %cst_32 {dimension_numbers = #tpu.dot_dimension_numbers<[1], [0], [0], [1], [0, 0, 1, 1], [], []>} : vector<16x128xf32>, vector<128x128xf32>, vector<16x128xf32> -> vector<16x128xf32>
    %53 = vector.broadcast %39 : vector<16x1xf32> to vector<16x128xf32>
    %54 = arith.addf %52, %53 : vector<16x128xf32>
    %55 = vector.extract_strided_slice %31 {offsets = [16, 0], sizes = [16, 128], strides = [1, 1]} : vector<32x128xf32> to vector<16x128xf32>
    %cst_33 = arith.constant dense<0.000000e+00> : vector<128x128xf32>
    %56 = tpu.matmul %33, %55, %cst_33 {dimension_numbers = #tpu.dot_dimension_numbers<[1], [0], [0], [1], [0, 0, 1, 1], [], []>} : vector<128x16xf32>, vector<16x128xf32>, vector<128x128xf32> -> vector<128x128xf32>
    %57 = vector.broadcast %35 : vector<128x1xf32> to vector<128x128xf32>
    %58 = arith.addf %56, %57 : vector<128x128xf32>
    %cst_34 = arith.constant 5.000000e-01 : f32
    %59 = vector.broadcast %cst_34 : f32 to vector<128x128xf32>
    %60 = arith.mulf %59, %58 : vector<128x128xf32>
    %cst_35 = arith.constant 0.707106769 : f32
    %61 = vector.broadcast %cst_35 : f32 to vector<128x128xf32>
    %62 = arith.mulf %58, %61 : vector<128x128xf32>
    %63 = math.erf %62 : vector<128x128xf32>
    %cst_36 = arith.constant 1.000000e+00 : f32
    %64 = vector.broadcast %cst_36 : f32 to vector<128x128xf32>
    %65 = arith.addf %64, %63 : vector<128x128xf32>
    %66 = arith.mulf %60, %65 : vector<128x128xf32>
    %cst_37 = arith.constant dense<0.000000e+00> : vector<16x128xf32>
    %67 = tpu.matmul %37, %66, %cst_37 {dimension_numbers = #tpu.dot_dimension_numbers<[1], [0], [0], [1], [0, 0, 1, 1], [], []>} : vector<16x128xf32>, vector<128x128xf32>, vector<16x128xf32> -> vector<16x128xf32>
    %68 = vector.broadcast %39 : vector<16x1xf32> to vector<16x128xf32>
    %69 = arith.addf %67, %68 : vector<16x128xf32>
    %70 = tpu.concatenate %54, %69 in 0 : vector<16x128xf32>, vector<16x128xf32> -> vector<32x128xf32>
    %71 = arith.addf %5, %70 : vector<32x128xf32>
    %cst_38 = arith.constant dense<0.000000e+00> : vector<32xf32>
    %72 = vector.multi_reduction <add>, %70, %cst_38 [1] : vector<32x128xf32> to vector<32xf32>
    %73 = vector.shape_cast %72 : vector<32xf32> to vector<32x1xf32>
    %cst_39 = arith.constant 1.280000e+02 : f32
    %74 = vector.broadcast %cst_39 : f32 to vector<32x1xf32>
    %75 = arith.divf %73, %74 : vector<32x1xf32>
    %76 = vector.broadcast %75 : vector<32x1xf32> to vector<32x128xf32>
    %77 = arith.subf %70, %76 : vector<32x128xf32>
    %78 = arith.mulf %77, %77 : vector<32x128xf32>
    %cst_40 = arith.constant dense<0.000000e+00> : vector<32xf32>
    %79 = vector.multi_reduction <add>, %78, %cst_40 [1] : vector<32x128xf32> to vector<32xf32>
    %80 = vector.shape_cast %79 : vector<32xf32> to vector<32x1xf32>
    %cst_41 = arith.constant 1.280000e+02 : f32
    %81 = vector.broadcast %cst_41 : f32 to vector<32x1xf32>
    %82 = arith.divf %80, %81 : vector<32x1xf32>
    %83 = vector.broadcast %75 : vector<32x1xf32> to vector<32x128xf32>
    %84 = arith.subf %70, %83 : vector<32x128xf32>
    %cst_42 = arith.constant 9.99999974E-6 : f32
    %85 = vector.broadcast %cst_42 : f32 to vector<32x1xf32>
    %86 = arith.addf %82, %85 : vector<32x1xf32>
    %87 = math.rsqrt %86 : vector<32x1xf32>
    %88 = vector.broadcast %87 : vector<32x1xf32> to vector<32x128xf32>
    %89 = arith.mulf %84, %88 : vector<32x128xf32>
    %90 = vector.broadcast %7 : vector<1x128xf32> to vector<32x128xf32>
    %91 = arith.mulf %89, %90 : vector<32x128xf32>
    %92 = vector.broadcast %9 : vector<1x128xf32> to vector<32x128xf32>
    %93 = arith.addf %91, %92 : vector<32x128xf32>
    %c0_43 = arith.constant 0 : index
    %c0_44 = arith.constant 0 : index
    %c0_45 = arith.constant 0 : index
    %94 = vector.load %arg9[%c0_43, %c0_44, %c0_45] : memref<2x128x128xf32, #tpu.memory_space<vmem>>, vector<1x128x128xf32>
    %95 = vector.shape_cast %94 : vector<1x128x128xf32> to vector<128x128xf32>
    %cst_46 = arith.constant dense<0.000000e+00> : vector<32x128xf32>
    %96 = tpu.matmul %93, %95, %cst_46 {dimension_numbers = #tpu.dot_dimension_numbers<[1], [0], [0], [1], [0, 0, 1, 1], [], []>} : vector<32x128xf32>, vector<128x128xf32>, vector<32x128xf32> -> vector<32x128xf32>
    %c0_47 = arith.constant 0 : index
    %c0_48 = arith.constant 0 : index
    %c0_49 = arith.constant 0 : index
    %97 = vector.load %arg10[%c0_47, %c0_48, %c0_49] : memref<2x1x128xf32, #tpu.memory_space<vmem>>, vector<1x1x128xf32>
    %98 = vector.shape_cast %97 : vector<1x1x128xf32> to vector<1x128xf32>
    %99 = vector.broadcast %98 : vector<1x128xf32> to vector<32x128xf32>
    %100 = arith.addf %96, %99 : vector<32x128xf32>
    %cst_50 = arith.constant 5.000000e-01 : f32
    %101 = vector.broadcast %cst_50 : f32 to vector<32x128xf32>
    %102 = arith.mulf %101, %100 : vector<32x128xf32>
    %cst_51 = arith.constant 0.707106769 : f32
    %103 = vector.broadcast %cst_51 : f32 to vector<32x128xf32>
    %104 = arith.mulf %100, %103 : vector<32x128xf32>
    %105 = math.erf %104 : vector<32x128xf32>
    %cst_52 = arith.constant 1.000000e+00 : f32
    %106 = vector.broadcast %cst_52 : f32 to vector<32x128xf32>
    %107 = arith.addf %106, %105 : vector<32x128xf32>
    %108 = arith.mulf %102, %107 : vector<32x128xf32>
    %c0_53 = arith.constant 0 : index
    %c0_54 = arith.constant 0 : index
    %c0_55 = arith.constant 0 : index
    %109 = vector.load %arg11[%c0_53, %c0_54, %c0_55] : memref<2x128x128xf32, #tpu.memory_space<vmem>>, vector<1x128x128xf32>
    %110 = vector.shape_cast %109 : vector<1x128x128xf32> to vector<128x128xf32>
    %cst_56 = arith.constant dense<0.000000e+00> : vector<32x128xf32>
    %111 = tpu.matmul %108, %110, %cst_56 {dimension_numbers = #tpu.dot_dimension_numbers<[1], [0], [0], [1], [0, 0, 1, 1], [], []>} : vector<32x128xf32>, vector<128x128xf32>, vector<32x128xf32> -> vector<32x128xf32>
    %c0_57 = arith.constant 0 : index
    %c0_58 = arith.constant 0 : index
    %c0_59 = arith.constant 0 : index
    %112 = vector.load %arg12[%c0_57, %c0_58, %c0_59] : memref<2x1x128xf32, #tpu.memory_space<vmem>>, vector<1x1x128xf32>
    %113 = vector.shape_cast %112 : vector<1x1x128xf32> to vector<1x128xf32>
    %114 = vector.broadcast %113 : vector<1x128xf32> to vector<32x128xf32>
    %115 = arith.addf %111, %114 : vector<32x128xf32>
    %116 = arith.addf %115, %71 : vector<32x128xf32>
    %c1 = arith.constant 1 : index
    %c0_60 = arith.constant 0 : index
    %c0_61 = arith.constant 0 : index
    %117 = vector.load %arg3[%c1, %c0_60, %c0_61] : memref<2x1x128xf32, #tpu.memory_space<vmem>>, vector<1x1x128xf32>
    %118 = vector.shape_cast %117 : vector<1x1x128xf32> to vector<1x128xf32>
    %c1_62 = arith.constant 1 : index
    %c0_63 = arith.constant 0 : index
    %c0_64 = arith.constant 0 : index
    %119 = vector.load %arg4[%c1_62, %c0_63, %c0_64] : memref<2x1x128xf32, #tpu.memory_space<vmem>>, vector<1x1x128xf32>
    %120 = vector.shape_cast %119 : vector<1x1x128xf32> to vector<1x128xf32>
    %cst_65 = arith.constant dense<0.000000e+00> : vector<32xf32>
    %121 = vector.multi_reduction <add>, %116, %cst_65 [1] : vector<32x128xf32> to vector<32xf32>
    %122 = vector.shape_cast %121 : vector<32xf32> to vector<32x1xf32>
    %cst_66 = arith.constant 1.280000e+02 : f32
    %123 = vector.broadcast %cst_66 : f32 to vector<32x1xf32>
    %124 = arith.divf %122, %123 : vector<32x1xf32>
    %125 = vector.broadcast %124 : vector<32x1xf32> to vector<32x128xf32>
    %126 = arith.subf %116, %125 : vector<32x128xf32>
    %127 = arith.mulf %126, %126 : vector<32x128xf32>
    %cst_67 = arith.constant dense<0.000000e+00> : vector<32xf32>
    %128 = vector.multi_reduction <add>, %127, %cst_67 [1] : vector<32x128xf32> to vector<32xf32>
    %129 = vector.shape_cast %128 : vector<32xf32> to vector<32x1xf32>
    %cst_68 = arith.constant 1.280000e+02 : f32
    %130 = vector.broadcast %cst_68 : f32 to vector<32x1xf32>
    %131 = arith.divf %129, %130 : vector<32x1xf32>
    %132 = vector.broadcast %124 : vector<32x1xf32> to vector<32x128xf32>
    %133 = arith.subf %116, %132 : vector<32x128xf32>
    %cst_69 = arith.constant 9.99999974E-6 : f32
    %134 = vector.broadcast %cst_69 : f32 to vector<32x1xf32>
    %135 = arith.addf %131, %134 : vector<32x1xf32>
    %136 = math.rsqrt %135 : vector<32x1xf32>
    %137 = vector.broadcast %136 : vector<32x1xf32> to vector<32x128xf32>
    %138 = arith.mulf %133, %137 : vector<32x128xf32>
    %139 = vector.broadcast %118 : vector<1x128xf32> to vector<32x128xf32>
    %140 = arith.mulf %138, %139 : vector<32x128xf32>
    %141 = vector.broadcast %120 : vector<1x128xf32> to vector<32x128xf32>
    %142 = arith.addf %140, %141 : vector<32x128xf32>
    %c1_70 = arith.constant 1 : index
    %c0_71 = arith.constant 0 : index
    %c0_72 = arith.constant 0 : index
    %143 = vector.load %arg5[%c1_70, %c0_71, %c0_72] : memref<2x128x16xf32, #tpu.memory_space<vmem>>, vector<1x128x16xf32>
    %144 = vector.shape_cast %143 : vector<1x128x16xf32> to vector<128x16xf32>
    %c1_73 = arith.constant 1 : index
    %c0_74 = arith.constant 0 : index
    %c0_75 = arith.constant 0 : index
    %145 = vector.load %arg6[%c1_73, %c0_74, %c0_75] : memref<2x128x1xf32, #tpu.memory_space<vmem>>, vector<1x128x1xf32>
    %146 = vector.shape_cast %145 : vector<1x128x1xf32> to vector<128x1xf32>
    %c1_76 = arith.constant 1 : index
    %c0_77 = arith.constant 0 : index
    %c0_78 = arith.constant 0 : index
    %147 = vector.load %arg7[%c1_76, %c0_77, %c0_78] : memref<2x16x128xf32, #tpu.memory_space<vmem>>, vector<1x16x128xf32>
    %148 = vector.shape_cast %147 : vector<1x16x128xf32> to vector<16x128xf32>
    %c1_79 = arith.constant 1 : index
    %c0_80 = arith.constant 0 : index
    %c0_81 = arith.constant 0 : index
    %149 = vector.load %arg8[%c1_79, %c0_80, %c0_81] : memref<2x16x1xf32, #tpu.memory_space<vmem>>, vector<1x16x1xf32>
    %150 = vector.shape_cast %149 : vector<1x16x1xf32> to vector<16x1xf32>
    %151 = vector.extract_strided_slice %142 {offsets = [0, 0], sizes = [16, 128], strides = [1, 1]} : vector<32x128xf32> to vector<16x128xf32>
    %cst_82 = arith.constant dense<0.000000e+00> : vector<128x128xf32>
    %152 = tpu.matmul %144, %151, %cst_82 {dimension_numbers = #tpu.dot_dimension_numbers<[1], [0], [0], [1], [0, 0, 1, 1], [], []>} : vector<128x16xf32>, vector<16x128xf32>, vector<128x128xf32> -> vector<128x128xf32>
    %153 = vector.broadcast %146 : vector<128x1xf32> to vector<128x128xf32>
    %154 = arith.addf %152, %153 : vector<128x128xf32>
    %cst_83 = arith.constant 5.000000e-01 : f32
    %155 = vector.broadcast %cst_83 : f32 to vector<128x128xf32>
    %156 = arith.mulf %155, %154 : vector<128x128xf32>
    %cst_84 = arith.constant 0.707106769 : f32
    %157 = vector.broadcast %cst_84 : f32 to vector<128x128xf32>
    %158 = arith.mulf %154, %157 : vector<128x128xf32>
    %159 = math.erf %158 : vector<128x128xf32>
    %cst_85 = arith.constant 1.000000e+00 : f32
    %160 = vector.broadcast %cst_85 : f32 to vector<128x128xf32>
    %161 = arith.addf %160, %159 : vector<128x128xf32>
    %162 = arith.mulf %156, %161 : vector<128x128xf32>
    %cst_86 = arith.constant dense<0.000000e+00> : vector<16x128xf32>
    %163 = tpu.matmul %148, %162, %cst_86 {dimension_numbers = #tpu.dot_dimension_numbers<[1], [0], [0], [1], [0, 0, 1, 1], [], []>} : vector<16x128xf32>, vector<128x128xf32>, vector<16x128xf32> -> vector<16x128xf32>
    %164 = vector.broadcast %150 : vector<16x1xf32> to vector<16x128xf32>
    %165 = arith.addf %163, %164 : vector<16x128xf32>
    %166 = vector.extract_strided_slice %142 {offsets = [16, 0], sizes = [16, 128], strides = [1, 1]} : vector<32x128xf32> to vector<16x128xf32>
    %cst_87 = arith.constant dense<0.000000e+00> : vector<128x128xf32>
    %167 = tpu.matmul %144, %166, %cst_87 {dimension_numbers = #tpu.dot_dimension_numbers<[1], [0], [0], [1], [0, 0, 1, 1], [], []>} : vector<128x16xf32>, vector<16x128xf32>, vector<128x128xf32> -> vector<128x128xf32>
    %168 = vector.broadcast %146 : vector<128x1xf32> to vector<128x128xf32>
    %169 = arith.addf %167, %168 : vector<128x128xf32>
    %cst_88 = arith.constant 5.000000e-01 : f32
    %170 = vector.broadcast %cst_88 : f32 to vector<128x128xf32>
    %171 = arith.mulf %170, %169 : vector<128x128xf32>
    %cst_89 = arith.constant 0.707106769 : f32
    %172 = vector.broadcast %cst_89 : f32 to vector<128x128xf32>
    %173 = arith.mulf %169, %172 : vector<128x128xf32>
    %174 = math.erf %173 : vector<128x128xf32>
    %cst_90 = arith.constant 1.000000e+00 : f32
    %175 = vector.broadcast %cst_90 : f32 to vector<128x128xf32>
    %176 = arith.addf %175, %174 : vector<128x128xf32>
    %177 = arith.mulf %171, %176 : vector<128x128xf32>
    %cst_91 = arith.constant dense<0.000000e+00> : vector<16x128xf32>
    %178 = tpu.matmul %148, %177, %cst_91 {dimension_numbers = #tpu.dot_dimension_numbers<[1], [0], [0], [1], [0, 0, 1, 1], [], []>} : vector<16x128xf32>, vector<128x128xf32>, vector<16x128xf32> -> vector<16x128xf32>
    %179 = vector.broadcast %150 : vector<16x1xf32> to vector<16x128xf32>
    %180 = arith.addf %178, %179 : vector<16x128xf32>
    %181 = tpu.concatenate %165, %180 in 0 : vector<16x128xf32>, vector<16x128xf32> -> vector<32x128xf32>
    %182 = arith.addf %116, %181 : vector<32x128xf32>
    %cst_92 = arith.constant dense<0.000000e+00> : vector<32xf32>
    %183 = vector.multi_reduction <add>, %181, %cst_92 [1] : vector<32x128xf32> to vector<32xf32>
    %184 = vector.shape_cast %183 : vector<32xf32> to vector<32x1xf32>
    %cst_93 = arith.constant 1.280000e+02 : f32
    %185 = vector.broadcast %cst_93 : f32 to vector<32x1xf32>
    %186 = arith.divf %184, %185 : vector<32x1xf32>
    %187 = vector.broadcast %186 : vector<32x1xf32> to vector<32x128xf32>
    %188 = arith.subf %181, %187 : vector<32x128xf32>
    %189 = arith.mulf %188, %188 : vector<32x128xf32>
    %cst_94 = arith.constant dense<0.000000e+00> : vector<32xf32>
    %190 = vector.multi_reduction <add>, %189, %cst_94 [1] : vector<32x128xf32> to vector<32xf32>
    %191 = vector.shape_cast %190 : vector<32xf32> to vector<32x1xf32>
    %cst_95 = arith.constant 1.280000e+02 : f32
    %192 = vector.broadcast %cst_95 : f32 to vector<32x1xf32>
    %193 = arith.divf %191, %192 : vector<32x1xf32>
    %194 = vector.broadcast %186 : vector<32x1xf32> to vector<32x128xf32>
    %195 = arith.subf %181, %194 : vector<32x128xf32>
    %cst_96 = arith.constant 9.99999974E-6 : f32
    %196 = vector.broadcast %cst_96 : f32 to vector<32x1xf32>
    %197 = arith.addf %193, %196 : vector<32x1xf32>
    %198 = math.rsqrt %197 : vector<32x1xf32>
    %199 = vector.broadcast %198 : vector<32x1xf32> to vector<32x128xf32>
    %200 = arith.mulf %195, %199 : vector<32x128xf32>
    %201 = vector.broadcast %118 : vector<1x128xf32> to vector<32x128xf32>
    %202 = arith.mulf %200, %201 : vector<32x128xf32>
    %203 = vector.broadcast %120 : vector<1x128xf32> to vector<32x128xf32>
    %204 = arith.addf %202, %203 : vector<32x128xf32>
    %c1_97 = arith.constant 1 : index
    %c0_98 = arith.constant 0 : index
    %c0_99 = arith.constant 0 : index
    %205 = vector.load %arg9[%c1_97, %c0_98, %c0_99] : memref<2x128x128xf32, #tpu.memory_space<vmem>>, vector<1x128x128xf32>
    %206 = vector.shape_cast %205 : vector<1x128x128xf32> to vector<128x128xf32>
    %cst_100 = arith.constant dense<0.000000e+00> : vector<32x128xf32>
    %207 = tpu.matmul %204, %206, %cst_100 {dimension_numbers = #tpu.dot_dimension_numbers<[1], [0], [0], [1], [0, 0, 1, 1], [], []>} : vector<32x128xf32>, vector<128x128xf32>, vector<32x128xf32> -> vector<32x128xf32>
    %c1_101 = arith.constant 1 : index
    %c0_102 = arith.constant 0 : index
    %c0_103 = arith.constant 0 : index
    %208 = vector.load %arg10[%c1_101, %c0_102, %c0_103] : memref<2x1x128xf32, #tpu.memory_space<vmem>>, vector<1x1x128xf32>
    %209 = vector.shape_cast %208 : vector<1x1x128xf32> to vector<1x128xf32>
    %210 = vector.broadcast %209 : vector<1x128xf32> to vector<32x128xf32>
    %211 = arith.addf %207, %210 : vector<32x128xf32>
    %cst_104 = arith.constant 5.000000e-01 : f32
    %212 = vector.broadcast %cst_104 : f32 to vector<32x128xf32>
    %213 = arith.mulf %212, %211 : vector<32x128xf32>
    %cst_105 = arith.constant 0.707106769 : f32
    %214 = vector.broadcast %cst_105 : f32 to vector<32x128xf32>
    %215 = arith.mulf %211, %214 : vector<32x128xf32>
    %216 = math.erf %215 : vector<32x128xf32>
    %cst_106 = arith.constant 1.000000e+00 : f32
    %217 = vector.broadcast %cst_106 : f32 to vector<32x128xf32>
    %218 = arith.addf %217, %216 : vector<32x128xf32>
    %219 = arith.mulf %213, %218 : vector<32x128xf32>
    %c1_107 = arith.constant 1 : index
    %c0_108 = arith.constant 0 : index
    %c0_109 = arith.constant 0 : index
    %220 = vector.load %arg11[%c1_107, %c0_108, %c0_109] : memref<2x128x128xf32, #tpu.memory_space<vmem>>, vector<1x128x128xf32>
    %221 = vector.shape_cast %220 : vector<1x128x128xf32> to vector<128x128xf32>
    %cst_110 = arith.constant dense<0.000000e+00> : vector<32x128xf32>
    %222 = tpu.matmul %219, %221, %cst_110 {dimension_numbers = #tpu.dot_dimension_numbers<[1], [0], [0], [1], [0, 0, 1, 1], [], []>} : vector<32x128xf32>, vector<128x128xf32>, vector<32x128xf32> -> vector<32x128xf32>
    %c1_111 = arith.constant 1 : index
    %c0_112 = arith.constant 0 : index
    %c0_113 = arith.constant 0 : index
    %223 = vector.load %arg12[%c1_111, %c0_112, %c0_113] : memref<2x1x128xf32, #tpu.memory_space<vmem>>, vector<1x1x128xf32>
    %224 = vector.shape_cast %223 : vector<1x1x128xf32> to vector<1x128xf32>
    %225 = vector.broadcast %224 : vector<1x128xf32> to vector<32x128xf32>
    %226 = arith.addf %222, %225 : vector<32x128xf32>
    %227 = arith.addf %226, %182 : vector<32x128xf32>
    %228 = vector.extract_strided_slice %227 {offsets = [0, 0], sizes = [16, 128], strides = [1, 1]} : vector<32x128xf32> to vector<16x128xf32>
    %cst_114 = arith.constant dense<0.000000e+00> : vector<128xf32>
    %229 = vector.multi_reduction <add>, %228, %cst_114 [0] : vector<16x128xf32> to vector<128xf32>
    %230 = vector.shape_cast %229 : vector<128xf32> to vector<1x128xf32>
    %cst_115 = arith.constant 1.600000e+01 : f32
    %231 = vector.broadcast %cst_115 : f32 to vector<1x128xf32>
    %232 = arith.divf %230, %231 : vector<1x128xf32>
    %233 = vector.extract_strided_slice %227 {offsets = [16, 0], sizes = [16, 128], strides = [1, 1]} : vector<32x128xf32> to vector<16x128xf32>
    %cst_116 = arith.constant dense<0.000000e+00> : vector<128xf32>
    %234 = vector.multi_reduction <add>, %233, %cst_116 [0] : vector<16x128xf32> to vector<128xf32>
    %235 = vector.shape_cast %234 : vector<128xf32> to vector<1x128xf32>
    %cst_117 = arith.constant 1.600000e+01 : f32
    %236 = vector.broadcast %cst_117 : f32 to vector<1x128xf32>
    %237 = arith.divf %235, %236 : vector<1x128xf32>
    %238 = tpu.concatenate %232, %237 in 0 : vector<1x128xf32>, vector<1x128xf32> -> vector<2x128xf32>
    %c0_118 = arith.constant 0 : index
    %c0_119 = arith.constant 0 : index
    %239 = vector.load %arg13[%c0_118, %c0_119] : memref<128x10xf32, #tpu.memory_space<vmem>>, vector<128x10xf32>
    %cst_120 = arith.constant dense<0.000000e+00> : vector<2x10xf32>
    %240 = tpu.matmul %238, %239, %cst_120 {dimension_numbers = #tpu.dot_dimension_numbers<[1], [0], [0], [1], [0, 0, 1, 1], [], []>} : vector<2x128xf32>, vector<128x10xf32>, vector<2x10xf32> -> vector<2x10xf32>
    %c0_121 = arith.constant 0 : index
    %c0_122 = arith.constant 0 : index
    %241 = vector.load %arg14[%c0_121, %c0_122] : memref<1x10xf32, #tpu.memory_space<vmem>>, vector<1x10xf32>
    %242 = vector.broadcast %241 : vector<1x10xf32> to vector<2x10xf32>
    %243 = arith.addf %240, %242 : vector<2x10xf32>
    %c0_123 = arith.constant 0 : index
    %c0_124 = arith.constant 0 : index
    %244 = vector.load %arg15[%c0_123, %c0_124] : memref<2x10xf32, #tpu.memory_space<vmem>>, vector<2x10xf32>
    tpu.vector_store %arg15[%c0_123, %c0_124], %243 {strides = array<i32>} : memref<2x10xf32, #tpu.memory_space<vmem>>, vector<2x10xf32>,
    return
  }
}

</mosaic_0001>

<bundles_post_ra>
// kernel: mlp_mixer_forward.1
= control target key start
LH: loop header
LB: loop body
LE: loop exit
PB: predicated region body
PF: predicated region fallthrough
CT: control target
= control target key end

     0   :  { %s9258_s0 = inlined_call_operand.vmem [shape: f32[32,48], index: 0, kind: input, shape index: {}]   ;;  %s9259_s1 = inlined_call_operand.vmem [shape: f32[48,128], index: 1, kind: input, shape index: {}]   ;;  %s9260_s2 = inlined_call_operand.vmem [shape: f32[1,128], index: 2, kind: input, shape index: {}]   ;;  %s9261_s3 = inlined_call_operand.vmem [shape: f32[2,1,128], index: 3, kind: input, shape index: {}]   ;;  %s9262_s4 = inlined_call_operand.vmem [shape: f32[2,1,128], index: 4, kind: input, shape index: {}]   ;;  %s9263_s5 = inlined_call_operand.vmem [shape: f32[2,128,16], index: 5, kind: input, shape index: {}]   ;;  %s9264_s6 = inlined_call_operand.vmem [shape: f32[2,128,1], index: 6, kind: input, shape index: {}]   ;;  %s9265_s7 = inlined_call_operand.vmem [shape: f32[2,16,128], index: 7, kind: input, shape index: {}]   ;;  %s9266_s8 = inlined_call_operand.vmem [shape: f32[2,16,1], index: 8, kind: input, shape index: {}]   ;;  %s9267_s9 = inlined_call_operand.vmem [shape: f32[2,128,128], index: 9, kind: input, shape index: {}]   ;;  %s9268_s10 = inlined_call_operand.vmem [shape: f32[2,1,128], index: 10, kind: input, shape index: {}]   ;;  %s9269_s11 = inlined_call_operand.vmem [shape: f32[2,128,128], index: 11, kind: input, shape index: {}]   ;;  %s9270_s12 = inlined_call_operand.vmem [shape: f32[2,1,128], index: 12, kind: input, shape index: {}]   ;;  %s9271_s13 = inlined_call_operand.vmem [shape: f32[128,10], index: 13, kind: input, shape index: {}]   ;;  %s9272_s14 = inlined_call_operand.vmem [shape: f32[1,10], index: 14, kind: input, shape index: {}]   ;;  %s9273_s15 = inlined_call_operand.hbm [shape: f32[2,10], index: 15, kind: output, shape index: {}]  }
   0x1   :  { %v60_v0 = vld [vmem:[%s9259_s1 + $0x28] sm:$0xff]  ;;  %v59_v1 = vld [vmem:[%s9259_s1 + $0x20] sm:$0xff]  ;;  %v58_v2 = vld [vmem:[%s9259_s1 + $0x18] sm:$0xff] }
   0x2   :  { %88 = vmatpush.msra.mxu0 %v60_v0  ;;  %v57_v3 = vld [vmem:[%s9259_s1 + $0x10] sm:$0xff]  ;;  %v56_v4 = vld [vmem:[%s9259_s1 + $0x8] sm:$0xff] }
   0x4   :  { %89 = vmatpush.msra.mxu0 %v59_v1 }
   0x6   :  { %90 = vmatpush.msra.mxu0 %v58_v2 }
   0x8   :  { %91 = vmatpush.msra.mxu0 %v57_v3 }
   0x9   :  { %20 = vsyncpa [#allocation3], 0  ;;  %v55_v5 = vld [vmem:[%s9259_s1] sm:$0xff]  ;;  %vm65_vm0 = vcmask 392192   ;;  %v52_v7 = vld [vmem:[%s9258_s0 + $0x8] sm:$0xff]  ;;  %v5117_v10 = vmov 0  }
   0xa   :  { %92 = vmatpush.msra.mxu0 %v56_v4  ;;  %v51_v6 = vld [vmem:[%s9258_s0] sm:$0xff]  ;;  %v53_v8 = vld [vmem:[%s9258_s0 + $0x10] sm:$0xff]  ;;  %v54_v9 = vld [vmem:[%s9258_s0 + $0x18] sm:$0xff]  ;;  %4875 = vset.pattern.permute.xlu0 %v5117_v10  ;;  %v5118_v27 = vmov 128.0   ;;  %vm9399_vm8 = vcmask 130048   ;;  %s5120_s28 = smov [#allocation2]  }
   0xb   :  { %4874 = vset.pattern.permute.xlu2 %v5117_v10  ;;  %4876 = vset.pattern.permute.xlu1 %v5117_v10  ;;  %v4877_v12 = vld [vmem:[%s9260_s2] ss:$0 sm:$0xff]  ;;  %v239_v18 = vld [vmem:[%s9264_s6 + $0x68] sm:$0xff]  ;;  %v241_v20 = vld [vmem:[%s9264_s6 + $0x78] sm:$0xff]  ;;  %4887 = vrcp.f32 %v5118_v27  ;;  %s4645_s29 = sshll.u32 %s5120_s28, 4  ;;  %s4647_s16 = sshll.u32 %s9273_s15, 4  ;;  %s4646_s29 = int_to_ptr.vmem [resolvable:$true] %s4645_s29  ;;  %s4648_s16 = int_to_ptr.hbm [resolvable:$true] %s4647_s16 }
   0xc   :  { %93 = vmatpush.msra.mxu0 %v55_v5  ;;  %v230_v19 = vld [vmem:[%s9264_s6 + $0x20] sm:$0xff]  ;;  %323 = vperm.xlu2 %4874, %v241_v20   ;;  %v240_v21 = vld [vmem:[%s9264_s6 + $0x70] sm:$0xff]  ;;  %v237_v22 = vld [vmem:[%s9264_s6 + $0x58] sm:$0xff] }
   0xd   :  { %4656 = vmatmul.msk.f32.vlgmr.msra.gmra.mxu0 %vm65_vm0, %v51_v6  ;;  %v236_v23 = vld [vmem:[%s9264_s6 + $0x50] sm:$0xff]  ;;  %v235_v26 = vld [vmem:[%s9264_s6 + $0x48] sm:$0xff]  ;;  %v234_v29 = vld [vmem:[%s9264_s6 + $0x40] sm:$0xff] }
   0xe   :  { %v232_v31 = vld [vmem:[%s9264_s6 + $0x30] sm:$0xff]  ;;  %v229_v34 = vld [vmem:[%s9264_s6 + $0x18] sm:$0xff]  ;;  %v227_v39 = vld [vmem:[%s9264_s6 + $0x8] sm:$0xff] }
   0xf   :  { %v226_v44 = vld [vmem:[%s9264_s6] sm:$0xff]  ;;  %v233_v48 = vld [vmem:[%s9264_s6 + $0x38] sm:$0xff]  ;;  %v231_v49 = vld [vmem:[%s9264_s6 + $0x28] sm:$0xff] }
  0x10   :  { %v238_v47 = vld [vmem:[%s9264_s6 + $0x60] sm:$0xff]  ;;  %v228_v51 = vld [vmem:[%s9264_s6 + $0x10] sm:$0xff] }
  0x11   :  { %v4888_v28 = vpop.eup %4887  ;;  %v244_v63 = vld [vmem:[%s9266_s8] sm:$0xff] }
  0x12   :  { %v118_v30 = vmul.f32 128.0, %v4888_v28  ;;  %vm122_vm1 = vweird.f32 %v4888_v28  ;;  %v5337_v20 = vld [vmem:[%s9262_s4] ss:$0 sm:$0xff] }
  0x14   :  { %318 = vperm.xlu2 %4874, %v240_v21   ;;  %v119_v32 = vsub.f32 1.0, %v118_v30 }
  0x15   :  { %4657 = vmatmul.msk.f32.gmra.mxu0 %vm65_vm0, %v52_v7 }
  0x16   :  { %v120_v33 = vmul.f32 %v4888_v28, %v119_v32  ;;  %v5349_v32 = vld [vmem:[%s9263_s5] sm:$0xff] }
  0x18   :  { %v121_v35 = vadd.f32 %v4888_v28, %v120_v33 }
  0x1a   :  { %v5275_v36 = vsel %vm122_vm1, %v4888_v28, %v121_v35 }
  0x1b   :  { %9417 = vst [vmem:[#allocation9_spill] sm:$0xff] %v5275_v36 }
  0x1c   :  { %303 = vperm.xlu2 %4874, %v237_v22  }
  0x1d   :  { %4658 = vmatmul.msk.f32.gmra.mxu0 %vm65_vm0, %v53_v8 }
  0x24   :  { %298 = vperm.xlu2 %4874, %v236_v23  }
  0x25   :  { %4659 = vmatmul.msk.f32.gmra.mxu0 %vm65_vm0, %v54_v9 }
  0x2c   :  { %293 = vperm.xlu2 %4874, %v235_v26  }
  0x34   :  { %288 = vperm.xlu2 %4874, %v234_v29  }
  0x3c   :  { %278 = vperm.xlu2 %4874, %v232_v31  }
  0x44   :  { %263 = vperm.xlu2 %4874, %v229_v34   ;;  %v5358_v34 = vld [vmem:[%s9263_s5 + $0x8] sm:$0xff] }
  0x4c   :  { %253 = vperm.xlu2 %4874, %v227_v39   ;;  %v5376_v39 = vld [vmem:[%s9263_s5 + $0x18] sm:$0xff] }
  0x54   :  { %248 = vperm.xlu2 %4874, %v226_v44   ;;  %v5396_v44 = vld [vmem:[%s9263_s5 + $0x28] sm:$0xff] }
  0x66   :  { %v5313_v57 = vpop.permute.xlu2 %323 }
  0x67   :  { %9420 = vst [vmem:[#allocation12_spill] sm:$0xff] %v5313_v57 }
  0x6e   :  { %v5316_v58 = vpop.permute.xlu2 %318 }
  0x6f   :  { %9421 = vst [vmem:[#allocation13_spill] sm:$0xff] %v5316_v58 }
  0x76   :  { %v5318_v59 = vpop.permute.xlu2 %303 }
  0x77   :  { %9422 = vst [vmem:[#allocation14_spill] sm:$0xff] %v5318_v59 }
  0x7e   :  { %v5324_v1 = vpop.permute.xlu2 %298 }
  0x7f   :  { %9423 = vst [vmem:[#allocation15_spill] sm:$0xff] %v5324_v1 }
  0x86   :  { %v5327_v9 = vpop.permute.xlu2 %293 }
  0x87   :  { %9424 = vst [vmem:[#allocation16_spill] sm:$0xff] %v5327_v9 }
  0x8a   :  { %v95_v11 = vpop.f32.mrf.mxu0 }
  0x8b   :  { %v5237_v16 = vadd.f32 %v4877_v12, %v95_v11 }
  0x8d   :  { %9414 = vst [vmem:[#allocation6_spill] sm:$0xff] %v5237_v16 }
  0x8e   :  { %v5341_v27 = vpop.permute.xlu2 %288 }
  0x8f   :  { %9425 = vst [vmem:[#allocation17_spill] sm:$0xff] %v5341_v27 }
  0x92   :  { %v98_v13 = vpop.f32.mrf.mxu0 }
  0x93   :  { %v5234_v14 = vadd.f32 %v4877_v12, %v98_v13  ;;  %v5332_v13 = vld [vmem:[%s9261_s3] ss:$0 sm:$0xff] }
  0x95   :  { %9413 = vst [vmem:[#allocation5_spill] sm:$0xff] %v5234_v14  ;;  %111 = vadd.xlane.f32.xlu0 %v5234_v14 }
  0x96   :  { %v5353_v33 = vpop.permute.xlu2 %278 }
  0x97   :  { %9426 = vst [vmem:[#allocation18_spill] sm:$0xff] %v5353_v33 }
  0x9a   :  { %v101_v15 = vpop.f32.mrf.mxu0 }
  0x9b   :  { %v5239_v17 = vadd.f32 %v4877_v12, %v101_v15 }
  0x9d   :  { %9415 = vst [vmem:[#allocation7_spill] sm:$0xff] %v5239_v17  ;;  %109 = vadd.xlane.f32.xlu0 %v5237_v16 }
  0x9e   :  { %v5362_v35 = vpop.permute.xlu2 %263 }
  0x9f   :  { %9427 = vst [vmem:[#allocation19_spill] sm:$0xff] %v5362_v35 }
  0xa2   :  { %v104_v24 = vpop.f32.mrf.mxu0 }
  0xa3   :  { %v5260_v25 = vadd.f32 %v4877_v12, %v104_v24 }
  0xa5   :  { %9416 = vst [vmem:[#allocation8_spill] sm:$0xff] %v5260_v25 }
  0xb1   :  { %313 = vperm.xlu0 %4875, %v239_v18  }
  0xb9   :  { %268 = vperm.xlu0 %4875, %v230_v19  }
  0xe3   :  { %115 = vadd.xlane.f32.xlu0 %v5260_v25 }
 0x108   :  { %v112_v37 = vpop.xlane.xlu0 %111 }
 0x109   :  { %v125_v38 = vmul.f32 %v5275_v36, %v112_v37  ;;  %v5367_v37 = vld [vmem:[%s9263_s5 + $0x10] sm:$0xff] }
 0x10b   :  { %v129_v40 = vsub.f32 %v5234_v14, %v125_v38  ;;  %v5371_v38 = vpop.permute.xlu2 %253 }
 0x10c   :  { %9428 = vst [vmem:[#allocation20_spill] sm:$0xff] %v5371_v38 }
 0x10d   :  { %v133_v41 = vmul.f32 %v129_v40, %v129_v40 }
 0x10f   :  { %138 = vadd.xlane.f32.xlu1 %v133_v41  ;;  %v5385_v41 = vld [vmem:[%s9263_s5 + $0x20] sm:$0xff] }
 0x110   :  { %v110_v42 = vpop.xlane.xlu0 %109 }
 0x111   :  { %v124_v43 = vmul.f32 %v5275_v36, %v110_v42 }
 0x113   :  { %v5287_v45 = vsub.f32 %v5237_v16, %v124_v43  ;;  %v5387_v42 = vpop.permute.xlu2 %248 }
 0x114   :  { %9430 = vst [vmem:[#allocation22_spill] sm:$0xff] %v5387_v42 }
 0x115   :  { %v132_v46 = vmul.f32 %v5287_v45, %v5287_v45 }
 0x117   :  { %136 = vadd.xlane.f32.xlu1 %v132_v46 }
 0x123   :  { %v5300_v50 = vpop.permute.xlu0 %313 }
 0x124   :  { %9418 = vst [vmem:[#allocation10_spill] sm:$0xff] %v5300_v50 }
 0x12b   :  { %v5305_v52 = vpop.permute.xlu0 %268 }
 0x12c   :  { %9419 = vst [vmem:[#allocation11_spill] sm:$0xff] %v5305_v52 }
 0x130   :  { %308 = vperm.xlu1 %4876, %v238_v47  }
 0x138   :  { %283 = vperm.xlu1 %4876, %v233_v48  }
 0x140   :  { %273 = vperm.xlu1 %4876, %v231_v49   ;;  %v5406_v49 = vld [vmem:[%s9263_s5 + $0x30] sm:$0xff] }
 0x148   :  { %258 = vperm.xlu1 %4876, %v228_v51  }
 0x156   :  { %v116_v53 = vpop.xlane.xlu0 %115 }
 0x157   :  { %v127_v54 = vmul.f32 %v5275_v36, %v116_v53 }
 0x159   :  { %v5309_v55 = vsub.f32 %v5260_v25, %v127_v54 }
 0x15b   :  { %v135_v56 = vmul.f32 %v5309_v55, %v5309_v55 }
 0x15d   :  { %142 = vadd.xlane.f32.xlu2 %v135_v56  ;;  %v5415_v56 = vld [vmem:[%s9263_s5 + $0x38] sm:$0xff] }
 0x172   :  { %113 = vadd.xlane.f32.xlu1 %v5239_v17 }
 0x182   :  { %v139_v60 = vpop.xlane.xlu1 %138 }
 0x183   :  { %v145_v61 = vmul.f32 %v139_v60, %v5275_v36 }
 0x185   :  { %v149_v62 = vadd.f32 1e-05, %v145_v61 }
 0x187   :  { %4889 = vrsqrt.f32 %v149_v62  ;;  %vm168_vm3 = vweird.f32 %v149_v62 }
 0x18a   :  { %v137_v0 = vpop.xlane.xlu1 %136 }
 0x18b   :  { %v144_v2 = vmul.f32 %v137_v0, %v5275_v36  ;;  %1146 = vperm.xlu1 %4876, %v244_v63  }
 0x18d   :  { %v4890_v3 = vpop.eup %4889  ;;  %v148_v4 = vadd.f32 1e-05, %v144_v2  ;;  %v5422_v2 = vld [vmem:[%s9263_s5 + $0x40] sm:$0xff] }
 0x18e   :  { %v163_v5 = vmul.f32 %v4890_v3, %v149_v62  ;;  %vm169_vm2 = vweird.f32 %v4890_v3 }
 0x18f   :  { %4891 = vrsqrt.f32 %v148_v4  ;;  %vm170_vm4 = vmor %vm168_vm3, %vm169_vm2  ;;  %vm158_vm6 = vweird.f32 %v148_v4 }
 0x190   :  { %v164_v6 = vmul.f32 %v4890_v3, %v163_v5 }
 0x192   :  { %v165_v7 = vmul.f32 0.5, %v164_v6 }
 0x194   :  { %v166_v8 = vsub.f32 1.5, %v165_v7 }
 0x195   :  { %v4892_v10 = vpop.eup %4891 }
 0x196   :  { %v153_v11 = vmul.f32 %v4892_v10, %v148_v4  ;;  %v167_v12 = vmul.f32 %v4890_v3, %v166_v8  ;;  %vm159_vm5 = vweird.f32 %v4892_v10 }
 0x197   :  { %vm160_vm7 = vmor %vm158_vm6, %vm159_vm5 }
 0x198   :  { %v154_v15 = vmul.f32 %v4892_v10, %v153_v11  ;;  %v171_v18 = vsel %vm170_vm4, %v4890_v3, %v167_v12  ;;  %v5438_v11 = vld [vmem:[%s9263_s5 + $0x48] sm:$0xff]  ;;  %v221_v12 = vld [vmem:[%s9263_s5 + $0x58] sm:$0xff] }
 0x199   :  { %v193_v19 = vmul.f32 %v171_v18, %v129_v40  ;;  %v222_v18 = vld [vmem:[%s9263_s5 + $0x60] sm:$0xff] }
 0x19a   :  { %v155_v21 = vmul.f32 0.5, %v154_v15  ;;  %v245_v15 = vld [vmem:[%s9266_s8 + $0x8] sm:$0xff] }
 0x19b   :  { %v200_v22 = vmul.f32 %v5332_v13, %v193_v19  ;;  %v223_v19 = vld [vmem:[%s9263_s5 + $0x68] sm:$0xff] }
 0x19c   :  { %v156_v23 = vsub.f32 1.5, %v155_v21  ;;  %v224_v21 = vld [vmem:[%s9263_s5 + $0x70] sm:$0xff] }
 0x19d   :  { %v207_v24 = vadd.f32 %v5337_v20, %v200_v22  ;;  %v225_v22 = vld [vmem:[%s9263_s5 + $0x78] sm:$0xff] }
 0x19e   :  { %v157_v26 = vmul.f32 %v4892_v10, %v156_v23 }
 0x19f   :  { %389 = vmatpush.msra.mxu1 %v207_v24 }
 0x1a0   :  { %v161_v28 = vsel %vm160_vm7, %v4892_v10, %v157_v26 }
 0x1a1   :  { %v192_v29 = vmul.f32 %v161_v28, %v5287_v45 }
 0x1a2   :  { %v5378_v40 = vpop.permute.xlu1 %308 }
 0x1a3   :  { %v199_v30 = vmul.f32 %v5332_v13, %v192_v29  ;;  %9429 = vst [vmem:[#allocation21_spill] sm:$0xff] %v5378_v40 }
 0x1a5   :  { %v206_v31 = vadd.f32 %v5337_v20, %v199_v30 }
 0x1a7   :  { %390 = vmatpush.msra.mxu1 %v206_v31 }
 0x1a8   :  { %4660 = vmatmul.msk.f32.vlgmr.msra.gmra.mxu1 %vm9399_vm8, %v5349_v32 }
 0x1aa   :  { %v5389_v43 = vpop.permute.xlu1 %283 }
 0x1ab   :  { %9431 = vst [vmem:[#allocation23_spill] sm:$0xff] %v5389_v43 }
 0x1b0   :  { %4661 = vmatmul.msk.f32.gmra.mxu1 %vm9399_vm8, %v5358_v34 }
 0x1b2   :  { %v5401_v47 = vpop.permute.xlu1 %273 }
 0x1b3   :  { %9432 = vst [vmem:[#allocation24_spill] sm:$0xff] %v5401_v47 }
 0x1b8   :  { %4662 = vmatmul.msk.f32.gmra.mxu1 %vm9399_vm8, %v5367_v37 }
 0x1ba   :  { %v5410_v53 = vpop.permute.xlu1 %258 }
 0x1bb   :  { %9433 = vst [vmem:[#allocation25_spill] sm:$0xff] %v5410_v53 }
 0x1c0   :  { %4663 = vmatmul.msk.f32.gmra.mxu1 %vm9399_vm8, %v5376_v39 }
 0x1c8   :  { %4664 = vmatmul.msk.f32.gmra.mxu1 %vm9399_vm8, %v5385_v41 }
 0x1d0   :  { %4665 = vmatmul.msk.f32.gmra.mxu1 %vm9399_vm8, %v5396_v44  ;;  %v143_v45 = vpop.xlane.xlu2 %142 }
 0x1d1   :  { %v147_v46 = vmul.f32 %v143_v45, %v5275_v36 }
 0x1d3   :  { %v151_v48 = vadd.f32 1e-05, %v147_v46 }
 0x1d5   :  { %4893 = vrsqrt.f32 %v151_v48  ;;  %vm188_vm9 = vweird.f32 %v151_v48 }
 0x1d8   :  { %4666 = vmatmul.msk.f32.gmra.mxu1 %vm9399_vm8, %v5406_v49 }
 0x1db   :  { %v4894_v51 = vpop.eup %4893 }
 0x1dc   :  { %v183_v54 = vmul.f32 %v4894_v51, %v151_v48  ;;  %vm189_vm10 = vweird.f32 %v4894_v51 }
 0x1dd   :  { %vm190_vm11 = vmor %vm188_vm9, %vm189_vm10 }
 0x1de   :  { %v184_v60 = vmul.f32 %v4894_v51, %v183_v54 }
 0x1e0   :  { %v185_v61 = vmul.f32 0.5, %v184_v60  ;;  %4667 = vmatmul.msk.f32.gmra.mxu1 %vm9399_vm8, %v5415_v56 }
 0x1e2   :  { %v186_v62 = vsub.f32 1.5, %v185_v61 }
 0x1e4   :  { %v187_v63 = vmul.f32 %v4894_v51, %v186_v62 }
 0x1e5   :  { %v114_v0 = vpop.xlane.xlu1 %113 }
 0x1e6   :  { %v126_v3 = vmul.f32 %v5275_v36, %v114_v0  ;;  %v191_v4 = vsel %vm190_vm11, %v4894_v51, %v187_v63 }
 0x1e7   :  { %v195_v5 = vmul.f32 %v191_v4, %v5309_v55  ;;  %v5445_v55 = vld [vmem:[%s9263_s5 + $0x50] sm:$0xff] }
 0x1e8   :  { %v5427_v6 = vsub.f32 %v5239_v17, %v126_v3  ;;  %4668 = vmatmul.msk.f32.gmra.mxu1 %vm9399_vm8, %v5422_v2 }
 0x1e9   :  { %v202_v7 = vmul.f32 %v5332_v13, %v195_v5 }
 0x1ea   :  { %v134_v8 = vmul.f32 %v5427_v6, %v5427_v6 }
 0x1eb   :  { %v209_v10 = vadd.f32 %v5337_v20, %v202_v7 }
 0x1ec   :  { %140 = vadd.xlane.f32.xlu0 %v134_v8 }
 0x1ed   :  { %1191 = vmatpush.msra.mxu3 %v209_v10 }
 0x1f0   :  { %4669 = vmatmul.msk.f32.gmra.mxu1 %vm9399_vm8, %v5438_v11 }
 0x1f8   :  { %4670 = vmatmul.msk.f32.gmra.mxu1 %vm9399_vm8, %v5445_v55 }
 0x200   :  { %4671 = vmatmul.msk.f32.gmra.mxu1 %vm9399_vm8, %v221_v12  ;;  %1151 = vperm.xlu0 %4875, %v245_v15  }
 0x208   :  { %4672 = vmatmul.msk.f32.gmra.mxu1 %vm9399_vm8, %v222_v18 }
 0x210   :  { %4673 = vmatmul.msk.f32.gmra.mxu1 %vm9399_vm8, %v223_v19 }
 0x218   :  { %4674 = vmatmul.msk.f32.gmra.mxu1 %vm9399_vm8, %v224_v21 }
 0x220   :  { %4675 = vmatmul.msk.f32.gmra.mxu1 %vm9399_vm8, %v225_v22 }
 0x225   :  { %v392_v23 = vpop.f32.mrf.mxu1 }
 0x226   :  { %v5519_v18 = vadd.f32 %v392_v23, %v5387_v42 }
 0x228   :  { %9442 = vst [vmem:[#allocation34_spill] sm:$0xff] %v5519_v18 }
 0x22d   :  { %v395_v24 = vpop.f32.mrf.mxu1 }
 0x22e   :  { %v5491_v61 = vadd.f32 %v395_v24, %v5371_v38 }
 0x230   :  { %9437 = vst [vmem:[#allocation29_spill] sm:$0xff] %v5491_v61  ;;  %v5507_v5 = vmul.f32 0.70710677, %v5491_v61 }
 0x232   :  { %9440 = vst [vmem:[#allocation32_spill] sm:$0xff] %v5507_v5  ;;  %v512_v22 = vmul.f32 %v5507_v5, %v5507_v5 }
 0x235   :  { %v398_v26 = vpop.f32.mrf.mxu1 }
 0x236   :  { %v5499_v0 = vadd.f32 %v398_v26, %v5410_v53 }
 0x238   :  { %9439 = vst [vmem:[#allocation31_spill] sm:$0xff] %v5499_v0  ;;  %v5514_v10 = vmul.f32 0.70710677, %v5499_v0 }
 0x23a   :  { %9441 = vst [vmem:[#allocation33_spill] sm:$0xff] %v5514_v10 }
 0x23d   :  { %v401_v28 = vpop.f32.mrf.mxu1 }
 0x23e   :  { %v5479_v46 = vadd.f32 %v401_v28, %v5362_v35 }
 0x240   :  { %9436 = vst [vmem:[#allocation28_spill] sm:$0xff] %v5479_v46  ;;  %v5494_v62 = vmul.f32 0.70710677, %v5479_v46 }
 0x242   :  { %9438 = vst [vmem:[#allocation30_spill] sm:$0xff] %v5494_v62  ;;  %v592_v7 = vmul.f32 %v5494_v62, %v5494_v62 }
 0x244   :  { %v5528_v24 = vmin.f32 %v592_v7, 16.0 }
 0x245   :  { %v404_v29 = vpop.f32.mrf.mxu1 }
 0x246   :  { %v5473_v31 = vadd.f32 %v404_v29, %v5305_v52  ;;  %v552_v29 = vmul.f32 %v5514_v10, %v5514_v10  ;;  %v594_v25 = vmul.f32 2.1237322e-06, %v5528_v24 }
 0x248   :  { %9434 = vst [vmem:[#allocation26_spill] sm:$0xff] %v5473_v31  ;;  %v5482_v48 = vmul.f32 0.70710677, %v5473_v31 }
 0x24a   :  { %v632_v63 = vmul.f32 %v5482_v48, %v5482_v48 }
 0x24c   :  { %v5511_v8 = vmin.f32 %v632_v63, 16.0  ;;  %v5539_v63 = vmul.f32 0.70710677, %v5519_v18 }
 0x24d   :  { %v407_v30 = vpop.f32.mrf.mxu1 }
 0x24e   :  { %v5476_v45 = vadd.f32 %v407_v30, %v5401_v47  ;;  %v634_v26 = vmul.f32 2.1237322e-06, %v5511_v8  ;;  %9443 = vst [vmem:[#allocation35_spill] sm:$0xff] %v5539_v63 }
 0x250   :  { %9435 = vst [vmem:[#allocation27_spill] sm:$0xff] %v5476_v45  ;;  %v5485_v51 = vmul.f32 0.70710677, %v5476_v45  ;;  %v635_v17 = vadd.f32 0.00028619796, %v634_v26 }
 0x252   :  { %v672_v3 = vmul.f32 %v5485_v51, %v5485_v51  ;;  %v636_v53 = vmul.f32 %v635_v17, %v5511_v8 }
 0x254   :  { %v5516_v12 = vmin.f32 %v672_v3, 16.0  ;;  %v637_v17 = vadd.f32 0.0036580483, %v636_v53 }
 0x255   :  { %v410_v54 = vpop.f32.mrf.mxu1 }
 0x256   :  { %v5488_v60 = vadd.f32 %v410_v54, %v5353_v33  ;;  %v674_v30 = vmul.f32 2.1237322e-06, %v5516_v12  ;;  %v595_v33 = vadd.f32 0.00028619796, %v594_v25 }
 0x258   :  { %v5504_v4 = vmul.f32 0.70710677, %v5488_v60  ;;  %v675_v16 = vadd.f32 0.00028619796, %v674_v30  ;;  %v596_v25 = vmul.f32 %v595_v33, %v5528_v24 }
 0x25a   :  { %v712_v19 = vmul.f32 %v5504_v4, %v5504_v4  ;;  %v676_v38 = vmul.f32 %v675_v16, %v5516_v12  ;;  %v597_v53 = vadd.f32 0.0036580483, %v596_v25 }
 0x25c   :  { %v5541_v3 = vmin.f32 %v712_v19, 16.0  ;;  %v472_v19 = vmul.f32 %v5539_v63, %v5539_v63  ;;  %v677_v5 = vadd.f32 0.0036580483, %v676_v38 }
 0x25d   :  { %v413_v15 = vpop.f32.mrf.mxu1 }
 0x25e   :  { %v5524_v21 = vadd.f32 %v413_v15, %v5389_v43  ;;  %v5543_v15 = vmin.f32 %v512_v22, 16.0  ;;  %v5566_v47 = vmin.f32 %v472_v19, 16.0 }
 0x25f   :  { %v141_v28 = vpop.xlane.xlu0 %140 }
 0x260   :  { %v146_v23 = vmul.f32 %v141_v28, %v5275_v36  ;;  %v5536_v54 = vmul.f32 0.70710677, %v5524_v21  ;;  %v5548_v28 = vmin.f32 %v552_v29, 16.0  ;;  %v514_v26 = vmul.f32 2.1237322e-06, %v5543_v15 }
 0x261   :  { %v474_v16 = vmul.f32 2.1237322e-06, %v5566_v47 }
 0x262   :  { %v150_v7 = vadd.f32 1e-05, %v146_v23  ;;  %v752_v14 = vmul.f32 %v5536_v54, %v5536_v54  ;;  %v714_v23 = vmul.f32 2.1237322e-06, %v5541_v3  ;;  %v554_v29 = vmul.f32 2.1237322e-06, %v5548_v28 }
 0x263   :  { %v475_v25 = vadd.f32 0.00028619796, %v474_v16 }
 0x264   :  { %4895 = vrsqrt.f32 %v150_v7  ;;  %v5550_v36 = vmin.f32 %v752_v14, 16.0  ;;  %v715_v35 = vadd.f32 0.00028619796, %v714_v23  ;;  %v555_v18 = vadd.f32 0.00028619796, %v554_v29 }
 0x265   :  { %v416_v43 = vpop.f32.mrf.mxu1  ;;  %vm178_vm12 = vweird.f32 %v150_v7 }
 0x266   :  { %v5556_v22 = vadd.f32 %v416_v43, %v5341_v27  ;;  %v754_v30 = vmul.f32 2.1237322e-06, %v5550_v36  ;;  %v515_v27 = vadd.f32 0.00028619796, %v514_v26  ;;  %v716_v19 = vmul.f32 %v715_v35, %v5541_v3 }
 0x267   :  { %v638_v26 = vmul.f32 %v637_v17, %v5511_v8  ;;  %v678_v35 = vmul.f32 %v677_v5, %v5516_v12 }
 0x268   :  { %v5563_v14 = vmul.f32 0.70710677, %v5556_v22  ;;  %v755_v63 = vadd.f32 0.00028619796, %v754_v30  ;;  %v516_v33 = vmul.f32 %v515_v27, %v5543_v15  ;;  %v556_v30 = vmul.f32 %v555_v18, %v5548_v28 }
 0x269   :  { %v639_v17 = vadd.f32 0.05243302, %v638_v26 }
 0x26a   :  { %9444 = vst [vmem:[#allocation36_spill] sm:$0xff] %v5563_v14  ;;  %v4896_v42 = vpop.eup %4895  ;;  %v792_v43 = vmul.f32 %v5563_v14, %v5563_v14  ;;  %v517_v45 = vadd.f32 0.0036580483, %v516_v33  ;;  %v557_v5 = vadd.f32 0.0036580483, %v556_v30 }
 0x26b   :  { %v173_v52 = vmul.f32 %v4896_v42, %v150_v7  ;;  %vm179_vm13 = vweird.f32 %v4896_v42 }
 0x26c   :  { %v5571_v61 = vmin.f32 %v792_v43, 16.0  ;;  %vm180_vm14 = vmor %vm178_vm12, %vm179_vm13 }
 0x26d   :  { %v174_v0 = vmul.f32 %v4896_v42, %v173_v52  ;;  %v419_v10 = vpop.f32.mrf.mxu1  ;;  %v756_v52 = vmul.f32 %v755_v63, %v5550_v36 }
 0x26e   :  { %v794_v23 = vmul.f32 2.1237322e-06, %v5571_v61  ;;  %v5577_v46 = vadd.f32 %v419_v10, %v5327_v9  ;;  %v717_v10 = vadd.f32 0.0036580483, %v716_v19 }
 0x26f   :  { %v175_v29 = vmul.f32 0.5, %v174_v0  ;;  %v598_v0 = vmul.f32 %v597_v53, %v5528_v24  ;;  %v757_v9 = vadd.f32 0.0036580483, %v756_v52  ;;  %v476_v53 = vmul.f32 %v475_v25, %v5566_v47 }
 0x270   :  { %v795_v38 = vadd.f32 0.00028619796, %v794_v23  ;;  %v5584_v43 = vmul.f32 0.70710677, %v5577_v46  ;;  %v718_v19 = vmul.f32 %v717_v10, %v5541_v3  ;;  %v640_v52 = vmul.f32 %v639_v17, %v5511_v8 }
 0x271   :  { %v176_v62 = vsub.f32 1.5, %v175_v29  ;;  %v679_v29 = vadd.f32 0.05243302, %v678_v35  ;;  %v599_v26 = vadd.f32 0.05243302, %v598_v0  ;;  %v758_v30 = vmul.f32 %v757_v9, %v5550_v36 }
 0x272   :  { %v832_v27 = vmul.f32 %v5584_v43, %v5584_v43  ;;  %v796_v63 = vmul.f32 %v795_v38, %v5571_v61  ;;  %v518_v10 = vmul.f32 %v517_v45, %v5543_v15  ;;  %v719_v25 = vadd.f32 0.05243302, %v718_v19 }
 0x273   :  { %v177_v18 = vmul.f32 %v4896_v42, %v176_v62  ;;  %v5612_v9 = vadd.f32 0.0036580483, %v476_v53 }
 0x274   :  { %v5591_v23 = vmin.f32 %v832_v27, 16.0  ;;  %v797_v38 = vadd.f32 0.0036580483, %v796_v63  ;;  %v558_v27 = vmul.f32 %v557_v5, %v5548_v28  ;;  %v641_v63 = vadd.f32 0.18741608, %v640_v52 }
 0x275   :  { %v422_v7 = vpop.f32.mrf.mxu1  ;;  %v181_v31 = vsel %vm180_vm14, %v4896_v42, %v177_v18  ;;  %9445 = vst [vmem:[#allocation37_spill] sm:$0xff] %v5612_v9  ;;  %v759_v5 = vadd.f32 0.05243302, %v758_v30 }
 0x276   :  { %v834_v14 = vmul.f32 2.1237322e-06, %v5591_v23  ;;  %v5596_v16 = vadd.f32 %v422_v7, %v5324_v1  ;;  %v194_v62 = vmul.f32 %v181_v31, %v5427_v6  ;;  %v845_v33 = vmul.f32 3.8918573e-05, %v5591_v23 }
 0x277   :  { %v680_v31 = vmul.f32 %v679_v29, %v5516_v12  ;;  %v798_v7 = vmul.f32 %v797_v38, %v5571_v61  ;;  %v5619_v29 = vadd.f32 0.05243302, %v518_v10 }
 0x278   :  { %v835_v42 = vadd.f32 0.00028619796, %v834_v14  ;;  %v201_v35 = vmul.f32 %v5332_v13, %v194_v62  ;;  %v5607_v18 = vmul.f32 0.70710677, %v5596_v16  ;;  %v846_v6 = vadd.f32 0.001143296, %v845_v33 }
 0x279   :  { %v600_v14 = vmul.f32 %v599_v26, %v5528_v24  ;;  %9446 = vst [vmem:[#allocation38_spill] sm:$0xff] %v5619_v29  ;;  %v559_v26 = vadd.f32 0.05243302, %v558_v27  ;;  %v681_v33 = vadd.f32 0.18741608, %v680_v31 }
 0x27a   :  { %v836_v0 = vmul.f32 %v835_v42, %v5591_v23  ;;  %v208_v17 = vadd.f32 %v5337_v20, %v201_v35  ;;  %v872_v13 = vmul.f32 %v5607_v18, %v5607_v18  ;;  %v847_v45 = vmul.f32 %v846_v6, %v5591_v23 }
 0x27b   :  { %v720_v42 = vmul.f32 %v719_v25, %v5541_v3  ;;  %v601_v30 = vadd.f32 0.18741608, %v600_v14  ;;  %v642_v6 = vmul.f32 %v641_v63, %v5511_v8  ;;  %v5639_v14 = vmul.f32 %v559_v26, %v5548_v28 }
 0x27c   :  { %v837_v62 = vadd.f32 0.0036580483, %v836_v0  ;;  %1192 = vmatpush.msra.mxu3 %v208_v17  ;;  %v5621_v19 = vmin.f32 %v872_v13, 16.0  ;;  %v848_v53 = vadd.f32 0.014752088, %v847_v45  ;;  %v760_v0 = vmul.f32 %v759_v5, %v5550_v36 }
 0x27d   :  { %v425_v20 = vpop.f32.mrf.mxu1  ;;  %4692 = vmatmul.msk.f32.vlgmr.msra.gmra.mxu3 %vm9399_vm8, %v5349_v32  ;;  %v799_v32 = vadd.f32 0.05243302, %v798_v7  ;;  %9447 = vst [vmem:[#allocation39_spill] sm:$0xff] %v5639_v14  ;;  %v682_v13 = vmul.f32 %v681_v33, %v5516_v12  ;;  %v5643_v45 = vmul.f32 0.5, %v5488_v60 }
 0x27e   :  { %v5627_v52 = vadd.f32 %v425_v20, %v5318_v59  ;;  %v838_v38 = vmul.f32 %v837_v62, %v5591_v23  ;;  %v874_v35 = vmul.f32 2.1237322e-06, %v5621_v19  ;;  %v885_v10 = vmul.f32 3.8918573e-05, %v5621_v19 }
 0x27f   :  { %v849_v27 = vmul.f32 %v848_v53, %v5591_v23  ;;  %9448 = vst [vmem:[#allocation40_spill] sm:$0xff] %v5643_v45  ;;  %v721_v62 = vadd.f32 0.18741608, %v720_v42  ;;  %v5650_v53 = vmul.f32 %v601_v30, %v5528_v24  ;;  %v761_v26 = vadd.f32 0.18741608, %v760_v0 }
 0x280   :  { %v875_v31 = vadd.f32 0.00028619796, %v874_v35  ;;  %v5636_v25 = vmul.f32 0.70710677, %v5627_v52  ;;  %v886_v17 = vadd.f32 0.001143296, %v885_v10  ;;  %v800_v33 = vmul.f32 %v799_v32, %v5571_v61 }
 0x281   :  { %v839_v63 = vadd.f32 0.05243302, %v838_v38  ;;  %9449 = vst [vmem:[#allocation41_spill] sm:$0xff] %v5650_v53  ;;  %v643_v35 = vadd.f32 1.1283791, %v642_v6  ;;  %v722_v1 = vmul.f32 %v721_v62, %v5541_v3 }
 0x282   :  { %v876_v5 = vmul.f32 %v875_v31, %v5621_v19  ;;  %v912_v7 = vmul.f32 %v5636_v25, %v5636_v25  ;;  %v887_v20 = vmul.f32 %v886_v17, %v5621_v19  ;;  %v850_v10 = vadd.f32 0.112945676, %v849_v27 }
 0x283   :  { %v683_v31 = vadd.f32 1.1283791, %v682_v13  ;;  %v5659_v17 = vmul.f32 0.5, %v5524_v21  ;;  %v840_v6 = vmul.f32 %v839_v63, %v5591_v23  ;;  %v801_v62 = vadd.f32 0.18741608, %v800_v33 }
 0x284   :  { %v877_v59 = vadd.f32 0.0036580483, %v876_v5  ;;  %v5653_v60 = vmin.f32 %v912_v7, 16.0  ;;  %v888_v38 = vadd.f32 0.014752088, %v887_v20  ;;  %v5667_v5 = vmul.f32 %v643_v35, %v5482_v48 }
 0x285   :  { %v428_v42 = vpop.f32.mrf.mxu1  ;;  %4693 = vmatmul.msk.f32.gmra.mxu3 %vm9399_vm8, %v5358_v34  ;;  %9450 = vst [vmem:[#allocation42_spill] sm:$0xff] %v5659_v17  ;;  %v762_v34 = vmul.f32 %v761_v26, %v5550_v36  ;;  %v851_v21 = vmul.f32 %v850_v10, %v5591_v23  ;;  %v841_v35 = vadd.f32 0.18741608, %v840_v6 }
 0x286   :  { %v429_v30 = vadd.f32 %v428_v42, %v5378_v40  ;;  %v878_v0 = vmul.f32 %v877_v59, %v5621_v19  ;;  %v914_v32 = vmul.f32 2.1237322e-06, %v5653_v60  ;;  %v925_v27 = vmul.f32 3.8918573e-05, %v5653_v60  ;;  %9451 = vst [vmem:[#allocation43_spill] sm:$0xff] %v5667_v5 }
 0x287   :  { %v889_v63 = vmul.f32 %v888_v38, %v5621_v19  ;;  %v5675_v59 = vmul.f32 %v683_v31, %v5485_v51  ;;  %v723_v42 = vadd.f32 1.1283791, %v722_v1  ;;  %v5678_v40 = vmul.f32 0.5, %v5556_v22 }
 0x288   :  { %v5670_v13 = vmul.f32 0.70710677, %v429_v30  ;;  %v915_v7 = vadd.f32 0.00028619796, %v914_v32  ;;  %v926_v20 = vadd.f32 0.001143296, %v925_v27  ;;  %v802_v1 = vmul.f32 %v801_v62, %v5571_v61 }
 0x289   :  { %9452 = vst [vmem:[#allocation44_spill] sm:$0xff] %v5675_v59  ;;  %v879_v26 = vadd.f32 0.05243302, %v878_v0  ;;  %v763_v33 = vadd.f32 1.1283791, %v762_v34  ;;  %v5685_v32 = vmul.f32 0.5, %v5577_v46  ;;  %v5693_v27 = vmul.f32 %v723_v42, %v5504_v4 }
 0x28a   :  { %v952_v48 = vmul.f32 %v5670_v13, %v5670_v13  ;;  %v916_v29 = vmul.f32 %v915_v7, %v5653_v60  ;;  %v927_v10 = vmul.f32 %v926_v20, %v5653_v60  ;;  %v852_v51 = vadd.f32 0.4994258, %v851_v21 }
 0x28b   :  { %v890_v0 = vadd.f32 0.112945676, %v889_v63  ;;  %9453 = vst [vmem:[#allocation45_spill] sm:$0xff] %v5693_v27  ;;  %v842_v21 = vmul.f32 %v841_v35, %v5591_v23  ;;  %v5700_v62 = vmul.f32 0.5, %v5596_v16  ;;  %v5705_v20 = vmul.f32 %v763_v33, %v5536_v54 }
 0x28c   :  { %v5687_v38 = vmin.f32 %v952_v48, 16.0  ;;  %v917_v22 = vadd.f32 0.0036580483, %v916_v29  ;;  %v928_v6 = vadd.f32 0.014752088, %v927_v10  ;;  %v880_v29 = vmul.f32 %v879_v26, %v5621_v19 }
 0x28d   :  { %v431_v31 = vpop.f32.mrf.mxu1  ;;  %4694 = vmatmul.msk.f32.gmra.mxu3 %vm9399_vm8, %v5367_v37  ;;  %9454 = vst [vmem:[#allocation46_spill] sm:$0xff] %v5705_v20  ;;  %v5710_v48 = vadd.f32 1.1283791, %v802_v1  ;;  %v891_v35 = vmul.f32 %v890_v0, %v5621_v19  ;;  %v853_v16 = vmul.f32 %v852_v51, %v5591_v23  ;;  %v805_v1 = vmul.f32 3.8918573e-05, %v5571_v61 }
 0x28e   :  { %v954_v34 = vmul.f32 2.1237322e-06, %v5687_v38  ;;  %v432_v46 = vadd.f32 %v431_v31, %v5300_v50  ;;  %v965_v7 = vmul.f32 3.8918573e-05, %v5687_v38  ;;  %v929_v37 = vmul.f32 %v928_v6, %v5653_v60 }
 0x28f   :  { %v918_v4 = vmul.f32 %v917_v22, %v5653_v60  ;;  %v5715_v31 = vmul.f32 0.5, %v5627_v52  ;;  %v843_v22 = vadd.f32 1.1283791, %v842_v21  ;;  %v881_v6 = vadd.f32 0.18741608, %v880_v29 }
 0x290   :  { %v955_v63 = vadd.f32 0.00028619796, %v954_v34  ;;  %v5708_v42 = vmul.f32 0.70710677, %v432_v46  ;;  %v966_v10 = vadd.f32 0.001143296, %v965_v7 }
 0x291   :  { %v930_v33 = vadd.f32 0.112945676, %v929_v37  ;;  %v919_v7 = vadd.f32 0.05243302, %v918_v4  ;;  %v5725_v52 = vmul.f32 0.5, %v429_v30  ;;  %v5729_v21 = vadd.f32 1.0, %v853_v16 }
 0x292   :  { %v956_v26 = vmul.f32 %v955_v63, %v5687_v38  ;;  %v992_v54 = vmul.f32 %v5708_v42, %v5708_v42  ;;  %v967_v34 = vmul.f32 %v966_v10, %v5687_v38  ;;  %v892_v37 = vadd.f32 0.4994258, %v891_v35 }
 0x293   :  { %v931_v23 = vmul.f32 %v930_v33, %v5653_v60  ;;  %v882_v30 = vmul.f32 %v881_v6, %v5621_v19  ;;  %v920_v35 = vmul.f32 %v919_v7, %v5653_v60  ;;  %v806_v9 = vadd.f32 0.001143296, %v805_v1 }
 0x294   :  { %v957_v50 = vadd.f32 0.0036580483, %v956_v26  ;;  %v5722_v0 = vmin.f32 %v992_v54, 16.0  ;;  %v968_v63 = vadd.f32 0.014752088, %v967_v34  ;;  %v5736_v54 = vmul.f32 %v843_v22, %v5584_v43 }
 0x295   :  { %v434_v51 = vpop.f32.mrf.mxu1  ;;  %4695 = vmatmul.msk.f32.gmra.mxu3 %vm9399_vm8, %v5376_v39  ;;  %v932_v39 = vadd.f32 0.4994258, %v931_v23  ;;  %4897 = vrcp.f32 %v5729_v21  ;;  %v5748_v23 = vmul.f32 0.5, %v432_v46 }
 0x296   :  { %v958_v29 = vmul.f32 %v957_v50, %v5687_v38  ;;  %v994_v10 = vmul.f32 2.1237322e-06, %v5722_v0  ;;  %v435_v4 = vadd.f32 %v434_v51, %v5316_v58  ;;  %v1005_v26 = vmul.f32 3.8918573e-05, %v5722_v0 }
 0x297   :  { %v969_v33 = vmul.f32 %v968_v63, %v5687_v38  ;;  %v933_v51 = vmul.f32 %v932_v39, %v5653_v60  ;;  %v893_v58 = vmul.f32 %v892_v37, %v5621_v19 }
 0x298   :  { %v959_v16 = vadd.f32 0.05243302, %v958_v29  ;;  %v995_v34 = vadd.f32 0.00028619796, %v994_v10  ;;  %v5741_v50 = vmul.f32 0.70710677, %v435_v4 }
 0x299   :  { %v1006_v45 = vadd.f32 0.001143296, %v1005_v26  ;;  %v970_v6 = vadd.f32 0.112945676, %v969_v33  ;;  %v5753_v63 = vadd.f32 1.0, %v933_v51  ;;  %v5760_v33 = vadd.f32 1.0, %v893_v58 }
 0x29a   :  { %v960_v43 = vmul.f32 %v959_v16, %v5687_v38  ;;  %v996_v22 = vmul.f32 %v995_v34, %v5722_v0  ;;  %v1032_v7 = vmul.f32 %v5741_v50, %v5741_v50  ;;  %v883_v29 = vadd.f32 1.1283791, %v882_v30 }
 0x29b   :  { %v1007_v1 = vmul.f32 %v1006_v45, %v5722_v0  ;;  %v921_v10 = vadd.f32 0.18741608, %v920_v35  ;;  %v971_v19 = vmul.f32 %v970_v6, %v5687_v38  ;;  %v5763_v16 = vmul.f32 %v806_v9, %v5571_v61 }
 0x29c   :  { %v997_v26 = vadd.f32 0.0036580483, %v996_v22  ;;  %v5756_v37 = vmin.f32 %v1032_v7, 16.0  ;;  %v961_v45 = vadd.f32 0.18741608, %v960_v43  ;;  %4899 = vrcp.f32 %v5753_v63 }
 0x29d   :  { %v437_v39 = vpop.f32.mrf.mxu1  ;;  %4696 = vmatmul.msk.f32.gmra.mxu3 %vm9399_vm8, %v5385_v41  ;;  %v1008_v46 = vadd.f32 0.014752088, %v1007_v1  ;;  %v972_v35 = vadd.f32 0.4994258, %v971_v19  ;;  %v5771_v41 = vpop.eup %4897  ;;  %v5774_v58 = vmul.f32 %v883_v29, %v5607_v18  ;;  %v922_v9 = vmul.f32 %v921_v10, %v5653_v60 }
 0x29e   :  { %v998_v34 = vmul.f32 %v997_v26, %v5722_v0  ;;  %v438_v30 = vadd.f32 %v437_v39, %v5313_v57  ;;  %v1034_v51 = vmul.f32 2.1237322e-06, %v5756_v37  ;;  %v1045_v22 = vmul.f32 3.8918573e-05, %v5756_v37 }
 0x29f   :  { %v1009_v6 = vmul.f32 %v1008_v46, %v5722_v0  ;;  %v973_v7 = vmul.f32 %v972_v35, %v5687_v38  ;;  %4901 = vrcp.f32 %v5760_v33  ;;  %v906_v18 = vand.u32 2147483648, %v5760_v33 }
 0x2a0   :  { %v5777_v43 = vmul.f32 0.70710677, %v438_v30  ;;  %v999_v1 = vadd.f32 0.05243302, %v998_v34  ;;  %v1035_v26 = vadd.f32 0.00028619796, %v1034_v51  ;;  %v962_v29 = vmul.f32 %v961_v45, %v5687_v38 }
 0x2a1   :  { %v1046_v19 = vadd.f32 0.001143296, %v1045_v22  ;;  %v1010_v46 = vadd.f32 0.112945676, %v1009_v6  ;;  %v5788_v35 = vadd.f32 1.0, %v973_v7  ;;  %v5790_v51 = vmul.f32 0.5, %v435_v4 }
 0x2a2   :  { %v1072_v39 = vmul.f32 %v5777_v43, %v5777_v43  ;;  %v1036_v60 = vmul.f32 %v1035_v26, %v5756_v37  ;;  %v923_v34 = vadd.f32 1.1283791, %v922_v9  ;;  %v5795_v6 = vpop.eup %4899  ;;  %v1000_v57 = vmul.f32 %v999_v1, %v5722_v0 }
 0x2a3   :  { %v1047_v10 = vmul.f32 %v1046_v19, %v5756_v37  ;;  %v1011_v53 = vmul.f32 %v1010_v46, %v5722_v0  ;;  %4903 = vrcp.f32 %v5788_v35  ;;  %v5805_v7 = vmul.f32 %v5771_v41, %v5729_v21 }
 0x2a4   :  { %v5792_v22 = vmin.f32 %v1072_v39, 16.0  ;;  %v1037_v14 = vadd.f32 0.0036580483, %v1036_v60  ;;  %v963_v19 = vadd.f32 1.1283791, %v962_v29  ;;  %v5817_v5 = vmul.f32 %v923_v34, %v5636_v25 }
 0x2a5   :  { %4697 = vmatmul.msk.f32.gmra.mxu3 %vm9399_vm8, %v5396_v44  ;;  %v1048_v38 = vadd.f32 0.014752088, %v1047_v10  ;;  %v1012_v9 = vadd.f32 0.4994258, %v1011_v53  ;;  %v5807_v26 = vpop.eup %4901  ;;  %v5811_v44 = vor.u32 1.1754944e-38, %v906_v18  ;;  %v936_v53 = vmul.f32 %v5795_v6, %v5753_v63 }
 0x2a6   :  { %v1074_v45 = vmul.f32 2.1237322e-06, %v5792_v22  ;;  %v1085_v4 = vmul.f32 3.8918573e-05, %v5792_v22  ;;  %v1038_v1 = vmul.f32 %v1037_v14, %v5756_v37  ;;  %v1001_v17 = vadd.f32 0.18741608, %v1000_v57 }
 0x2a7   :  { %v1049_v39 = vmul.f32 %v1048_v38, %v5756_v37  ;;  %v1013_v10 = vmul.f32 %v1012_v9, %v5722_v0  ;;  %v5825_v18 = vmul.f32 %v5807_v26, %v5760_v33  ;;  %v5830_v9 = vmul.f32 0.5, %v438_v30 }
 0x2a8   :  { %v1075_v46 = vadd.f32 0.00028619796, %v1074_v45  ;;  %v1086_v60 = vadd.f32 0.001143296, %v1085_v4  ;;  %v1039_v59 = vadd.f32 0.05243302, %v1038_v1  ;;  %vm940_vm15 = vweird.f32 %v5753_v63 }
 0x2a9   :  { %v1050_v27 = vadd.f32 0.112945676, %v1049_v39  ;;  %v5821_v38 = vadd.f32 1.0, %v1013_v10  ;;  %v5827_v45 = vpop.eup %4903  ;;  %v944_v25 = vand.u32 2147483647, %v5753_v63  ;;  %v937_v39 = vsub.f32 1.0, %v936_v53 }
 0x2aa   :  { %v1076_v29 = vmul.f32 %v1075_v46, %v5792_v22  ;;  %v1087_v14 = vmul.f32 %v1086_v60, %v5792_v22  ;;  %v1040_v4 = vmul.f32 %v1039_v59, %v5756_v37  ;;  %v964_v46 = vmul.f32 %v963_v19, %v5670_v13 }
 0x2ab   :  { %v1051_v57 = vmul.f32 %v1050_v27, %v5756_v37  ;;  %4905 = vrcp.f32 %v5821_v38  ;;  %v1002_v60 = vmul.f32 %v1001_v17, %v5722_v0  ;;  %v976_v27 = vmul.f32 %v5827_v45, %v5788_v35 }
 0x2ac   :  { %v1077_v34 = vadd.f32 0.0036580483, %v1076_v29  ;;  %v1088_v1 = vadd.f32 0.014752088, %v1087_v14  ;;  %vm980_vm0 = vweird.f32 %v5788_v35  ;;  %v946_v53 = vand.u32 2147483648, %v5753_v63 }
 0x2ad   :  { %4698 = vmatmul.msk.f32.gmra.mxu3 %vm9399_vm8, %v5406_v49  ;;  %v1052_v59 = vadd.f32 0.4994258, %v1051_v57  ;;  %v1041_v29 = vadd.f32 0.18741608, %v1040_v4  ;;  %v977_v19 = vsub.f32 1.0, %v976_v27  ;;  %v986_v14 = vand.u32 2147483648, %v5788_v35 }
 0x2ae   :  { %v1078_v30 = vmul.f32 %v1077_v34, %v5792_v22  ;;  %v1089_v10 = vmul.f32 %v1088_v1, %v5792_v22  ;;  %v984_v17 = vand.u32 2147483647, %v5788_v35  ;;  %v938_v57 = vmul.f32 %v5795_v6, %v937_v39 }
 0x2af   :  { %v1053_v13 = vmul.f32 %v1052_v59, %v5756_v37  ;;  %vm5850_vm1 = vcmp.eq.f32.partialorder %v944_v25, 8.507059e+37  ;;  %v1003_v1 = vadd.f32 1.1283791, %v1002_v60  ;;  %v978_v4 = vmul.f32 %v5827_v45, %v977_v19 }
 0x2b0   :  { %v1079_v0 = vadd.f32 0.05243302, %v1078_v30  ;;  %v1090_v49 = vadd.f32 0.112945676, %v1089_v10  ;;  %vm941_vm2 = vweird.f32 %v5795_v6  ;;  %v1024_v10 = vand.u32 2147483647, %v5821_v38 }
 0x2b1   :  { %v5854_v20 = vadd.f32 1.0, %v1053_v13  ;;  %v5858_v59 = vpop.eup %4905  ;;  %v939_v25 = vadd.f32 %v5795_v6, %v938_v57  ;;  %v1042_v39 = vmul.f32 %v1041_v29, %v5756_v37  ;;  %vm981_vm3 = vweird.f32 %v5827_v45  ;;  %vm5887_vm7 = vmor %vm940_vm15, %vm941_vm2 }
 0x2b2   :  { %v1080_v27 = vmul.f32 %v1079_v0, %v5792_v22  ;;  %v1091_v30 = vmul.f32 %v1090_v49, %v5792_v22  ;;  %v897_v60 = vsub.f32 1.0, %v5825_v18  ;;  %v1016_v19 = vmul.f32 %v5858_v59, %v5821_v38  ;;  %vm982_vm9 = vmor %vm980_vm0, %vm981_vm3 }
 0x2b3   :  { %4907 = vrcp.f32 %v5854_v20  ;;  %vm5870_vm4 = vcmp.eq.f32.partialorder %v984_v17, 8.507059e+37  ;;  %v987_v49 = vor.u32 1.1754944e-38, %v986_v14  ;;  %vm900_vm5 = vweird.f32 %v5760_v33 }
 0x2b4   :  { %v1092_v13 = vadd.f32 0.4994258, %v1091_v30  ;;  %v5876_v57 = vmul.f32 %v1003_v1, %v5708_v42  ;;  %vm1020_vm6 = vweird.f32 %v5821_v38  ;;  %v1026_v37 = vand.u32 2147483648, %v5821_v38 }
 0x2b5   :  { %4699 = vmatmul.msk.f32.gmra.mxu3 %vm9399_vm8, %v5415_v56  ;;  %v979_v18 = vadd.f32 %v5827_v45, %v978_v4  ;;  %v1081_v17 = vadd.f32 0.18741608, %v1080_v27  ;;  %v1017_v14 = vsub.f32 1.0, %v1016_v19  ;;  %v943_v56 = vsel %vm5887_vm7, %v5795_v6, %v939_v25 }
 0x2b6   :  { %v1093_v42 = vmul.f32 %v1092_v13, %v5792_v22  ;;  %v1043_v1 = vadd.f32 1.1283791, %v1042_v39  ;;  %vm5899_vm10 = vcmp.eq.f32.partialorder %v1024_v10, 8.507059e+37  ;;  %v947_v27 = vor.u32 1.1754944e-38, %v946_v53 }
 0x2b7   :  { %v983_v4 = vsel %vm982_vm9, %v5827_v45, %v979_v18  ;;  %v898_v30 = vmul.f32 %v5807_v26, %v897_v60  ;;  %v1064_v19 = vand.u32 2147483647, %v5854_v20  ;;  %v1018_v35 = vmul.f32 %v5858_v59, %v1017_v14 }
 0x2b8   :  { %v5905_v13 = vadd.f32 1.0, %v1093_v42  ;;  %v988_v29 = vsel %vm5870_vm4, %v987_v49, %v983_v4  ;;  %v9463_v6 = vand.u32 2147483647, %v5760_v33  ;;  %v1066_v45 = vand.u32 2147483648, %v5854_v20 }
 0x2b9   :  { %v4908_v25 = vpop.eup %4907  ;;  %vm1021_vm12 = vweird.f32 %v5858_v59  ;;  %v989_v53 = vmul.f32 %v988_v29, %v964_v46  ;;  %v948_v39 = vsel %vm5850_vm1, %v947_v27, %v943_v56  ;;  %v1082_v60 = vmul.f32 %v1081_v17, %v5792_v22 }
 0x2ba   :  { %vm5913_vm11 = vcmp.eq.f32.partialorder %v9463_v6, 8.507059e+37  ;;  %4909 = vrcp.f32 %v5905_v13  ;;  %v899_v0 = vadd.f32 %v5807_v26, %v898_v30  ;;  %vm901_vm13 = vweird.f32 %v5807_v26  ;;  %vm5933_vm15 = vmor %vm1020_vm6, %vm1021_vm12 }
 0x2bb   :  { %v1056_v49 = vmul.f32 %v4908_v25, %v5854_v20  ;;  %v1019_v18 = vadd.f32 %v5858_v59, %v1018_v35  ;;  %v1027_v42 = vor.u32 1.1754944e-38, %v1026_v37  ;;  %v857_v14 = vsub.f32 1.0, %v5805_v7  ;;  %vm5950_vm0 = vmor %vm900_vm5, %vm901_vm13 }
 0x2bc   :  { %v1044_v46 = vmul.f32 %v1043_v1, %v5741_v50  ;;  %v1106_v34 = vand.u32 2147483648, %v5905_v13  ;;  %vm1060_vm14 = vweird.f32 %v5854_v20  ;;  %v5938_v17 = vmul.f32 %v948_v39, %v5817_v5 }
 0x2bd   :  { %4700 = vmatmul.msk.f32.gmra.mxu3 %vm9399_vm8, %v5422_v2  ;;  %v1104_v7 = vand.u32 2147483647, %v5905_v13  ;;  %v1057_v37 = vsub.f32 1.0, %v1056_v49  ;;  %v1023_v50 = vsel %vm5933_vm15, %v5858_v59, %v1019_v18  ;;  %v4688_v56 = vclamps-f32 %v989_v53, 1.0 }
 0x2be   :  { %v1083_v5 = vadd.f32 1.1283791, %v1082_v60  ;;  %vm5954_vm1 = vcmp.eq.f32.partialorder %v1064_v19, 8.507059e+37  ;;  %v1067_v2 = vor.u32 1.1754944e-38, %v1066_v45  ;;  %v903_v4 = vsel %vm5950_vm0, %v5807_v26, %v899_v0 }
 0x2bf   :  { %vm1100_vm2 = vweird.f32 %v5905_v13  ;;  %v1058_v59 = vmul.f32 %v4908_v25, %v1057_v37  ;;  %vm1061_vm3 = vweird.f32 %v4908_v25  ;;  %v858_v33 = vmul.f32 %v5771_v41, %v857_v14 }
 0x2c0   :  { %v4910_v27 = vpop.eup %4909  ;;  %v1107_v30 = vor.u32 1.1754944e-38, %v1106_v34  ;;  %v1028_v35 = vsel %vm5899_vm10, %v1027_v42, %v1023_v50  ;;  %v4687_v19 = vclamps-f32 %v5938_v17, 1.0  ;;  %vm861_vm4 = vweird.f32 %v5771_v41  ;;  %vm1062_vm6 = vmor %vm1060_vm14, %vm1061_vm3  ;;  %v5067_v17 = vld [vmem:[%s9263_s5 + $0x58] sm:$0xff] }
 0x2c1   :  { %v1096_v29 = vmul.f32 %v4910_v27, %v5905_v13  ;;  %vm5968_vm5 = vcmp.eq.f32.partialorder %v1104_v7, 8.507059e+37  ;;  %v1059_v26 = vadd.f32 %v4908_v25, %v1058_v59  ;;  %v5972_v45 = vadd.f32 1.0, %v4688_v56 }
 0x2c2   :  { %v908_v53 = vsel %vm5913_vm11, %v5811_v44, %v903_v4  ;;  %v859_v63 = vadd.f32 %v5771_v41, %v858_v33  ;;  %vm860_vm7 = vweird.f32 %v5729_v21  ;;  %v864_v39 = vand.u32 2147483647, %v5729_v21 }
 0x2c3   :  { %v866_v60 = vand.u32 2147483648, %v5729_v21  ;;  %v1097_v0 = vsub.f32 1.0, %v1096_v29  ;;  %v1063_v49 = vsel %vm1062_vm6, %v4908_v25, %v1059_v26  ;;  %v1029_v18 = vmul.f32 %v1028_v35, %v5876_v57  ;;  %vm5984_vm9 = vmor %vm860_vm7, %vm861_vm4 }
 0x2c4   :  { %v808_v44 = vadd.f32 0.014752088, %v5763_v16  ;;  %vm1101_vm10 = vweird.f32 %v4910_v27  ;;  %v1068_v20 = vsel %vm5954_vm1, %v1067_v2, %v1063_v49  ;;  %v909_v10 = vmul.f32 %v908_v53, %v5774_v58 }
 0x2c5   :  { %v863_v21 = vsel %vm5984_vm9, %v5771_v41, %v859_v63  ;;  %4701 = vmatmul.msk.f32.gmra.mxu3 %vm9399_vm8, %v5438_v11  ;;  %v1098_v57 = vmul.f32 %v4910_v27, %v1097_v0  ;;  %v1069_v25 = vmul.f32 %v1068_v20, %v1044_v46  ;;  %vm865_vm11 = vcmp.eq.f32.partialorder %v864_v39, 8.507059e+37  ;;  %vm1102_vm12 = vmor %vm1100_vm2, %vm1101_vm10 }
 0x2c6   :  { %v867_v14 = vor.u32 1.1754944e-38, %v866_v60  ;;  %v809_v34 = vmul.f32 %v808_v44, %v5571_v61  ;;  %v765_v16 = vmul.f32 3.8918573e-05, %v5550_v36  ;;  %v725_v22 = vmul.f32 3.8918573e-05, %v5541_v3 }
 0x2c7   :  { %v685_v7 = vmul.f32 3.8918573e-05, %v5516_v12  ;;  %v1099_v58 = vadd.f32 %v4910_v27, %v1098_v57  ;;  %v4689_v37 = vclamps-f32 %v1029_v18, 1.0  ;;  %v645_v41 = vmul.f32 3.8918573e-05, %v5511_v8 }
 0x2c8   :  { %v868_v50 = vsel %vm865_vm11, %v867_v14, %v863_v21  ;;  %v1084_v56 = vmul.f32 %v1083_v5, %v5777_v43  ;;  %v810_v11 = vadd.f32 0.112945676, %v809_v34  ;;  %v766_v46 = vadd.f32 0.001143296, %v765_v16 }
 0x2c9   :  { %v726_v38 = vadd.f32 0.001143296, %v725_v22  ;;  %v1103_v1 = vsel %vm1102_vm12, %v4910_v27, %v1099_v58  ;;  %v4690_v2 = vclamps-f32 %v1069_v25, 1.0  ;;  %v686_v4 = vadd.f32 0.001143296, %v685_v7 }
 0x2ca   :  { %v646_v59 = vadd.f32 0.001143296, %v645_v41  ;;  %v1108_v33 = vsel %vm5968_vm5, %v1107_v30, %v1103_v1  ;;  %v869_v35 = vmul.f32 %v868_v50, %v5736_v54  ;;  %v811_v29 = vmul.f32 %v810_v11, %v5571_v61 }
 0x2cb   :  { %v767_v43 = vmul.f32 %v766_v46, %v5550_v36  ;;  %v1109_v5 = vmul.f32 %v1108_v33, %v1084_v56  ;;  %v4686_v26 = vclamps-f32 %v909_v10, 1.0  ;;  %v727_v13 = vmul.f32 %v726_v38, %v5541_v3  ;;  %v9476_v33 = vld [vmem:[#allocation36_spill] sm:$0xff] }
 0x2cc   :  { %v687_v53 = vmul.f32 %v686_v4, %v5516_v12  ;;  %v1125_v63 = vadd.f32 1.0, %v4689_v37  ;;  %v812_v27 = vadd.f32 0.4994258, %v811_v29  ;;  %v647_v60 = vmul.f32 %v646_v59, %v5511_v8 }
 0x2cd   :  { %v768_v39 = vadd.f32 0.014752088, %v767_v43  ;;  %4702 = vmatmul.msk.f32.gmra.mxu3 %vm9399_vm8, %v5445_v55  ;;  %v4691_v30 = vclamps-f32 %v1109_v5, 1.0  ;;  %v1126_v54 = vadd.f32 1.0, %v4690_v2  ;;  %v728_v6 = vadd.f32 0.014752088, %v727_v13 }
 0x2ce   :  { %v688_v0 = vadd.f32 0.014752088, %v687_v53  ;;  %v4685_v49 = vclamps-f32 %v869_v35, 1.0  ;;  %v813_v18 = vmul.f32 %v812_v27, %v5571_v61  ;;  %v648_v44 = vadd.f32 0.014752088, %v647_v60 }
 0x2cf   :  { %v769_v42 = vmul.f32 %v768_v39, %v5550_v36  ;;  %v1127_v20 = vadd.f32 1.0, %v4691_v30  ;;  %v729_v10 = vmul.f32 %v728_v6, %v5541_v3  ;;  %v605_v57 = vmul.f32 3.8918573e-05, %v5528_v24 }
 0x2d0   :  { %v689_v21 = vmul.f32 %v688_v0, %v5516_v12  ;;  %v6021_v25 = vadd.f32 1.0, %v813_v18  ;;  %v649_v14 = vmul.f32 %v648_v44, %v5511_v8  ;;  %v565_v34 = vmul.f32 3.8918573e-05, %v5548_v28 }
 0x2d1   :  { %v770_v55 = vadd.f32 0.112945676, %v769_v42  ;;  %v1143_v16 = vmul.f32 %v1127_v20, %v5830_v9  ;;  %v730_v61 = vadd.f32 0.112945676, %v729_v10  ;;  %v606_v7 = vadd.f32 0.001143296, %v605_v57 }
 0x2d2   :  { %v690_v22 = vadd.f32 0.112945676, %v689_v21  ;;  %v1142_v58 = vmul.f32 %v1126_v54, %v5790_v51  ;;  %v1123_v37 = vadd.f32 1.0, %v4687_v19  ;;  %v1122_v50 = vadd.f32 1.0, %v4686_v26 }
 0x2d3   :  { %4911 = vrcp.f32 %v6021_v25  ;;  %1154 = vmatpush.msra.mxu2 %v1143_v16  ;;  %v771_v41 = vmul.f32 %v770_v55, %v5550_v36  ;;  %v731_v56 = vmul.f32 %v730_v61, %v5541_v3  ;;  %v650_v46 = vadd.f32 0.112945676, %v649_v14 }
 0x2d4   :  { %v691_v11 = vmul.f32 %v690_v22, %v5516_v12  ;;  %v1141_v9 = vmul.f32 %v1125_v63, %v5748_v23  ;;  %v1121_v38 = vadd.f32 1.0, %v4685_v49  ;;  %v607_v1 = vmul.f32 %v606_v7, %v5528_v24  ;;  %v5068_v49 = vld [vmem:[%s9263_s5 + $0x60] sm:$0xff] }
 0x2d5   :  { %v566_v51 = vadd.f32 0.001143296, %v565_v34  ;;  %1155 = vmatpush.msra.mxu2 %v1142_v58  ;;  %4703 = vmatmul.msk.f32.gmra.mxu3 %vm9399_vm8, %v5067_v17  ;;  %v772_v19 = vadd.f32 0.4994258, %v771_v41  ;;  %v732_v2 = vadd.f32 0.4994258, %v731_v56  ;;  %v651_v59 = vmul.f32 %v650_v46, %v5511_v8 }
 0x2d6   :  { %v692_v4 = vadd.f32 0.4994258, %v691_v11  ;;  %v6042_v35 = vmul.f32 %v5710_v48, %v9476_v33  ;;  %v1140_v23 = vmul.f32 %v5972_v45, %v5725_v52  ;;  %v608_v29 = vadd.f32 0.014752088, %v607_v1  ;;  %v9490_v33 = vld [vmem:[#allocation39_spill] sm:$0xff] }
 0x2d7   :  { %v567_v43 = vmul.f32 %v566_v51, %v5548_v28  ;;  %1156 = vmatpush.msra.mxu2 %v1141_v9  ;;  %v773_v5 = vmul.f32 %v772_v19, %v5550_v36  ;;  %v733_v26 = vmul.f32 %v732_v2, %v5541_v3  ;;  %v652_v53 = vadd.f32 0.4994258, %v651_v59 }
 0x2d8   :  { %v693_v13 = vmul.f32 %v692_v4, %v5516_v12  ;;  %v1139_v27 = vmul.f32 %v1123_v37, %v5715_v31  ;;  %v1138_v48 = vmul.f32 %v1122_v50, %v5700_v62  ;;  %v1137_v39 = vmul.f32 %v1121_v38, %v5685_v32 }
 0x2d9   :  { %v4912_v63 = vpop.eup %4911  ;;  %v824_v52 = vand.u32 2147483647, %v6021_v25  ;;  %1157 = vmatpush.msra.mxu2 %v1140_v23  ;;  %v6055_v60 = vadd.f32 1.0, %v773_v5  ;;  %v6057_v36 = vadd.f32 1.0, %v733_v26  ;;  %v609_v3 = vmul.f32 %v608_v29, %v5528_v24 }
 0x2da   :  { %v816_v45 = vmul.f32 %v4912_v63, %v6021_v25  ;;  %vm820_vm13 = vweird.f32 %v6021_v25  ;;  %v6061_v12 = vadd.f32 1.0, %v693_v13  ;;  %v568_v31 = vadd.f32 0.014752088, %v567_v43  ;;  %v5069_v43 = vld [vmem:[%s9263_s5 + $0x68] sm:$0xff] }
 0x2db   :  { %v525_v62 = vmul.f32 3.8918573e-05, %v5543_v15  ;;  %1158 = vmatpush.msra.mxu2 %v1139_v27  ;;  %v826_v30 = vand.u32 2147483648, %v6021_v25  ;;  %4913 = vrcp.f32 %v6055_v60  ;;  %v653_v54 = vmul.f32 %v652_v53, %v5511_v8 }
 0x2dc   :  { %v817_v32 = vsub.f32 1.0, %v816_v45  ;;  %vm821_vm14 = vweird.f32 %v4912_v63  ;;  %vm6067_vm15 = vcmp.eq.f32.partialorder %v824_v52, 8.507059e+37  ;;  %4915 = vrcp.f32 %v6057_v36 }
 0x2dd   :  { %v485_v0 = vmul.f32 3.8918573e-05, %v5566_v47  ;;  %1159 = vmatpush.msra.mxu2 %v1138_v48  ;;  %4704 = vmatmul.msk.f32.gmra.mxu3 %vm9399_vm8, %v5068_v49  ;;  %v786_v42 = vand.u32 2147483648, %v6055_v60  ;;  %4917 = vrcp.f32 %v6061_v12  ;;  %v610_v8 = vadd.f32 0.112945676, %v609_v3  ;;  %vm822_vm0 = vmor %vm820_vm13, %vm821_vm14 }
 0x2de   :  { %v818_v18 = vmul.f32 %v4912_v63, %v817_v32  ;;  %v784_v44 = vand.u32 2147483647, %v6055_v60  ;;  %v746_v20 = vand.u32 2147483648, %v6057_v36  ;;  %v569_v10 = vmul.f32 %v568_v31, %v5548_v28 }
 0x2df   :  { %v526_v21 = vadd.f32 0.001143296, %v525_v62  ;;  %1160 = vmatpush.msra.mxu2 %v1137_v39  ;;  %v744_v55 = vand.u32 2147483647, %v6057_v36  ;;  %v706_v14 = vand.u32 2147483648, %v6061_v12  ;;  %v6084_v34 = vadd.f32 1.0, %v653_v54 }
 0x2e0   :  { %v819_v57 = vadd.f32 %v4912_v63, %v818_v18  ;;  %v827_v16 = vor.u32 1.1754944e-38, %v826_v30  ;;  %vm780_vm1 = vweird.f32 %v6055_v60  ;;  %v704_v61 = vand.u32 2147483647, %v6061_v12 }
 0x2e1   :  { %v6091_v22 = vadd.f32 0.001143296, %v485_v0  ;;  %v4914_v7 = vpop.eup %4913  ;;  %v787_v37 = vor.u32 1.1754944e-38, %v786_v42  ;;  %vm740_vm2 = vweird.f32 %v6057_v36  ;;  %4919 = vrcp.f32 %v6084_v34  ;;  %v9485_v42 = vld [vmem:[#allocation46_spill] sm:$0xff] }
 0x2e2   :  { %v823_v58 = vsel %vm822_vm0, %v4912_v63, %v819_v57  ;;  %v611_v50 = vmul.f32 %v610_v8, %v5528_v24  ;;  %v4916_v41 = vpop.eup %4915  ;;  %v776_v56 = vmul.f32 %v4914_v7, %v6055_v60  ;;  %vm6099_vm3 = vcmp.eq.f32.partialorder %v784_v44, 8.507059e+37 }
 0x2e3   :  { %v828_v25 = vsel %vm6067_vm15, %v827_v16, %v823_v58  ;;  %v747_v46 = vor.u32 1.1754944e-38, %v746_v20  ;;  %vm700_vm4 = vweird.f32 %v6061_v12  ;;  %v570_v9 = vadd.f32 0.112945676, %v569_v10  ;;  %v4918_v38 = vpop.eup %4917  ;;  %v9486_v10 = vld [vmem:[#allocation45_spill] sm:$0xff]  ;;  %v9487_v16 = vld [vmem:[#allocation44_spill] sm:$0xff] }
 0x2e4   :  { %v829_v1 = vmul.f32 %v828_v25, %v6042_v35  ;;  %v736_v51 = vmul.f32 %v4916_v41, %v6057_v36  ;;  %vm6106_vm5 = vcmp.eq.f32.partialorder %v744_v55, 8.507059e+37  ;;  %v707_v19 = vor.u32 1.1754944e-38, %v706_v14 }
 0x2e5   :  { %v527_v2 = vmul.f32 %v526_v21, %v5543_v15  ;;  %v777_v4 = vsub.f32 1.0, %v776_v56  ;;  %vm781_vm6 = vweird.f32 %v4914_v7  ;;  %v696_v59 = vmul.f32 %v4918_v38, %v6061_v12  ;;  %4705 = vmatmul.msk.f32.gmra.mxu3 %vm9399_vm8, %v5069_v43  ;;  %v5070_v12 = vld [vmem:[%s9263_s5 + $0x70] sm:$0xff] }
 0x2e6   :  { %vm6112_vm7 = vcmp.eq.f32.partialorder %v704_v61, 8.507059e+37  ;;  %v664_v23 = vand.u32 2147483647, %v6084_v34  ;;  %v4684_v35 = vclamps-f32 %v829_v1, 1.0  ;;  %v737_v29 = vsub.f32 1.0, %v736_v51  ;;  %vm782_vm11 = vmor %vm780_vm1, %vm781_vm6  ;;  %v9488_v51 = vld [vmem:[#allocation42_spill] sm:$0xff] }
 0x2e7   :  { %vm741_vm9 = vweird.f32 %v4916_v41  ;;  %v612_v5 = vadd.f32 0.4994258, %v611_v50  ;;  %v778_v26 = vmul.f32 %v4914_v7, %v777_v4  ;;  %v697_v13 = vsub.f32 1.0, %v696_v59  ;;  %v4920_v27 = vpop.eup %4919  ;;  %v9492_v43 = vld [vmem:[#allocation27_spill] sm:$0xff] }
 0x2e8   :  { %v666_v53 = vand.u32 2147483648, %v6084_v34  ;;  %v571_v63 = vmul.f32 %v570_v9, %v5548_v28  ;;  %v1120_v48 = vadd.f32 1.0, %v4684_v35  ;;  %v738_v39 = vmul.f32 %v4916_v41, %v737_v29  ;;  %vm742_vm13 = vmor %vm740_vm2, %vm741_vm9  ;;  %v9491_v35 = vld [vmem:[#allocation26_spill] sm:$0xff] }
 0x2e9   :  { %v613_v52 = vmul.f32 %v612_v5, %v5528_v24  ;;  %v528_v45 = vadd.f32 0.014752088, %v527_v2  ;;  %v779_v3 = vadd.f32 %v4914_v7, %v778_v26  ;;  %v698_v31 = vmul.f32 %v4918_v38, %v697_v13  ;;  %v9489_v2 = vld [vmem:[#allocation43_spill] sm:$0xff]  ;;  %v9493_v26 = vld [vmem:[#allocation41_spill] sm:$0xff] }
 0x2ea   :  { %vm701_vm10 = vweird.f32 %v4918_v38  ;;  %v656_v62 = vmul.f32 %v4920_v27, %v6084_v34  ;;  %v1136_v32 = vmul.f32 %v1120_v48, %v5678_v40  ;;  %v739_v30 = vadd.f32 %v4916_v41, %v738_v39 }
 0x2eb   :  { %vm661_vm12 = vweird.f32 %v4920_v27  ;;  %v6129_v54 = vadd.f32 1.0, %v613_v52  ;;  %v783_v6 = vsel %vm782_vm11, %v4914_v7, %v779_v3  ;;  %v699_v24 = vadd.f32 %v4918_v38, %v698_v31  ;;  %vm702_vm14 = vmor %vm700_vm4, %vm701_vm10  ;;  %v5071_v31 = vld [vmem:[%s9263_s5 + $0x78] sm:$0xff] }
 0x2ec   :  { %v657_v0 = vsub.f32 1.0, %v656_v62  ;;  %v572_v49 = vadd.f32 0.4994258, %v571_v63  ;;  %1161 = vmatpush.msra.mxu2 %v1136_v32  ;;  %v788_v40 = vsel %vm6099_vm3, %v787_v37, %v783_v6  ;;  %v743_v18 = vsel %vm742_vm13, %v4916_v41, %v739_v30  ;;  %v9495_v6 = vld [vmem:[#allocation37_spill] sm:$0xff] }
 0x2ed   :  { %4921 = vrcp.f32 %v6129_v54  ;;  %v529_v60 = vmul.f32 %v528_v45, %v5543_v15  ;;  %v789_v8 = vmul.f32 %v788_v40, %v9485_v42  ;;  %v748_v36 = vsel %vm6106_vm5, %v747_v46, %v743_v18  ;;  %4706 = vmatmul.msk.f32.gmra.mxu3 %vm9399_vm8, %v5070_v12  ;;  %v9496_v40 = vld [vmem:[#allocation38_spill] sm:$0xff] }
 0x2ee   :  { %v703_v44 = vsel %vm702_vm14, %v4918_v38, %v699_v24  ;;  %v658_v20 = vmul.f32 %v4920_v27, %v657_v0  ;;  %v749_v21 = vmul.f32 %v748_v36, %v9486_v10  ;;  %vm660_vm15 = vweird.f32 %v6084_v34 }
 0x2ef   :  { %v708_v57 = vsel %vm6112_vm7, %v707_v19, %v703_v44  ;;  %v487_v55 = vmul.f32 %v6091_v22, %v5566_v47  ;;  %v4683_v14 = vclamps-f32 %v789_v8, 1.0  ;;  %v573_v58 = vmul.f32 %v572_v49, %v5548_v28  ;;  %vm662_vm0 = vmor %vm660_vm15, %vm661_vm12 }
 0x2f0   :  { %v709_v61 = vmul.f32 %v708_v57, %v9487_v16  ;;  %v659_v7 = vadd.f32 %v4920_v27, %v658_v20  ;;  %v4682_v37 = vclamps-f32 %v749_v21, 1.0  ;;  %vm665_vm1 = vcmp.eq.f32.partialorder %v664_v23, 8.507059e+37  ;;  %v9497_v21 = vld [vmem:[#allocation30_spill] sm:$0xff] }
 0x2f1   :  { %v667_v34 = vor.u32 1.1754944e-38, %v666_v53  ;;  %v530_v50 = vadd.f32 0.112945676, %v529_v60  ;;  %v1119_v41 = vadd.f32 1.0, %v4683_v14  ;;  %v6157_v11 = vadd.f32 1.0, %v573_v58  ;;  %v9494_v53 = vld [vmem:[#allocation40_spill] sm:$0xff] }
 0x2f2   :  { %v4681_v25 = vclamps-f32 %v709_v61, 1.0  ;;  %v663_v56 = vsel %vm662_vm0, %v4920_v27, %v659_v7  ;;  %v1118_v9 = vadd.f32 1.0, %v4682_v37  ;;  %v488_v1 = vadd.f32 0.014752088, %v487_v55 }
 0x2f3   :  { %v4922_v46 = vpop.eup %4921  ;;  %v668_v22 = vsel %vm665_vm1, %v667_v34, %v663_v56  ;;  %v531_v38 = vmul.f32 %v530_v50, %v5543_v15  ;;  %v1135_v17 = vmul.f32 %v1119_v41, %v9488_v51  ;;  %v561_v23 = vadd.f32 0.18741608, %v9490_v33  ;;  %v9498_v56 = vld [vmem:[#allocation28_spill] sm:$0xff] }
 0x2f4   :  { %v1117_v19 = vadd.f32 1.0, %v4681_v25  ;;  %v669_v4 = vmul.f32 %v668_v22, %v9489_v2  ;;  %v616_v59 = vmul.f32 %v4922_v46, %v6129_v54  ;;  %v444_v29 = vmul.f32 0.5, %v9491_v35 }
 0x2f5   :  { %v445_v5 = vmul.f32 0.5, %v9492_v43  ;;  %4923 = vrcp.f32 %v6157_v11  ;;  %v603_v13 = vadd.f32 1.1283791, %v9493_v26  ;;  %1162 = vmatpush.msra.mxu2 %v1135_v17  ;;  %v1134_v63 = vmul.f32 %v1118_v9, %v9494_v53  ;;  %4707 = vmatmul.msk.f32.gmra.mxu3 %vm9399_vm8, %v5071_v31  ;;  %v9501_v31 = vld [vmem:[#allocation32_spill] sm:$0xff] }
 0x2f6   :  { %v4680_v27 = vclamps-f32 %v669_v4, 1.0  ;;  %v617_v48 = vsub.f32 1.0, %v616_v59  ;;  %v624_v39 = vand.u32 2147483647, %v6129_v54  ;;  %v626_v52 = vand.u32 2147483648, %v6129_v54 }
 0x2f7   :  { %v532_v45 = vadd.f32 0.4994258, %v531_v38  ;;  %v489_v3 = vmul.f32 %v488_v1, %v5566_v47  ;;  %1163 = vmatpush.msra.mxu2 %v1134_v63  ;;  %v1133_v62 = vmul.f32 %v1117_v19, %v445_v5  ;;  %vm621_vm2 = vweird.f32 %v4922_v46  ;;  %v9499_v19 = vld [vmem:[#allocation33_spill] sm:$0xff] }
 0x2f8   :  { %v1116_v32 = vadd.f32 1.0, %v4680_v27  ;;  %v618_v30 = vmul.f32 %v4922_v46, %v617_v48  ;;  %v478_v24 = vmul.f32 %v9495_v6, %v5566_v47  ;;  %v520_v18 = vmul.f32 %v9496_v40, %v5543_v15  ;;  %v9500_v27 = vld [vmem:[#allocation31_spill] sm:$0xff] }
 0x2f9   :  { %v533_v0 = vmul.f32 %v532_v45, %v5543_v15  ;;  %v490_v49 = vadd.f32 0.112945676, %v489_v3  ;;  %1164 = vmatpush.msra.mxu2 %v1133_v62  ;;  %vm620_vm3 = vweird.f32 %v6129_v54  ;;  %v562_v36 = vmul.f32 %v561_v23, %v5548_v28 }
 0x2fa   :  { %v1132_v60 = vmul.f32 %v1116_v32, %v444_v29  ;;  %v619_v42 = vadd.f32 %v4922_v46, %v618_v30  ;;  %vm622_vm4 = vmor %vm620_vm3, %vm621_vm2  ;;  %v627_v44 = vor.u32 1.1754944e-38, %v626_v52  ;;  %v604_v57 = vmul.f32 %v603_v13, %v9497_v21 }
 0x2fb   :  { %v4924_v8 = vpop.eup %4923  ;;  %v534_v20 = vadd.f32 1.0, %v533_v0  ;;  %v491_v10 = vmul.f32 %v490_v49, %v5566_v47  ;;  %vm625_vm5 = vcmp.eq.f32.partialorder %v624_v39, 8.507059e+37  ;;  %v479_v14 = vadd.f32 0.05243302, %v478_v24 }
 0x2fc   :  { %1165 = vmatpush.msra.mxu2 %v1132_v60  ;;  %v623_v12 = vsel %vm622_vm4, %v4922_v46, %v619_v42  ;;  %v576_v55 = vmul.f32 %v4924_v8, %v6157_v11  ;;  %v521_v61 = vadd.f32 0.18741608, %v520_v18  ;;  %v563_v28 = vadd.f32 1.1283791, %v562_v36 }
 0x2fd   :  { %v628_v16 = vsel %vm625_vm5, %v627_v44, %v623_v12  ;;  %4925 = vrcp.f32 %v534_v20  ;;  %v492_v58 = vadd.f32 0.4994258, %v491_v10  ;;  %v584_v37 = vand.u32 2147483647, %v6157_v11  ;;  %v9503_v12 = vld [vmem:[#allocation35_spill] sm:$0xff] }
 0x2fe   :  { %v629_v54 = vmul.f32 %v628_v16, %v604_v57  ;;  %v577_v7 = vsub.f32 1.0, %v576_v55  ;;  %v586_v34 = vand.u32 2147483648, %v6157_v11  ;;  %vm581_vm6 = vweird.f32 %v4924_v8 }
 0x2ff   :  { %v493_v25 = vmul.f32 %v492_v58, %v5566_v47  ;;  %v443_v46 = vmul.f32 0.5, %v9498_v56  ;;  %vm580_vm7 = vweird.f32 %v6157_v11  ;;  %v480_v51 = vmul.f32 %v479_v14, %v5566_v47  ;;  %v243_v56 = vld [vmem:[%s9265_s7 + $0x8] sm:$0xff] }
 0x300   :  { %v4679_v50 = vclamps-f32 %v629_v54, 1.0  ;;  %v578_v41 = vmul.f32 %v4924_v8, %v577_v7  ;;  %v522_v17 = vmul.f32 %v521_v61, %v5543_v15  ;;  %v564_v2 = vmul.f32 %v563_v28, %v9499_v19  ;;  %vm582_vm9 = vmor %vm580_vm7, %vm581_vm6  ;;  %v6194_v13 = vpop.f32.mrf.mxu3  ;;  %v9504_v28 = vld [vmem:[#allocation34_spill] sm:$0xff] }
 0x301   :  { %v494_v38 = vadd.f32 1.0, %v493_v25  ;;  %v587_v4 = vor.u32 1.1754944e-38, %v586_v34  ;;  %vm585_vm10 = vcmp.eq.f32.partialorder %v584_v37, 8.507059e+37  ;;  %v481_v11 = vadd.f32 0.18741608, %v480_v51 }
 0x302   :  { %v1115_v9 = vadd.f32 1.0, %v4679_v50  ;;  %v579_v22 = vadd.f32 %v4924_v8, %v578_v41  ;;  %v523_v5 = vadd.f32 1.1283791, %v522_v17  ;;  %v546_v26 = vand.u32 2147483648, %v534_v20  ;;  %v242_v41 = vld [vmem:[%s9265_s7] sm:$0xff] }
 0x303   :  { %v4926_v1 = vpop.eup %4925  ;;  %4927 = vrcp.f32 %v494_v38  ;;  %v544_v63 = vand.u32 2147483647, %v534_v20  ;;  %v442_v48 = vmul.f32 0.5, %v9500_v27  ;;  %vm540_vm12 = vweird.f32 %v534_v20  ;;  %v9511_v27 = vld [vmem:[#allocation22_spill] sm:$0xff] }
 0x304   :  { %v1131_v59 = vmul.f32 %v1115_v9, %v443_v46  ;;  %v583_v33 = vsel %vm582_vm9, %v4924_v8, %v579_v22  ;;  %v536_v23 = vmul.f32 %v4926_v1, %v534_v20  ;;  %vm541_vm11 = vweird.f32 %v4926_v1 }
 0x305   :  { %v588_v35 = vsel %vm585_vm10, %v587_v4, %v583_v33  ;;  %v482_v3 = vmul.f32 %v481_v11, %v5566_v47  ;;  %v524_v62 = vmul.f32 %v523_v5, %v9501_v31  ;;  %vm542_vm13 = vmor %vm540_vm12, %vm541_vm11  ;;  %v547_v32 = vor.u32 1.1754944e-38, %v546_v26  ;;  %v9502_v47 = vld [vmem:[#allocation29_spill] sm:$0xff]  ;;  %v9505_v4 = vld [vmem:[#allocation11_spill] sm:$0xff] }
 0x306   :  { %1166 = vmatpush.msra.mxu2 %v1131_v59  ;;  %v589_v29 = vmul.f32 %v588_v35, %v564_v2  ;;  %v537_v43 = vsub.f32 1.0, %v536_v23  ;;  %vm545_vm14 = vcmp.eq.f32.partialorder %v544_v63, 8.507059e+37  ;;  %v506_v60 = vand.u32 2147483648, %v494_v38  ;;  %v9507_v33 = vld [vmem:[#allocation19_spill] sm:$0xff] }
 0x307   :  { %v483_v18 = vadd.f32 1.1283791, %v482_v3  ;;  %v504_v44 = vand.u32 2147483647, %v494_v38  ;;  %v441_v20 = vmul.f32 0.5, %v9502_v47  ;;  %vm500_vm0 = vweird.f32 %v494_v38  ;;  %v9515_v3 = vld [vmem:[#allocation25_spill] sm:$0xff] }
 0x308   :  { %v4678_v53 = vclamps-f32 %v589_v29, 1.0  ;;  %v538_v15 = vmul.f32 %v4926_v1, %v537_v43  ;;  %v1197_v42 = vpop.f32.mrf.mxu3  ;;  %v507_v57 = vor.u32 1.1754944e-38, %v506_v60  ;;  %v440_v37 = vmul.f32 0.5, %v9504_v28  ;;  %v9509_v29 = vld [vmem:[#allocation24_spill] sm:$0xff] }
 0x309   :  { %v4928_v45 = vpop.eup %4927  ;;  %v484_v55 = vmul.f32 %v483_v18, %v9503_v12  ;;  %vm505_vm2 = vcmp.eq.f32.partialorder %v504_v44, 8.507059e+37 }
 0x30a   :  { %v1114_v39 = vadd.f32 1.0, %v4678_v53  ;;  %v539_v52 = vadd.f32 %v4926_v1, %v538_v15  ;;  %v496_v24 = vmul.f32 %v4928_v45, %v494_v38  ;;  %vm501_vm15 = vweird.f32 %v4928_v45 }
 0x30b   :  { %vm502_vm1 = vmor %vm500_vm0, %vm501_vm15 }
 0x30c   :  { %v1130_v30 = vmul.f32 %v1114_v39, %v442_v48  ;;  %v543_v6 = vsel %vm542_vm13, %v4926_v1, %v539_v52  ;;  %v497_v40 = vsub.f32 1.0, %v496_v24  ;;  %v6246_v48 = vadd.f32 %v6194_v13, %v9511_v27  ;;  %v9513_v39 = vld [vmem:[#allocation20_spill] sm:$0xff] }
 0x30d   :  { %v548_v0 = vsel %vm545_vm14, %v547_v32, %v543_v6  ;;  %v6249_v52 = vadd.f32 %v1197_v42, %v9513_v39 }
 0x30e   :  { %1167 = vmatpush.msra.mxu2 %v1130_v30  ;;  %v549_v49 = vmul.f32 %v548_v0, %v524_v62  ;;  %v498_v36 = vmul.f32 %v4928_v45, %v497_v40  ;;  %9512 = vst [vmem:[#allocation44_spill] sm:$0xff] %v6246_v48  ;;  %v9517_v30 = vld [vmem:[#allocation18_spill] sm:$0xff]  ;;  %v6263_v13 = vmul.f32 0.70710677, %v6246_v48 }
 0x30f   :  { %9514 = vst [vmem:[#allocation42_spill] sm:$0xff] %v6249_v52  ;;  %v6266_v0 = vmul.f32 0.70710677, %v6249_v52 }
 0x310   :  { %v4677_v8 = vclamps-f32 %v549_v49, 1.0  ;;  %v499_v21 = vadd.f32 %v4928_v45, %v498_v36  ;;  %v1200_v7 = vpop.f32.mrf.mxu3  ;;  %9519 = vst [vmem:[#allocation26_spill] sm:$0xff] %v6263_v13  ;;  %v1274_v44 = vmul.f32 %v6263_v13, %v6263_v13 }
 0x311   :  { %v6254_v31 = vadd.f32 %v1200_v7, %v9515_v3  ;;  %9520 = vst [vmem:[#allocation27_spill] sm:$0xff] %v6266_v0  ;;  %v1314_v47 = vmul.f32 %v6266_v0, %v6266_v0 }
 0x312   :  { %v1113_v10 = vadd.f32 1.0, %v4677_v8  ;;  %v503_v16 = vsel %vm502_vm1, %v4928_v45, %v499_v21  ;;  %v9522_v8 = vld [vmem:[#allocation23_spill] sm:$0xff] }
 0x313   :  { %v508_v61 = vsel %vm505_vm2, %v507_v57, %v503_v16  ;;  %9516 = vst [vmem:[#allocation43_spill] sm:$0xff] %v6254_v31  ;;  %v6271_v40 = vmul.f32 0.70710677, %v6254_v31 }
 0x314   :  { %v1129_v14 = vmul.f32 %v1113_v10, %v441_v20  ;;  %v509_v54 = vmul.f32 %v508_v61, %v484_v55  ;;  %v6296_v61 = vmin.f32 %v1274_v44, 16.0 }
 0x315   :  { %9521 = vst [vmem:[#allocation41_spill] sm:$0xff] %v6271_v40  ;;  %v1354_v10 = vmul.f32 %v6271_v40, %v6271_v40 }
 0x316   :  { %1168 = vmatpush.msra.mxu2 %v1129_v14  ;;  %v4676_v58 = vclamps-f32 %v509_v54, 1.0  ;;  %v9524_v14 = vld [vmem:[#allocation13_spill] sm:$0xff]  ;;  %v6298_v54 = vmin.f32 %v1314_v47, 16.0 }
 0x317   :  { %v6300_v28 = vmin.f32 %v1354_v10, 16.0 }
 0x318   :  { %v1112_v34 = vadd.f32 1.0, %v4676_v58  ;;  %v1203_v25 = vpop.f32.mrf.mxu3 }
 0x319   :  { %v6222_v23 = vadd.f32 %v1203_v25, %v9507_v33  ;;  %v1356_v33 = vmul.f32 2.1237322e-06, %v6300_v28 }
 0x31a   :  { %v1128_v50 = vmul.f32 %v1112_v34, %v440_v37  ;;  %v9525_v34 = vld [vmem:[#allocation12_spill] sm:$0xff] }
 0x31b   :  { %9508 = vst [vmem:[#allocation46_spill] sm:$0xff] %v6222_v23  ;;  %v6233_v5 = vmul.f32 0.70710677, %v6222_v23 }
 0x31c   :  { %1169 = vmatpush.msra.mxu2 %v1128_v50 }
 0x31d   :  { %1170 = vmatmul.f32.vlgmr.msra.gmra.mxu2 %v242_v41  ;;  %v1394_v15 = vmul.f32 %v6233_v5, %v6233_v5 }
 0x31f   :  { %v6256_v62 = vmin.f32 %v1394_v15, 16.0 }
 0x320   :  { %v1206_v46 = vpop.f32.mrf.mxu3 }
 0x321   :  { %v6219_v59 = vadd.f32 %v1206_v46, %v9505_v4  ;;  %v1396_v18 = vmul.f32 2.1237322e-06, %v6256_v62 }
 0x323   :  { %9506 = vst [vmem:[#allocation36_spill] sm:$0xff] %v6219_v59  ;;  %v6225_v35 = vmul.f32 0.70710677, %v6219_v59  ;;  %v1397_v21 = vadd.f32 0.00028619796, %v1396_v18  ;;  %v9526_v18 = vld [vmem:[#allocation17_spill] sm:$0xff] }
 0x325   :  { %1173 = vmatmul.f32.gmra.mxu2 %v243_v56  ;;  %v1434_v26 = vmul.f32 %v6225_v35, %v6225_v35  ;;  %v1398_v37 = vmul.f32 %v1397_v21, %v6256_v62 }
 0x327   :  { %v6242_v63 = vmin.f32 %v1434_v26, 16.0 }
 0x328   :  { %v1209_v9 = vpop.f32.mrf.mxu3 }
 0x329   :  { %v6228_v43 = vadd.f32 %v1209_v9, %v9509_v29  ;;  %v1436_v32 = vmul.f32 2.1237322e-06, %v6242_v63  ;;  %v1399_v29 = vadd.f32 0.0036580483, %v1398_v37 }
 0x32b   :  { %9510 = vst [vmem:[#allocation45_spill] sm:$0xff] %v6228_v43  ;;  %v6238_v53 = vmul.f32 0.70710677, %v6228_v43  ;;  %v1437_v60 = vadd.f32 0.00028619796, %v1436_v32  ;;  %v1400_v44 = vmul.f32 %v1399_v29, %v6256_v62 }
 0x32d   :  { %v1474_v45 = vmul.f32 %v6238_v53, %v6238_v53  ;;  %v1438_v57 = vmul.f32 %v1437_v60, %v6242_v63 }
 0x32f   :  { %v6268_v49 = vmin.f32 %v1474_v45, 16.0  ;;  %v1439_v41 = vadd.f32 0.0036580483, %v1438_v57 }
 0x330   :  { %v1212_v22 = vpop.f32.mrf.mxu3 }
 0x331   :  { %v6260_v6 = vadd.f32 %v1212_v22, %v9517_v30  ;;  %v1476_v20 = vmul.f32 2.1237322e-06, %v6268_v49  ;;  %v1276_v22 = vmul.f32 2.1237322e-06, %v6296_v61  ;;  %v1440_v15 = vmul.f32 %v1439_v41, %v6242_v63 }
 0x333   :  { %9518 = vst [vmem:[#allocation39_spill] sm:$0xff] %v6260_v6  ;;  %v6275_v42 = vmul.f32 0.70710677, %v6260_v6  ;;  %v1477_v7 = vadd.f32 0.00028619796, %v1476_v20 }
 0x334   :  { %v1277_v32 = vadd.f32 0.00028619796, %v1276_v22  ;;  %v1441_v10 = vadd.f32 0.05243302, %v1440_v15 }
 0x335   :  { %v1514_v12 = vmul.f32 %v6275_v42, %v6275_v42  ;;  %v1478_v4 = vmul.f32 %v1477_v7, %v6268_v49 }
 0x336   :  { %v1278_v37 = vmul.f32 %v1277_v32, %v6296_v61 }
 0x337   :  { %v6306_v25 = vmin.f32 %v1514_v12, 16.0  ;;  %v9528_v12 = vld [vmem:[#allocation10_spill] sm:$0xff] }
 0x338   :  { %v1215_v38 = vpop.f32.mrf.mxu3 }
 0x339   :  { %v6278_v36 = vadd.f32 %v1215_v38, %v9522_v8  ;;  %v1316_v38 = vmul.f32 2.1237322e-06, %v6298_v54  ;;  %v1516_v27 = vmul.f32 2.1237322e-06, %v6306_v25  ;;  %v1357_v8 = vadd.f32 0.00028619796, %v1356_v33 }
 0x33a   :  { %v1442_v33 = vmul.f32 %v1441_v10, %v6242_v63 }
 0x33b   :  { %9523 = vst [vmem:[#allocation40_spill] sm:$0xff] %v6278_v36  ;;  %v6291_v55 = vmul.f32 0.70710677, %v6278_v36  ;;  %v1317_v30 = vadd.f32 0.00028619796, %v1316_v38  ;;  %v1358_v22 = vmul.f32 %v1357_v8, %v6300_v28  ;;  %v9529_v8 = vld [vmem:[#allocation16_spill] sm:$0xff] }
 0x33c   :  { %v1517_v21 = vadd.f32 0.00028619796, %v1516_v27  ;;  %v1401_v38 = vadd.f32 0.05243302, %v1400_v44 }
 0x33d   :  { %v1554_v56 = vmul.f32 %v6291_v55, %v6291_v55 }
 0x33e   :  { %v1518_v29 = vmul.f32 %v1517_v21, %v6306_v25  ;;  %v6367_v21 = vadd.f32 0.0036580483, %v1278_v37 }
 0x33f   :  { %v6324_v39 = vmin.f32 %v1554_v56, 16.0 }
 0x340   :  { %v6208_v1 = vpop.f32.mrf.mxu3  ;;  %9530 = vst [vmem:[#allocation38_spill] sm:$0xff] %v6367_v21 }
 0x341   :  { %v6332_v60 = vadd.f32 %v6208_v1, %v9526_v18  ;;  %v1556_v57 = vmul.f32 2.1237322e-06, %v6324_v39 }
 0x343   :  { %9527 = vst [vmem:[#allocation37_spill] sm:$0xff] %v6332_v60  ;;  %v6348_v56 = vmul.f32 0.70710677, %v6332_v60 }
 0x345   :  { %v1594_v18 = vmul.f32 %v6348_v56, %v6348_v56 }
 0x348   :  { %v6210_v51 = vpop.f32.mrf.mxu3 }
 0x349   :  { %v6363_v44 = vadd.f32 %v6210_v51, %v9529_v8 }
 0x34b   :  { %v6380_v37 = vmul.f32 0.70710677, %v6363_v44 }
 0x350   :  { %v6212_v17 = vpop.f32.mrf.mxu3 }
 0x358   :  { %v6214_v19 = vpop.f32.mrf.mxu3 }
 0x360   :  { %v6216_v2 = vpop.f32.mrf.mxu3 }
 0x368   :  { %v6230_v11 = vpop.f32.mrf.mxu3 }
 0x370   :  { %v1236_v24 = vpop.f32.mrf.mxu3 }
 0x371   :  { %v6294_v16 = vadd.f32 %v1236_v24, %v9524_v14  ;;  %v1479_v24 = vadd.f32 0.0036580483, %v1478_v4  ;;  %v6340_v14 = vadd.f32 %v6230_v11, %v9528_v12  ;;  %v1519_v12 = vadd.f32 0.0036580483, %v1518_v29  ;;  %v9532_v29 = vld [vmem:[#allocation21_spill] sm:$0xff] }
 0x373   :  { %v6311_v46 = vmul.f32 0.70710677, %v6294_v16  ;;  %v1480_v41 = vmul.f32 %v1479_v24, %v6268_v49  ;;  %v6356_v15 = vmul.f32 0.70710677, %v6340_v14 }
 0x375   :  { %v1834_v45 = vmul.f32 %v6311_v46, %v6311_v46  ;;  %v1481_v24 = vadd.f32 0.05243302, %v1480_v41 }
 0x377   :  { %v6342_v7 = vmin.f32 %v1834_v45, 16.0 }
 0x378   :  { %v1239_v58 = vpop.f32.mrf.mxu3 }
 0x379   :  { %v6304_v50 = vadd.f32 %v1239_v58, %v9525_v34  ;;  %v1318_v34 = vmul.f32 %v1317_v30, %v6298_v54  ;;  %v1836_v27 = vmul.f32 2.1237322e-06, %v6342_v7 }
 0x37b   :  { %v6314_v9 = vmul.f32 0.70710677, %v6304_v50  ;;  %v1319_v30 = vadd.f32 0.0036580483, %v1318_v34  ;;  %v1837_v34 = vadd.f32 0.00028619796, %v1836_v27 }
 0x37d   :  { %v1874_v26 = vmul.f32 %v6314_v9, %v6314_v9  ;;  %v6374_v51 = vmul.f32 %v1319_v30, %v6298_v54  ;;  %v1838_v8 = vmul.f32 %v1837_v34, %v6342_v7 }
 0x37f   :  { %v6328_v3 = vmin.f32 %v1874_v26, 16.0  ;;  %v1557_v26 = vadd.f32 0.00028619796, %v1556_v57  ;;  %v1443_v57 = vadd.f32 0.18741608, %v1442_v33  ;;  %9531 = vst [vmem:[#allocation30_spill] sm:$0xff] %v6374_v51  ;;  %v6456_v51 = vpop.permute.xlu0 %1151 }
 0x380   :  { %9539 = vst [vmem:[#allocation29_spill] sm:$0xff] %v6456_v51 }
 0x381   :  { %v1876_v47 = vmul.f32 2.1237322e-06, %v6328_v3  ;;  %v1887_v20 = vmul.f32 3.8918573e-05, %v6328_v3 }
 0x383   :  { %v1877_v58 = vadd.f32 0.00028619796, %v1876_v47  ;;  %v1888_v1 = vadd.f32 0.001143296, %v1887_v20  ;;  %v1359_v47 = vadd.f32 0.0036580483, %v1358_v22  ;;  %v1402_v20 = vmul.f32 %v1401_v38, %v6256_v62 }
 0x384   :  { %v1482_v22 = vmul.f32 %v1481_v24, %v6268_v49  ;;  %v6377_v38 = vmin.f32 %v1594_v18, 16.0  ;;  %v1847_v24 = vmul.f32 3.8918573e-05, %v6342_v7 }
 0x385   :  { %v1878_v4 = vmul.f32 %v1877_v58, %v6328_v3  ;;  %v1889_v11 = vmul.f32 %v1888_v1, %v6328_v3  ;;  %v1794_v58 = vmul.f32 %v6356_v15, %v6356_v15  ;;  %v1558_v1 = vmul.f32 %v1557_v26, %v6324_v39 }
 0x386   :  { %v1403_v33 = vadd.f32 0.18741608, %v1402_v20  ;;  %v6385_v26 = vadd.f32 %v6216_v2, %v9532_v29  ;;  %v1483_v20 = vadd.f32 0.18741608, %v1482_v22  ;;  %v1596_v48 = vmul.f32 2.1237322e-06, %v6377_v38 }
 0x387   :  { %v1879_v45 = vadd.f32 0.0036580483, %v1878_v4  ;;  %v1890_v32 = vadd.f32 0.014752088, %v1889_v11  ;;  %v1360_v11 = vmul.f32 %v1359_v47, %v6300_v28  ;;  %v6390_v30 = vmin.f32 %v1794_v58, 16.0  ;;  %v9533_v29 = vld [vmem:[#allocation15_spill] sm:$0xff] }
 0x388   :  { %v1559_v18 = vadd.f32 0.0036580483, %v1558_v1  ;;  %v1634_v2 = vmul.f32 %v6380_v37, %v6380_v37  ;;  %v6403_v58 = vmul.f32 0.70710677, %v6385_v26 }
 0x389   :  { %v1891_v10 = vmul.f32 %v1890_v32, %v6328_v3  ;;  %v1880_v41 = vmul.f32 %v1879_v45, %v6328_v3  ;;  %v1444_v45 = vmul.f32 %v1443_v57, %v6242_v63  ;;  %v1520_v32 = vmul.f32 %v1519_v12, %v6306_v25 }
 0x38a   :  { %v1404_v57 = vmul.f32 %v1403_v33, %v6256_v62  ;;  %v6400_v12 = vadd.f32 %v6212_v17, %v9533_v29  ;;  %v1796_v22 = vmul.f32 2.1237322e-06, %v6390_v30  ;;  %v1560_v52 = vmul.f32 %v1559_v18, %v6324_v39 }
 0x38b   :  { %v1892_v4 = vadd.f32 0.112945676, %v1891_v10  ;;  %v1881_v10 = vadd.f32 0.05243302, %v1880_v41  ;;  %v1445_v34 = vadd.f32 1.1283791, %v1444_v45  ;;  %v1484_v17 = vmul.f32 %v1483_v20, %v6268_v49 }
 0x38c   :  { %v1521_v41 = vadd.f32 0.05243302, %v1520_v32  ;;  %v1597_v29 = vadd.f32 0.00028619796, %v1596_v48  ;;  %v6413_v0 = vmin.f32 %v1634_v2, 16.0  ;;  %v9535_v32 = vld [vmem:[#allocation14_spill] sm:$0xff]  ;;  %v1754_v18 = vmul.f32 %v6403_v58, %v6403_v58 }
 0x38d   :  { %v1893_v27 = vmul.f32 %v1892_v4, %v6328_v3  ;;  %v1848_v4 = vadd.f32 0.001143296, %v1847_v24  ;;  %v1839_v24 = vadd.f32 0.0036580483, %v1838_v8  ;;  %v1882_v33 = vmul.f32 %v1881_v10, %v6328_v3 }
 0x38e   :  { %v6418_v45 = vmul.f32 0.70710677, %v6400_v12  ;;  %v1522_v48 = vmul.f32 %v1521_v41, %v6306_v25  ;;  %v1797_v10 = vadd.f32 0.00028619796, %v1796_v22  ;;  %v6435_v40 = vadd.f32 1.1283791, %v1404_v57 }
 0x38f   :  { %v1894_v47 = vadd.f32 0.4994258, %v1893_v27  ;;  %v1849_v27 = vmul.f32 %v1848_v4, %v6342_v7  ;;  %v6422_v4 = vadd.f32 %v6214_v19, %v9535_v32  ;;  %v1840_v19 = vmul.f32 %v1839_v24, %v6342_v7 }
 0x390   :  { %v1883_v32 = vadd.f32 0.18741608, %v1882_v33  ;;  %9537 = vst [vmem:[#allocation31_spill] sm:$0xff] %v6435_v40  ;;  %v1598_v23 = vmul.f32 %v1597_v29, %v6377_v38  ;;  %v1636_v59 = vmul.f32 2.1237322e-06, %v6413_v0  ;;  %v6441_v22 = vmul.f32 %v1445_v34, %v6225_v35 }
 0x391   :  { %v1895_v1 = vmul.f32 %v1894_v47, %v6328_v3  ;;  %v1850_v31 = vadd.f32 0.014752088, %v1849_v27  ;;  %v6415_v47 = vpop.permute.xlu1 %1146  ;;  %v1561_v27 = vadd.f32 0.05243302, %v1560_v52  ;;  %v6446_v52 = vmul.f32 0.70710677, %v6422_v4 }
 0x392   :  { %9534 = vst [vmem:[#allocation28_spill] sm:$0xff] %v6415_v47  ;;  %v1485_v57 = vadd.f32 1.1283791, %v1484_v17  ;;  %v1523_v24 = vadd.f32 0.18741608, %v1522_v48  ;;  %v1798_v33 = vmul.f32 %v1797_v10, %v6390_v30  ;;  %v1884_v35 = vmul.f32 %v1883_v32, %v6328_v3 }
 0x393   :  { %v6410_v13 = vadd.f32 1.0, %v1895_v1  ;;  %v1851_v2 = vmul.f32 %v1850_v31, %v6342_v7  ;;  %v6432_v1 = vadd.f32 0.05243302, %v1360_v11  ;;  %9538 = vst [vmem:[#allocation32_spill] sm:$0xff] %v6441_v22  ;;  %v1674_v31 = vmul.f32 %v6418_v45, %v6418_v45 }
 0x394   :  { %v6448_v11 = vmin.f32 %v1754_v18, 16.0  ;;  %v1807_v34 = vmul.f32 3.8918573e-05, %v6390_v30  ;;  %v1637_v43 = vadd.f32 0.00028619796, %v1636_v59  ;;  %v1714_v48 = vmul.f32 %v6446_v52, %v6446_v52 }
 0x395   :  { %4929 = vrcp.f32 %v6410_v13  ;;  %v1852_v41 = vadd.f32 0.112945676, %v1851_v2  ;;  %v1562_v2 = vmul.f32 %v1561_v27, %v6324_v39  ;;  %v6458_v17 = vmin.f32 %v1674_v31, 16.0 }
 0x396   :  { %v1756_v10 = vmul.f32 2.1237322e-06, %v6448_v11  ;;  %v1908_v31 = vand.u32 2147483648, %v6410_v13  ;;  %vm1902_vm4 = vweird.f32 %v6410_v13 }
 0x397   :  { %v1853_v29 = vmul.f32 %v1852_v41, %v6342_v7  ;;  %v1799_v41 = vadd.f32 0.0036580483, %v1798_v33 }
 0x399   :  { %v1854_v18 = vadd.f32 0.4994258, %v1853_v29  ;;  %v1885_v29 = vadd.f32 1.1283791, %v1884_v35  ;;  %v6477_v35 = vmin.f32 %v1714_v48, 16.0 }
 0x39b   :  { %v1855_v59 = vmul.f32 %v1854_v18, %v6342_v7  ;;  %v1676_v18 = vmul.f32 2.1237322e-06, %v6458_v17 }
 0x39d   :  { %v6472_v33 = vadd.f32 1.0, %v1855_v59  ;;  %v1909_v59 = vor.u32 1.1754944e-38, %v1908_v31  ;;  %v1677_v48 = vadd.f32 0.00028619796, %v1676_v18  ;;  %v1563_v31 = vadd.f32 0.18741608, %v1562_v2 }
 0x39f   :  { %4931 = vrcp.f32 %v6472_v33  ;;  %vm1862_vm9 = vweird.f32 %v6472_v33 }
 0x3a0   :  { %v1171_v8 = vpop.f32.mrf.mxu2 }
 0x3a1   :  { %v6429_v20 = vadd.f32 %v1171_v8, %v6415_v47  ;;  %v4930_v8 = vpop.eup %4929  ;;  %v1841_v47 = vadd.f32 0.05243302, %v1840_v19  ;;  %v1808_v19 = vadd.f32 0.001143296, %v1807_v34  ;;  %v1906_v34 = vand.u32 2147483647, %v6410_v13 }
 0x3a2   :  { %v1898_v6 = vmul.f32 %v4930_v8, %v6410_v13  ;;  %vm1903_vm3 = vweird.f32 %v4930_v8  ;;  %v6485_v13 = vmul.f32 %v1485_v57, %v6238_v53  ;;  %v1678_v57 = vmul.f32 %v1677_v48, %v6458_v17 }
 0x3a3   :  { %9536 = vst [vmem:[#allocation33_spill] sm:$0xff] %v6429_v20  ;;  %1973 = vadd.xlane.f32.xlu2 %v6429_v20  ;;  %v1599_v20 = vadd.f32 0.0036580483, %v1598_v23  ;;  %v1842_v32 = vmul.f32 %v1841_v47, %v6342_v7  ;;  %v1809_v21 = vmul.f32 %v1808_v19, %v6390_v30  ;;  %v1757_v19 = vadd.f32 0.00028619796, %v1756_v10  ;;  %vm1904_vm5 = vmor %vm1902_vm4, %vm1903_vm3 }
 0x3a4   :  { %v1899_v23 = vsub.f32 1.0, %v1898_v6  ;;  %v1638_v6 = vmul.f32 %v1637_v43, %v6413_v0  ;;  %v1886_v43 = vmul.f32 %v1885_v29, %v6314_v9  ;;  %vm1907_vm6 = vcmp.eq.f32.partialorder %v1906_v34, 8.507059e+37 }
 0x3a5   :  { %v1810_v47 = vadd.f32 0.014752088, %v1809_v21  ;;  %v1524_v10 = vmul.f32 %v1523_v24, %v6306_v25  ;;  %v1257_v34 = vmul.f32 0.5, %v6304_v50  ;;  %v1866_v48 = vand.u32 2147483647, %v6472_v33 }
 0x3a6   :  { %v1900_v36 = vmul.f32 %v4930_v8, %v1899_v23  ;;  %v1800_v23 = vmul.f32 %v1799_v41, %v6390_v30  ;;  %v1639_v21 = vadd.f32 0.0036580483, %v1638_v6  ;;  %v1716_v41 = vmul.f32 2.1237322e-06, %v6477_v35 }
 0x3a7   :  { %v1564_v50 = vmul.f32 %v1563_v31, %v6324_v39  ;;  %vm1867_vm11 = vcmp.eq.f32.partialorder %v1866_v48, 8.507059e+37 }
 0x3a8   :  { %v1174_v27 = vpop.f32.mrf.mxu2  ;;  %v1640_v53 = vmul.f32 %v1639_v21, %v6413_v0  ;;  %v1717_v2 = vadd.f32 0.00028619796, %v1716_v41  ;;  %v1679_v41 = vadd.f32 0.0036580483, %v1678_v57 }
 0x3a9   :  { %v6464_v3 = vadd.f32 %v1174_v27, %v6456_v51  ;;  %v1600_v27 = vmul.f32 %v1599_v20, %v6377_v38  ;;  %v1901_v51 = vadd.f32 %v4930_v8, %v1900_v36  ;;  %v1843_v20 = vadd.f32 0.18741608, %v1842_v32 }
 0x3aa   :  { %v1801_v32 = vadd.f32 0.05243302, %v1800_v23  ;;  %v1641_v31 = vadd.f32 0.05243302, %v1640_v53 }
 0x3ab   :  { %9540 = vst [vmem:[#allocation35_spill] sm:$0xff] %v6464_v3  ;;  %1975 = vadd.xlane.f32.xlu2 %v6464_v3  ;;  %v1811_v3 = vmul.f32 %v1810_v47, %v6390_v30  ;;  %v1905_v60 = vsel %vm1904_vm5, %v4930_v8, %v1901_v51  ;;  %v1758_v47 = vmul.f32 %v1757_v19, %v6448_v11  ;;  %v4932_v51 = vpop.eup %4931  ;;  %v1601_v8 = vadd.f32 0.05243302, %v1600_v27 }
 0x3ac   :  { %v1910_v22 = vsel %vm1907_vm6, %v1909_v59, %v1905_v60  ;;  %v1844_v29 = vmul.f32 %v1843_v20, %v6342_v7  ;;  %v1858_v24 = vmul.f32 %v4932_v51, %v6472_v33  ;;  %v1802_v27 = vmul.f32 %v1801_v32, %v6390_v30 }
 0x3ad   :  { %v1812_v36 = vadd.f32 0.112945676, %v1811_v3  ;;  %v1911_v40 = vmul.f32 %v1910_v22, %v1886_v43  ;;  %v1767_v3 = vmul.f32 3.8918573e-05, %v6448_v11  ;;  %v1759_v19 = vadd.f32 0.0036580483, %v1758_v47 }
 0x3ae   :  { %v1859_v23 = vsub.f32 1.0, %v1858_v24  ;;  %v1845_v7 = vadd.f32 1.1283791, %v1844_v29  ;;  %v1868_v20 = vand.u32 2147483648, %v6472_v33  ;;  %vm1863_vm7 = vweird.f32 %v4932_v51 }
 0x3af   :  { %v1813_v9 = vmul.f32 %v1812_v36, %v6390_v30  ;;  %v4723_v60 = vclamps-f32 %v1911_v40, 1.0  ;;  %v1768_v18 = vadd.f32 0.001143296, %v1767_v3  ;;  %v1718_v47 = vmul.f32 %v1717_v2, %v6477_v35  ;;  %vm1864_vm10 = vmor %vm1862_vm9, %vm1863_vm7 }
 0x3b0   :  { %v1860_v21 = vmul.f32 %v4932_v51, %v1859_v23  ;;  %v1803_v3 = vadd.f32 0.18741608, %v1802_v27  ;;  %v1869_v24 = vor.u32 1.1754944e-38, %v1868_v20  ;;  %v1846_v57 = vmul.f32 %v1845_v7, %v6311_v46 }
 0x3b1   :  { %v1814_v22 = vadd.f32 0.4994258, %v1813_v9  ;;  %v1929_v6 = vadd.f32 1.0, %v4723_v60  ;;  %v1769_v43 = vmul.f32 %v1768_v18, %v6448_v11  ;;  %v1760_v9 = vmul.f32 %v1759_v19, %v6448_v11 }
 0x3b2   :  { %v1861_v29 = vadd.f32 %v4932_v51, %v1860_v21  ;;  %v1602_v60 = vmul.f32 %v1601_v8, %v6377_v38  ;;  %v1525_v33 = vadd.f32 1.1283791, %v1524_v10  ;;  %v6514_v23 = vmul.f32 0.5, %v6363_v44 }
 0x3b3   :  { %v1815_v40 = vmul.f32 %v1814_v22, %v6390_v30  ;;  %v1945_v59 = vmul.f32 %v1929_v6, %v1257_v34  ;;  %v1770_v32 = vadd.f32 0.014752088, %v1769_v43  ;;  %v1680_v34 = vmul.f32 %v1679_v41, %v6458_v17 }
 0x3b4   :  { %v1865_v2 = vsel %vm1864_vm10, %v4932_v51, %v1861_v29  ;;  %v1719_v6 = vadd.f32 0.0036580483, %v1718_v47  ;;  %v1761_v8 = vadd.f32 0.05243302, %v1760_v9  ;;  %v1804_v53 = vmul.f32 %v1803_v3, %v6390_v30 }
 0x3b5   :  { %v6502_v36 = vadd.f32 1.0, %v1815_v40  ;;  %1946 = vmatpush.msrb.mxu0 %v1945_v59  ;;  %v1771_v22 = vmul.f32 %v1770_v32, %v6448_v11  ;;  %v1870_v18 = vsel %vm1867_vm11, %v1869_v24, %v1865_v2  ;;  %v1565_v40 = vadd.f32 1.1283791, %v1564_v50 }
 0x3b6   :  { %v1871_v27 = vmul.f32 %v1870_v18, %v1846_v57  ;;  %v6517_v59 = vmul.f32 0.5, %v6400_v12  ;;  %v1603_v7 = vadd.f32 0.18741608, %v1602_v60  ;;  %v1642_v20 = vmul.f32 %v1641_v31, %v6413_v0 }
 0x3b7   :  { %4933 = vrcp.f32 %v6502_v36  ;;  %v1772_v19 = vadd.f32 0.112945676, %v1771_v22  ;;  %v1727_v10 = vmul.f32 3.8918573e-05, %v6477_v35  ;;  %v1681_v21 = vadd.f32 0.05243302, %v1680_v34 }
 0x3b8   :  { %v4722_v43 = vclamps-f32 %v1871_v27, 1.0  ;;  %v1720_v44 = vmul.f32 %v1719_v6, %v6477_v35  ;;  %v1762_v12 = vmul.f32 %v1761_v8, %v6448_v11  ;;  %v1256_v41 = vmul.f32 0.5, %v6294_v16 }
 0x3b9   :  { %v1773_v46 = vmul.f32 %v1772_v19, %v6448_v11  ;;  %v1728_v47 = vadd.f32 0.001143296, %v1727_v10  ;;  %v1805_v32 = vadd.f32 1.1283791, %v1804_v53  ;;  %v1407_v60 = vmul.f32 3.8918573e-05, %v6256_v62 }
 0x3ba   :  { %v1928_v30 = vadd.f32 1.0, %v4722_v43  ;;  %v1826_v24 = vand.u32 2147483647, %v6502_v36  ;;  %v1828_v22 = vand.u32 2147483648, %v6502_v36  ;;  %v6535_v34 = vmul.f32 %v1525_v33, %v6275_v42 }
 0x3bb   :  { %v1774_v50 = vadd.f32 0.4994258, %v1773_v46  ;;  %v1729_v31 = vmul.f32 %v1728_v47, %v6477_v35  ;;  %v1408_v16 = vadd.f32 0.001143296, %v1407_v60  ;;  %v1643_v6 = vadd.f32 0.18741608, %v1642_v20 }
 0x3bc   :  { %v1944_v3 = vmul.f32 %v1928_v30, %v1256_v41  ;;  %v1721_v18 = vadd.f32 0.05243302, %v1720_v44  ;;  %v1763_v8 = vadd.f32 0.18741608, %v1762_v12  ;;  %vm1822_vm13 = vweird.f32 %v6502_v36 }
 0x3bd   :  { %v4934_v51 = vpop.eup %4933  ;;  %v1775_v29 = vmul.f32 %v1774_v50, %v6448_v11  ;;  %v1730_v19 = vadd.f32 0.014752088, %v1729_v31  ;;  %v1682_v53 = vmul.f32 %v1681_v21, %v6458_v17  ;;  %v1829_v46 = vor.u32 1.1754944e-38, %v1828_v22 }
 0x3be   :  { %v1818_v48 = vmul.f32 %v4934_v51, %v6502_v36  ;;  %vm1823_vm12 = vweird.f32 %v4934_v51  ;;  %1947 = vmatpush.msrb.mxu0 %v1944_v3  ;;  %v1409_v10 = vmul.f32 %v1408_v16, %v6256_v62  ;;  %v6543_v42 = vmul.f32 %v1565_v40, %v6291_v55 }
 0x3bf   :  { %v6532_v2 = vadd.f32 1.0, %v1775_v29  ;;  %vm1824_vm14 = vmor %vm1822_vm13, %vm1823_vm12  ;;  %v1731_v43 = vmul.f32 %v1730_v19, %v6477_v35  ;;  %v1806_v33 = vmul.f32 %v1805_v32, %v6356_v15  ;;  %vm1827_vm15 = vcmp.eq.f32.partialorder %v1826_v24, 8.507059e+37 }
 0x3c0   :  { %v1819_v9 = vsub.f32 1.0, %v1818_v48  ;;  %v1722_v44 = vmul.f32 %v1721_v18, %v6477_v35  ;;  %v1410_v50 = vadd.f32 0.014752088, %v1409_v10  ;;  %v1604_v21 = vmul.f32 %v1603_v7, %v6377_v38 }
 0x3c1   :  { %4935 = vrcp.f32 %v6532_v2  ;;  %v1732_v48 = vadd.f32 0.112945676, %v1731_v43  ;;  %v1764_v12 = vmul.f32 %v1763_v8, %v6448_v11  ;;  %v1447_v30 = vmul.f32 3.8918573e-05, %v6242_v63 }
 0x3c2   :  { %v1820_v57 = vmul.f32 %v4934_v51, %v1819_v9  ;;  %v1644_v47 = vmul.f32 %v1643_v6, %v6413_v0  ;;  %v1683_v55 = vadd.f32 0.18741608, %v1682_v53  ;;  %v6552_v40 = vmul.f32 0.5, %v6422_v4 }
 0x3c3   :  { %v1733_v15 = vmul.f32 %v1732_v48, %v6477_v35  ;;  %v1255_v32 = vmul.f32 0.5, %v6340_v14  ;;  %v1687_v29 = vmul.f32 3.8918573e-05, %v6458_v17  ;;  %v1448_v7 = vadd.f32 0.001143296, %v1447_v30 }
 0x3c4   :  { %v1821_v27 = vadd.f32 %v4934_v51, %v1820_v57  ;;  %v1723_v60 = vadd.f32 0.18741608, %v1722_v44  ;;  %v1411_v24 = vmul.f32 %v1410_v50, %v6256_v62  ;;  %v1765_v22 = vadd.f32 1.1283791, %v1764_v12 }
 0x3c5   :  { %v1734_v3 = vadd.f32 0.4994258, %v1733_v15  ;;  %v1688_v57 = vadd.f32 0.001143296, %v1687_v29  ;;  %v1449_v4 = vmul.f32 %v1448_v7, %v6242_v63  ;;  %v1786_v6 = vand.u32 2147483647, %v6532_v2 }
 0x3c6   :  { %v1825_v20 = vsel %vm1824_vm14, %v4934_v51, %v1821_v27  ;;  %v1788_v14 = vand.u32 2147483648, %v6532_v2  ;;  %v1367_v53 = vmul.f32 3.8918573e-05, %v6300_v28  ;;  %v1412_v10 = vadd.f32 0.112945676, %v1411_v24 }
 0x3c7   :  { %v1830_v36 = vsel %vm1827_vm15, %v1829_v46, %v1825_v20  ;;  %v4936_v51 = vpop.eup %4935  ;;  %v1735_v18 = vmul.f32 %v1734_v3, %v6477_v35  ;;  %v1689_v8 = vmul.f32 %v1688_v57, %v6458_v17  ;;  %v1450_v27 = vadd.f32 0.014752088, %v1449_v4 }
 0x3c8   :  { %v1831_v41 = vmul.f32 %v1830_v36, %v1806_v33  ;;  %v1778_v11 = vmul.f32 %v4936_v51, %v6532_v2  ;;  %vm1783_vm0 = vweird.f32 %v4936_v51  ;;  %v1724_v33 = vmul.f32 %v1723_v60, %v6477_v35 }
 0x3c9   :  { %v6565_v43 = vadd.f32 1.0, %v1735_v18  ;;  %v1690_v20 = vadd.f32 0.014752088, %v1689_v8  ;;  %v1487_v44 = vmul.f32 3.8918573e-05, %v6268_v49  ;;  %v1451_v36 = vmul.f32 %v1450_v27, %v6242_v63 }
 0x3ca   :  { %v4721_v9 = vclamps-f32 %v1831_v41, 1.0  ;;  %v1779_v16 = vsub.f32 1.0, %v1778_v11  ;;  %v1766_v48 = vmul.f32 %v1765_v22, %v6403_v58  ;;  %vm1782_vm1 = vweird.f32 %v6532_v2 }
 0x3cb   :  { %4937 = vrcp.f32 %v6565_v43  ;;  %vm1784_vm2 = vmor %vm1782_vm1, %vm1783_vm0  ;;  %v1789_v12 = vor.u32 1.1754944e-38, %v1788_v14  ;;  %v1691_v41 = vmul.f32 %v1690_v20, %v6458_v17  ;;  %v1488_v30 = vadd.f32 0.001143296, %v1487_v44 }
 0x3cc   :  { %v1927_v31 = vadd.f32 1.0, %v4721_v9  ;;  %v1780_v46 = vmul.f32 %v4936_v51, %v1779_v16  ;;  %v1452_v15 = vadd.f32 0.112945676, %v1451_v36  ;;  %vm1787_vm3 = vcmp.eq.f32.partialorder %v1786_v6, 8.507059e+37 }
 0x3cd   :  { %v1368_v9 = vadd.f32 0.001143296, %v1367_v53  ;;  %v6575_v29 = vadd.f32 1.1283791, %v1604_v21  ;;  %v1692_v58 = vadd.f32 0.112945676, %v1691_v41  ;;  %v1489_v60 = vmul.f32 %v1488_v30, %v6268_v49 }
 0x3ce   :  { %v1943_v19 = vmul.f32 %v1927_v31, %v1255_v32  ;;  %v1781_v50 = vadd.f32 %v4936_v51, %v1780_v46  ;;  %v1413_v32 = vmul.f32 %v1412_v10, %v6256_v62  ;;  %v6578_v2 = vadd.f32 1.1283791, %v1644_v47 }
 0x3cf   :  { %v1254_v11 = vmul.f32 0.5, %v6385_v26  ;;  %v1453_v24 = vmul.f32 %v1452_v15, %v6242_v63  ;;  %v1684_v22 = vmul.f32 %v1683_v55, %v6458_v17  ;;  %v1693_v31 = vmul.f32 %v1692_v58, %v6458_v17 }
 0x3d0   :  { %1948 = vmatpush.msrb.mxu0 %v1943_v19  ;;  %v1785_v35 = vsel %vm1784_vm2, %v4936_v51, %v1781_v50  ;;  %v1725_v51 = vadd.f32 1.1283791, %v1724_v33  ;;  %v1490_v57 = vadd.f32 0.014752088, %v1489_v60  ;;  %v1647_v16 = vmul.f32 3.8918573e-05, %v6413_v0 }
 0x3d1   :  { %v1790_v7 = vsel %vm1787_vm3, %v1789_v12, %v1785_v35  ;;  %v4938_v4 = vpop.eup %4937  ;;  %v1414_v6 = vadd.f32 0.4994258, %v1413_v32  ;;  %v1369_v14 = vmul.f32 %v1368_v9, %v6300_v28  ;;  %v1746_v26 = vand.u32 2147483647, %v6565_v43 }
 0x3d2   :  { %v1791_v3 = vmul.f32 %v1790_v7, %v1766_v48  ;;  %v1738_v47 = vmul.f32 %v4938_v4, %v6565_v43  ;;  %v1694_v18 = vadd.f32 0.4994258, %v1693_v31  ;;  %v1527_v19 = vmul.f32 3.8918573e-05, %v6306_v25 }
 0x3d3   :  { %v1648_v55 = vadd.f32 0.001143296, %v1647_v16  ;;  %v1491_v27 = vmul.f32 %v1490_v57, %v6268_v49  ;;  %v1454_v53 = vadd.f32 0.4994258, %v1453_v24  ;;  %v1748_v10 = vand.u32 2147483648, %v6565_v43 }
 0x3d4   :  { %v4720_v21 = vclamps-f32 %v1791_v3, 1.0  ;;  %v1739_v46 = vsub.f32 1.0, %v1738_v47  ;;  %v1695_v33 = vmul.f32 %v1694_v18, %v6458_v17  ;;  %v1528_v20 = vadd.f32 0.001143296, %v1527_v19 }
 0x3d5   :  { %v1649_v36 = vmul.f32 %v1648_v55, %v6413_v0  ;;  %v1492_v48 = vadd.f32 0.112945676, %v1491_v27  ;;  %v1415_v50 = vmul.f32 %v1414_v6, %v6256_v62  ;;  %vm1743_vm4 = vweird.f32 %v4938_v4 }
 0x3d6   :  { %v1926_v8 = vadd.f32 1.0, %v4720_v21  ;;  %v1740_v12 = vmul.f32 %v4938_v4, %v1739_v46  ;;  %v6594_v41 = vadd.f32 1.0, %v1695_v33  ;;  %v1529_v30 = vmul.f32 %v1528_v20, %v6306_v25 }
 0x3d7   :  { %v1650_v15 = vadd.f32 0.014752088, %v1649_v36  ;;  %v1493_v35 = vmul.f32 %v1492_v48, %v6268_v49  ;;  %v1455_v32 = vmul.f32 %v1454_v53, %v6242_v63  ;;  %v1370_v17 = vadd.f32 0.014752088, %v1369_v14 }
 0x3d8   :  { %v1942_v44 = vmul.f32 %v1926_v8, %v1254_v11  ;;  %v1741_v9 = vadd.f32 %v4938_v4, %v1740_v12  ;;  %vm1742_vm5 = vweird.f32 %v6565_v43  ;;  %v1749_v7 = vor.u32 1.1754944e-38, %v1748_v10 }
 0x3d9   :  { %4939 = vrcp.f32 %v6594_v41  ;;  %vm1744_vm6 = vmor %vm1742_vm5, %vm1743_vm4  ;;  %v1651_v62 = vmul.f32 %v1650_v15, %v6413_v0  ;;  %v1530_v58 = vadd.f32 0.014752088, %v1529_v30  ;;  %v1494_v60 = vadd.f32 0.4994258, %v1493_v35 }
 0x3da   :  { %1949 = vmatpush.msrb.mxu0 %v1942_v44  ;;  %v6602_v11 = vadd.f32 1.0, %v1415_v50  ;;  %v1726_v3 = vmul.f32 %v1725_v51, %v6446_v52  ;;  %v1745_v24 = vsel %vm1744_vm6, %v4938_v4, %v1741_v9  ;;  %vm1747_vm7 = vcmp.eq.f32.partialorder %v1746_v26, 8.507059e+37 }
 0x3db   :  { %v1567_v63 = vmul.f32 3.8918573e-05, %v6324_v39  ;;  %v1750_v31 = vsel %vm1747_vm7, %v1749_v7, %v1745_v24  ;;  %v1652_v57 = vadd.f32 0.112945676, %v1651_v62  ;;  %v1531_v43 = vmul.f32 %v1530_v58, %v6306_v25 }
 0x3dc   :  { %v6607_v21 = vadd.f32 1.0, %v1455_v32  ;;  %v1685_v16 = vadd.f32 1.1283791, %v1684_v22  ;;  %v1751_v6 = vmul.f32 %v1750_v31, %v1726_v3  ;;  %v1495_v47 = vmul.f32 %v1494_v60, %v6268_v49 }
 0x3dd   :  { %v1568_v14 = vadd.f32 0.001143296, %v1567_v63  ;;  %v1653_v18 = vmul.f32 %v1652_v57, %v6413_v0  ;;  %v1532_v19 = vadd.f32 0.112945676, %v1531_v43  ;;  %4941 = vrcp.f32 %v6602_v11 }
 0x3de   :  { %v1371_v52 = vmul.f32 %v1370_v17, %v6300_v28  ;;  %v4719_v4 = vclamps-f32 %v1751_v6, 1.0  ;;  %v1607_v26 = vmul.f32 3.8918573e-05, %v6377_v38  ;;  %v6615_v55 = vadd.f32 1.0, %v1495_v47 }
 0x3df   :  { %v4940_v51 = vpop.eup %4939  ;;  %v1569_v8 = vmul.f32 %v1568_v14, %v6324_v39  ;;  %v1654_v27 = vadd.f32 0.4994258, %v1653_v18  ;;  %v1533_v49 = vmul.f32 %v1532_v19, %v6306_v25  ;;  %4943 = vrcp.f32 %v6607_v21 }
 0x3e0   :  { %v1698_v22 = vmul.f32 %v4940_v51, %v6594_v41  ;;  %v1925_v53 = vadd.f32 1.0, %v4719_v4  ;;  %v1608_v46 = vadd.f32 0.001143296, %v1607_v26  ;;  %4945 = vrcp.f32 %v6615_v55 }
 0x3e1   :  { %v1570_v10 = vadd.f32 0.014752088, %v1569_v8  ;;  %v1706_v20 = vand.u32 2147483647, %v6594_v41  ;;  %v1655_v44 = vmul.f32 %v1654_v27, %v6413_v0  ;;  %v1534_v36 = vadd.f32 0.4994258, %v1533_v49 }
 0x3e2   :  { %v1699_v33 = vsub.f32 1.0, %v1698_v22  ;;  %v1941_v48 = vmul.f32 %v1925_v53, %v6552_v40  ;;  %v1708_v50 = vand.u32 2147483648, %v6594_v41  ;;  %v1609_v12 = vmul.f32 %v1608_v46, %v6377_v38 }
 0x3e3   :  { %v1571_v30 = vmul.f32 %v1570_v10, %v6324_v39  ;;  %v6627_v15 = vpop.eup %4941  ;;  %vm1703_vm9 = vweird.f32 %v4940_v51  ;;  %v6629_v32 = vadd.f32 1.0, %v1655_v44  ;;  %v1535_v17 = vmul.f32 %v1534_v36, %v6306_v25 }
 0x3e4   :  { %v1700_v35 = vmul.f32 %v4940_v51, %v1699_v33  ;;  %v6634_v0 = vmul.f32 %v6575_v29, %v6348_v56  ;;  %v6638_v40 = vmul.f32 %v6578_v2, %v6380_v37  ;;  %1950 = vmatpush.msrb.mxu0 %v1941_v48  ;;  %v1610_v9 = vadd.f32 0.014752088, %v1609_v12 }
 0x3e5   :  { %v1572_v7 = vadd.f32 0.112945676, %v1571_v30  ;;  %v6640_v62 = vpop.eup %4943  ;;  %v1686_v58 = vmul.f32 %v1685_v16, %v6418_v45  ;;  %vm1702_vm10 = vweird.f32 %v6594_v41  ;;  %4947 = vrcp.f32 %v6629_v32 }
 0x3e6   :  { %v1701_v60 = vadd.f32 %v4940_v51, %v1700_v35  ;;  %v6645_v25 = vpop.eup %4945  ;;  %vm1704_vm11 = vmor %vm1702_vm10, %vm1703_vm9  ;;  %v1709_v56 = vor.u32 1.1754944e-38, %v1708_v50  ;;  %v1611_v29 = vmul.f32 %v1610_v9, %v6377_v38  ;;  %v6649_v2 = vadd.f32 1.0, %v1535_v17  ;;  %v9567_v9 = vld [vmem:[#allocation39_spill] sm:$0xff] }
 0x3e7   :  { %v1573_v37 = vmul.f32 %v1572_v7, %v6324_v39  ;;  %vm1707_vm12 = vcmp.eq.f32.partialorder %v1706_v20, 8.507059e+37  ;;  %v1498_v45 = vmul.f32 %v6645_v25, %v6615_v55  ;;  %v6653_v24 = vadd.f32 0.112945676, %v1371_v52 }
 0x3e8   :  { %v1705_v3 = vsel %vm1704_vm11, %v4940_v51, %v1701_v60  ;;  %v1612_v63 = vadd.f32 0.112945676, %v1611_v29  ;;  %v6656_v57 = vmul.f32 3.8918573e-05, %v6298_v54  ;;  %4949 = vrcp.f32 %v6649_v2 }
 0x3e9   :  { %v1710_v41 = vsel %vm1707_vm12, %v1709_v56, %v1705_v3  ;;  %v1574_v31 = vadd.f32 0.4994258, %v1573_v37  ;;  %v1466_v16 = vand.u32 2147483647, %v6607_v21  ;;  %v1426_v6 = vand.u32 2147483647, %v6602_v11 }
 0x3ea   :  { %v1711_v43 = vmul.f32 %v1710_v41, %v1686_v58  ;;  %v1613_v14 = vmul.f32 %v1612_v63, %v6377_v38  ;;  %v1499_v18 = vsub.f32 1.0, %v1498_v45  ;;  %v1468_v19 = vand.u32 2147483648, %v6607_v21 }
 0x3eb   :  { %v1575_v47 = vmul.f32 %v1574_v31, %v6324_v39  ;;  %v4948_v52 = vpop.eup %4947  ;;  %v1506_v4 = vand.u32 2147483647, %v6615_v55  ;;  %v1458_v26 = vmul.f32 %v6640_v62, %v6607_v21  ;;  %v6669_v8 = vmul.f32 %v6627_v15, %v6602_v11 }
 0x3ec   :  { %v4718_v51 = vclamps-f32 %v1711_v43, 1.0  ;;  %v1658_v22 = vmul.f32 %v4948_v52, %v6629_v32  ;;  %v1614_v27 = vadd.f32 0.4994258, %v1613_v14  ;;  %vm1502_vm13 = vweird.f32 %v6615_v55 }
 0x3ed   :  { %v6672_v49 = vadd.f32 1.0, %v1575_v47  ;;  %v1666_v53 = vand.u32 2147483647, %v6629_v32  ;;  %v1500_v46 = vmul.f32 %v6645_v25, %v1499_v18  ;;  %v1508_v10 = vand.u32 2147483648, %v6615_v55 }
 0x3ee   :  { %v1924_v39 = vadd.f32 1.0, %v4718_v51  ;;  %v1659_v33 = vsub.f32 1.0, %v1658_v22  ;;  %v1668_v20 = vand.u32 2147483648, %v6629_v32  ;;  %v1615_v44 = vmul.f32 %v1614_v27, %v6377_v38  ;;  %v6681_v36 = vpop.eup %4949  ;;  %v9562_v51 = vld [vmem:[#allocation32_spill] sm:$0xff] }
 0x3ef   :  { %4951 = vrcp.f32 %v6672_v49  ;;  %vm1662_vm14 = vweird.f32 %v6629_v32  ;;  %v1548_v50 = vand.u32 2147483648, %v6649_v2  ;;  %vm6686_vm15 = vcmp.eq.f32.partialorder %v1506_v4, 8.507059e+37 }
 0x3f0   :  { %v1940_v48 = vmul.f32 %v1924_v39, %v6517_v59  ;;  %v1459_v30 = vsub.f32 1.0, %v1458_v26  ;;  %v1660_v35 = vmul.f32 %v4948_v52, %v1659_v33  ;;  %vm1663_vm0 = vweird.f32 %v4948_v52 }
 0x3f1   :  { %v6690_v17 = vadd.f32 1.0, %v1615_v44  ;;  %v1538_v38 = vmul.f32 %v6681_v36, %v6649_v2  ;;  %vm6694_vm1 = vcmp.eq.f32.partialorder %v1666_v53, 8.507059e+37  ;;  %v1546_v59 = vand.u32 2147483647, %v6649_v2  ;;  %vm1664_vm4 = vmor %vm1662_vm14, %vm1663_vm0 }
 0x3f2   :  { %1951 = vmatpush.msrb.mxu0 %v1940_v48  ;;  %v1501_v7 = vadd.f32 %v6645_v25, %v1500_v46  ;;  %vm1503_vm2 = vweird.f32 %v6645_v25  ;;  %v1661_v58 = vadd.f32 %v4948_v52, %v1660_v35  ;;  %v1669_v60 = vor.u32 1.1754944e-38, %v1668_v20 }
 0x3f3   :  { %4953 = vrcp.f32 %v6690_v17  ;;  %v1586_v56 = vand.u32 2147483647, %v6672_v49  ;;  %vm1462_vm3 = vweird.f32 %v6607_v21  ;;  %v1588_v29 = vand.u32 2147483648, %v6672_v49  ;;  %vm6714_vm7 = vmor %vm1502_vm13, %vm1503_vm2 }
 0x3f4   :  { %v1539_v37 = vsub.f32 1.0, %v1538_v38  ;;  %vm1542_vm5 = vweird.f32 %v6649_v2  ;;  %v1460_v3 = vmul.f32 %v6640_v62, %v1459_v30  ;;  %v1665_v41 = vsel %vm1664_vm4, %v4948_v52, %v1661_v58 }
 0x3f5   :  { %v4952_v45 = vpop.eup %4951  ;;  %vm1582_vm6 = vweird.f32 %v6672_v49  ;;  %v1549_v63 = vor.u32 1.1754944e-38, %v1548_v50  ;;  %v1509_v32 = vor.u32 1.1754944e-38, %v1508_v10  ;;  %v1670_v43 = vsel %vm6694_vm1, %v1669_v60, %v1665_v41 }
 0x3f6   :  { %v1578_v14 = vmul.f32 %v4952_v45, %v6672_v49  ;;  %vm1543_vm9 = vweird.f32 %v6681_v36  ;;  %vm6722_vm10 = vcmp.eq.f32.partialorder %v1546_v59, 8.507059e+37  ;;  %v1505_v55 = vsel %vm6714_vm7, %v6645_v25, %v1501_v7 }
 0x3f7   :  { %v1671_v18 = vmul.f32 %v1670_v43, %v6638_v40  ;;  %v1626_v52 = vand.u32 2147483647, %v6690_v17  ;;  %vm6731_vm11 = vcmp.eq.f32.partialorder %v1586_v56, 8.507059e+37  ;;  %v1540_v4 = vmul.f32 %v6681_v36, %v1539_v37 }
 0x3f8   :  { %vm1422_vm12 = vweird.f32 %v6602_v11  ;;  %v1579_v26 = vsub.f32 1.0, %v1578_v14  ;;  %v1589_v22 = vor.u32 1.1754944e-38, %v1588_v29  ;;  %v1461_v27 = vadd.f32 %v6640_v62, %v1460_v3 }
 0x3f9   :  { %vm6740_vm13 = vcmp.eq.f32.partialorder %v1466_v16, 8.507059e+37  ;;  %v1419_v40 = vsub.f32 1.0, %v6669_v8  ;;  %v4954_v39 = vpop.eup %4953  ;;  %v4717_v53 = vclamps-f32 %v1671_v18, 1.0  ;;  %v1541_v46 = vadd.f32 %v6681_v36, %v1540_v4  ;;  %v9561_v18 = vld [vmem:[#allocation31_spill] sm:$0xff] }
 0x3fa   :  { %v1510_v10 = vsel %vm6686_vm15, %v1509_v32, %v1505_v55  ;;  %vm1463_vm14 = vweird.f32 %v6640_v62  ;;  %v1618_v33 = vmul.f32 %v4954_v39, %v6690_v17  ;;  %v1580_v20 = vmul.f32 %v4952_v45, %v1579_v26  ;;  %vm6761_vm15 = vmor %vm1542_vm5, %vm1543_vm9 }
 0x3fb   :  { %vm1583_vm0 = vweird.f32 %v4952_v45  ;;  %v1420_v16 = vmul.f32 %v6627_v15, %v1419_v40  ;;  %v1923_v44 = vadd.f32 1.0, %v4717_v53  ;;  %vm1622_vm1 = vweird.f32 %v6690_v17  ;;  %vm6773_vm4 = vmor %vm1462_vm3, %vm1463_vm14 }
 0x3fc   :  { %vm6752_vm2 = vcmp.eq.f32.partialorder %v1626_v52, 8.507059e+37  ;;  %v1628_v48 = vand.u32 2147483648, %v6690_v17  ;;  %v1619_v12 = vsub.f32 1.0, %v1618_v33  ;;  %v1581_v30 = vadd.f32 %v4952_v45, %v1580_v20  ;;  %vm1584_vm5 = vmor %vm1582_vm6, %vm1583_vm0  ;;  %v9564_v33 = vld [vmem:[#allocation40_spill] sm:$0xff] }
 0x3fd   :  { %v1545_v35 = vsel %vm6761_vm15, %v6681_v36, %v1541_v46  ;;  %v6769_v38 = vmul.f32 %v1510_v10, %v6485_v13  ;;  %v1939_v2 = vmul.f32 %v1923_v44, %v6514_v23  ;;  %v1465_v59 = vsel %vm6773_vm4, %v6640_v62, %v1461_v27 }
 0x3fe   :  { %v1421_v36 = vadd.f32 %v6627_v15, %v1420_v16  ;;  %vm1423_vm7 = vweird.f32 %v6627_v15  ;;  %v1620_v13 = vmul.f32 %v4954_v39, %v1619_v12  ;;  %vm1623_vm9 = vweird.f32 %v4954_v39  ;;  %v9565_v12 = vld [vmem:[#allocation38_spill] sm:$0xff] }
 0x3ff   :  { %v1585_v7 = vsel %vm1584_vm5, %v4952_v45, %v1581_v30  ;;  %v1428_v58 = vand.u32 2147483648, %v6602_v11  ;;  %1952 = vmatpush.msrb.mxu0 %v1939_v2  ;;  %v1550_v49 = vsel %vm6722_vm10, %v1549_v63, %v1545_v35  ;;  %v1469_v60 = vor.u32 1.1754944e-38, %v1468_v19  ;;  %vm6797_vm3 = vmor %vm1422_vm12, %vm1423_vm7  ;;  %v9566_v35 = vld [vmem:[#allocation30_spill] sm:$0xff] }
 0x400   :  { %v1590_v23 = vsel %vm6731_vm11, %v1589_v22, %v1585_v7  ;;  %v1373_v62 = vmul.f32 %v6653_v24, %v6300_v28  ;;  %v1621_v56 = vadd.f32 %v4954_v39, %v1620_v13  ;;  %v1629_v29 = vor.u32 1.1754944e-38, %v1628_v48  ;;  %vm1624_vm6 = vmor %vm1622_vm1, %vm1623_vm9 }
 0x401   :  { %v1591_v37 = vmul.f32 %v1590_v23, %v6543_v42  ;;  %v1328_v45 = vadd.f32 0.001143296, %v6656_v57  ;;  %v1470_v21 = vsel %vm6740_vm13, %v1469_v60, %v1465_v59  ;;  %v1425_v24 = vsel %vm6797_vm3, %v6627_v15, %v1421_v36  ;;  %v9568_v60 = vld [vmem:[#allocation45_spill] sm:$0xff] }
 0x402   :  { %v1374_v19 = vadd.f32 0.4994258, %v1373_v62  ;;  %v1287_v42 = vmul.f32 3.8918573e-05, %v6296_v61  ;;  %v1625_v41 = vsel %vm1624_vm6, %v4954_v39, %v1621_v56  ;;  %v1551_v63 = vmul.f32 %v1550_v49, %v6535_v34 }
 0x403   :  { %v1429_v31 = vor.u32 1.1754944e-38, %v1428_v58  ;;  %v1329_v32 = vmul.f32 %v1328_v45, %v6298_v54  ;;  %v1630_v57 = vsel %vm6752_vm2, %v1629_v29, %v1625_v41  ;;  %v4715_v17 = vclamps-f32 %v1591_v37, 1.0 }
 0x404   :  { %vm1427_vm10 = vcmp.eq.f32.partialorder %v1426_v6, 8.507059e+37  ;;  %v1375_v43 = vmul.f32 %v1374_v19, %v6300_v28  ;;  %v1631_v15 = vmul.f32 %v1630_v57, %v6634_v0  ;;  %v1288_v55 = vadd.f32 0.001143296, %v1287_v42  ;;  %v9563_v0 = vld [vmem:[#allocation37_spill] sm:$0xff]  ;;  %v9569_v19 = vld [vmem:[#allocation36_spill] sm:$0xff] }
 0x405   :  { %v1430_v14 = vsel %vm1427_vm10, %v1429_v31, %v1425_v24  ;;  %v1330_v47 = vadd.f32 0.014752088, %v1329_v32  ;;  %v1362_v34 = vmul.f32 %v6432_v1, %v6300_v28  ;;  %v1406_v52 = vmul.f32 %v9561_v18, %v6233_v5 }
 0x406   :  { %v1471_v4 = vmul.f32 %v1470_v21, %v9562_v51  ;;  %v6823_v26 = vadd.f32 1.0, %v1375_v43  ;;  %v4716_v22 = vclamps-f32 %v1631_v15, 1.0  ;;  %v4714_v11 = vclamps-f32 %v1551_v63, 1.0 }
 0x407   :  { %v1331_v6 = vmul.f32 %v1330_v47, %v6298_v54  ;;  %v1289_v27 = vmul.f32 %v1288_v55, %v6296_v61  ;;  %v1250_v25 = vmul.f32 0.5, %v9563_v0  ;;  %v4713_v40 = vclamps-f32 %v6769_v38, 1.0 }
 0x408   :  { %v1431_v39 = vmul.f32 %v1430_v14, %v1406_v52  ;;  %4955 = vrcp.f32 %v6823_v26  ;;  %v1922_v1 = vadd.f32 1.0, %v4716_v22  ;;  %v1921_v53 = vadd.f32 1.0, %v4715_v17  ;;  %v9570_v17 = vld [vmem:[#allocation46_spill] sm:$0xff] }
 0x409   :  { %v1332_v5 = vadd.f32 0.112945676, %v1331_v6  ;;  %v1290_v46 = vadd.f32 0.014752088, %v1289_v27  ;;  %v1363_v10 = vadd.f32 0.18741608, %v1362_v34  ;;  %v1280_v30 = vmul.f32 %v9565_v12, %v6296_v61 }
 0x40a   :  { %v1249_v20 = vmul.f32 0.5, %v9564_v33  ;;  %v4712_v16 = vclamps-f32 %v1471_v4, 1.0  ;;  %v1938_v44 = vmul.f32 %v1922_v1, %v1250_v25  ;;  %v1920_v8 = vadd.f32 1.0, %v4714_v11  ;;  %v9571_v6 = vld [vmem:[#allocation41_spill] sm:$0xff] }
 0x40b   :  { %v1333_v48 = vmul.f32 %v1332_v5, %v6298_v54  ;;  %v1291_v50 = vmul.f32 %v1290_v46, %v6296_v61  ;;  %v1321_v38 = vadd.f32 0.05243302, %v9566_v35  ;;  %v1248_v2 = vmul.f32 0.5, %v9567_v9  ;;  %v9572_v33 = vld [vmem:[#allocation9_spill] sm:$0xff] }
 0x40c   :  { %v1919_v59 = vadd.f32 1.0, %v4713_v40  ;;  %1953 = vmatpush.msrb.mxu0 %v1938_v44  ;;  %v1937_v36 = vmul.f32 %v1921_v53, %v1249_v20  ;;  %v4711_v13 = vclamps-f32 %v1431_v39, 1.0  ;;  %v1364_v49 = vmul.f32 %v1363_v10, %v6300_v28 }
 0x40d   :  { %v1334_v7 = vadd.f32 0.4994258, %v1333_v48  ;;  %v1292_v58 = vadd.f32 0.112945676, %v1291_v50  ;;  %v1247_v62 = vmul.f32 0.5, %v9568_v60  ;;  %v1918_v56 = vadd.f32 1.0, %v4712_v16 }
 0x40e   :  { %v4956_v23 = vpop.eup %4955  ;;  %1954 = vmatpush.msrb.mxu0 %v1937_v36  ;;  %v1936_v29 = vmul.f32 %v1920_v8, %v1248_v2  ;;  %v1281_v21 = vadd.f32 0.05243302, %v1280_v30  ;;  %v1322_v24 = vmul.f32 %v1321_v38, %v6298_v54  ;;  %v1246_v42 = vmul.f32 0.5, %v9569_v19  ;;  %v9573_v16 = vld [vmem:[#allocation43_spill] sm:$0xff]  ;;  %v9574_v30 = vld [vmem:[#allocation33_spill] sm:$0xff] }
 0x40f   :  { %v1378_v37 = vmul.f32 %v4956_v23, %v6823_v26  ;;  %v1335_v3 = vmul.f32 %v1334_v7, %v6298_v54  ;;  %v1293_v45 = vmul.f32 %v1292_v58, %v6296_v61  ;;  %v1935_v41 = vmul.f32 %v1919_v59, %v1247_v62  ;;  %v9575_v7 = vld [vmem:[#allocation27_spill] sm:$0xff] }
 0x410   :  { %1955 = vmatpush.msrb.mxu0 %v1936_v29  ;;  %v1917_v63 = vadd.f32 1.0, %v4711_v13  ;;  %v1365_v57 = vadd.f32 1.1283791, %v1364_v49  ;;  %v1245_v43 = vmul.f32 0.5, %v9570_v17  ;;  %v1934_v15 = vmul.f32 %v1918_v56, %v1246_v42  ;;  %v9576_v19 = vld [vmem:[#allocation35_spill] sm:$0xff]  ;;  %v9578_v17 = vld [vmem:[#allocation42_spill] sm:$0xff] }
 0x411   :  { %v1379_v28 = vsub.f32 1.0, %v1378_v37  ;;  %v1336_v31 = vadd.f32 1.0, %v1335_v3  ;;  %v1294_v32 = vadd.f32 0.4994258, %v1293_v45  ;;  %v1388_v14 = vand.u32 2147483648, %v6823_v26 }
 0x412   :  { %1956 = vmatpush.msrb.mxu0 %v1935_v41  ;;  %vm1383_vm11 = vweird.f32 %v4956_v23  ;;  %v1386_v55 = vand.u32 2147483647, %v6823_v26  ;;  %v1282_v34 = vmul.f32 %v1281_v21, %v6296_v61  ;;  %v1323_v52 = vadd.f32 0.18741608, %v1322_v24 }
 0x413   :  { %v1380_v47 = vmul.f32 %v4956_v23, %v1379_v28  ;;  %4957 = vrcp.f32 %v1336_v31  ;;  %v1295_v18 = vmul.f32 %v1294_v32, %v6296_v61  ;;  %v1933_v51 = vmul.f32 %v1917_v63, %v1245_v43  ;;  %v9577_v28 = vld [vmem:[#allocation26_spill] sm:$0xff] }
 0x414   :  { %1957 = vmatpush.msrb.mxu0 %v1934_v15  ;;  %vm1382_vm12 = vweird.f32 %v6823_v26  ;;  %v1389_v22 = vor.u32 1.1754944e-38, %v1388_v14  ;;  %v1366_v27 = vmul.f32 %v1365_v57, %v9571_v6  ;;  %vm1387_vm14 = vcmp.eq.f32.partialorder %v1386_v55, 8.507059e+37  ;;  %v2076_v6 = vld [vmem:[%s9267_s9 + $0x78] sm:$0xff] }
 0x415   :  { %v1381_v4 = vadd.f32 %v4956_v23, %v1380_v47  ;;  %vm1384_vm13 = vmor %vm1382_vm12, %vm1383_vm11  ;;  %v1296_v11 = vadd.f32 1.0, %v1295_v18  ;;  %v1283_v25 = vadd.f32 0.18741608, %v1282_v34  ;;  %v1324_v1 = vmul.f32 %v1323_v52, %v6298_v54  ;;  %v9579_v18 = vld [vmem:[#allocation44_spill] sm:$0xff]  ;;  %2081 = vmatpush.msrb.mxu2 %v2076_v6 }
 0x416   :  { %1958 = vmatpush.msrb.mxu0 %v1933_v51  ;;  %v1974_v46 = vpop.xlane.xlu2 %1973  ;;  %v1244_v44 = vmul.f32 0.5, %v9573_v16  ;;  %v1348_v12 = vand.u32 2147483648, %v1336_v31  ;;  %v1346_v54 = vand.u32 2147483647, %v1336_v31  ;;  %vm1342_vm1 = vweird.f32 %v1336_v31 }
 0x417   :  { %v1385_v0 = vsel %vm1384_vm13, %v4956_v23, %v1381_v4  ;;  %4959 = vrcp.f32 %v1296_v11  ;;  %v1981_v26 = vmul.f32 %v1974_v46, %v9572_v33  ;;  %v1284_v20 = vmul.f32 %v1283_v25, %v6296_v61 }
 0x418   :  { %v1390_v40 = vsel %vm1387_vm14, %v1389_v22, %v1385_v0  ;;  %v1325_v48 = vadd.f32 1.1283791, %v1324_v1  ;;  %v1349_v23 = vor.u32 1.1754944e-38, %v1348_v12  ;;  %vm1347_vm15 = vcmp.eq.f32.partialorder %v1346_v54, 8.507059e+37  ;;  %v5072_v22 = vld [vmem:[%s9265_s7] sm:$0xff] }
 0x419   :  { %v4958_v39 = vpop.eup %4957  ;;  %v1391_v53 = vmul.f32 %v1390_v40, %v1366_v27  ;;  %v6856_v35 = vsub.f32 %v9574_v30, %v1981_v26  ;;  %v1285_v61 = vadd.f32 1.1283791, %v1284_v20  ;;  %v1306_v62 = vand.u32 2147483647, %v1296_v11  ;;  %v2075_v27 = vld [vmem:[%s9267_s9 + $0x70] sm:$0xff]  ;;  %v2074_v40 = vld [vmem:[%s9267_s9 + $0x68] sm:$0xff] }
 0x41a   :  { %v1338_v5 = vmul.f32 %v4958_v39, %v1336_v31  ;;  %vm1343_vm0 = vweird.f32 %v4958_v39  ;;  %v1326_v58 = vmul.f32 %v1325_v48, %v9575_v7  ;;  %v1308_v56 = vand.u32 2147483648, %v1296_v11  ;;  %2082 = vmatpush.msrb.mxu2 %v2075_v27  ;;  %v2071_v26 = vld [vmem:[%s9267_s9 + $0x50] sm:$0xff]  ;;  %v2070_v20 = vld [vmem:[%s9267_s9 + $0x48] sm:$0xff] }
 0x41b   :  { %v4710_v10 = vclamps-f32 %v1391_v53, 1.0  ;;  %v1989_v36 = vmul.f32 %v6856_v35, %v6856_v35  ;;  %vm1344_vm2 = vmor %vm1342_vm1, %vm1343_vm0  ;;  %vm1302_vm5 = vweird.f32 %v1296_v11  ;;  %v1286_v31 = vmul.f32 %v1285_v61, %v9577_v28 }
 0x41c   :  { %v1339_v8 = vsub.f32 1.0, %v1338_v5  ;;  %v1309_v63 = vor.u32 1.1754944e-38, %v1308_v56  ;;  %vm1307_vm9 = vcmp.eq.f32.partialorder %v1306_v62, 8.507059e+37  ;;  %v1243_v43 = vmul.f32 0.5, %v9578_v17  ;;  %v2073_v5 = vld [vmem:[%s9267_s9 + $0x60] sm:$0xff]  ;;  %2083 = vmatpush.msrb.mxu2 %v2074_v40 }
 0x41d   :  { %v1916_v50 = vadd.f32 1.0, %v4710_v10  ;;  %v4960_v38 = vpop.eup %4959  ;;  %1993 = vadd.xlane.f32.xlu1 %v1989_v36  ;;  %v1242_v52 = vmul.f32 0.5, %v9579_v18  ;;  %v2072_v10 = vld [vmem:[%s9267_s9 + $0x58] sm:$0xff] }
 0x41e   :  { %v1340_v9 = vmul.f32 %v4958_v39, %v1339_v8  ;;  %v1298_v59 = vmul.f32 %v4960_v38, %v1296_v11  ;;  %v1976_v29 = vpop.xlane.xlu2 %1975  ;;  %vm1303_vm4 = vweird.f32 %v4960_v38  ;;  %v5073_v11 = vld [vmem:[%s9265_s7 + $0x8] sm:$0xff]  ;;  %2084 = vmatpush.msrb.mxu2 %v2073_v5  ;;  %v2069_v8 = vld [vmem:[%s9267_s9 + $0x40] sm:$0xff] }
 0x41f   :  { %v1932_v2 = vmul.f32 %v1916_v50, %v1244_v44  ;;  %v1982_v45 = vmul.f32 %v1976_v29, %v9572_v33  ;;  %vm1304_vm7 = vmor %vm1302_vm5, %vm1303_vm4  ;;  %v2064_v29 = vld [vmem:[%s9267_s9 + $0x18] sm:$0xff] }
 0x420   :  { %v1341_v13 = vadd.f32 %v4958_v39, %v1340_v9  ;;  %v1299_v49 = vsub.f32 1.0, %v1298_v59  ;;  %2085 = vmatpush.msrb.mxu2 %v2072_v10 }
 0x421   :  { %1959 = vmatpush.msrb.mxu0 %v1932_v2  ;;  %v6863_v42 = vsub.f32 %v9576_v19, %v1982_v45  ;;  %v2067_v2 = vld [vmem:[%s9267_s9 + $0x30] sm:$0xff]  ;;  %v6928_v45 = vld [vmem:[%s9261_s3] ss:$0 sm:$0xff] }
 0x422   :  { %v1345_v60 = vsel %vm1344_vm2, %v4958_v39, %v1341_v13  ;;  %v1300_v3 = vmul.f32 %v4960_v38, %v1299_v49  ;;  %2086 = vmatpush.msrb.mxu2 %v2071_v26  ;;  %v2066_v13 = vld [vmem:[%s9267_s9 + $0x28] sm:$0xff]  ;;  %v9580_v49 = vld [vmem:[#allocation28_spill] sm:$0xff] }
 0x423   :  { %v1350_v37 = vsel %vm1347_vm15, %v1349_v23, %v1345_v60  ;;  %v1990_v57 = vmul.f32 %v6863_v42, %v6863_v42 }
 0x424   :  { %v1351_v21 = vmul.f32 %v1350_v37, %v1326_v58  ;;  %v1301_v24 = vadd.f32 %v4960_v38, %v1300_v3  ;;  %2087 = vmatpush.msrb.mxu2 %v2070_v20  ;;  %v2065_v58 = vld [vmem:[%s9267_s9 + $0x20] sm:$0xff]  ;;  %v2063_v3 = vld [vmem:[%s9267_s9 + $0x10] sm:$0xff] }
 0x425   :  { %1995 = vadd.xlane.f32.xlu0 %v1990_v57  ;;  %v9581_v57 = vld [vmem:[#allocation29_spill] sm:$0xff] }
 0x426   :  { %v4709_v41 = vclamps-f32 %v1351_v21, 1.0  ;;  %v1305_v32 = vsel %vm1304_vm7, %v4960_v38, %v1301_v24  ;;  %v2068_v38 = vld [vmem:[%s9267_s9 + $0x38] sm:$0xff]  ;;  %2088 = vmatpush.msrb.mxu2 %v2069_v8  ;;  %v2300_v8 = vld [vmem:[%s9269_s11 + $0x70] sm:$0xff] }
 0x427   :  { %v1310_v14 = vsel %vm1307_vm9, %v1309_v63, %v1305_v32  ;;  %v6940_v63 = vld [vmem:[%s9262_s4] ss:$0 sm:$0xff] }
 0x428   :  { %v1915_v15 = vadd.f32 1.0, %v4709_v41  ;;  %v1311_v47 = vmul.f32 %v1310_v14, %v1286_v31  ;;  %2089 = vmatpush.msrb.mxu2 %v2068_v38  ;;  %v2061_v41 = vld [vmem:[%s9267_s9] sm:$0xff] }
 0x42a   :  { %v1931_v55 = vmul.f32 %v1915_v15, %v1243_v43  ;;  %v4708_v34 = vclamps-f32 %v1311_v47, 1.0  ;;  %2090 = vmatpush.msrb.mxu2 %v2067_v2  ;;  %v2297_v2 = vld [vmem:[%s9269_s11 + $0x58] sm:$0xff] }
 0x42c   :  { %1960 = vmatpush.msrb.mxu0 %v1931_v55  ;;  %v1914_v51 = vadd.f32 1.0, %v4708_v34  ;;  %2091 = vmatpush.msrb.mxu2 %v2066_v13  ;;  %v2296_v13 = vld [vmem:[%s9269_s11 + $0x50] sm:$0xff] }
 0x42e   :  { %v1930_v4 = vmul.f32 %v1914_v51, %v1242_v52  ;;  %2092 = vmatpush.msrb.mxu2 %v2065_v58  ;;  %v2294_v58 = vld [vmem:[%s9269_s11 + $0x40] sm:$0xff] }
 0x430   :  { %1961 = vmatpush.msrb.mxu0 %v1930_v4  ;;  %2093 = vmatpush.msrb.mxu2 %v2064_v29  ;;  %v6965_v4 = vld [vmem:[%s9268_s10] ss:$0 sm:$0xff]  ;;  %v2292_v29 = vld [vmem:[%s9269_s11 + $0x30] sm:$0xff] }
 0x431   :  { %1962 = vmatmul.f32.vlgmr.msrb.gmra.mxu0 %v5072_v22 }
 0x432   :  { %2094 = vmatpush.msrb.mxu2 %v2063_v3  ;;  %v2291_v3 = vld [vmem:[%s9269_s11 + $0x28] sm:$0xff] }
 0x439   :  { %1965 = vmatmul.f32.gmra.mxu0 %v5073_v11 }
 0x490   :  { %v1994_v0 = vpop.xlane.xlu1 %1993 }
 0x491   :  { %v2001_v25 = vmul.f32 %v1994_v0, %v9572_v33 }
 0x493   :  { %v2005_v1 = vadd.f32 1e-05, %v2001_v25 }
 0x495   :  { %4961 = vrsqrt.f32 %v2005_v1  ;;  %vm2015_vm6 = vweird.f32 %v2005_v1 }
 0x498   :  { %v1996_v39 = vpop.xlane.xlu0 %1995 }
 0x499   :  { %v2002_v53 = vmul.f32 %v1996_v39, %v9572_v33 }
 0x49b   :  { %v2006_v46 = vadd.f32 1e-05, %v2002_v53  ;;  %v4962_v16 = vpop.eup %4961 }
 0x49c   :  { %v2010_v44 = vmul.f32 %v4962_v16, %v2005_v1  ;;  %vm2016_vm3 = vweird.f32 %v4962_v16 }
 0x49d   :  { %4963 = vrsqrt.f32 %v2006_v46  ;;  %vm2017_vm10 = vmor %vm2015_vm6, %vm2016_vm3  ;;  %vm2025_vm12 = vweird.f32 %v2006_v46 }
 0x49e   :  { %v2011_v50 = vmul.f32 %v4962_v16, %v2010_v44  ;;  %v2301_v44 = vld [vmem:[%s9269_s11 + $0x78] sm:$0xff] }
 0x49f   :  { %2306 = vmatpush.msra.mxu0 %v2301_v44 }
 0x4a0   :  { %v2012_v9 = vmul.f32 0.5, %v2011_v50  ;;  %v2299_v50 = vld [vmem:[%s9269_s11 + $0x68] sm:$0xff] }
 0x4a1   :  { %2307 = vmatpush.msra.mxu0 %v2300_v8 }
 0x4a2   :  { %v2013_v59 = vsub.f32 1.5, %v2012_v9  ;;  %v2298_v9 = vld [vmem:[%s9269_s11 + $0x60] sm:$0xff] }
 0x4a3   :  { %v4964_v48 = vpop.eup %4963  ;;  %2308 = vmatpush.msra.mxu0 %v2299_v50 }
 0x4a4   :  { %v2020_v12 = vmul.f32 %v4964_v48, %v2006_v46  ;;  %v2014_v61 = vmul.f32 %v4962_v16, %v2013_v59  ;;  %vm2026_vm11 = vweird.f32 %v4964_v48 }
 0x4a5   :  { %vm2027_vm13 = vmor %vm2025_vm12, %vm2026_vm11  ;;  %2309 = vmatpush.msra.mxu0 %v2298_v9 }
 0x4a6   :  { %v2021_v54 = vmul.f32 %v4964_v48, %v2020_v12  ;;  %v2018_v62 = vsel %vm2017_vm10, %v4962_v16, %v2014_v61  ;;  %v2295_v61 = vld [vmem:[%s9269_s11 + $0x48] sm:$0xff] }
 0x4a7   :  { %v2049_v37 = vmul.f32 %v2018_v62, %v6856_v35  ;;  %v2062_v35 = vld [vmem:[%s9267_s9 + $0x8] sm:$0xff]  ;;  %2310 = vmatpush.msra.mxu0 %v2297_v2 }
 0x4a8   :  { %v2022_v36 = vmul.f32 0.5, %v2021_v54  ;;  %2095 = vmatpush.msrb.mxu2 %v2062_v35 }
 0x4a9   :  { %v2053_v21 = vmul.f32 %v6928_v45, %v2049_v37  ;;  %2311 = vmatpush.msra.mxu0 %v2296_v13 }
 0x4aa   :  { %v2023_v7 = vsub.f32 1.5, %v2022_v36  ;;  %2096 = vmatpush.msrb.mxu2 %v2061_v41 }
 0x4ab   :  { %v2057_v28 = vadd.f32 %v6940_v63, %v2053_v21  ;;  %2312 = vmatpush.msra.mxu0 %v2295_v61 }
 0x4ac   :  { %v2024_v56 = vmul.f32 %v4964_v48, %v2023_v7 }
 0x4ad   :  { %2097 = vmatmul.f32.vlgmr.msrb.gmra.mxu2 %v2057_v28  ;;  %2313 = vmatpush.msra.mxu0 %v2294_v58  ;;  %v2290_v28 = vld [vmem:[%s9269_s11 + $0x20] sm:$0xff] }
 0x4ae   :  { %v1963_v23 = vpop.f32.mrf.mxu0  ;;  %v2028_v24 = vsel %vm2027_vm13, %v4964_v48, %v2024_v56 }
 0x4af   :  { %v6915_v60 = vadd.f32 %v1963_v23, %v9580_v49  ;;  %v2050_v31 = vmul.f32 %v2028_v24, %v6863_v42  ;;  %v2293_v23 = vld [vmem:[%s9269_s11 + $0x38] sm:$0xff] }
 0x4b0   :  { %2314 = vmatpush.msra.mxu0 %v2293_v23 }
 0x4b1   :  { %1977 = vadd.xlane.f32.xlu2 %v6915_v60  ;;  %v2054_v43 = vmul.f32 %v6928_v45, %v2050_v31 }
 0x4b2   :  { %2315 = vmatpush.msra.mxu0 %v2292_v29 }
 0x4b3   :  { %v2058_v15 = vadd.f32 %v6940_v63, %v2054_v43 }
 0x4b4   :  { %2316 = vmatpush.msra.mxu0 %v2291_v3 }
 0x4b5   :  { %2100 = vmatmul.f32.gmra.mxu2 %v2058_v15 }
 0x4b6   :  { %v1966_v32 = vpop.f32.mrf.mxu0  ;;  %2317 = vmatpush.msra.mxu0 %v2290_v28 }
 0x4b7   :  { %v6945_v17 = vadd.f32 %v1966_v32, %v9581_v57  ;;  %v2289_v32 = vld [vmem:[%s9269_s11 + $0x18] sm:$0xff] }
 0x4b8   :  { %2318 = vmatpush.msra.mxu0 %v2289_v32 }
 0x4b9   :  { %1979 = vadd.xlane.f32.xlu2 %v6945_v17 }
 0x524   :  { %v1978_v14 = vpop.xlane.xlu2 %1977 }
 0x525   :  { %v1983_v47 = vmul.f32 %v1978_v14, %v9572_v33  ;;  %v2288_v14 = vld [vmem:[%s9269_s11 + $0x10] sm:$0xff] }
 0x526   :  { %2319 = vmatpush.msra.mxu0 %v2288_v14 }
 0x527   :  { %v6952_v55 = vsub.f32 %v6915_v60, %v1983_v47 }
 0x529   :  { %v1991_v42 = vmul.f32 %v6952_v55, %v6952_v55 }
 0x52b   :  { %1997 = vadd.xlane.f32.xlu2 %v1991_v42 }
 0x52c   :  { %v1980_v34 = vpop.xlane.xlu2 %1979 }
 0x52d   :  { %v1984_v18 = vmul.f32 %v1980_v34, %v9572_v33  ;;  %v2287_v34 = vld [vmem:[%s9269_s11 + $0x8] sm:$0xff] }
 0x52e   :  { %2320 = vmatpush.msra.mxu0 %v2287_v34 }
 0x52f   :  { %v6958_v52 = vsub.f32 %v6945_v17, %v1984_v18 }
 0x530   :  { %v2098_v22 = vpop.f32.mrf.mxu2 }
 0x531   :  { %v1992_v51 = vmul.f32 %v6958_v52, %v6958_v52  ;;  %v6968_v11 = vadd.f32 %v6965_v4, %v2098_v22 }
 0x533   :  { %1999 = vadd.xlane.f32.xlu2 %v1992_v51  ;;  %v2114_v6 = vmul.f32 0.70710677, %v6968_v11  ;;  %v2286_v51 = vld [vmem:[%s9269_s11] sm:$0xff]  ;;  %v2110_v22 = vmul.f32 0.5, %v6968_v11 }
 0x534   :  { %2321 = vmatpush.msra.mxu0 %v2286_v51 }
 0x535   :  { %v2118_v27 = vmul.f32 %v2114_v6, %v2114_v6 }
 0x537   :  { %v2119_v0 = vmin.f32 %v2118_v27, 16.0 }
 0x539   :  { %v2120_v25 = vmul.f32 2.1237322e-06, %v2119_v0  ;;  %v2131_v40 = vmul.f32 3.8918573e-05, %v2119_v0 }
 0x53b   :  { %v2121_v39 = vadd.f32 0.00028619796, %v2120_v25  ;;  %v2132_v1 = vadd.f32 0.001143296, %v2131_v40 }
 0x53d   :  { %v2122_v53 = vmul.f32 %v2121_v39, %v2119_v0  ;;  %v2133_v5 = vmul.f32 %v2132_v1, %v2119_v0 }
 0x53f   :  { %v2134_v46 = vadd.f32 0.014752088, %v2133_v5  ;;  %v2123_v10 = vadd.f32 0.0036580483, %v2122_v53 }
 0x541   :  { %v2135_v26 = vmul.f32 %v2134_v46, %v2119_v0  ;;  %v2124_v16 = vmul.f32 %v2123_v10, %v2119_v0 }
 0x543   :  { %v2136_v20 = vadd.f32 0.112945676, %v2135_v26  ;;  %v2125_v38 = vadd.f32 0.05243302, %v2124_v16 }
 0x545   :  { %v2137_v48 = vmul.f32 %v2136_v20, %v2119_v0  ;;  %v2126_v36 = vmul.f32 %v2125_v38, %v2119_v0 }
 0x547   :  { %v2138_v12 = vadd.f32 0.4994258, %v2137_v48  ;;  %v2127_v7 = vadd.f32 0.18741608, %v2126_v36 }
 0x549   :  { %v2139_v54 = vmul.f32 %v2138_v12, %v2119_v0  ;;  %v2128_v62 = vmul.f32 %v2127_v7, %v2119_v0  ;;  %v2101_v0 = vpop.f32.mrf.mxu2 }
 0x54a   :  { %v7021_v25 = vadd.f32 %v6965_v4, %v2101_v0 }
 0x54b   :  { %v2140_v59 = vadd.f32 1.0, %v2139_v54  ;;  %v2129_v24 = vadd.f32 1.1283791, %v2128_v62 }
 0x54c   :  { %v7024_v40 = vmul.f32 0.70710677, %v7021_v25 }
 0x54d   :  { %4965 = vrcp.f32 %v2140_v59  ;;  %v2152_v21 = vand.u32 2147483648, %v2140_v59  ;;  %v2150_v41 = vand.u32 2147483647, %v2140_v59  ;;  %vm2146_vm0 = vweird.f32 %v2140_v59 }
 0x54e   :  { %v2130_v43 = vmul.f32 %v2129_v24, %v2114_v6  ;;  %v2158_v39 = vmul.f32 %v7024_v40, %v7024_v40 }
 0x54f   :  { %v2153_v57 = vor.u32 1.1754944e-38, %v2152_v21  ;;  %vm2151_vm2 = vcmp.eq.f32.partialorder %v2150_v41, 8.507059e+37 }
 0x550   :  { %v2159_v1 = vmin.f32 %v2158_v39, 16.0 }
 0x552   :  { %v2160_v53 = vmul.f32 2.1237322e-06, %v2159_v1  ;;  %v2171_v46 = vmul.f32 3.8918573e-05, %v2159_v1 }
 0x553   :  { %v4966_v49 = vpop.eup %4965 }
 0x554   :  { %v2142_v56 = vmul.f32 %v4966_v49, %v2140_v59  ;;  %vm2147_vm14 = vweird.f32 %v4966_v49  ;;  %v2161_v5 = vadd.f32 0.00028619796, %v2160_v53  ;;  %v2172_v11 = vadd.f32 0.001143296, %v2171_v46 }
 0x555   :  { %vm2148_vm1 = vmor %vm2146_vm0, %vm2147_vm14 }
 0x556   :  { %v2143_v37 = vsub.f32 1.0, %v2142_v56  ;;  %v2162_v10 = vmul.f32 %v2161_v5, %v2159_v1  ;;  %v2173_v20 = vmul.f32 %v2172_v11, %v2159_v1 }
 0x558   :  { %v2144_v35 = vmul.f32 %v4966_v49, %v2143_v37  ;;  %v2163_v44 = vadd.f32 0.0036580483, %v2162_v10  ;;  %v2174_v8 = vadd.f32 0.014752088, %v2173_v20  ;;  %v2111_v20 = vmul.f32 0.5, %v7021_v25  ;;  %v4757_v25 = vld [vmem:[%s9264_s6 + $0xd8] sm:$0xff] }
 0x55a   :  { %v2145_v31 = vadd.f32 %v4966_v49, %v2144_v35  ;;  %v2175_v50 = vmul.f32 %v2174_v8, %v2159_v1  ;;  %v2164_v12 = vmul.f32 %v2163_v44, %v2159_v1 }
 0x55c   :  { %v2149_v15 = vsel %vm2148_vm1, %v4966_v49, %v2145_v31  ;;  %v2176_v38 = vadd.f32 0.112945676, %v2175_v50  ;;  %v2165_v59 = vadd.f32 0.05243302, %v2164_v12 }
 0x55d   :  { %v2154_v47 = vsel %vm2151_vm2, %v2153_v57, %v2149_v15 }
 0x55e   :  { %v2155_v42 = vmul.f32 %v2154_v47, %v2130_v43  ;;  %v2177_v54 = vmul.f32 %v2176_v38, %v2159_v1  ;;  %v2166_v23 = vmul.f32 %v2165_v59, %v2159_v1  ;;  %v9584_v59 = vld [vmem:[#allocation5_spill] sm:$0xff] }
 0x560   :  { %v4724_v18 = vclamps-f32 %v2155_v42, 1.0  ;;  %v2178_v36 = vadd.f32 0.4994258, %v2177_v54  ;;  %v2167_v29 = vadd.f32 0.18741608, %v2166_v23  ;;  %v4754_v54 = vld [vmem:[%s9264_s6 + $0xc0] sm:$0xff] }
 0x562   :  { %v2278_v6 = vadd.f32 1.0, %v4724_v18  ;;  %v2179_v58 = vmul.f32 %v2178_v36, %v2159_v1  ;;  %v2168_v41 = vmul.f32 %v2167_v29, %v2159_v1  ;;  %v1970_v36 = vadd.f32 %v9576_v19, %v9584_v59  ;;  %v4751_v19 = vld [vmem:[%s9264_s6 + $0xa8] sm:$0xff] }
 0x564   :  { %v2282_v27 = vmul.f32 %v2278_v6, %v2110_v22  ;;  %v2180_v62 = vadd.f32 1.0, %v2179_v58  ;;  %v2169_v47 = vadd.f32 1.1283791, %v2168_v41 }
 0x566   :  { %2322 = vmatmul.f32.vlgmr.msra.gmra.mxu0 %v2282_v27  ;;  %v2192_v34 = vand.u32 2147483648, %v2180_v62  ;;  %v2190_v51 = vand.u32 2147483647, %v2180_v62  ;;  %vm2186_vm10 = vweird.f32 %v2180_v62  ;;  %v2170_v39 = vmul.f32 %v2169_v47, %v7024_v40  ;;  %v7041_v40 = vld [vmem:[%s9270_s12] ss:$0 sm:$0xff] }
 0x568   :  { %vm2191_vm12 = vcmp.eq.f32.partialorder %v2190_v51, 8.507059e+37 }
 0x59e   :  { %v1998_v26 = vpop.xlane.xlu2 %1997 }
 0x59f   :  { %v2003_v16 = vmul.f32 %v1998_v26, %v9572_v33 }
 0x5a1   :  { %v2007_v48 = vadd.f32 1e-05, %v2003_v16 }
 0x5a3   :  { %4967 = vrsqrt.f32 %v2007_v48  ;;  %vm2035_vm4 = vweird.f32 %v2007_v48 }
 0x5a6   :  { %v2000_v9 = vpop.xlane.xlu2 %1999 }
 0x5a7   :  { %v2004_v2 = vmul.f32 %v2000_v9, %v9572_v33 }
 0x5a9   :  { %v4968_v13 = vpop.eup %4967  ;;  %v2008_v61 = vadd.f32 1e-05, %v2004_v2 }
 0x5aa   :  { %v2030_v7 = vmul.f32 %v4968_v13, %v2007_v48  ;;  %vm2036_vm15 = vweird.f32 %v4968_v13 }
 0x5ab   :  { %4969 = vrsqrt.f32 %v2008_v61  ;;  %vm2037_vm5 = vmor %vm2035_vm4, %vm2036_vm15  ;;  %vm2045_vm3 = vweird.f32 %v2008_v61 }
 0x5ac   :  { %v2031_v49 = vmul.f32 %v4968_v13, %v2030_v7  ;;  %4971 = vrcp.f32 %v2180_v62 }
 0x5ae   :  { %v2032_v56 = vmul.f32 0.5, %v2031_v49 }
 0x5b0   :  { %v2033_v37 = vsub.f32 1.5, %v2032_v56 }
 0x5b1   :  { %v4970_v3 = vpop.eup %4969 }
 0x5b2   :  { %v2034_v21 = vmul.f32 %v4968_v13, %v2033_v37  ;;  %v2040_v24 = vmul.f32 %v4970_v3, %v2008_v61  ;;  %v4972_v35 = vpop.eup %4971  ;;  %vm2046_vm7 = vweird.f32 %v4970_v3 }
 0x5b3   :  { %v2182_v32 = vmul.f32 %v4972_v35, %v2180_v62  ;;  %vm2187_vm9 = vweird.f32 %v4972_v35  ;;  %vm2047_vm6 = vmor %vm2045_vm3, %vm2046_vm7 }
 0x5b4   :  { %v2041_v28 = vmul.f32 %v4970_v3, %v2040_v24  ;;  %v2038_v31 = vsel %vm2037_vm5, %v4968_v13, %v2034_v21  ;;  %vm2188_vm11 = vmor %vm2186_vm10, %vm2187_vm9 }
 0x5b5   :  { %v2051_v57 = vmul.f32 %v2038_v31, %v6952_v55  ;;  %v2183_v15 = vsub.f32 1.0, %v2182_v32  ;;  %v2193_v55 = vor.u32 1.1754944e-38, %v2192_v34 }
 0x5b6   :  { %v2042_v43 = vmul.f32 0.5, %v2041_v28 }
 0x5b7   :  { %v2055_v14 = vmul.f32 %v6928_v45, %v2051_v57  ;;  %v2184_v18 = vmul.f32 %v4972_v35, %v2183_v15 }
 0x5b8   :  { %v2043_v42 = vsub.f32 1.5, %v2042_v43 }
 0x5b9   :  { %v2059_v22 = vadd.f32 %v6940_v63, %v2055_v14  ;;  %v2185_v27 = vadd.f32 %v4972_v35, %v2184_v18 }
 0x5ba   :  { %v2044_v6 = vmul.f32 %v4970_v3, %v2043_v42 }
 0x5bb   :  { %2103 = vmatmul.f32.gmra.mxu2 %v2059_v22  ;;  %v2189_v1 = vsel %vm2188_vm11, %v4972_v35, %v2185_v27 }
 0x5bc   :  { %v2048_v0 = vsel %vm2047_vm6, %v4970_v3, %v2044_v6  ;;  %v2194_v5 = vsel %vm2191_vm12, %v2193_v55, %v2189_v1 }
 0x5bd   :  { %v2052_v53 = vmul.f32 %v2048_v0, %v6958_v52  ;;  %v2195_v46 = vmul.f32 %v2194_v5, %v2170_v39  ;;  %v9582_v52 = vld [vmem:[#allocation6_spill] sm:$0xff] }
 0x5be   :  { %v1969_v48 = vadd.f32 %v9574_v30, %v9582_v52 }
 0x5bf   :  { %v2056_v10 = vmul.f32 %v6928_v45, %v2052_v53  ;;  %v4725_v11 = vclamps-f32 %v2195_v46, 1.0 }
 0x5c1   :  { %v2060_v26 = vadd.f32 %v6940_v63, %v2056_v10  ;;  %v2279_v16 = vadd.f32 1.0, %v4725_v11  ;;  %v4761_v63 = vld [vmem:[%s9264_s6 + $0xf8] sm:$0xff] }
 0x5c3   :  { %2106 = vmatmul.f32.gmra.mxu2 %v2060_v26  ;;  %v2283_v44 = vmul.f32 %v2279_v16, %v2111_v20 }
 0x5c5   :  { %2325 = vmatmul.f32.gmra.mxu0 %v2283_v44 }
 0x5e3   :  { %v2323_v8 = vpop.f32.mrf.mxu0 }
 0x5e4   :  { %v2324_v45 = vadd.f32 %v7041_v40, %v2323_v8 }
 0x5e6   :  { %v7046_v50 = vadd.f32 %v2324_v45, %v1969_v48 }
 0x5e8   :  { %9583 = vst [vmem:[#allocation34_spill] sm:$0xff] %v7046_v50  ;;  %2343 = vadd.xlane.f32.xlu1 %v7046_v50 }
 0x601   :  { %2554 = vperm.xlu1 %4876, %v4761_v63  }
 0x609   :  { %2534 = vperm.xlu1 %4876, %v4757_v25  }
 0x611   :  { %2519 = vperm.xlu1 %4876, %v4754_v54  }
 0x619   :  { %2504 = vperm.xlu1 %4876, %v4751_v19  }
 0x63e   :  { %v2104_v12 = vpop.f32.mrf.mxu2 }
 0x63f   :  { %v7056_v38 = vadd.f32 %v6965_v4, %v2104_v12 }
 0x641   :  { %v7059_v30 = vmul.f32 0.70710677, %v7056_v38 }
 0x642   :  { %v2326_v2 = vpop.f32.mrf.mxu0 }
 0x643   :  { %v2198_v9 = vmul.f32 %v7059_v30, %v7059_v30  ;;  %v2327_v13 = vadd.f32 %v7041_v40, %v2326_v2 }
 0x645   :  { %v2199_v61 = vmin.f32 %v2198_v9, 16.0  ;;  %v7069_v58 = vadd.f32 %v2327_v13, %v1970_v36 }
 0x646   :  { %v2107_v7 = vpop.f32.mrf.mxu2 }
 0x647   :  { %9585 = vst [vmem:[#allocation11_spill] sm:$0xff] %v7069_v58  ;;  %v2200_v23 = vmul.f32 2.1237322e-06, %v2199_v61  ;;  %v7072_v49 = vadd.f32 %v6965_v4, %v2107_v7  ;;  %v2211_v62 = vmul.f32 3.8918573e-05, %v2199_v61  ;;  %2345 = vadd.xlane.f32.xlu2 %v7069_v58 }
 0x649   :  { %v2201_v56 = vadd.f32 0.00028619796, %v2200_v23  ;;  %v7076_v29 = vmul.f32 0.70710677, %v7072_v49  ;;  %v2212_v37 = vadd.f32 0.001143296, %v2211_v62 }
 0x64b   :  { %v2202_v3 = vmul.f32 %v2201_v56, %v2199_v61  ;;  %v2238_v21 = vmul.f32 %v7076_v29, %v7076_v29  ;;  %v2213_v24 = vmul.f32 %v2212_v37, %v2199_v61 }
 0x64d   :  { %v2239_v4 = vmin.f32 %v2238_v21, 16.0  ;;  %v2203_v35 = vadd.f32 0.0036580483, %v2202_v3  ;;  %v2214_v41 = vadd.f32 0.014752088, %v2213_v24  ;;  %v2112_v24 = vmul.f32 0.5, %v7056_v38 }
 0x64f   :  { %v2240_v28 = vmul.f32 2.1237322e-06, %v2239_v4  ;;  %v2215_v31 = vmul.f32 %v2214_v41, %v2199_v61  ;;  %v2204_v32 = vmul.f32 %v2203_v35, %v2199_v61  ;;  %v2251_v14 = vmul.f32 3.8918573e-05, %v2239_v4 }
 0x651   :  { %v2216_v57 = vadd.f32 0.112945676, %v2215_v31  ;;  %v2241_v43 = vadd.f32 0.00028619796, %v2240_v28  ;;  %v2205_v47 = vadd.f32 0.05243302, %v2204_v32 }
 0x652   :  { %v2252_v34 = vadd.f32 0.001143296, %v2251_v14 }
 0x653   :  { %v2217_v15 = vmul.f32 %v2216_v57, %v2199_v61  ;;  %v2242_v18 = vmul.f32 %v2241_v43, %v2239_v4  ;;  %v2206_v6 = vmul.f32 %v2205_v47, %v2199_v61 }
 0x654   :  { %v2253_v22 = vmul.f32 %v2252_v34, %v2239_v4  ;;  %v2113_v34 = vmul.f32 0.5, %v7072_v49  ;;  %v4753_v49 = vld [vmem:[%s9264_s6 + $0xb8] sm:$0xff] }
 0x655   :  { %v2218_v42 = vadd.f32 0.4994258, %v2217_v15  ;;  %v2243_v0 = vadd.f32 0.0036580483, %v2242_v18  ;;  %v2207_v1 = vadd.f32 0.18741608, %v2206_v6 }
 0x656   :  { %v2254_v55 = vadd.f32 0.014752088, %v2253_v22  ;;  %v4759_v22 = vld [vmem:[%s9264_s6 + $0xe8] sm:$0xff]  ;;  %v4756_v6 = vld [vmem:[%s9264_s6 + $0xd0] sm:$0xff] }
 0x657   :  { %v2219_v51 = vmul.f32 %v2218_v42, %v2199_v61  ;;  %v2244_v5 = vmul.f32 %v2243_v0, %v2239_v4  ;;  %v2208_v11 = vmul.f32 %v2207_v1, %v2199_v61  ;;  %v4758_v1 = vld [vmem:[%s9264_s6 + $0xe0] sm:$0xff] }
 0x658   :  { %v2255_v39 = vmul.f32 %v2254_v55, %v2239_v4 }
 0x659   :  { %v2220_v27 = vadd.f32 1.0, %v2219_v51  ;;  %v2245_v16 = vadd.f32 0.05243302, %v2244_v5  ;;  %v2209_v52 = vadd.f32 1.1283791, %v2208_v11  ;;  %v4752_v5 = vld [vmem:[%s9264_s6 + $0xb0] sm:$0xff] }
 0x65a   :  { %v2256_v53 = vadd.f32 0.112945676, %v2255_v39  ;;  %v4760_v39 = vld [vmem:[%s9264_s6 + $0xf0] sm:$0xff] }
 0x65b   :  { %4973 = vrcp.f32 %v2220_v27  ;;  %v2232_v48 = vand.u32 2147483648, %v2220_v27  ;;  %v2230_v63 = vand.u32 2147483647, %v2220_v27  ;;  %v2344_v12 = vpop.xlane.xlu1 %2343  ;;  %v2246_v9 = vmul.f32 %v2245_v16, %v2239_v4 }
 0x65c   :  { %v2257_v46 = vmul.f32 %v2256_v53, %v2239_v4  ;;  %v2351_v54 = vmul.f32 %v2344_v12, %v9572_v33  ;;  %vm2226_vm14 = vweird.f32 %v2220_v27  ;;  %v2210_v13 = vmul.f32 %v2209_v52, %v7059_v30  ;;  %v4755_v53 = vld [vmem:[%s9264_s6 + $0xc8] sm:$0xff]  ;;  %v9588_v52 = vld [vmem:[#allocation8_spill] sm:$0xff]  ;;  %v4764_v12 = vld [vmem:[%s9266_s8 + $0x10] sm:$0xff] }
 0x65d   :  { %v2233_v59 = vor.u32 1.1754944e-38, %v2232_v48  ;;  %vm2231_vm1 = vcmp.eq.f32.partialorder %v2230_v63, 8.507059e+37  ;;  %v2247_v7 = vadd.f32 0.18741608, %v2246_v9  ;;  %v4748_v63 = vld [vmem:[%s9264_s6 + $0x90] sm:$0xff] }
 0x65e   :  { %v2258_v20 = vadd.f32 0.4994258, %v2257_v46  ;;  %v7085_v36 = vsub.f32 %v7046_v50, %v2351_v54 }
 0x65f   :  { %v2248_v3 = vmul.f32 %v2247_v7, %v2239_v4 }
 0x660   :  { %v2259_v8 = vmul.f32 %v2258_v20, %v2239_v4  ;;  %v2359_v62 = vmul.f32 %v7085_v36, %v7085_v36  ;;  %v4750_v20 = vld [vmem:[%s9264_s6 + $0xa0] sm:$0xff] }
 0x661   :  { %v4974_v10 = vpop.eup %4973  ;;  %v2249_v30 = vadd.f32 1.1283791, %v2248_v3 }
 0x662   :  { %v2222_v26 = vmul.f32 %v4974_v10, %v2220_v27  ;;  %vm2227_vm13 = vweird.f32 %v4974_v10  ;;  %v2260_v25 = vadd.f32 1.0, %v2259_v8  ;;  %2363 = vadd.xlane.f32.xlu2 %v2359_v62 }
 0x663   :  { %vm2228_vm0 = vmor %vm2226_vm14, %vm2227_vm13  ;;  %v2250_v14 = vmul.f32 %v2249_v30, %v7076_v29  ;;  %v7157_v30 = vld [vmem:[%s9261_s3 + $0x1] ss:$0 sm:$0xff] }
 0x664   :  { %v2223_v44 = vsub.f32 1.0, %v2222_v26  ;;  %4975 = vrcp.f32 %v2260_v25  ;;  %v2272_v31 = vand.u32 2147483648, %v2260_v25  ;;  %v2270_v57 = vand.u32 2147483647, %v2260_v25 }
 0x665   :  { %vm2266_vm15 = vweird.f32 %v2260_v25 }
 0x666   :  { %v2224_v45 = vmul.f32 %v4974_v10, %v2223_v44  ;;  %v2273_v15 = vor.u32 1.1754944e-38, %v2272_v31  ;;  %vm2271_vm5 = vcmp.eq.f32.partialorder %v2270_v57, 8.507059e+37  ;;  %v4749_v44 = vld [vmem:[%s9264_s6 + $0x98] sm:$0xff] }
 0x668   :  { %v2225_v2 = vadd.f32 %v4974_v10, %v2224_v45 }
 0x66a   :  { %v2229_v61 = vsel %vm2228_vm0, %v4974_v10, %v2225_v2  ;;  %v4976_v19 = vpop.eup %4975  ;;  %v9586_v10 = vld [vmem:[#allocation7_spill] sm:$0xff] }
 0x66b   :  { %v2234_v23 = vsel %vm2231_vm1, %v2233_v59, %v2229_v61  ;;  %v2262_v21 = vmul.f32 %v4976_v19, %v2260_v25  ;;  %vm2267_vm2 = vweird.f32 %v4976_v19  ;;  %v1971_v11 = vadd.f32 %v6915_v60, %v9586_v10  ;;  %v4747_v25 = vld [vmem:[%s9264_s6 + $0x88] sm:$0xff] }
 0x66c   :  { %v2235_v56 = vmul.f32 %v2234_v23, %v2210_v13  ;;  %vm2268_vm4 = vmor %vm2266_vm15, %vm2267_vm2  ;;  %v1972_v60 = vadd.f32 %v6945_v17, %v9588_v52  ;;  %v4746_v17 = vld [vmem:[%s9264_s6 + $0x80] sm:$0xff]  ;;  %v4765_v52 = vld [vmem:[%s9266_s8 + $0x18] sm:$0xff] }
 0x66d   :  { %v2263_v41 = vsub.f32 1.0, %v2262_v21 }
 0x66e   :  { %v4726_v37 = vclamps-f32 %v2235_v56, 1.0 }
 0x66f   :  { %v2264_v32 = vmul.f32 %v4976_v19, %v2263_v41 }
 0x670   :  { %v2280_v35 = vadd.f32 1.0, %v4726_v37 }
 0x671   :  { %v2265_v43 = vadd.f32 %v4976_v19, %v2264_v32 }
 0x672   :  { %v2284_v28 = vmul.f32 %v2280_v35, %v2112_v24 }
 0x673   :  { %v2269_v47 = vsel %vm2268_vm4, %v4976_v19, %v2265_v43  ;;  %v7152_v3 = vpop.permute.xlu1 %2554 }
 0x674   :  { %2328 = vmatmul.f32.gmra.mxu0 %v2284_v28  ;;  %v2274_v4 = vsel %vm2271_vm5, %v2273_v15, %v2269_v47  ;;  %9590 = vst [vmem:[#allocation22_spill] sm:$0xff] %v7152_v3  ;;  %v7167_v47 = vld [vmem:[%s9262_s4 + $0x1] ss:$0 sm:$0xff] }
 0x675   :  { %v2275_v42 = vmul.f32 %v2274_v4, %v2250_v14 }
 0x677   :  { %v4727_v38 = vclamps-f32 %v2275_v42, 1.0 }
 0x679   :  { %v2281_v18 = vadd.f32 1.0, %v4727_v38 }
 0x67a   :  { %2544 = vperm.xlu2 %4874, %v4759_v22  }
 0x67b   :  { %v2285_v51 = vmul.f32 %v2281_v18, %v2113_v34  ;;  %v7161_v15 = vpop.permute.xlu1 %2534 }
 0x67c   :  { %9591 = vst [vmem:[#allocation20_spill] sm:$0xff] %v7161_v15 }
 0x67d   :  { %2331 = vmatmul.f32.gmra.mxu0 %v2285_v51  ;;  %v4731_v51 = vld [vmem:[%s9263_s5 + $0x88] sm:$0xff] }
 0x682   :  { %2529 = vperm.xlu2 %4874, %v4756_v6   ;;  %v4732_v6 = vld [vmem:[%s9263_s5 + $0x90] sm:$0xff] }
 0x683   :  { %v7176_v34 = vpop.permute.xlu1 %2519 }
 0x684   :  { %9592 = vst [vmem:[#allocation25_spill] sm:$0xff] %v7176_v34 }
 0x68a   :  { %2514 = vperm.xlu2 %4874, %v4753_v49  }
 0x68b   :  { %v7184_v22 = vpop.permute.xlu1 %2504 }
 0x68c   :  { %9594 = vst [vmem:[#allocation23_spill] sm:$0xff] %v7184_v22 }
 0x6ba   :  { %v2346_v29 = vpop.xlane.xlu2 %2345 }
 0x6bb   :  { %v2352_v27 = vmul.f32 %v2346_v29, %v9572_v33 }
 0x6bd   :  { %v7101_v55 = vsub.f32 %v7069_v58, %v2352_v27 }
 0x6bf   :  { %v2360_v0 = vmul.f32 %v7101_v55, %v7101_v55 }
 0x6c1   :  { %2365 = vadd.xlane.f32.xlu0 %v2360_v0 }
 0x6d5   :  { %2549 = vperm.xlu0 %4875, %v4760_v39  }
 0x6dd   :  { %2539 = vperm.xlu0 %4875, %v4758_v1  }
 0x6e5   :  { %2524 = vperm.xlu0 %4875, %v4755_v53   ;;  %v4734_v53 = vld [vmem:[%s9263_s5 + $0xa0] sm:$0xff] }
 0x6ed   :  { %2509 = vperm.xlu0 %4875, %v4752_v5  }
 0x6f1   :  { %v2329_v46 = vpop.f32.mrf.mxu0 }
 0x6f2   :  { %v2330_v26 = vadd.f32 %v7041_v40, %v2329_v46 }
 0x6f4   :  { %v7126_v16 = vadd.f32 %v2330_v26, %v1971_v11  ;;  %v4735_v11 = vld [vmem:[%s9263_s5 + $0xa8] sm:$0xff] }
 0x6f5   :  { %2499 = vperm.xlu0 %4875, %v4750_v20   ;;  %v4736_v20 = vld [vmem:[%s9263_s5 + $0xb0] sm:$0xff] }
 0x6f6   :  { %9587 = vst [vmem:[#allocation19_spill] sm:$0xff] %v7126_v16  ;;  %2347 = vadd.xlane.f32.xlu1 %v7126_v16 }
 0x6fa   :  { %v2332_v8 = vpop.f32.mrf.mxu0 }
 0x6fb   :  { %v2333_v48 = vadd.f32 %v7041_v40, %v2332_v8  ;;  %v2364_v40 = vpop.xlane.xlu2 %2363  ;;  %v4738_v8 = vld [vmem:[%s9263_s5 + $0xc0] sm:$0xff] }
 0x6fc   :  { %v2371_v9 = vmul.f32 %v2364_v40, %v9572_v33 }
 0x6fd   :  { %2494 = vperm.xlu0 %4875, %v4749_v44   ;;  %v7135_v45 = vadd.f32 %v2333_v48, %v1972_v60  ;;  %v4737_v44 = vld [vmem:[%s9263_s5 + $0xb8] sm:$0xff]  ;;  %v4739_v60 = vld [vmem:[%s9263_s5 + $0xc8] sm:$0xff]  ;;  %v4740_v48 = vld [vmem:[%s9263_s5 + $0xd0] sm:$0xff] }
 0x6fe   :  { %v2375_v54 = vadd.f32 1e-05, %v2371_v9  ;;  %v7274_v9 = vld [vmem:[%s9263_s5 + $0xf8] sm:$0xff] }
 0x6ff   :  { %9589 = vst [vmem:[#allocation24_spill] sm:$0xff] %v7135_v45  ;;  %2349 = vadd.xlane.f32.xlu2 %v7135_v45 }
 0x700   :  { %4977 = vrsqrt.f32 %v2375_v54  ;;  %vm2385_vm9 = vweird.f32 %v2375_v54 }
 0x703   :  { %v7178_v18 = vpop.permute.xlu2 %2544 }
 0x704   :  { %9593 = vst [vmem:[#allocation18_spill] sm:$0xff] %v7178_v18 }
 0x705   :  { %2489 = vperm.xlu0 %4875, %v4748_v63   ;;  %v7244_v63 = vld [vmem:[%s9263_s5 + $0xd8] sm:$0xff] }
 0x706   :  { %v4978_v2 = vpop.eup %4977 }
 0x707   :  { %v2380_v59 = vmul.f32 %v4978_v2, %v2375_v54  ;;  %vm2386_vm7 = vweird.f32 %v4978_v2 }
 0x708   :  { %vm2387_vm3 = vmor %vm2385_vm9, %vm2386_vm7 }
 0x709   :  { %v2381_v7 = vmul.f32 %v4978_v2, %v2380_v59 }
 0x70b   :  { %v2382_v62 = vmul.f32 0.5, %v2381_v7  ;;  %v7189_v29 = vpop.permute.xlu2 %2529 }
 0x70c   :  { %9595 = vst [vmem:[#allocation13_spill] sm:$0xff] %v7189_v29 }
 0x70d   :  { %2484 = vperm.xlu0 %4875, %v4747_v25   ;;  %v2383_v56 = vsub.f32 1.5, %v2382_v62  ;;  %v7251_v25 = vld [vmem:[%s9263_s5 + $0xe0] sm:$0xff] }
 0x70f   :  { %3376 = vperm.xlu1 %4876, %v4764_v12   ;;  %v2384_v21 = vmul.f32 %v4978_v2, %v2383_v56  ;;  %v7258_v12 = vld [vmem:[%s9263_s5 + $0xe8] sm:$0xff] }
 0x711   :  { %v2388_v41 = vsel %vm2387_vm3, %v4978_v2, %v2384_v21 }
 0x712   :  { %v2419_v32 = vmul.f32 %v2388_v41, %v7085_v36  ;;  %v4730_v36 = vld [vmem:[%s9263_s5 + $0x80] sm:$0xff] }
 0x713   :  { %v7200_v39 = vpop.permute.xlu2 %2514 }
 0x714   :  { %v2426_v4 = vmul.f32 %v7157_v30, %v2419_v32  ;;  %9596 = vst [vmem:[#allocation12_spill] sm:$0xff] %v7200_v39 }
 0x715   :  { %2479 = vperm.xlu0 %4875, %v4746_v17   ;;  %v7265_v17 = vld [vmem:[%s9263_s5 + $0xf0] sm:$0xff] }
 0x716   :  { %v2433_v38 = vadd.f32 %v7167_v47, %v2426_v4 }
 0x734   :  { %v2366_v13 = vpop.xlane.xlu0 %2365 }
 0x735   :  { %v2372_v61 = vmul.f32 %v2366_v13, %v9572_v33 }
 0x737   :  { %v2376_v23 = vadd.f32 1e-05, %v2372_v61 }
 0x739   :  { %4979 = vrsqrt.f32 %v2376_v23  ;;  %vm2395_vm10 = vweird.f32 %v2376_v23 }
 0x73f   :  { %v4980_v19 = vpop.eup %4979 }
 0x740   :  { %v2390_v37 = vmul.f32 %v4980_v19, %v2376_v23  ;;  %vm2396_vm6 = vweird.f32 %v4980_v19 }
 0x741   :  { %vm2397_vm11 = vmor %vm2395_vm10, %vm2396_vm6 }
 0x742   :  { %v2391_v24 = vmul.f32 %v4980_v19, %v2390_v37 }
 0x744   :  { %v2392_v35 = vmul.f32 0.5, %v2391_v24 }
 0x746   :  { %v2393_v28 = vsub.f32 1.5, %v2392_v35 }
 0x747   :  { %v7269_v40 = vpop.permute.xlu0 %2549 }
 0x748   :  { %v2394_v31 = vmul.f32 %v4980_v19, %v2393_v28  ;;  %9597 = vst [vmem:[#allocation17_spill] sm:$0xff] %v7269_v40 }
 0x74a   :  { %v2398_v57 = vsel %vm2397_vm11, %v4980_v19, %v2394_v31 }
 0x74b   :  { %v2420_v43 = vmul.f32 %v2398_v57, %v7101_v55  ;;  %v4733_v55 = vld [vmem:[%s9263_s5 + $0x98] sm:$0xff] }
 0x74d   :  { %v2427_v14 = vmul.f32 %v7157_v30, %v2420_v43 }
 0x74f   :  { %v2434_v42 = vadd.f32 %v7167_v47, %v2427_v14  ;;  %v7278_v54 = vpop.permute.xlu0 %2539 }
 0x750   :  { %9598 = vst [vmem:[#allocation10_spill] sm:$0xff] %v7278_v54 }
 0x751   :  { %2619 = vmatpush.msra.mxu2 %v2434_v42 }
 0x753   :  { %2620 = vmatpush.msra.mxu2 %v2433_v38 }
 0x754   :  { %4766 = vmatmul.msk.f32.vlgmr.msra.gmra.mxu2 %vm9399_vm8, %v4730_v36 }
 0x757   :  { %v7280_v2 = vpop.permute.xlu0 %2524 }
 0x758   :  { %9599 = vst [vmem:[#allocation16_spill] sm:$0xff] %v7280_v2 }
 0x75c   :  { %4767 = vmatmul.msk.f32.gmra.mxu2 %vm9399_vm8, %v4731_v51 }
 0x75f   :  { %v7282_v59 = vpop.permute.xlu0 %2509 }
 0x760   :  { %9600 = vst [vmem:[#allocation21_spill] sm:$0xff] %v7282_v59 }
 0x764   :  { %4768 = vmatmul.msk.f32.gmra.mxu2 %vm9399_vm8, %v4732_v6 }
 0x767   :  { %v7284_v13 = vpop.permute.xlu0 %2499 }
 0x768   :  { %9601 = vst [vmem:[#allocation15_spill] sm:$0xff] %v7284_v13 }
 0x769   :  { %v2348_v27 = vpop.xlane.xlu1 %2347 }
 0x76a   :  { %v2353_v49 = vmul.f32 %v2348_v27, %v9572_v33 }
 0x76c   :  { %v7197_v0 = vsub.f32 %v7126_v16, %v2353_v49  ;;  %4769 = vmatmul.msk.f32.gmra.mxu2 %vm9399_vm8, %v4733_v55 }
 0x76e   :  { %v2361_v1 = vmul.f32 %v7197_v0, %v7197_v0 }
 0x76f   :  { %v7286_v61 = vpop.permute.xlu0 %2494 }
 0x770   :  { %2367 = vadd.xlane.f32.xlu0 %v2361_v1  ;;  %9602 = vst [vmem:[#allocation14_spill] sm:$0xff] %v7286_v61 }
 0x772   :  { %v2350_v5 = vpop.xlane.xlu2 %2349 }
 0x773   :  { %v2354_v46 = vmul.f32 %v2350_v5, %v9572_v33 }
 0x774   :  { %4770 = vmatmul.msk.f32.gmra.mxu2 %vm9399_vm8, %v4734_v53 }
 0x775   :  { %v7210_v10 = vsub.f32 %v7135_v45, %v2354_v46 }
 0x777   :  { %v2362_v26 = vmul.f32 %v7210_v10, %v7210_v10  ;;  %v7288_v7 = vpop.permute.xlu0 %2489 }
 0x778   :  { %9603 = vst [vmem:[#allocation31_spill] sm:$0xff] %v7288_v7 }
 0x779   :  { %2369 = vadd.xlane.f32.xlu2 %v2362_v26 }
 0x77c   :  { %4771 = vmatmul.msk.f32.gmra.mxu2 %vm9399_vm8, %v4735_v11 }
 0x77f   :  { %v7290_v23 = vpop.permute.xlu0 %2484 }
 0x780   :  { %9604 = vst [vmem:[#allocation32_spill] sm:$0xff] %v7290_v23 }
 0x784   :  { %4772 = vmatmul.msk.f32.gmra.mxu2 %vm9399_vm8, %v4736_v20 }
 0x787   :  { %v7292_v56 = vpop.permute.xlu0 %2479 }
 0x788   :  { %9605 = vst [vmem:[#allocation37_spill] sm:$0xff] %v7292_v56 }
 0x78c   :  { %4773 = vmatmul.msk.f32.gmra.mxu2 %vm9399_vm8, %v4737_v44 }
 0x791   :  { %3381 = vperm.xlu2 %4874, %v4765_v52  }
 0x794   :  { %4774 = vmatmul.msk.f32.gmra.mxu2 %vm9399_vm8, %v4738_v8 }
 0x79c   :  { %4775 = vmatmul.msk.f32.gmra.mxu2 %vm9399_vm8, %v4739_v60 }
 0x7a4   :  { %4776 = vmatmul.msk.f32.gmra.mxu2 %vm9399_vm8, %v4740_v48 }
 0x7ac   :  { %4777 = vmatmul.msk.f32.gmra.mxu2 %vm9399_vm8, %v7244_v63 }
 0x7b4   :  { %4778 = vmatmul.msk.f32.gmra.mxu2 %vm9399_vm8, %v7251_v25 }
 0x7bc   :  { %4779 = vmatmul.msk.f32.gmra.mxu2 %vm9399_vm8, %v7258_v12 }
 0x7c4   :  { %4780 = vmatmul.msk.f32.gmra.mxu2 %vm9399_vm8, %v7265_v17 }
 0x7cc   :  { %4781 = vmatmul.msk.f32.gmra.mxu2 %vm9399_vm8, %v7274_v9 }
 0x7d7   :  { %v2622_v62 = vpop.f32.mrf.mxu2 }
 0x7d8   :  { %v7295_v19 = vadd.f32 %v2622_v62, %v7292_v56 }
 0x7da   :  { %9606 = vst [vmem:[#allocation40_spill] sm:$0xff] %v7295_v19  ;;  %v7298_v21 = vmul.f32 0.70710677, %v7295_v19 }
 0x7dc   :  { %9607 = vst [vmem:[#allocation38_spill] sm:$0xff] %v7298_v21  ;;  %v2702_v24 = vmul.f32 %v7298_v21, %v7298_v21 }
 0x7de   :  { %v7302_v41 = vmin.f32 %v2702_v24, 16.0 }
 0x7df   :  { %v2625_v37 = vpop.f32.mrf.mxu2 }
 0x7e0   :  { %v7305_v28 = vadd.f32 %v2625_v37, %v7290_v23  ;;  %v2715_v31 = vmul.f32 3.8918573e-05, %v7302_v41  ;;  %v2704_v53 = vmul.f32 2.1237322e-06, %v7302_v41 }
 0x7e2   :  { %9608 = vst [vmem:[#allocation30_spill] sm:$0xff] %v7305_v28  ;;  %v7309_v32 = vmul.f32 0.70710677, %v7305_v28  ;;  %v2716_v57 = vadd.f32 0.001143296, %v2715_v31 }
 0x7e3   :  { %v2705_v20 = vadd.f32 0.00028619796, %v2704_v53 }
 0x7e4   :  { %9609 = vst [vmem:[#allocation39_spill] sm:$0xff] %v7309_v32  ;;  %v2742_v14 = vmul.f32 %v7309_v32, %v7309_v32  ;;  %v2717_v4 = vmul.f32 %v2716_v57, %v7302_v41 }
 0x7e5   :  { %v2706_v37 = vmul.f32 %v2705_v20, %v7302_v41 }
 0x7e6   :  { %v7317_v38 = vmin.f32 %v2742_v14, 16.0  ;;  %v2718_v36 = vadd.f32 0.014752088, %v2717_v4  ;;  %v2368_v4 = vpop.xlane.xlu0 %2367 }
 0x7e7   :  { %v2628_v35 = vpop.f32.mrf.mxu2  ;;  %v2373_v53 = vmul.f32 %v2368_v4, %v9572_v33 }
 0x7e8   :  { %v7315_v42 = vadd.f32 %v2628_v35, %v7288_v7  ;;  %v2755_v27 = vmul.f32 3.8918573e-05, %v7317_v38  ;;  %v2719_v55 = vmul.f32 %v2718_v36, %v7302_v41  ;;  %v2744_v35 = vmul.f32 2.1237322e-06, %v7317_v38 }
 0x7e9   :  { %v2707_v36 = vadd.f32 0.0036580483, %v2706_v37 }
 0x7ea   :  { %9610 = vst [vmem:[#allocation45_spill] sm:$0xff] %v7315_v42  ;;  %v7320_v51 = vmul.f32 0.70710677, %v7315_v42  ;;  %v2756_v1 = vadd.f32 0.001143296, %v2755_v27 }
 0x7eb   :  { %v2720_v5 = vadd.f32 0.112945676, %v2719_v55  ;;  %v2745_v27 = vadd.f32 0.00028619796, %v2744_v35 }
 0x7ec   :  { %9611 = vst [vmem:[#allocation36_spill] sm:$0xff] %v7320_v51  ;;  %v2782_v49 = vmul.f32 %v7320_v51, %v7320_v51  ;;  %v2757_v26 = vmul.f32 %v2756_v1, %v7317_v38 }
 0x7ed   :  { %v2721_v44 = vmul.f32 %v2720_v5, %v7302_v41  ;;  %v2746_v37 = vmul.f32 %v2745_v27, %v7317_v38 }
 0x7ee   :  { %v7330_v11 = vmin.f32 %v2782_v49, 16.0  ;;  %v2758_v62 = vadd.f32 0.014752088, %v2757_v26 }
 0x7ef   :  { %v2631_v43 = vpop.f32.mrf.mxu2  ;;  %v2722_v24 = vadd.f32 0.4994258, %v2721_v44  ;;  %v2370_v44 = vpop.xlane.xlu2 %2369 }
 0x7f0   :  { %v7328_v46 = vadd.f32 %v2631_v43, %v7286_v61  ;;  %v2795_v48 = vmul.f32 3.8918573e-05, %v7330_v11  ;;  %v2759_v14 = vmul.f32 %v2758_v62, %v7317_v38  ;;  %v2374_v4 = vmul.f32 %v2370_v44, %v9572_v33 }
 0x7f2   :  { %9612 = vst [vmem:[#allocation46_spill] sm:$0xff] %v7328_v46  ;;  %v7335_v52 = vmul.f32 0.70710677, %v7328_v46  ;;  %v2796_v43 = vadd.f32 0.001143296, %v2795_v48  ;;  %v2708_v48 = vmul.f32 %v2707_v36, %v7302_v41 }
 0x7f3   :  { %v2760_v26 = vadd.f32 0.112945676, %v2759_v14  ;;  %v2747_v36 = vadd.f32 0.0036580483, %v2746_v37  ;;  %v2784_v37 = vmul.f32 2.1237322e-06, %v7330_v11 }
 0x7f4   :  { %9613 = vst [vmem:[#allocation41_spill] sm:$0xff] %v7335_v52  ;;  %v2822_v31 = vmul.f32 %v7335_v52, %v7335_v52  ;;  %v2797_v1 = vmul.f32 %v2796_v43, %v7330_v11  ;;  %v7366_v43 = vadd.f32 1e-05, %v2373_v53  ;;  %v2709_v45 = vadd.f32 0.05243302, %v2708_v48 }
 0x7f5   :  { %v2761_v14 = vmul.f32 %v2760_v26, %v7317_v38  ;;  %v7380_v53 = vadd.f32 1e-05, %v2374_v4  ;;  %v2748_v16 = vmul.f32 %v2747_v36, %v7317_v38 }
 0x7f6   :  { %v7350_v55 = vmin.f32 %v2822_v31, 16.0  ;;  %v2798_v31 = vadd.f32 0.014752088, %v2797_v1  ;;  %v2710_v48 = vmul.f32 %v2709_v45, %v7302_v41  ;;  %vm2405_vm1 = vweird.f32 %v7366_v43 }
 0x7f7   :  { %v2634_v6 = vpop.f32.mrf.mxu2  ;;  %v2762_v26 = vadd.f32 0.4994258, %v2761_v14  ;;  %v2749_v36 = vadd.f32 0.05243302, %v2748_v16  ;;  %vm2415_vm5 = vweird.f32 %v7380_v53 }
 0x7f8   :  { %v7338_v60 = vadd.f32 %v2634_v6, %v7284_v13  ;;  %v2723_v6 = vmul.f32 %v2722_v24, %v7302_v41  ;;  %v2835_v24 = vmul.f32 3.8918573e-05, %v7350_v55  ;;  %v2799_v1 = vmul.f32 %v2798_v31, %v7330_v11 }
 0x7f9   :  { %v2763_v14 = vmul.f32 %v2762_v26, %v7317_v38  ;;  %v2824_v26 = vmul.f32 2.1237322e-06, %v7350_v55 }
 0x7fa   :  { %9614 = vst [vmem:[#allocation43_spill] sm:$0xff] %v7338_v60  ;;  %v7346_v57 = vmul.f32 0.70710677, %v7338_v60  ;;  %v7360_v62 = vadd.f32 1.0, %v2723_v6  ;;  %v2836_v6 = vadd.f32 0.001143296, %v2835_v24 }
 0x7fb   :  { %v2800_v4 = vadd.f32 0.112945676, %v2799_v1  ;;  %v2825_v28 = vadd.f32 0.00028619796, %v2824_v26 }
 0x7fc   :  { %9615 = vst [vmem:[#allocation33_spill] sm:$0xff] %v7346_v57  ;;  %v2862_v49 = vmul.f32 %v7346_v57, %v7346_v57  ;;  %4981 = vrcp.f32 %v7360_v62  ;;  %vm2730_vm12 = vweird.f32 %v7360_v62 }
 0x7fd   :  { %9617 = vst [vmem:[#allocation35_spill] sm:$0xff] %v7360_v62  ;;  %4983 = vrsqrt.f32 %v7366_v43  ;;  %v2801_v7 = vmul.f32 %v2800_v4, %v7330_v11 }
 0x7fe   :  { %v7364_v35 = vmin.f32 %v2862_v49, 16.0  ;;  %4985 = vrsqrt.f32 %v7380_v53 }
 0x7ff   :  { %v2637_v8 = vpop.f32.mrf.mxu2  ;;  %v2802_v19 = vadd.f32 0.4994258, %v2801_v7 }
 0x800   :  { %v7357_v20 = vadd.f32 %v2637_v8, %v7184_v22  ;;  %v2875_v27 = vmul.f32 3.8918573e-05, %v7364_v35  ;;  %v2785_v22 = vadd.f32 0.00028619796, %v2784_v37 }
 0x802   :  { %9616 = vst [vmem:[#allocation27_spill] sm:$0xff] %v7357_v20  ;;  %v7371_v8 = vmul.f32 0.70710677, %v7357_v20  ;;  %v2876_v50 = vadd.f32 0.001143296, %v2875_v27  ;;  %v7391_v58 = vpop.eup %4981  ;;  %v2786_v37 = vmul.f32 %v2785_v22, %v7330_v11 }
 0x803   :  { %9621 = vst [vmem:[#allocation28_spill] sm:$0xff] %v7391_v58  ;;  %v7397_v45 = vpop.eup %4983  ;;  %v2726_v1 = vmul.f32 %v7391_v58, %v7360_v62  ;;  %vm2731_vm13 = vweird.f32 %v7391_v58 }
 0x804   :  { %9618 = vst [vmem:[#allocation26_spill] sm:$0xff] %v7371_v8  ;;  %v2902_v44 = vmul.f32 %v7371_v8, %v7371_v8  ;;  %v2400_v16 = vmul.f32 %v7397_v45, %v7366_v43  ;;  %vm2406_vm14 = vweird.f32 %v7397_v45  ;;  %vm7480_vm0 = vmor %vm2730_vm12, %vm2731_vm13 }
 0x805   :  { %vm7491_vm2 = vmor %vm2405_vm1, %vm2406_vm14 }
 0x806   :  { %v7395_v33 = vmin.f32 %v2902_v44, 16.0  ;;  %v7406_v44 = vadd.f32 1.0, %v2763_v14  ;;  %v2727_v14 = vsub.f32 1.0, %v2726_v1  ;;  %v2826_v1 = vmul.f32 %v2825_v28, %v7350_v55 }
 0x807   :  { %v2640_v5 = vpop.f32.mrf.mxu2 }
 0x808   :  { %v7376_v49 = vadd.f32 %v2640_v5, %v7282_v59  ;;  %v2837_v5 = vmul.f32 %v2836_v6, %v7350_v55  ;;  %v2711_v59 = vadd.f32 0.18741608, %v2710_v48  ;;  %v2877_v6 = vmul.f32 %v2876_v50, %v7364_v35  ;;  %9622 = vst [vmem:[#allocation29_spill] sm:$0xff] %v7406_v44  ;;  %v7411_v48 = vpop.eup %4985 }
 0x809   :  { %v2915_v13 = vmul.f32 3.8918573e-05, %v7395_v33  ;;  %4987 = vrcp.f32 %v7406_v44  ;;  %v2410_v22 = vmul.f32 %v7411_v48, %v7380_v53  ;;  %v2728_v26 = vmul.f32 %v7391_v58, %v2727_v14 }
 0x80a   :  { %9619 = vst [vmem:[#allocation42_spill] sm:$0xff] %v7376_v49  ;;  %v7389_v31 = vmul.f32 0.70710677, %v7376_v49  ;;  %v2838_v61 = vadd.f32 0.014752088, %v2837_v5  ;;  %v2712_v50 = vmul.f32 %v2711_v59, %v7302_v41  ;;  %v2750_v5 = vmul.f32 %v2749_v36, %v7317_v38 }
 0x80b   :  { %v2878_v4 = vadd.f32 0.014752088, %v2877_v6  ;;  %v2916_v60 = vadd.f32 0.001143296, %v2915_v13  ;;  %v2401_v59 = vmul.f32 %v7397_v45, %v2400_v16  ;;  %v2787_v41 = vadd.f32 0.0036580483, %v2786_v37 }
 0x80c   :  { %9620 = vst [vmem:[#allocation44_spill] sm:$0xff] %v7389_v31  ;;  %v2942_v27 = vmul.f32 %v7389_v31, %v7389_v31  ;;  %v2839_v23 = vmul.f32 %v2838_v61, %v7350_v55  ;;  %v2751_v61 = vadd.f32 0.18741608, %v2750_v5  ;;  %vm2416_vm15 = vweird.f32 %v7411_v48 }
 0x80d   :  { %v2879_v6 = vmul.f32 %v2878_v4, %v7364_v35  ;;  %v2917_v16 = vmul.f32 %v2916_v60, %v7395_v33  ;;  %v2402_v37 = vmul.f32 0.5, %v2401_v59  ;;  %v2827_v59 = vadd.f32 0.0036580483, %v2826_v1  ;;  %vm2417_vm9 = vmor %vm2415_vm5, %vm2416_vm15 }
 0x80e   :  { %v7417_v56 = vmin.f32 %v2942_v27, 16.0  ;;  %v2840_v36 = vadd.f32 0.112945676, %v2839_v23  ;;  %v7428_v27 = vadd.f32 1.1283791, %v2712_v50  ;;  %v2411_v23 = vmul.f32 %v7411_v48, %v2410_v22 }
 0x80f   :  { %v2643_v24 = vpop.f32.mrf.mxu2  ;;  %v7442_v4 = vpop.eup %4987  ;;  %v2752_v28 = vmul.f32 %v2751_v61, %v7317_v38  ;;  %v2880_v14 = vadd.f32 0.112945676, %v2879_v6  ;;  %v7452_v50 = vadd.f32 %v7391_v58, %v2728_v26  ;;  %v2403_v5 = vsub.f32 1.5, %v2402_v37 }
 0x810   :  { %v7420_v42 = vadd.f32 %v2643_v24, %v7200_v39  ;;  %v2955_v7 = vmul.f32 3.8918573e-05, %v7417_v56  ;;  %9624 = vst [vmem:[#allocation5_spill] sm:$0xff] %v7428_v27  ;;  %v2803_v24 = vmul.f32 %v2802_v19, %v7330_v11  ;;  %v2788_v19 = vmul.f32 %v2787_v41, %v7330_v11 }
 0x811   :  { %9626 = vst [vmem:[#allocation8_spill] sm:$0xff] %v7442_v4  ;;  %v2841_v39 = vmul.f32 %v2840_v36, %v7350_v55  ;;  %v2918_v41 = vadd.f32 0.014752088, %v2917_v16  ;;  %v2412_v49 = vmul.f32 0.5, %v2411_v23  ;;  %v2766_v38 = vmul.f32 %v7442_v4, %v7406_v44 }
 0x812   :  { %9623 = vst [vmem:[#allocation6_spill] sm:$0xff] %v7420_v42  ;;  %v7433_v13 = vmul.f32 0.70710677, %v7420_v42  ;;  %v2956_v20 = vadd.f32 0.001143296, %v2955_v7  ;;  %v7447_v60 = vadd.f32 1.0, %v2803_v24  ;;  %v2881_v27 = vmul.f32 %v2880_v14, %v7364_v35 }
 0x813   :  { %9628 = vst [vmem:[#allocation48_spill] sm:$0xff] %v7452_v50  ;;  %v2789_v61 = vadd.f32 0.05243302, %v2788_v19  ;;  %v2864_v36 = vmul.f32 2.1237322e-06, %v7364_v35  ;;  %v2828_v37 = vmul.f32 %v2827_v59, %v7350_v55  ;;  %v2919_v19 = vmul.f32 %v2918_v41, %v7395_v33 }
 0x814   :  { %9625 = vst [vmem:[#allocation7_spill] sm:$0xff] %v7433_v13  ;;  %v2982_v22 = vmul.f32 %v7433_v13, %v7433_v13  ;;  %v7460_v24 = vadd.f32 1.1283791, %v2752_v28  ;;  %v2842_v1 = vadd.f32 0.4994258, %v2841_v39  ;;  %v2957_v26 = vmul.f32 %v2956_v20, %v7417_v56 }
 0x815   :  { %9627 = vst [vmem:[#allocation47_spill] sm:$0xff] %v7447_v60  ;;  %4989 = vrcp.f32 %v7447_v60  ;;  %v2413_v28 = vsub.f32 1.5, %v2412_v49  ;;  %v2767_v39 = vsub.f32 1.0, %v2766_v38  ;;  %v2790_v14 = vmul.f32 %v2789_v61, %v7330_v11 }
 0x816   :  { %9630 = vst [vmem:[#allocation50_spill] sm:$0xff] %v7460_v24  ;;  %v7467_v23 = vmin.f32 %v2982_v22, 16.0  ;;  %v9632_v59 = vmov 0  ;;  %v2882_v22 = vadd.f32 0.4994258, %v2881_v27  ;;  %vm2771_vm4 = vweird.f32 %v7442_v4 }
 0x817   :  { %v2646_v46 = vpop.f32.mrf.mxu2  ;;  %v9633_v59 = vsel %vm7480_vm0, 4294967295, %v9632_v59  ;;  %v2958_v49 = vadd.f32 0.014752088, %v2957_v26  ;;  %v2829_v38 = vadd.f32 0.05243302, %v2828_v37  ;;  %v2414_v27 = vmul.f32 %v7411_v48, %v2413_v28 }
 0x818   :  { %v7458_v6 = vadd.f32 %v2646_v46, %v7176_v34  ;;  %v2404_v46 = vmul.f32 %v7397_v45, %v2403_v5  ;;  %v2865_v34 = vadd.f32 0.00028619796, %v2864_v36  ;;  %9634 = vst [vmem:[#allocation52_spill] sm:$0xff] %v9633_v59  ;;  %v2843_v5 = vmul.f32 %v2842_v1, %v7350_v55 }
 0x819   :  { %v2904_v61 = vmul.f32 2.1237322e-06, %v7395_v33  ;;  %v2995_v16 = vmul.f32 3.8918573e-05, %v7467_v23  ;;  %v2920_v21 = vadd.f32 0.112945676, %v2919_v19  ;;  %v2883_v19 = vmul.f32 %v2882_v22, %v7364_v35 }
 0x81a   :  { %9629 = vst [vmem:[#allocation49_spill] sm:$0xff] %v7458_v6  ;;  %v7474_v20 = vmul.f32 0.70710677, %v7458_v6  ;;  %v2408_v43 = vsel %vm7491_vm2, %v7397_v45, %v2404_v46  ;;  %v2791_v26 = vadd.f32 0.18741608, %v2790_v14  ;;  %v2866_v37 = vmul.f32 %v2865_v34, %v7364_v35 }
 0x81b   :  { %v7501_v1 = vpop.eup %4989  ;;  %v7507_v42 = vadd.f32 1.0, %v2843_v5  ;;  %v2959_v28 = vmul.f32 %v2958_v49, %v7417_v56  ;;  %v2768_v45 = vmul.f32 %v7442_v4, %v2767_v39  ;;  %vm2770_vm7 = vweird.f32 %v7406_v44 }
 0x81c   :  { %9631 = vst [vmem:[#allocation51_spill] sm:$0xff] %v7474_v20  ;;  %v3022_v41 = vmul.f32 %v7474_v20, %v7474_v20  ;;  %v2905_v46 = vadd.f32 0.00028619796, %v2904_v61  ;;  %v2996_v14 = vadd.f32 0.001143296, %v2995_v16  ;;  %v2421_v34 = vmul.f32 %v2408_v43, %v7197_v0  ;;  %vm7564_vm3 = vmor %vm2770_vm7, %vm2771_vm4 }
 0x81d   :  { %9637 = vst [vmem:[#allocation53_spill] sm:$0xff] %v7501_v1  ;;  %v2806_v5 = vmul.f32 %v7501_v1, %v7447_v60  ;;  %v2830_v24 = vmul.f32 %v2829_v38, %v7350_v55  ;;  %v2921_v22 = vmul.f32 %v2920_v21, %v7395_v33  ;;  %v2418_v49 = vsel %vm2417_vm9, %v7411_v48, %v2414_v27 }
 0x81e   :  { %v2867_v53 = vadd.f32 0.0036580483, %v2866_v37  ;;  %v7520_v32 = vmin.f32 %v3022_v41, 16.0  ;;  %v2422_v16 = vmul.f32 %v2418_v49, %v7210_v10  ;;  %4991 = vrcp.f32 %v7507_v42 }
 0x81f   :  { %v2649_v7 = vpop.f32.mrf.mxu2  ;;  %v7527_v0 = vadd.f32 1.0, %v2883_v19  ;;  %v2960_v61 = vadd.f32 0.112945676, %v2959_v28  ;;  %v2906_v21 = vmul.f32 %v2905_v46, %v7395_v33  ;;  %v2997_v48 = vmul.f32 %v2996_v14, %v7467_v23 }
 0x820   :  { %v7523_v39 = vadd.f32 %v2649_v7, %v7280_v2  ;;  %v2429_v41 = vmul.f32 %v7157_v30, %v2422_v16  ;;  %v2428_v38 = vmul.f32 %v7157_v30, %v2421_v34  ;;  %v7537_v7 = vadd.f32 %v7442_v4, %v2768_v45 }
 0x821   :  { %v2792_v10 = vmul.f32 %v2791_v26, %v7330_v11  ;;  %v2922_v27 = vadd.f32 0.4994258, %v2921_v22  ;;  %v2944_v37 = vmul.f32 2.1237322e-06, %v7417_v56  ;;  %v2868_v19 = vmul.f32 %v2867_v53, %v7364_v35 }
 0x822   :  { %9638 = vst [vmem:[#allocation54_spill] sm:$0xff] %v7523_v39  ;;  %v3035_v28 = vmul.f32 3.8918573e-05, %v7520_v32  ;;  %v7544_v46 = vmul.f32 0.70710677, %v7523_v39  ;;  %v7547_v14 = vadd.f32 %v7167_v47, %v2429_v41  ;;  %v2961_v45 = vmul.f32 %v2960_v61, %v7417_v56 }
 0x823   :  { %9640 = vst [vmem:[#allocation56_spill] sm:$0xff] %v7537_v7  ;;  %v2831_v30 = vadd.f32 0.18741608, %v2830_v24  ;;  %4993 = vrcp.f32 %v7527_v0  ;;  %v2907_v11 = vadd.f32 0.0036580483, %v2906_v21  ;;  %v7556_v22 = vadd.f32 %v7167_v47, %v2428_v38 }
 0x824   :  { %9641 = vst [vmem:[#allocation57_spill] sm:$0xff] %v7547_v14  ;;  %v2998_v26 = vadd.f32 0.014752088, %v2997_v48  ;;  %4868 = vmatpush.msrb.mxu3 %v7547_v14  ;;  %v7558_v49 = vpop.eup %4991  ;;  %v9644_v24 = vmov 0  ;;  %v7569_v53 = vadd.f32 1.1283791, %v2792_v10  ;;  %v2923_v16 = vmul.f32 %v2922_v27, %v7395_v33 }
 0x825   :  { %9642 = vst [vmem:[#allocation58_spill] sm:$0xff] %v7556_v22  ;;  %v9645_v24 = vsel %vm7564_vm3, 4294967295, %v9644_v24  ;;  %v2945_v61 = vadd.f32 0.00028619796, %v2944_v37  ;;  %v2869_v21 = vadd.f32 0.05243302, %v2868_v19  ;;  %v3062_v41 = vmul.f32 %v7544_v46, %v7544_v46 }
 0x826   :  { %9643 = vst [vmem:[#allocation59_spill] sm:$0xff] %v7558_v49  ;;  %v3036_v48 = vadd.f32 0.001143296, %v3035_v28  ;;  %4869 = vmatpush.msrb.mxu3 %v7556_v22  ;;  %v2832_v38 = vmul.f32 %v2831_v30, %v7350_v55  ;;  %v2984_v10 = vmul.f32 2.1237322e-06, %v7467_v23  ;;  %v2846_v19 = vmul.f32 %v7558_v49, %v7507_v42 }
 0x827   :  { %v2652_v36 = vpop.f32.mrf.mxu2  ;;  %9646 = vst [vmem:[#allocation60_spill] sm:$0xff] %v9645_v24  ;;  %4809 = vmatmul.msk.f32.vlgmr.msrb.gmra.mxu3 %vm9399_vm8, %v7244_v63  ;;  %v2908_v28 = vmul.f32 %v2907_v11, %v7395_v33  ;;  %v2999_v47 = vmul.f32 %v2998_v26, %v7467_v23  ;;  %vm2811_vm6 = vweird.f32 %v7501_v1  ;;  %v2870_v63 = vmul.f32 %v2869_v21, %v7364_v35 }
 0x828   :  { %v7530_v43 = vadd.f32 %v2652_v36, %v7189_v29  ;;  %v2807_v36 = vsub.f32 1.0, %v2806_v5  ;;  %9647 = vst [vmem:[#allocation61_spill] sm:$0xff] %v7569_v53  ;;  %v2962_v5 = vadd.f32 0.4994258, %v2961_v45  ;;  %v7592_v45 = vadd.f32 1.0, %v2923_v16 }
 0x829   :  { %v2946_v29 = vmul.f32 %v2945_v61, %v7417_v56  ;;  %v7595_v2 = vpop.eup %4993  ;;  %v7600_v22 = vmin.f32 %v3062_v41, 16.0  ;;  %v7602_v11 = vadd.f32 1.1283791, %v2832_v38  ;;  %v2985_v55 = vadd.f32 0.00028619796, %v2984_v10 }
 0x82a   :  { %9639 = vst [vmem:[#allocation55_spill] sm:$0xff] %v7530_v43  ;;  %v7551_v34 = vmul.f32 0.70710677, %v7530_v43  ;;  %v2808_v37 = vmul.f32 %v7501_v1, %v2807_v36  ;;  %v3037_v36 = vmul.f32 %v3036_v48, %v7520_v32  ;;  %v2963_v26 = vmul.f32 %v2962_v5, %v7417_v56 }
 0x82b   :  { %9648 = vst [vmem:[#allocation62_spill] sm:$0xff] %v7595_v2  ;;  %v2847_v14 = vsub.f32 1.0, %v2846_v19  ;;  %v2909_v50 = vadd.f32 0.05243302, %v2908_v28  ;;  %v3000_v58 = vadd.f32 0.112945676, %v2999_v47  ;;  %v2886_v21 = vmul.f32 %v7595_v2, %v7527_v0 }
 0x82c   :  { %v3102_v27 = vmul.f32 %v7551_v34, %v7551_v34  ;;  %9649 = vst [vmem:[#allocation63_spill] sm:$0xff] %v7602_v11  ;;  %v7608_v61 = vadd.f32 %v7501_v1, %v2808_v37  ;;  %4995 = vrcp.f32 %v7592_v45  ;;  %v2947_v48 = vadd.f32 0.0036580483, %v2946_v29 }
 0x82d   :  { %vm2810_vm10 = vweird.f32 %v7447_v60  ;;  %v2871_v5 = vadd.f32 0.18741608, %v2870_v63  ;;  %v3038_v38 = vadd.f32 0.014752088, %v3037_v36  ;;  %v3075_v10 = vmul.f32 3.8918573e-05, %v7600_v22 }
 0x82e   :  { %v7605_v30 = vmin.f32 %v3102_v27, 16.0  ;;  %9650 = vst [vmem:[#allocation64_spill] sm:$0xff] %v7608_v61  ;;  %vm7620_vm11 = vmor %vm2810_vm10, %vm2811_vm6  ;;  %v9652_v27 = vmov 0  ;;  %v7624_v47 = vadd.f32 1.0, %v2963_v26  ;;  %v2986_v37 = vmul.f32 %v2985_v55, %v7467_v23 }
 0x82f   :  { %v2655_v16 = vpop.f32.mrf.mxu2  ;;  %v9653_v27 = vsel %vm7620_vm11, 4294967295, %v9652_v27  ;;  %4810 = vmatmul.msk.f32.gmra.mxu3 %vm9399_vm8, %v7251_v25  ;;  %v2848_v63 = vmul.f32 %v7558_v49, %v2847_v14  ;;  %v2910_v36 = vmul.f32 %v2909_v50, %v7395_v33  ;;  %v3001_v26 = vmul.f32 %v3000_v58, %v7467_v23 }
 0x830   :  { %v7614_v41 = vadd.f32 %v2655_v16, %v7161_v15  ;;  %9654 = vst [vmem:[#allocation66_spill] sm:$0xff] %v9653_v27  ;;  %v3115_v29 = vmul.f32 3.8918573e-05, %v7605_v30  ;;  %v2887_v55 = vsub.f32 1.0, %v2886_v21  ;;  %v2948_v16 = vmul.f32 %v2947_v48, %v7417_v56 }
 0x831   :  { %v3024_v15 = vmul.f32 2.1237322e-06, %v7520_v32  ;;  %vm2850_vm12 = vweird.f32 %v7507_v42  ;;  %v2872_v25 = vmul.f32 %v2871_v5, %v7364_v35  ;;  %v3039_v28 = vmul.f32 %v3038_v38, %v7520_v32 }
 0x832   :  { %9651 = vst [vmem:[#allocation65_spill] sm:$0xff] %v7614_v41  ;;  %v7629_v19 = vmul.f32 0.70710677, %v7614_v41  ;;  %v3076_v6 = vadd.f32 0.001143296, %v3075_v10  ;;  %v7647_v14 = vpop.eup %4995  ;;  %4997 = vrcp.f32 %v7624_v47  ;;  %v7653_v48 = vadd.f32 %v7558_v49, %v2848_v63 }
 0x833   :  { %9655 = vst [vmem:[#allocation67_spill] sm:$0xff] %v7647_v14  ;;  %v2987_v58 = vadd.f32 0.0036580483, %v2986_v37  ;;  %v3116_v50 = vadd.f32 0.001143296, %v3115_v29  ;;  %vm2851_vm13 = vweird.f32 %v7558_v49  ;;  %v2888_v35 = vmul.f32 %v7595_v2, %v2887_v55 }
 0x834   :  { %v3142_v59 = vmul.f32 %v7629_v19, %v7629_v19  ;;  %9656 = vst [vmem:[#allocation68_spill] sm:$0xff] %v7653_v48  ;;  %v3002_v51 = vadd.f32 0.4994258, %v3001_v26  ;;  %v2911_v5 = vadd.f32 0.18741608, %v2910_v36  ;;  %v2926_v37 = vmul.f32 %v7647_v14, %v7592_v45  ;;  %vm7664_vm14 = vmor %vm2850_vm12, %vm2851_vm13 }
 0x835   :  { %v2949_v38 = vadd.f32 0.05243302, %v2948_v16  ;;  %v3025_v10 = vadd.f32 0.00028619796, %v3024_v15  ;;  %v3077_v29 = vmul.f32 %v3076_v6, %v7600_v22  ;;  %v9657_v63 = vmov 0 }
 0x836   :  { %v7650_v21 = vmin.f32 %v3142_v59, 16.0  ;;  %v3040_v59 = vadd.f32 0.112945676, %v3039_v28  ;;  %v9658_v63 = vsel %vm7664_vm14, 4294967295, %v9657_v63  ;;  %v7668_v26 = vadd.f32 1.1283791, %v2872_v25 }
 0x837   :  { %9659 = vst [vmem:[#allocation69_spill] sm:$0xff] %v9658_v63  ;;  %v2988_v36 = vmul.f32 %v2987_v58, %v7467_v23  ;;  %v3117_v15 = vmul.f32 %v3116_v50, %v7605_v30  ;;  %v2658_v16 = vpop.f32.mrf.mxu2  ;;  %4811 = vmatmul.msk.f32.gmra.mxu3 %vm9399_vm8, %v7258_v12  ;;  %vm2891_vm1 = vweird.f32 %v7595_v2  ;;  %v3003_v28 = vmul.f32 %v3002_v51, %v7467_v23 }
 0x838   :  { %9660 = vst [vmem:[#allocation70_spill] sm:$0xff] %v7668_v26  ;;  %v3155_v55 = vmul.f32 3.8918573e-05, %v7650_v21  ;;  %v7682_v25 = vadd.f32 %v2658_v16, %v7278_v54  ;;  %v7684_v58 = vpop.eup %4997  ;;  %v7687_v50 = vadd.f32 %v7595_v2, %v2888_v35  ;;  %v2912_v7 = vmul.f32 %v2911_v5, %v7395_v33 }
 0x839   :  { %9662 = vst [vmem:[#allocation72_spill] sm:$0xff] %v7684_v58  ;;  %v2950_v12 = vmul.f32 %v2949_v38, %v7417_v56  ;;  %v3026_v53 = vmul.f32 %v3025_v10, %v7520_v32  ;;  %v2927_v4 = vsub.f32 1.0, %v2926_v37  ;;  %v3041_v24 = vmul.f32 %v3040_v59, %v7520_v32 }
 0x83a   :  { %9661 = vst [vmem:[#allocation71_spill] sm:$0xff] %v7682_v25  ;;  %v3078_v51 = vadd.f32 0.014752088, %v3077_v29  ;;  %vm2890_vm2 = vweird.f32 %v7527_v0  ;;  %v2989_v16 = vadd.f32 0.05243302, %v2988_v36  ;;  %v9664_v35 = vmov 0 }
 0x83b   :  { %9663 = vst [vmem:[#allocation73_spill] sm:$0xff] %v7687_v50  ;;  %v3118_v54 = vadd.f32 0.014752088, %v3117_v15  ;;  %v3156_v39 = vadd.f32 0.001143296, %v3155_v55  ;;  %vm7697_vm15 = vmor %vm2890_vm2, %vm2891_vm1  ;;  %v2966_v5 = vmul.f32 %v7684_v58, %v7624_v47  ;;  %v7704_v38 = vadd.f32 1.0, %v3003_v28 }
 0x83c   :  { %v9665_v35 = vsel %vm7697_vm15, 4294967295, %v9664_v35  ;;  %v7707_v10 = vmul.f32 0.70710677, %v7682_v25  ;;  %v7713_v59 = vadd.f32 1.1283791, %v2912_v7  ;;  %v3079_v33 = vmul.f32 %v3078_v51, %v7600_v22 }
 0x83d   :  { %9666 = vst [vmem:[#allocation74_spill] sm:$0xff] %v9665_v35  ;;  %v2951_v29 = vadd.f32 0.18741608, %v2950_v12  ;;  %v3027_v36 = vadd.f32 0.0036580483, %v3026_v53  ;;  %v2928_v6 = vmul.f32 %v7647_v14, %v2927_v4  ;;  %v2990_v11 = vmul.f32 %v2989_v16, %v7467_v23 }
 0x83e   :  { %9667 = vst [vmem:[#allocation75_spill] sm:$0xff] %v7713_v59  ;;  %v3042_v15 = vadd.f32 0.4994258, %v3041_v24  ;;  %v3064_v55 = vmul.f32 2.1237322e-06, %v7600_v22  ;;  %v3182_v28 = vmul.f32 %v7707_v10, %v7707_v10  ;;  %v3119_v52 = vmul.f32 %v3118_v54, %v7605_v30 }
 0x83f   :  { %v3157_v37 = vmul.f32 %v3156_v39, %v7650_v21  ;;  %v2661_v7 = vpop.f32.mrf.mxu2  ;;  %4812 = vmatmul.msk.f32.gmra.mxu3 %vm9399_vm8, %v7265_v17  ;;  %v2967_v24 = vsub.f32 1.0, %v2966_v5  ;;  %4999 = vrcp.f32 %v7704_v38  ;;  %vm2930_vm4 = vweird.f32 %v7592_v45 }
 0x840   :  { %v7726_v53 = vmin.f32 %v3182_v28, 16.0  ;;  %v7729_v12 = vadd.f32 %v2661_v7, %v7178_v18  ;;  %v2952_v39 = vmul.f32 %v2951_v29, %v7417_v56  ;;  %v3028_v51 = vmul.f32 %v3027_v36, %v7520_v32 }
 0x841   :  { %v3043_v17 = vmul.f32 %v3042_v15, %v7520_v32  ;;  %v3065_v16 = vadd.f32 0.00028619796, %v3064_v55  ;;  %v3080_v5 = vadd.f32 0.112945676, %v3079_v33  ;;  %vm2931_vm5 = vweird.f32 %v7647_v14 }
 0x842   :  { %9668 = vst [vmem:[#allocation76_spill] sm:$0xff] %v7729_v12  ;;  %v3195_v28 = vmul.f32 3.8918573e-05, %v7726_v53  ;;  %v3120_v7 = vadd.f32 0.112945676, %v3119_v52  ;;  %v7743_v4 = vadd.f32 %v7647_v14, %v2928_v6  ;;  %v2968_v56 = vmul.f32 %v7684_v58, %v2967_v24  ;;  %vm7779_vm6 = vmor %vm2930_vm4, %vm2931_vm5 }
 0x843   :  { %v3158_v18 = vadd.f32 0.014752088, %v3157_v37  ;;  %v7740_v61 = vmul.f32 0.70710677, %v7729_v12  ;;  %v2991_v29 = vadd.f32 0.18741608, %v2990_v11  ;;  %vm2970_vm7 = vweird.f32 %v7624_v47 }
 0x844   :  { %9669 = vst [vmem:[#allocation77_spill] sm:$0xff] %v7743_v4  ;;  %v3196_v36 = vadd.f32 0.001143296, %v3195_v28  ;;  %v7746_v54 = vadd.f32 1.1283791, %v2952_v39  ;;  %v7753_v37 = vadd.f32 1.0, %v3043_v17  ;;  %v3066_v55 = vmul.f32 %v3065_v16, %v7600_v22 }
 0x845   :  { %v3029_v33 = vadd.f32 0.05243302, %v3028_v51  ;;  %v3222_v15 = vmul.f32 %v7740_v61, %v7740_v61  ;;  %v7751_v52 = vpop.eup %4999  ;;  %v3081_v6 = vmul.f32 %v3080_v5, %v7600_v22  ;;  %v3121_v39 = vmul.f32 %v3120_v7, %v7605_v30 }
 0x846   :  { %9670 = vst [vmem:[#allocation78_spill] sm:$0xff] %v7746_v54  ;;  %v3197_v24 = vmul.f32 %v3196_v36, %v7726_v53  ;;  %v3159_v28 = vmul.f32 %v3158_v18, %v7650_v21  ;;  %v7766_v17 = vadd.f32 %v7684_v58, %v2968_v56  ;;  %vm2971_vm9 = vweird.f32 %v7684_v58 }
 0x847   :  { %9671 = vst [vmem:[#allocation79_spill] sm:$0xff] %v7751_v52  ;;  %v7761_v51 = vmin.f32 %v3222_v15, 16.0  ;;  %v2664_v1 = vpop.f32.mrf.mxu2  ;;  %4813 = vmatmul.msk.f32.gmra.mxu3 %vm9399_vm8, %v7274_v9  ;;  %v2992_v16 = vmul.f32 %v2991_v29, %v7467_v23  ;;  %v3006_v7 = vmul.f32 %v7751_v52, %v7704_v38  ;;  %v3030_v18 = vmul.f32 %v3029_v33, %v7520_v32  ;;  %vm7793_vm10 = vmor %vm2970_vm7, %vm2971_vm9 }
 0x848   :  { %9672 = vst [vmem:[#allocation80_spill] sm:$0xff] %v7766_v17  ;;  %v3198_v5 = vadd.f32 0.014752088, %v3197_v24  ;;  %v9673_v9 = vmov 0  ;;  %5001 = vrcp.f32 %v7753_v37  ;;  %v3067_v23 = vadd.f32 0.0036580483, %v3066_v55 }
 0x849   :  { %v3235_v15 = vmul.f32 3.8918573e-05, %v7761_v51  ;;  %v9674_v9 = vsel %vm7779_vm6, 4294967295, %v9673_v9  ;;  %v3082_v56 = vadd.f32 0.4994258, %v3081_v6  ;;  %v7785_v29 = vadd.f32 %v2664_v1, %v7269_v40 }
 0x84a   :  { %9675 = vst [vmem:[#allocation81_spill] sm:$0xff] %v9674_v9  ;;  %v9677_v24 = vmov 0  ;;  %v3104_v36 = vmul.f32 2.1237322e-06, %v7605_v30  ;;  %v3122_v11 = vadd.f32 0.4994258, %v3121_v39  ;;  %v3199_v6 = vmul.f32 %v3198_v5, %v7726_v53 }
 0x84b   :  { %9676 = vst [vmem:[#allocation82_spill] sm:$0xff] %v7785_v29  ;;  %v9678_v24 = vsel %vm7793_vm10, 4294967295, %v9677_v24  ;;  %v3160_v27 = vadd.f32 0.112945676, %v3159_v28  ;;  %v7802_v55 = vadd.f32 1.1283791, %v2992_v16  ;;  %v3068_v48 = vmul.f32 %v3067_v23, %v7600_v22 }
 0x84c   :  { %9679 = vst [vmem:[#allocation83_spill] sm:$0xff] %v9678_v24  ;;  %v3236_v33 = vadd.f32 0.001143296, %v3235_v15  ;;  %v3007_v40 = vsub.f32 1.0, %v3006_v7  ;;  %v3031_v57 = vadd.f32 0.18741608, %v3030_v18  ;;  %v3083_v16 = vmul.f32 %v3082_v56, %v7600_v22 }
 0x84d   :  { %9680 = vst [vmem:[#allocation84_spill] sm:$0xff] %v7802_v55  ;;  %v3144_v39 = vmul.f32 2.1237322e-06, %v7650_v21  ;;  %v7811_v49 = vmul.f32 0.70710677, %v7785_v29  ;;  %v3123_v5 = vmul.f32 %v3122_v11, %v7605_v30  ;;  %v3161_v7 = vmul.f32 %v3160_v27, %v7650_v21 }
 0x84e   :  { %v3237_v28 = vmul.f32 %v3236_v33, %v7761_v51  ;;  %v3105_v1 = vadd.f32 0.00028619796, %v3104_v36  ;;  %v7816_v43 = vpop.eup %5001  ;;  %vm3010_vm12 = vweird.f32 %v7704_v38  ;;  %v3200_v18 = vadd.f32 0.112945676, %v3199_v6 }
 0x84f   :  { %v2667_v15 = vpop.f32.mrf.mxu2  ;;  %v3262_v33 = vmul.f32 %v7811_v49, %v7811_v49  ;;  %v3008_v56 = vmul.f32 %v7751_v52, %v3007_v40  ;;  %vm3011_vm13 = vweird.f32 %v7751_v52  ;;  %v3032_v11 = vmul.f32 %v3031_v57, %v7520_v32 }
 0x850   :  { %v3238_v23 = vadd.f32 0.014752088, %v3237_v28  ;;  %v7822_v26 = vadd.f32 %v2667_v15, %v7152_v3  ;;  %v3184_v27 = vmul.f32 2.1237322e-06, %v7726_v53  ;;  %v3069_v36 = vadd.f32 0.05243302, %v3068_v48  ;;  %vm7862_vm1 = vmor %vm3010_vm12, %vm3011_vm13 }
 0x851   :  { %v3145_v63 = vadd.f32 0.00028619796, %v3144_v39  ;;  %v7829_v6 = vmin.f32 %v3262_v33, 16.0  ;;  %v3046_v28 = vmul.f32 %v7816_v43, %v7753_v37  ;;  %v7833_v59 = vadd.f32 1.0, %v3083_v16 }
 0x852   :  { %v3239_v41 = vmul.f32 %v3238_v23, %v7761_v51  ;;  %v3106_v15 = vmul.f32 %v3105_v1, %v7605_v30  ;;  %v7837_v40 = vmul.f32 0.70710677, %v7822_v26  ;;  %v7839_v3 = vadd.f32 1.0, %v3123_v5 }
 0x853   :  { %v3162_v32 = vadd.f32 0.4994258, %v3161_v7  ;;  %v3201_v57 = vmul.f32 %v3200_v18, %v7726_v53  ;;  %v7843_v39 = vadd.f32 %v7751_v52, %v3008_v56  ;;  %v7845_v23 = vadd.f32 1.1283791, %v3032_v11 }
 0x854   :  { %v3240_v48 = vadd.f32 0.112945676, %v3239_v41  ;;  %v3185_v33 = vadd.f32 0.00028619796, %v3184_v27  ;;  %v3275_v16 = vmul.f32 3.8918573e-05, %v7829_v6  ;;  %v3146_v8 = vmul.f32 %v3145_v63, %v7650_v21 }
 0x855   :  { %9681 = vst [vmem:[#allocation85_spill] sm:$0xff] %v7843_v39  ;;  %v3264_v50 = vmul.f32 2.1237322e-06, %v7829_v6  ;;  %v3302_v5 = vmul.f32 %v7837_v40, %v7837_v40  ;;  %v3070_v7 = vmul.f32 %v3069_v36, %v7600_v22  ;;  %5003 = vrcp.f32 %v7833_v59 }
 0x856   :  { %9682 = vst [vmem:[#allocation86_spill] sm:$0xff] %v7845_v23  ;;  %v3241_v1 = vmul.f32 %v3240_v48, %v7761_v51  ;;  %v3107_v41 = vadd.f32 0.0036580483, %v3106_v15  ;;  %v3224_v18 = vmul.f32 2.1237322e-06, %v7761_v51  ;;  %v3047_v56 = vsub.f32 1.0, %v3046_v28 }
 0x857   :  { %5005 = vrcp.f32 %v7839_v3  ;;  %v3163_v11 = vmul.f32 %v3162_v32, %v7650_v21  ;;  %v3202_v63 = vadd.f32 0.4994258, %v3201_v57  ;;  %v3186_v36 = vmul.f32 %v3185_v33, %v7726_v53 }
 0x858   :  { %v3242_v48 = vadd.f32 0.4994258, %v3241_v1  ;;  %v3276_v15 = vadd.f32 0.001143296, %v3275_v16  ;;  %v7867_v2 = vmin.f32 %v3302_v5, 16.0  ;;  %vm3050_vm2 = vweird.f32 %v7753_v37 }
 0x859   :  { %v3147_v57 = vadd.f32 0.0036580483, %v3146_v8  ;;  %v3265_v35 = vadd.f32 0.00028619796, %v3264_v50  ;;  %v3071_v25 = vadd.f32 0.18741608, %v3070_v7  ;;  %v3108_v62 = vmul.f32 %v3107_v41, %v7605_v30 }
 0x85a   :  { %v3225_v54 = vadd.f32 0.00028619796, %v3224_v18  ;;  %v3277_v33 = vmul.f32 %v3276_v15, %v7829_v6  ;;  %v3048_v16 = vmul.f32 %v7816_v43, %v3047_v56  ;;  %v7878_v1 = vadd.f32 1.0, %v3163_v11 }
 0x85b   :  { %v3243_v5 = vmul.f32 %v3242_v48, %v7761_v51  ;;  %v3304_v28 = vmul.f32 2.1237322e-06, %v7867_v2  ;;  %v7882_v31 = vpop.eup %5003  ;;  %v3187_v8 = vadd.f32 0.0036580483, %v3186_v36  ;;  %v3203_v50 = vmul.f32 %v3202_v63, %v7726_v53 }
 0x85c   :  { %v3278_v32 = vadd.f32 0.014752088, %v3277_v33  ;;  %v3315_v7 = vmul.f32 3.8918573e-05, %v7867_v2  ;;  %vm3051_vm4 = vweird.f32 %v7816_v43  ;;  %v3148_v56 = vmul.f32 %v3147_v57, %v7650_v21 }
 0x85d   :  { %v7886_v41 = vpop.eup %5005  ;;  %v3266_v11 = vmul.f32 %v3265_v35, %v7829_v6  ;;  %v3072_v48 = vmul.f32 %v3071_v25, %v7600_v22  ;;  %v3109_v15 = vadd.f32 0.05243302, %v3108_v62  ;;  %v3226_v36 = vmul.f32 %v3225_v54, %v7761_v51  ;;  %vm7916_vm5 = vmor %vm3050_vm2, %vm3051_vm4 }
 0x85e   :  { %v3305_v4 = vadd.f32 0.00028619796, %v3304_v28  ;;  %v3086_v63 = vmul.f32 %v7882_v31, %v7833_v59  ;;  %5007 = vrcp.f32 %v7878_v1  ;;  %v7897_v33 = vadd.f32 1.0, %v3243_v5 }
 0x85f   :  { %v3279_v14 = vmul.f32 %v3278_v32, %v7829_v6  ;;  %v7901_v18 = vadd.f32 %v7816_v43, %v3048_v16  ;;  %v3188_v35 = vmul.f32 %v3187_v8, %v7726_v53  ;;  %v7904_v57 = vadd.f32 1.0, %v3203_v50 }
 0x860   :  { %v3316_v62 = vadd.f32 0.001143296, %v3315_v7  ;;  %v3126_v22 = vmul.f32 %v7886_v41, %v7839_v3  ;;  %v3149_v25 = vadd.f32 0.05243302, %v3148_v56  ;;  %v3267_v54 = vadd.f32 0.0036580483, %v3266_v11 }
 0x861   :  { %v3280_v28 = vadd.f32 0.112945676, %v3279_v14  ;;  %v7908_v9 = vadd.f32 1.1283791, %v3072_v48  ;;  %v3227_v5 = vadd.f32 0.0036580483, %v3226_v36  ;;  %v3306_v12 = vmul.f32 %v3305_v4, %v7867_v2 }
 0x862   :  { %v3317_v32 = vmul.f32 %v3316_v62, %v7867_v2  ;;  %v3087_v8 = vsub.f32 1.0, %v3086_v63  ;;  %v3110_v50 = vmul.f32 %v3109_v15, %v7605_v30  ;;  %5009 = vrcp.f32 %v7897_v33 }
 0x863   :  { %v3281_v14 = vmul.f32 %v3280_v28, %v7829_v6  ;;  %v3189_v7 = vadd.f32 0.05243302, %v3188_v35  ;;  %5011 = vrcp.f32 %v7904_v57  ;;  %v3096_v48 = vand.u32 2147483648, %v7833_v59 }
 0x864   :  { %v3318_v56 = vadd.f32 0.014752088, %v3317_v32  ;;  %v7928_v11 = vpop.eup %5007  ;;  %v3127_v36 = vsub.f32 1.0, %v3126_v22  ;;  %v3150_v15 = vmul.f32 %v3149_v25, %v7650_v21  ;;  %v3268_v63 = vmul.f32 %v3267_v54, %v7829_v6 }
 0x865   :  { %v3228_v62 = vmul.f32 %v3227_v5, %v7761_v51  ;;  %v3282_v28 = vadd.f32 0.4994258, %v3281_v14  ;;  %v3307_v44 = vadd.f32 0.0036580483, %v3306_v12  ;;  %v3088_v35 = vmul.f32 %v7882_v31, %v3087_v8 }
 0x866   :  { %v3319_v55 = vmul.f32 %v3318_v56, %v7867_v2  ;;  %vm3090_vm7 = vweird.f32 %v7833_v59  ;;  %v3111_v4 = vadd.f32 0.18741608, %v3110_v50  ;;  %v3166_v22 = vmul.f32 %v7928_v11, %v7878_v1 }
 0x867   :  { %v3190_v25 = vmul.f32 %v3189_v7, %v7726_v53  ;;  %v3283_v54 = vmul.f32 %v3282_v28, %v7829_v6  ;;  %v7944_v12 = vor.u32 1.1754944e-38, %v3096_v48  ;;  %v3128_v14 = vmul.f32 %v7886_v41, %v3127_v36 }
 0x868   :  { %v3320_v13 = vadd.f32 0.112945676, %v3319_v55  ;;  %v7942_v5 = vpop.eup %5009  ;;  %v3151_v8 = vadd.f32 0.18741608, %v3150_v15  ;;  %v3269_v56 = vadd.f32 0.05243302, %v3268_v63  ;;  %v3308_v58 = vmul.f32 %v3307_v44, %v7867_v2 }
 0x869   :  { %v7947_v17 = vpop.eup %5011  ;;  %v3229_v32 = vadd.f32 0.05243302, %v3228_v62  ;;  %v7949_v50 = vadd.f32 1.0, %v3283_v54  ;;  %v7954_v28 = vadd.f32 %v7882_v31, %v3088_v35  ;;  %vm3091_vm9 = vweird.f32 %v7882_v31 }
 0x86a   :  { %v3321_v7 = vmul.f32 %v3320_v13, %v7867_v2  ;;  %v3112_v55 = vmul.f32 %v3111_v4, %v7605_v30  ;;  %v3136_v48 = vand.u32 2147483648, %v7839_v3  ;;  %v3167_v36 = vsub.f32 1.0, %v3166_v22  ;;  %vm7968_vm13 = vmor %vm3090_vm7, %vm3091_vm9 }
 0x86b   :  { %v3191_v15 = vadd.f32 0.18741608, %v3190_v25  ;;  %v3246_v63 = vmul.f32 %v7942_v5, %v7897_v33  ;;  %5013 = vrcp.f32 %v7949_v50  ;;  %vm3131_vm12 = vweird.f32 %v7886_v41 }
 0x86c   :  { %v3206_v44 = vmul.f32 %v7947_v17, %v7904_v57  ;;  %v3270_v13 = vmul.f32 %v3269_v56, %v7829_v6  ;;  %v3322_v62 = vadd.f32 0.4994258, %v3321_v7  ;;  %v7973_v4 = vadd.f32 %v7886_v41, %v3128_v14 }
 0x86d   :  { %v3152_v35 = vmul.f32 %v3151_v8, %v7650_v21  ;;  %v3230_v22 = vmul.f32 %v3229_v32, %v7761_v51  ;;  %v3309_v25 = vadd.f32 0.05243302, %v3308_v58  ;;  %v7981_v56 = vadd.f32 1.1283791, %v3112_v55 }
 0x86e   :  { %vm3130_vm2 = vweird.f32 %v7839_v3  ;;  %v3323_v7 = vmul.f32 %v3322_v62, %v7867_v2  ;;  %v3168_v14 = vmul.f32 %v7928_v11, %v3167_v36  ;;  %v3192_v21 = vmul.f32 %v3191_v15, %v7726_v53 }
 0x86f   :  { %v3247_v8 = vsub.f32 1.0, %v3246_v63  ;;  %vm7990_vm4 = vmor %vm3130_vm2, %vm3131_vm12  ;;  %v7994_v32 = vor.u32 1.1754944e-38, %v3136_v48  ;;  %v3207_v55 = vsub.f32 1.0, %v3206_v44  ;;  %v3271_v54 = vadd.f32 0.18741608, %v3270_v13 }
 0x870   :  { %v7996_v29 = vadd.f32 1.0, %v3323_v7  ;;  %v8002_v53 = vadd.f32 1.1283791, %v3152_v35  ;;  %v3231_v15 = vadd.f32 0.18741608, %v3230_v22  ;;  %v3310_v63 = vmul.f32 %v3309_v25, %v7867_v2 }
 0x871   :  { %v5014_v62 = vpop.eup %5013  ;;  %v3174_v24 = vand.u32 2147483647, %v7878_v1  ;;  %v3176_v48 = vand.u32 2147483648, %v7878_v1  ;;  %v8010_v13 = vadd.f32 %v7928_v11, %v3168_v14  ;;  %v3193_v7 = vadd.f32 1.1283791, %v3192_v21 }
 0x872   :  { %v3286_v44 = vmul.f32 %v5014_v62, %v7949_v50  ;;  %5015 = vrcp.f32 %v7996_v29  ;;  %v3248_v35 = vmul.f32 %v7942_v5, %v3247_v8  ;;  %v3208_v22 = vmul.f32 %v7947_v17, %v3207_v55 }
 0x873   :  { %v3272_v25 = vmul.f32 %v3271_v54, %v7829_v6  ;;  %v3214_v60 = vand.u32 2147483647, %v7904_v57  ;;  %v3232_v14 = vmul.f32 %v3231_v15, %v7761_v51  ;;  %v3311_v23 = vadd.f32 0.18741608, %v3310_v63 }
 0x874   :  { %v3287_v36 = vsub.f32 1.0, %v3286_v44  ;;  %v3254_v21 = vand.u32 2147483647, %v7897_v33  ;;  %vm3291_vm8 = vweird.f32 %v5014_v62  ;;  %v3296_v8 = vand.u32 2147483648, %v7949_v50 }
 0x875   :  { %v3249_v55 = vadd.f32 %v7942_v5, %v3248_v35  ;;  %v3256_v6 = vand.u32 2147483648, %v7897_v33  ;;  %v3294_v54 = vand.u32 2147483647, %v7949_v50  ;;  %v3209_v39 = vadd.f32 %v7947_v17, %v3208_v22 }
 0x876   :  { %v3288_v20 = vmul.f32 %v5014_v62, %v3287_v36  ;;  %v3273_v52 = vadd.f32 1.1283791, %v3272_v25  ;;  %vm3290_vm7 = vweird.f32 %v7949_v50  ;;  %vm8029_vm12 = vcmp.eq.f32.partialorder %v3174_v24, 8.507059e+37 }
 0x877   :  { %v3216_v15 = vand.u32 2147483648, %v7904_v57  ;;  %vm3250_vm2 = vweird.f32 %v7897_v33  ;;  %vm8035_vm9 = vmor %vm3290_vm7, %vm3291_vm8  ;;  %v3312_v35 = vmul.f32 %v3311_v23, %v7867_v2  ;;  %v3233_v25 = vadd.f32 1.1283791, %v3232_v14 }
 0x878   :  { %v5016_v44 = vpop.eup %5015  ;;  %v3289_v51 = vadd.f32 %v5014_v62, %v3288_v20  ;;  %vm9695_vm0 = vweird.f32 %v7942_v5  ;;  %vm8047_vm11 = vcmp.eq.f32.partialorder %v3254_v21, 8.507059e+37  ;;  %v3297_v50 = vor.u32 1.1754944e-38, %v3296_v8 }
 0x879   :  { %v3326_v22 = vmul.f32 %v5016_v44, %v7996_v29  ;;  %vm8043_vm3 = vmor %vm3250_vm2, %vm9695_vm0  ;;  %vm9700_vm8 = vweird.f32 %v7947_v17  ;;  %vm9701_vm7 = vweird.f32 %v7904_v57  ;;  %v3257_v14 = vor.u32 1.1754944e-38, %v3256_v6 }
 0x87a   :  { %v3293_v33 = vsel %vm8035_vm9, %v5014_v62, %v3289_v51  ;;  %vm8057_vm14 = vmor %vm9701_vm7, %vm9700_vm8  ;;  %v3253_v23 = vsel %vm8043_vm3, %v7942_v5, %v3249_v55  ;;  %vm3295_vm0 = vcmp.eq.f32.partialorder %v3294_v54, 8.507059e+37  ;;  %v3274_v8 = vmul.f32 %v3273_v52, %v7811_v49 }
 0x87b   :  { %v3327_v21 = vsub.f32 1.0, %v3326_v22  ;;  %v3213_v62 = vsel %vm8057_vm14, %v7947_v17, %v3209_v39  ;;  %v3298_v51 = vsel %vm3295_vm0, %v3297_v50, %v3293_v33  ;;  %v3336_v57 = vand.u32 2147483648, %v7996_v29 }
 0x87c   :  { %vm9704_vm9 = vweird.f32 %v7928_v11  ;;  %vm9705_vm2 = vweird.f32 %v7878_v1  ;;  %v3313_v5 = vadd.f32 1.1283791, %v3312_v35  ;;  %vm3331_vm3 = vweird.f32 %v5016_v44 }
 0x87d   :  { %vm8073_vm8 = vmor %vm9705_vm2, %vm9704_vm9  ;;  %v3328_v55 = vmul.f32 %v5016_v44, %v3327_v21  ;;  %v3334_v6 = vand.u32 2147483647, %v7996_v29  ;;  %vm3215_vm14 = vcmp.eq.f32.partialorder %v3214_v60, 8.507059e+37  ;;  %v3217_v52 = vor.u32 1.1754944e-38, %v3216_v15 }
 0x87e   :  { %v3173_v49 = vsel %vm8073_vm8, %v7928_v11, %v8010_v13  ;;  %v3258_v17 = vsel %vm8047_vm11, %v3257_v14, %v3253_v23  ;;  %v9708_v39 = vand.u32 2147483647, %v7704_v38  ;;  %v3234_v54 = vmul.f32 %v3233_v25, %v7740_v61 }
 0x87f   :  { %v3299_v35 = vmul.f32 %v3298_v51, %v3274_v8  ;;  %v3329_v22 = vadd.f32 %v5016_v44, %v3328_v55  ;;  %vm3330_vm0 = vweird.f32 %v7996_v29  ;;  %v3177_v20 = vor.u32 1.1754944e-38, %v3176_v48 }
 0x880   :  { %vm8086_vm7 = vcmp.eq.f32.partialorder %v9708_v39, 8.507059e+37  ;;  %v3194_v11 = vmul.f32 %v3193_v7, %v7707_v10  ;;  %v3218_v60 = vsel %vm3215_vm14, %v3217_v52, %v3213_v62  ;;  %vm3332_vm9 = vmor %vm3330_vm0, %vm3331_vm3  ;;  %v3337_v13 = vor.u32 1.1754944e-38, %v3336_v57  ;;  %v9736_v52 = vld [vmem:[#allocation86_spill] sm:$0xff] }
 0x881   :  { %v9711_v15 = vand.u32 2147483647, %v7624_v47  ;;  %v3259_v33 = vmul.f32 %v3258_v17, %v3234_v54  ;;  %v3314_v50 = vmul.f32 %v3313_v5, %v7837_v40  ;;  %v3333_v61 = vsel %vm3332_vm9, %v5016_v44, %v3329_v22  ;;  %v9737_v54 = vld [vmem:[#allocation47_spill] sm:$0xff] }
 0x882   :  { %vm3335_vm2 = vcmp.eq.f32.partialorder %v3334_v6, 8.507059e+37  ;;  %v9714_v25 = vand.u32 2147483647, %v7839_v3  ;;  %v3154_v10 = vmul.f32 %v8002_v53, %v7629_v19  ;;  %v3178_v29 = vsel %vm8029_vm12, %v3177_v20, %v3173_v49  ;;  %v9735_v49 = vld [vmem:[#allocation51_spill] sm:$0xff] }
 0x883   :  { %vm8095_vm11 = vcmp.eq.f32.partialorder %v9711_v15, 8.507059e+37  ;;  %v3338_v48 = vsel %vm3335_vm2, %v3337_v13, %v3333_v61  ;;  %v9715_v7 = vand.u32 2147483647, %v7592_v45  ;;  %v9718_v40 = vsel %vm7990_vm4, %v7886_v41, %v7973_v4  ;;  %v9744_v15 = vld [vmem:[#allocation72_spill] sm:$0xff] }
 0x884   :  { %vm3135_vm8 = vcmp.eq.f32.partialorder %v9714_v25, 8.507059e+37  ;;  %v3219_v44 = vmul.f32 %v3218_v60, %v3194_v11  ;;  %v3339_v23 = vmul.f32 %v3338_v48, %v3314_v50  ;;  %v4796_v19 = vclamps-f32 %v3299_v35, 1.0  ;;  %v9747_v25 = vld [vmem:[#allocation7_spill] sm:$0xff] }
 0x885   :  { %vm8108_vm3 = vcmp.eq.f32.partialorder %v9715_v7, 8.507059e+37  ;;  %v3138_v3 = vsel %vm3135_vm8, %v7994_v32, %v9718_v40  ;;  %v9719_v53 = vand.u32 2147483647, %v7753_v37  ;;  %v9720_v36 = vand.u32 2147483648, %v7753_v37  ;;  %v9749_v7 = vld [vmem:[#allocation29_spill] sm:$0xff] }
 0x886   :  { %v9721_v21 = vand.u32 2147483647, %v7833_v59  ;;  %v3114_v58 = vmul.f32 %v7981_v56, %v7551_v34  ;;  %v9722_v62 = vand.u32 2147483647, %v7527_v0  ;;  %v9725_v4 = vsel %vm7968_vm13, %v7882_v31, %v7954_v28 }
 0x887   :  { %vm3055_vm12 = vcmp.eq.f32.partialorder %v9719_v53, 8.507059e+37  ;;  %v3057_v14 = vor.u32 1.1754944e-38, %v9720_v36  ;;  %v3179_v32 = vmul.f32 %v3178_v29, %v3154_v10  ;;  %v4797_v8 = vclamps-f32 %v3339_v23, 1.0  ;;  %v9748_v10 = vld [vmem:[#allocation84_spill] sm:$0xff] }
 0x888   :  { %vm3095_vm14 = vcmp.eq.f32.partialorder %v9721_v21, 8.507059e+37  ;;  %vm8128_vm4 = vcmp.eq.f32.partialorder %v9722_v62, 8.507059e+37  ;;  %v4795_v59 = vclamps-f32 %v3259_v33, 1.0  ;;  %v9726_v51 = vand.u32 2147483648, %v7704_v38  ;;  %v9745_v33 = vld [vmem:[#allocation80_spill] sm:$0xff]  ;;  %v9756_v21 = vld [vmem:[#allocation67_spill] sm:$0xff] }
 0x889   :  { %v3098_v37 = vsel %vm3095_vm14, %v7944_v12, %v9725_v4  ;;  %v9727_v34 = vsel %vm7916_vm5, %v7816_v43, %v7901_v18  ;;  %v3074_v30 = vmul.f32 %v7908_v9, %v7544_v46  ;;  %v3139_v63 = vmul.f32 %v3138_v3, %v3114_v58  ;;  %v9732_v43 = vld [vmem:[#allocation79_spill] sm:$0xff]  ;;  %v9733_v18 = vld [vmem:[#allocation85_spill] sm:$0xff] }
 0x88a   :  { %v3017_v57 = vor.u32 1.1754944e-38, %v9726_v51  ;;  %v3058_v56 = vsel %vm3055_vm12, %v3057_v14, %v9727_v34  ;;  %v9728_v31 = vand.u32 2147483647, %v7507_v42  ;;  %v2685_v28 = vmul.f32 0.5, %v7822_v26  ;;  %v9757_v58 = vld [vmem:[#allocation77_spill] sm:$0xff]  ;;  %v9761_v51 = vld [vmem:[#allocation35_spill] sm:$0xff] }
 0x88b   :  { %v3357_v38 = vadd.f32 1.0, %v4797_v8  ;;  %v3356_v5 = vadd.f32 1.0, %v4796_v19  ;;  %v4794_v55 = vclamps-f32 %v3219_v44, 1.0  ;;  %v9731_v16 = vand.u32 2147483648, %v7624_v47  ;;  %v9741_v47 = vld [vmem:[#allocation82_spill] sm:$0xff]  ;;  %v9806_v3 = vld [vmem:[#allocation39_spill] sm:$0xff] }
 0x88c   :  { %vm8149_vm13 = vcmp.eq.f32.partialorder %v9728_v31, 8.507059e+37  ;;  %v9734_v46 = vsel %vm7862_vm1, %v9732_v43, %v9733_v18  ;;  %v3034_v17 = vmul.f32 %v9736_v52, %v9735_v49  ;;  %v3099_v39 = vmul.f32 %v3098_v37, %v3074_v30  ;;  %v9759_v37 = vld [vmem:[#allocation44_spill] sm:$0xff]  ;;  %v9771_v43 = vld [vmem:[#allocation26_spill] sm:$0xff]  ;;  %v9772_v18 = vld [vmem:[#allocation75_spill] sm:$0xff] }
 0x88d   :  { %v2977_v6 = vor.u32 1.1754944e-38, %v9731_v16  ;;  %v3018_v9 = vsel %vm8086_vm7, %v3017_v57, %v9734_v46  ;;  %v9738_v26 = vand.u32 2147483647, %v9737_v54  ;;  %v2684_v22 = vmul.f32 0.5, %v9741_v47  ;;  %v9773_v49 = vld [vmem:[#allocation65_spill] sm:$0xff] }
 0x88e   :  { %v3373_v20 = vmul.f32 %v3357_v38, %v2685_v28  ;;  %v3355_v27 = vadd.f32 1.0, %v4795_v59  ;;  %v4793_v11 = vclamps-f32 %v3179_v32, 1.0  ;;  %v9742_v60 = vand.u32 2147483648, %v7592_v45  ;;  %v9753_v45 = vld [vmem:[#allocation76_spill] sm:$0xff]  ;;  %v9760_v32 = vld [vmem:[#allocation78_spill] sm:$0xff] }
 0x88f   :  { %vm8167_vm5 = vcmp.eq.f32.partialorder %v9738_v26, 8.507059e+37  ;;  %v9746_v50 = vsel %vm7793_vm10, %v9744_v15, %v9745_v33  ;;  %v2994_v29 = vmul.f32 %v9748_v10, %v9747_v25  ;;  %v3059_v48 = vmul.f32 %v3058_v56, %v3034_v17  ;;  %v9782_v33 = vld [vmem:[#allocation55_spill] sm:$0xff] }
 0x890   :  { %v2937_v13 = vor.u32 1.1754944e-38, %v9742_v60  ;;  %v2978_v61 = vsel %vm8095_vm11, %v2977_v6, %v9746_v50  ;;  %v9750_v40 = vand.u32 2147483647, %v9749_v7  ;;  %v2683_v44 = vmul.f32 0.5, %v9753_v45  ;;  %3384 = vmatpush.msrb.mxu0 %v3373_v20  ;;  %v9777_v20 = vld [vmem:[#allocation59_spill] sm:$0xff]  ;;  %v9780_v60 = vld [vmem:[#allocation33_spill] sm:$0xff] }
 0x891   :  { %v3372_v23 = vmul.f32 %v3356_v5, %v2684_v22  ;;  %v3354_v19 = vadd.f32 1.0, %v4794_v55  ;;  %v4792_v53 = vclamps-f32 %v3139_v63, 1.0  ;;  %v9754_v36 = vand.u32 2147483648, %v7527_v0  ;;  %v9765_v0 = vld [vmem:[#allocation71_spill] sm:$0xff]  ;;  %v9768_v5 = vld [vmem:[#allocation62_spill] sm:$0xff]  ;;  %v9769_v55 = vld [vmem:[#allocation73_spill] sm:$0xff] }
 0x892   :  { %vm8185_vm1 = vcmp.eq.f32.partialorder %v9750_v40, 8.507059e+37  ;;  %v9758_v62 = vsel %vm7779_vm6, %v9756_v21, %v9757_v58  ;;  %v2954_v8 = vmul.f32 %v9760_v32, %v9759_v37  ;;  %v3019_v59 = vmul.f32 %v3018_v9, %v2994_v29  ;;  %v9775_v22 = vld [vmem:[#allocation69_spill] sm:$0xff]  ;;  %v9787_v45 = vld [vmem:[#allocation64_spill] sm:$0xff] }
 0x893   :  { %v2897_v24 = vor.u32 1.1754944e-38, %v9754_v36  ;;  %v2938_v4 = vsel %vm8108_vm3, %v2937_v13, %v9758_v62  ;;  %v9762_v57 = vand.u32 2147483647, %v9761_v51  ;;  %v2682_v56 = vmul.f32 0.5, %v9765_v0  ;;  %3385 = vmatpush.msrb.mxu0 %v3372_v23  ;;  %v9781_v13 = vld [vmem:[#allocation70_spill] sm:$0xff]  ;;  %v9786_v40 = vld [vmem:[#allocation53_spill] sm:$0xff] }
 0x894   :  { %v3371_v30 = vmul.f32 %v3355_v27, %v2683_v44  ;;  %v3353_v63 = vadd.f32 1.0, %v4793_v11  ;;  %v4791_v31 = vclamps-f32 %v3099_v39, 1.0  ;;  %v9766_v28 = vand.u32 2147483648, %v7507_v42  ;;  %v9778_v27 = vld [vmem:[#allocation68_spill] sm:$0xff]  ;;  %v9789_v23 = vld [vmem:[#allocation41_spill] sm:$0xff] }
 0x895   :  { %vm8203_vm10 = vcmp.eq.f32.partialorder %v9762_v57, 8.507059e+37  ;;  %v9770_v16 = vsel %vm7697_vm15, %v9768_v5, %v9769_v55  ;;  %v2914_v46 = vmul.f32 %v9772_v18, %v9771_v43  ;;  %v2979_v9 = vmul.f32 %v2978_v61, %v2954_v8  ;;  %v9793_v37 = vld [vmem:[#allocation60_spill] sm:$0xff]  ;;  %v9799_v0 = vld [vmem:[#allocation61_spill] sm:$0xff]  ;;  %v9807_v43 = vld [vmem:[#allocation50_spill] sm:$0xff] }
 0x896   :  { %v2857_v2 = vor.u32 1.1754944e-38, %v9766_v28  ;;  %v2898_v6 = vsel %vm8128_vm4, %v2897_v24, %v9770_v16  ;;  %v2681_v52 = vmul.f32 0.5, %v9773_v49  ;;  %3386 = vmatpush.msrb.mxu0 %v3371_v30  ;;  %v3370_v17 = vmul.f32 %v3354_v19, %v2682_v56  ;;  %v9790_v19 = vld [vmem:[#allocation63_spill] sm:$0xff]  ;;  %v9791_v24 = vld [vmem:[#allocation54_spill] sm:$0xff]  ;;  %v9795_v32 = vld [vmem:[#allocation8_spill] sm:$0xff] }
 0x897   :  { %v3352_v39 = vadd.f32 1.0, %v4792_v53  ;;  %v4790_v26 = vclamps-f32 %v3059_v48, 1.0  ;;  %v9774_v42 = vand.u32 2147483648, %v9737_v54  ;;  %vm9776_vm6 = vnez %v9775_v22  ;;  %v9784_v48 = vld [vmem:[#allocation66_spill] sm:$0xff]  ;;  %v9796_v8 = vld [vmem:[#allocation56_spill] sm:$0xff] }
 0x898   :  { %v9779_v11 = vsel %vm9776_vm6, %v9777_v20, %v9778_v27  ;;  %v2874_v1 = vmul.f32 %v9781_v13, %v9780_v60  ;;  %v2939_v15 = vmul.f32 %v2938_v4, %v2914_v46  ;;  %v2680_v50 = vmul.f32 0.5, %v9782_v33  ;;  %3387 = vmatpush.msrb.mxu0 %v3370_v17  ;;  %v9798_v57 = vld [vmem:[#allocation36_spill] sm:$0xff]  ;;  %v9811_v20 = vld [vmem:[#allocation42_spill] sm:$0xff]  ;;  %v9812_v13 = vld [vmem:[#allocation27_spill] sm:$0xff] }
 0x899   :  { %v2817_v47 = vor.u32 1.1754944e-38, %v9774_v42  ;;  %v2858_v41 = vsel %vm8149_vm13, %v2857_v2, %v9779_v11  ;;  %v3369_v61 = vmul.f32 %v3353_v63, %v2681_v52  ;;  %v3351_v25 = vadd.f32 1.0, %v4791_v31  ;;  %v9800_v63 = vld [vmem:[#allocation49_spill] sm:$0xff]  ;;  %v9803_v5 = vld [vmem:[#allocation28_spill] sm:$0xff] }
 0x89a   :  { %v4789_v10 = vclamps-f32 %v3019_v59, 1.0  ;;  %v9783_v54 = vand.u32 2147483648, %v9749_v7  ;;  %vm9785_vm15 = vnez %v9784_v48  ;;  %v2834_v53 = vmul.f32 %v9790_v19, %v9789_v23  ;;  %v9804_v55 = vld [vmem:[#allocation48_spill] sm:$0xff]  ;;  %v9810_v42 = vld [vmem:[#allocation5_spill] sm:$0xff]  ;;  %v9814_v48 = vld [vmem:[#allocation46_spill] sm:$0xff] }
 0x89b   :  { %v9788_v44 = vsel %vm9785_vm15, %v9786_v40, %v9787_v45  ;;  %v2899_v36 = vmul.f32 %v2898_v6, %v2874_v1  ;;  %v2679_v14 = vmul.f32 0.5, %v9791_v24  ;;  %3388 = vmatpush.msrb.mxu0 %v3369_v61  ;;  %v3368_v21 = vmul.f32 %v3352_v39, %v2680_v50  ;;  %v9813_v61 = vld [vmem:[#allocation43_spill] sm:$0xff]  ;;  %v9815_v23 = vld [vmem:[#allocation45_spill] sm:$0xff]  ;;  %v9816_v24 = vld [vmem:[#allocation30_spill] sm:$0xff] }
 0x89c   :  { %v2777_v29 = vor.u32 1.1754944e-38, %v9783_v54  ;;  %v2818_v12 = vsel %vm8167_vm5, %v2817_v47, %v9788_v44  ;;  %v3350_v58 = vadd.f32 1.0, %v4790_v26  ;;  %v4788_v62 = vclamps-f32 %v2979_v9, 1.0  ;;  %v9808_v9 = vld [vmem:[#allocation6_spill] sm:$0xff] }
 0x89d   :  { %v9792_v7 = vand.u32 2147483648, %v9761_v51  ;;  %vm9794_vm7 = vnez %v9793_v37  ;;  %v2794_v56 = vmul.f32 %v9799_v0, %v9798_v57  ;;  %v2859_v30 = vmul.f32 %v2858_v41, %v2834_v53  ;;  %3389 = vmatpush.msrb.mxu0 %v3368_v21  ;;  %v9801_v51 = vld [vmem:[#allocation52_spill] sm:$0xff]  ;;  %v9809_v26 = vld [vmem:[#allocation38_spill] sm:$0xff]  ;;  %v9819_v57 = vld [vmem:[#allocation57_spill] sm:$0xff] }
 0x89e   :  { %v9797_v59 = vsel %vm9794_vm7, %v9795_v32, %v9796_v8  ;;  %v2678_v31 = vmul.f32 0.5, %v9800_v63  ;;  %v3367_v28 = vmul.f32 %v3351_v25, %v2679_v14  ;;  %v3349_v2 = vadd.f32 1.0, %v4789_v10  ;;  %v4762_v32 = vld [vmem:[%s9265_s7 + $0x10] sm:$0xff]  ;;  %v4763_v63 = vld [vmem:[%s9265_s7 + $0x18] sm:$0xff] }
 0x89f   :  { %v2737_v4 = vor.u32 1.1754944e-38, %v9792_v7  ;;  %v2778_v35 = vsel %vm8185_vm1, %v2777_v29, %v9797_v59  ;;  %v4787_v38 = vclamps-f32 %v2939_v15, 1.0  ;;  %vm9802_vm0 = vnez %v9801_v51  ;;  %v9818_v59 = vld [vmem:[#allocation20_spill] sm:$0xff] }
 0x8a0   :  { %v9805_v16 = vsel %vm9802_vm0, %v9803_v5, %v9804_v55  ;;  %v2754_v18 = vmul.f32 %v9807_v43, %v9806_v3  ;;  %v2819_v46 = vmul.f32 %v2818_v12, %v2794_v56  ;;  %v2677_v49 = vmul.f32 0.5, %v9808_v9  ;;  %3390 = vmatpush.msrb.mxu0 %v3367_v28  ;;  %v9820_v56 = vld [vmem:[#allocation58_spill] sm:$0xff] }
 0x8a1   :  { %v2738_v6 = vsel %vm8203_vm10, %v2737_v4, %v9805_v16  ;;  %v3366_v52 = vmul.f32 %v3350_v58, %v2678_v31  ;;  %v3348_v17 = vadd.f32 1.0, %v4788_v62  ;;  %v4786_v39 = vclamps-f32 %v2899_v36, 1.0  ;;  %v9817_v62 = vld [vmem:[#allocation40_spill] sm:$0xff]  ;;  %v9822_v43 = vld [vmem:[#allocation18_spill] sm:$0xff] }
 0x8a2   :  { %v2714_v47 = vmul.f32 %v9810_v42, %v9809_v26  ;;  %v2779_v22 = vmul.f32 %v2778_v35, %v2754_v18  ;;  %v2676_v27 = vmul.f32 0.5, %v9811_v20  ;;  %v3365_v11 = vmul.f32 %v3349_v2, %v2677_v49  ;;  %v9821_v2 = vld [vmem:[#allocation10_spill] sm:$0xff] }
 0x8a3   :  { %3391 = vmatpush.msrb.mxu0 %v3366_v52  ;;  %v3347_v34 = vadd.f32 1.0, %v4787_v38  ;;  %v4785_v41 = vclamps-f32 %v2859_v30, 1.0  ;;  %v2675_v1 = vmul.f32 0.5, %v9812_v13  ;;  %v3346_v33 = vadd.f32 1.0, %v4786_v39 }
 0x8a4   :  { %v2739_v60 = vmul.f32 %v2738_v6, %v2714_v47  ;;  %v3364_v15 = vmul.f32 %v3348_v17, %v2676_v27  ;;  %v4784_v50 = vclamps-f32 %v2819_v46, 1.0  ;;  %v2674_v25 = vmul.f32 0.5, %v9813_v61  ;;  %v5076_v46 = vld [vmem:[%s9263_s5 + $0x80] sm:$0xff] }
 0x8a5   :  { %3392 = vmatpush.msrb.mxu0 %v3365_v11  ;;  %v3363_v10 = vmul.f32 %v3347_v34, %v2675_v1  ;;  %v3345_v54 = vadd.f32 1.0, %v4785_v41  ;;  %v4783_v29 = vclamps-f32 %v2779_v22, 1.0  ;;  %v2673_v40 = vmul.f32 0.5, %v9814_v48  ;;  %v9824_v11 = vld [vmem:[#allocation17_spill] sm:$0xff] }
 0x8a6   :  { %v3362_v45 = vmul.f32 %v3346_v33, %v2674_v25  ;;  %v3344_v44 = vadd.f32 1.0, %v4784_v50  ;;  %v4782_v12 = vclamps-f32 %v2739_v60, 1.0  ;;  %v2672_v19 = vmul.f32 0.5, %v9815_v23  ;;  %v5077_v41 = vld [vmem:[%s9263_s5 + $0x88] sm:$0xff] }
 0x8a7   :  { %3393 = vmatpush.msrb.mxu0 %v3364_v15  ;;  %v3361_v53 = vmul.f32 %v3345_v54, %v2673_v40  ;;  %v3343_v36 = vadd.f32 1.0, %v4783_v29  ;;  %v2671_v14 = vmul.f32 0.5, %v9816_v24  ;;  %v2670_v7 = vmul.f32 0.5, %v9817_v62 }
 0x8a8   :  { %v3360_v21 = vmul.f32 %v3344_v44, %v2672_v19  ;;  %v3342_v58 = vadd.f32 1.0, %v4782_v12  ;;  %vm9823_vm9 = vcmask 130048  }
 0x8a9   :  { %3394 = vmatpush.msrb.mxu0 %v3363_v10  ;;  %v3359_v4 = vmul.f32 %v3343_v36, %v2671_v14  ;;  %vm9825_vm11 = vmmov %vm9823_vm9  ;;  %v5078_v14 = vld [vmem:[%s9263_s5 + $0x90] sm:$0xff] }
 0x8aa   :  { %v3358_v37 = vmul.f32 %v3342_v58, %v2670_v7  ;;  %v3457_v8 = vpop.f32.mrf.mxu3  ;;  %vm9827_vm2 = vmmov %vm9823_vm9 }
 0x8ab   :  { %3395 = vmatpush.msrb.mxu0 %v3362_v45  ;;  %v8279_v35 = vadd.f32 %v3457_v8, %v9818_v59  ;;  %vm9828_vm8 = vmmov %vm9827_vm2 }
 0x8ac   :  { %vm9829_vm3 = vmmov %vm9827_vm2 }
 0x8ad   :  { %3396 = vmatpush.msrb.mxu0 %v3361_v53  ;;  %v8283_v0 = vmul.f32 0.70710677, %v8279_v35  ;;  %v9826_v53 = vld [vmem:[#allocation22_spill] sm:$0xff]  ;;  %vm9830_vm12 = vmmov %vm9827_vm2 }
 0x8ae   :  { %vm9831_vm4 = vmmov %vm9827_vm2 }
 0x8af   :  { %3397 = vmatpush.msrb.mxu0 %v3360_v21  ;;  %v3944_v30 = vmul.f32 %v8283_v0, %v8283_v0 }
 0x8b1   :  { %3398 = vmatpush.msrb.mxu0 %v3359_v4  ;;  %v8291_v31 = vmin.f32 %v3944_v30, 16.0 }
 0x8b2   :  { %v3460_v28 = vpop.f32.mrf.mxu3 }
 0x8b3   :  { %3399 = vmatpush.msrb.mxu0 %v3358_v37  ;;  %v8294_v38 = vadd.f32 %v3460_v28, %v9821_v2  ;;  %v3957_v5 = vmul.f32 3.8918573e-05, %v8291_v31  ;;  %v3946_v27 = vmul.f32 2.1237322e-06, %v8291_v31 }
 0x8b4   :  { %3400 = vmatmul.f32.vlgmr.msrb.gmra.mxu0 %v4762_v32 }
 0x8b5   :  { %3421 = vmatpush.msra.mxu0 %v9819_v57  ;;  %v8297_v51 = vmul.f32 0.70710677, %v8294_v38  ;;  %v3958_v16 = vadd.f32 0.001143296, %v3957_v5  ;;  %v3947_v25 = vadd.f32 0.00028619796, %v3946_v27 }
 0x8b7   :  { %3422 = vmatpush.msra.mxu0 %v9820_v56  ;;  %v3984_v55 = vmul.f32 %v8297_v51, %v8297_v51  ;;  %v3959_v9 = vmul.f32 %v3958_v16, %v8291_v31  ;;  %v3948_v19 = vmul.f32 %v3947_v25, %v8291_v31 }
 0x8b9   :  { %v8302_v6 = vmin.f32 %v3984_v55, 16.0  ;;  %v3960_v26 = vadd.f32 0.014752088, %v3959_v9  ;;  %v3949_v59 = vadd.f32 0.0036580483, %v3948_v19 }
 0x8ba   :  { %v3463_v3 = vpop.f32.mrf.mxu3 }
 0x8bb   :  { %v8305_v18 = vadd.f32 %v3463_v3, %v9822_v43  ;;  %v3997_v52 = vmul.f32 3.8918573e-05, %v8302_v6  ;;  %v3986_v42 = vmul.f32 2.1237322e-06, %v8302_v6  ;;  %v3961_v13 = vmul.f32 %v3960_v26, %v8291_v31 }
 0x8bc   :  { %3403 = vmatmul.f32.gmra.mxu0 %v4763_v63 }
 0x8bd   :  { %v8313_v49 = vmul.f32 0.70710677, %v8305_v18  ;;  %v3998_v39 = vadd.f32 0.001143296, %v3997_v52  ;;  %v3987_v1 = vadd.f32 0.00028619796, %v3986_v42 }
 0x8be   :  { %v3962_v48 = vadd.f32 0.112945676, %v3961_v13 }
 0x8bf   :  { %v4024_v17 = vmul.f32 %v8313_v49, %v8313_v49  ;;  %v3999_v20 = vmul.f32 %v3998_v39, %v8302_v6  ;;  %v3988_v40 = vmul.f32 %v3987_v1, %v8302_v6  ;;  %v5079_v39 = vld [vmem:[%s9263_s5 + $0x98] sm:$0xff] }
 0x8c0   :  { %v3963_v62 = vmul.f32 %v3962_v48, %v8291_v31 }
 0x8c1   :  { %v8319_v47 = vmin.f32 %v4024_v17, 16.0  ;;  %v4000_v60 = vadd.f32 0.014752088, %v3999_v20  ;;  %v3989_v7 = vadd.f32 0.0036580483, %v3988_v40  ;;  %v3950_v17 = vmul.f32 %v3949_v59, %v8291_v31 }
 0x8c2   :  { %v3466_v22 = vpop.f32.mrf.mxu3  ;;  %v3964_v2 = vadd.f32 0.4994258, %v3963_v62 }
 0x8c3   :  { %v8324_v34 = vadd.f32 %v3466_v22, %v9824_v11  ;;  %v4026_v15 = vmul.f32 2.1237322e-06, %v8319_v47  ;;  %v4037_v50 = vmul.f32 3.8918573e-05, %v8319_v47  ;;  %v4001_v61 = vmul.f32 %v4000_v60, %v8302_v6 }
 0x8c4   :  { %4798 = vmatmul.msk.f32.vlgmr.msra.gmra.mxu0 %vm9823_vm9, %v5076_v46  ;;  %v3990_v5 = vmul.f32 %v3989_v7, %v8302_v6  ;;  %v3965_v22 = vmul.f32 %v3964_v2, %v8291_v31  ;;  %v3951_v25 = vadd.f32 0.05243302, %v3950_v17 }
 0x8c5   :  { %v8333_v33 = vmul.f32 0.70710677, %v8324_v34  ;;  %v4038_v54 = vadd.f32 0.001143296, %v4037_v50  ;;  %v4002_v29 = vadd.f32 0.112945676, %v4001_v61 }
 0x8c6   :  { %v4027_v45 = vadd.f32 0.00028619796, %v4026_v15  ;;  %v3991_v20 = vadd.f32 0.05243302, %v3990_v5 }
 0x8c7   :  { %v4064_v10 = vmul.f32 %v8333_v33, %v8333_v33  ;;  %v4039_v23 = vmul.f32 %v4038_v54, %v8319_v47  ;;  %v4003_v24 = vmul.f32 %v4002_v29, %v8302_v6  ;;  %v8385_v29 = vadd.f32 1.0, %v3965_v22 }
 0x8c8   :  { %v4028_v37 = vmul.f32 %v4027_v45, %v8319_v47  ;;  %v3992_v48 = vmul.f32 %v3991_v20, %v8302_v6 }
 0x8c9   :  { %v8340_v44 = vmin.f32 %v4064_v10, 16.0  ;;  %v4040_v58 = vadd.f32 0.014752088, %v4039_v23  ;;  %v4004_v30 = vadd.f32 0.4994258, %v4003_v24  ;;  %v3952_v24 = vmul.f32 %v3951_v25, %v8291_v31 }
 0x8ca   :  { %v3469_v12 = vpop.f32.mrf.mxu3  ;;  %v4029_v16 = vadd.f32 0.0036580483, %v4028_v37  ;;  %v3976_v25 = vand.u32 2147483647, %v8385_v29  ;;  %vm3972_vm13 = vweird.f32 %v8385_v29 }
 0x8cb   :  { %v8345_v36 = vadd.f32 %v3469_v12, %v9826_v53  ;;  %v4066_v21 = vmul.f32 2.1237322e-06, %v8340_v44  ;;  %v4077_v32 = vmul.f32 3.8918573e-05, %v8340_v44  ;;  %v4041_v8 = vmul.f32 %v4040_v58, %v8319_v47 }
 0x8cc   :  { %4799 = vmatmul.msk.f32.gmra.mxu0 %vm9825_vm11, %v5077_v41  ;;  %v4005_v52 = vmul.f32 %v4004_v30, %v8302_v6  ;;  %v4030_v41 = vmul.f32 %v4029_v16, %v8319_v47  ;;  %v3993_v58 = vadd.f32 0.18741608, %v3992_v48 }
 0x8cd   :  { %v8355_v4 = vmul.f32 0.70710677, %v8345_v36  ;;  %v4067_v57 = vadd.f32 0.00028619796, %v4066_v21  ;;  %v4078_v63 = vadd.f32 0.001143296, %v4077_v32 }
 0x8ce   :  { %v4042_v28 = vadd.f32 0.112945676, %v4041_v8  ;;  %v8381_v61 = vadd.f32 1.0, %v4005_v52  ;;  %v4031_v45 = vadd.f32 0.05243302, %v4030_v41 }
 0x8cf   :  { %v4104_v56 = vmul.f32 %v8355_v4, %v8355_v4  ;;  %v4079_v3 = vmul.f32 %v4078_v63, %v8340_v44  ;;  %v4068_v46 = vmul.f32 %v4067_v57, %v8340_v44 }
 0x8d0   :  { %v4043_v43 = vmul.f32 %v4042_v28, %v8319_v47  ;;  %v4032_v37 = vmul.f32 %v4031_v45, %v8319_v47  ;;  %v3994_v28 = vmul.f32 %v3993_v58, %v8302_v6  ;;  %v5081_v6 = vld [vmem:[%s9263_s5 + $0xa8] sm:$0xff]  ;;  %vm4012_vm14 = vweird.f32 %v8381_v61 }
 0x8d1   :  { %v8363_v55 = vmin.f32 %v4104_v56, 16.0  ;;  %v4080_v26 = vadd.f32 0.014752088, %v4079_v3  ;;  %v4069_v1 = vadd.f32 0.0036580483, %v4068_v46 }
 0x8d2   :  { %v4044_v42 = vadd.f32 0.4994258, %v4043_v43  ;;  %v3953_v56 = vadd.f32 0.18741608, %v3952_v24  ;;  %v4033_v3 = vadd.f32 0.18741608, %v4032_v37 }
 0x8d3   :  { %v4106_v9 = vmul.f32 2.1237322e-06, %v8363_v55  ;;  %v4117_v11 = vmul.f32 3.8918573e-05, %v8363_v55  ;;  %v4081_v60 = vmul.f32 %v4080_v26, %v8340_v44  ;;  %v4070_v23 = vmul.f32 %v4069_v1, %v8340_v44 }
 0x8d4   :  { %4800 = vmatmul.msk.f32.gmra.mxu0 %vm9827_vm2, %v5078_v14  ;;  %v4045_v13 = vmul.f32 %v4044_v42, %v8319_v47  ;;  %v5080_v14 = vld [vmem:[%s9263_s5 + $0xa0] sm:$0xff]  ;;  %v3954_v52 = vmul.f32 %v3953_v56, %v8291_v31  ;;  %v4034_v20 = vmul.f32 %v4033_v3, %v8319_v47  ;;  %v3978_v1 = vand.u32 2147483648, %v8385_v29 }
 0x8d5   :  { %v4107_v27 = vadd.f32 0.00028619796, %v4106_v9  ;;  %v4118_v50 = vadd.f32 0.001143296, %v4117_v11  ;;  %v4082_v10 = vadd.f32 0.112945676, %v4081_v60 }
 0x8d6   :  { %v8383_v54 = vadd.f32 1.0, %v4045_v13  ;;  %v4071_v32 = vadd.f32 0.05243302, %v4070_v23  ;;  %v8431_v60 = vadd.f32 1.1283791, %v3954_v52  ;;  %v5082_v23 = vld [vmem:[%s9263_s5 + $0xb0] sm:$0xff] }
 0x8d7   :  { %v4108_v15 = vmul.f32 %v4107_v27, %v8363_v55  ;;  %v4119_v40 = vmul.f32 %v4118_v50, %v8363_v55  ;;  %v4083_v12 = vmul.f32 %v4082_v10, %v8340_v44  ;;  %v4016_v48 = vand.u32 2147483647, %v8381_v61 }
 0x8d8   :  { %5017 = vrcp.f32 %v8383_v54  ;;  %v4072_v43 = vmul.f32 %v4071_v32, %v8340_v44  ;;  %vm4052_vm6 = vweird.f32 %v8383_v54 }
 0x8d9   :  { %v4109_v19 = vadd.f32 0.0036580483, %v4108_v15  ;;  %v4120_v53 = vadd.f32 0.014752088, %v4119_v40  ;;  %5019 = vrcp.f32 %v8381_v61  ;;  %v4084_v21 = vadd.f32 0.4994258, %v4083_v12 }
 0x8da   :  { %5021 = vrcp.f32 %v8385_v29  ;;  %v4073_v27 = vadd.f32 0.18741608, %v4072_v43  ;;  %v4035_v40 = vadd.f32 1.1283791, %v4034_v20 }
 0x8db   :  { %v4121_v62 = vmul.f32 %v4120_v53, %v8363_v55  ;;  %v4085_v7 = vmul.f32 %v4084_v21, %v8340_v44  ;;  %v4110_v8 = vmul.f32 %v4109_v19, %v8363_v55  ;;  %v4056_v53 = vand.u32 2147483647, %v8383_v54 }
 0x8dc   :  { %4801 = vmatmul.msk.f32.gmra.mxu0 %vm9828_vm8, %v5079_v39  ;;  %v3995_v39 = vadd.f32 1.1283791, %v3994_v28  ;;  %v4074_v45 = vmul.f32 %v4073_v27, %v8340_v44 }
 0x8dd   :  { %v4122_v59 = vadd.f32 0.112945676, %v4121_v62  ;;  %v8405_v30 = vadd.f32 1.0, %v4085_v7  ;;  %v4111_v46 = vadd.f32 0.05243302, %v4110_v8  ;;  %vm8471_vm11 = vcmp.eq.f32.partialorder %v4056_v53, 8.507059e+37 }
 0x8de   :  { %v8403_v57 = vpop.eup %5017  ;;  %v8435_v15 = vmul.f32 %v3995_v39, %v8297_v51  ;;  %v4018_v51 = vand.u32 2147483648, %v8381_v61  ;;  %v4075_v32 = vadd.f32 1.1283791, %v4074_v45  ;;  %v3956_v45 = vmul.f32 %v8431_v60, %v8283_v0  ;;  %v9850_v39 = vld [vmem:[#allocation15_spill] sm:$0xff] }
 0x8df   :  { %v8407_v63 = vpop.eup %5019  ;;  %v4123_v2 = vmul.f32 %v4122_v59, %v8363_v55  ;;  %5023 = vrcp.f32 %v8405_v30  ;;  %v4048_v16 = vmul.f32 %v8403_v57, %v8383_v54  ;;  %v4112_v31 = vmul.f32 %v4111_v46, %v8363_v55 }
 0x8e0   :  { %v8411_v5 = vpop.eup %5021  ;;  %v4008_v17 = vmul.f32 %v8407_v63, %v8381_v61  ;;  %v4098_v44 = vand.u32 2147483648, %v8405_v30  ;;  %vm4053_vm1 = vweird.f32 %v8403_v57  ;;  %v4096_v62 = vand.u32 2147483647, %v8405_v30 }
 0x8e1   :  { %v4124_v9 = vadd.f32 0.4994258, %v4123_v2  ;;  %v3968_v42 = vmul.f32 %v8411_v5, %v8385_v29  ;;  %v4049_v22 = vsub.f32 1.0, %v4048_v16  ;;  %v4113_v12 = vadd.f32 0.18741608, %v4112_v31  ;;  %vm8466_vm0 = vmor %vm4052_vm6, %vm4053_vm1 }
 0x8e2   :  { %v4009_v13 = vsub.f32 1.0, %v4008_v17  ;;  %vm3973_vm5 = vweird.f32 %v8411_v5  ;;  %vm4013_vm15 = vweird.f32 %v8407_v63  ;;  %vm4092_vm7 = vweird.f32 %v8405_v30 }
 0x8e3   :  { %v4125_v26 = vmul.f32 %v4124_v9, %v8363_v55  ;;  %v3969_v50 = vsub.f32 1.0, %v3968_v42  ;;  %v4050_v10 = vmul.f32 %v8403_v57, %v4049_v22  ;;  %v4114_v8 = vmul.f32 %v4113_v12, %v8363_v55  ;;  %vm8485_vm8 = vmor %vm4012_vm14, %vm4013_vm15 }
 0x8e4   :  { %4802 = vmatmul.msk.f32.gmra.mxu0 %vm9829_vm3, %v5080_v14  ;;  %v4010_v24 = vmul.f32 %v8407_v63, %v4009_v13  ;;  %v4058_v14 = vand.u32 2147483648, %v8383_v54  ;;  %v4099_v16 = vor.u32 1.1754944e-38, %v4098_v44  ;;  %vm4097_vm2 = vcmp.eq.f32.partialorder %v4096_v62, 8.507059e+37  ;;  %vm9841_vm15 = vmmov %vm9829_vm3 }
 0x8e5   :  { %v8429_v11 = vadd.f32 1.0, %v4125_v26  ;;  %v5024_v41 = vpop.eup %5023  ;;  %v3970_v21 = vmul.f32 %v8411_v5, %v3969_v50  ;;  %v4051_v7 = vadd.f32 %v8403_v57, %v4050_v10  ;;  %v4076_v9 = vmul.f32 %v4075_v32, %v8333_v33  ;;  %v5083_v26 = vld [vmem:[%s9263_s5 + $0xb8] sm:$0xff] }
 0x8e6   :  { %v4088_v47 = vmul.f32 %v5024_v41, %v8405_v30  ;;  %vm4093_vm10 = vweird.f32 %v5024_v41  ;;  %v4011_v2 = vadd.f32 %v8407_v63, %v4010_v24  ;;  %v4059_v54 = vor.u32 1.1754944e-38, %v4058_v14 }
 0x8e7   :  { %5025 = vrcp.f32 %v8429_v11  ;;  %vm4094_vm9 = vmor %vm4092_vm7, %vm4093_vm10  ;;  %v3971_v3 = vadd.f32 %v8411_v5, %v3970_v21  ;;  %v4055_v30 = vsel %vm8466_vm0, %v8403_v57, %v4051_v7  ;;  %v4115_v52 = vadd.f32 1.1283791, %v4114_v8  ;;  %v5085_v7 = vld [vmem:[%s9263_s5 + $0xc8] sm:$0xff]  ;;  %v8537_v8 = vpop.permute.xlu1 %3376 }
 0x8e8   :  { %v4089_v19 = vsub.f32 1.0, %v4088_v47  ;;  %v4136_v33 = vand.u32 2147483647, %v8429_v11  ;;  %v4015_v42 = vsel %vm8485_vm8, %v8407_v63, %v4011_v2  ;;  %v4036_v61 = vmul.f32 %v4035_v40, %v8313_v49  ;;  %vm9842_vm7 = vmmov %vm9829_vm3  ;;  %9843 = vst [vmem:[#allocation79_spill] sm:$0xff] %v8537_v8 }
 0x8e9   :  { %v4060_v22 = vsel %vm8471_vm11, %v4059_v54, %v4055_v30  ;;  %vm4017_vm14 = vcmp.eq.f32.partialorder %v4016_v48, 8.507059e+37  ;;  %v4019_v20 = vor.u32 1.1754944e-38, %v4018_v51  ;;  %vm4132_vm1 = vweird.f32 %v8429_v11  ;;  %v9849_v30 = vld [vmem:[#allocation32_spill] sm:$0xff] }
 0x8ea   :  { %v4090_v58 = vmul.f32 %v5024_v41, %v4089_v19  ;;  %vm3977_vm6 = vcmp.eq.f32.partialorder %v3976_v25, 8.507059e+37  ;;  %v3979_v50 = vor.u32 1.1754944e-38, %v3978_v1  ;;  %v4116_v47 = vmul.f32 %v4115_v52, %v8355_v4  ;;  %v5084_v25 = vld [vmem:[%s9263_s5 + $0xc0] sm:$0xff] }
 0x8eb   :  { %v4020_v13 = vsel %vm4017_vm14, %v4019_v20, %v4015_v42  ;;  %v4061_v48 = vmul.f32 %v4060_v22, %v4036_v61  ;;  %v3486_v0 = vmul.f32 0.5, %v8324_v34  ;;  %v3484_v62 = vmul.f32 0.5, %v8294_v38  ;;  %v5086_v38 = vld [vmem:[%s9263_s5 + $0xd0] sm:$0xff] }
 0x8ec   :  { %4803 = vmatmul.msk.f32.gmra.mxu0 %vm9830_vm12, %v5081_v6  ;;  %v4091_v56 = vadd.f32 %v5024_v41, %v4090_v58  ;;  %v4138_v6 = vand.u32 2147483648, %v8429_v11  ;;  %v4021_v51 = vmul.f32 %v4020_v13, %v8435_v15  ;;  %v3485_v15 = vmul.f32 0.5, %v8305_v18  ;;  %v9852_v22 = vld [vmem:[#allocation14_spill] sm:$0xff] }
 0x8ed   :  { %v5026_v37 = vpop.eup %5025  ;;  %v4827_v4 = vclamps-f32 %v4061_v48, 1.0  ;;  %v3483_v34 = vmul.f32 0.5, %v8279_v35  ;;  %v8543_v35 = vpop.permute.xlu2 %3381  ;;  %v9853_v48 = vld [vmem:[#allocation23_spill] sm:$0xff] }
 0x8ee   :  { %v4128_v59 = vmul.f32 %v5026_v37, %v8429_v11  ;;  %v4095_v46 = vsel %vm4094_vm9, %v5024_v41, %v4091_v56  ;;  %vm4133_vm12 = vweird.f32 %v5026_v37  ;;  %v4139_v63 = vor.u32 1.1754944e-38, %v4138_v6  ;;  %9845 = vst [vmem:[#allocation51_spill] sm:$0xff] %v8543_v35 }
 0x8ef   :  { %v4100_v17 = vsel %vm4097_vm2, %v4099_v16, %v4095_v46  ;;  %vm4134_vm10 = vmor %vm4132_vm1, %vm4133_vm12  ;;  %v4826_v24 = vclamps-f32 %v4021_v51, 1.0  ;;  %v4157_v44 = vadd.f32 1.0, %v4827_v4 }
 0x8f0   :  { %v4129_v43 = vsub.f32 1.0, %v4128_v59  ;;  %v4101_v41 = vmul.f32 %v4100_v17, %v4076_v9 }
 0x8f1   :  { %v4156_v58 = vadd.f32 1.0, %v4826_v24 }
 0x8f2   :  { %v4130_v57 = vmul.f32 %v5026_v37, %v4129_v43  ;;  %v4828_v12 = vclamps-f32 %v4101_v41, 1.0  ;;  %v9847_v43 = vld [vmem:[#allocation37_spill] sm:$0xff] }
 0x8f3   :  { %v4172_v32 = vmul.f32 %v4156_v58, %v3484_v62 }
 0x8f4   :  { %4804 = vmatmul.msk.f32.gmra.mxu0 %vm9831_vm4, %v5082_v23  ;;  %vm8504_vm4 = vmor %vm3972_vm13, %vm3973_vm5  ;;  %v4131_v31 = vadd.f32 %v5026_v37, %v4130_v57  ;;  %vm4137_vm13 = vcmp.eq.f32.partialorder %v4136_v33, 8.507059e+37  ;;  %v3487_v23 = vmul.f32 0.5, %v8345_v36  ;;  %v4158_v53 = vadd.f32 1.0, %v4828_v12  ;;  %v9851_v33 = vld [vmem:[#allocation31_spill] sm:$0xff] }
 0x8f5   :  { %v3975_v49 = vsel %vm8504_vm4, %v8411_v5, %v3971_v3  ;;  %vm9840_vm5 = vmmov %vm9829_vm3  ;;  %v4173_v36 = vmul.f32 %v4157_v44, %v3485_v15  ;;  %v9854_v44 = vld [vmem:[#allocation21_spill] sm:$0xff] }
 0x8f6   :  { %v4135_v10 = vsel %vm4134_vm10, %v5026_v37, %v4131_v31  ;;  %v3980_v40 = vsel %vm3977_vm6, %v3979_v50, %v3975_v49  ;;  %v4174_v21 = vmul.f32 %v4158_v53, %v3486_v0 }
 0x8f7   :  { %v4140_v11 = vsel %vm4137_vm13, %v4139_v63, %v4135_v10  ;;  %v3981_v1 = vmul.f32 %v3980_v40, %v3956_v45 }
 0x8f8   :  { %v4141_v5 = vmul.f32 %v4140_v11, %v4116_v47 }
 0x8f9   :  { %v4825_v14 = vclamps-f32 %v3981_v1, 1.0 }
 0x8fa   :  { %v4829_v29 = vclamps-f32 %v4141_v5, 1.0 }
 0x8fb   :  { %v4155_v37 = vadd.f32 1.0, %v4825_v14 }
 0x8fc   :  { %4805 = vmatmul.msk.f32.gmra.mxu0 %vm9829_vm3, %v5083_v26  ;;  %v4159_v19 = vadd.f32 1.0, %v4829_v29 }
 0x8fd   :  { %v4171_v18 = vmul.f32 %v4155_v37, %v3483_v34 }
 0x8fe   :  { %v4175_v60 = vmul.f32 %v4159_v19, %v3487_v23 }
 0x900   :  { %4176 = vmatpush.msrb.mxu1 %v4175_v60 }
 0x902   :  { %4177 = vmatpush.msrb.mxu1 %v4174_v21 }
 0x904   :  { %4806 = vmatmul.msk.f32.gmra.mxu0 %vm9840_vm5, %v5084_v25  ;;  %4178 = vmatpush.msrb.mxu1 %v4173_v36 }
 0x906   :  { %4179 = vmatpush.msrb.mxu1 %v4172_v32 }
 0x908   :  { %4180 = vmatpush.msrb.mxu1 %v4171_v18 }
 0x90c   :  { %4807 = vmatmul.msk.f32.gmra.mxu0 %vm9841_vm15, %v5085_v7 }
 0x914   :  { %4808 = vmatmul.msk.f32.gmra.mxu0 %vm9842_vm7, %v5086_v38 }
 0x931   :  { %v3401_v59 = vpop.f32.mrf.mxu0 }
 0x932   :  { %v8540_v56 = vadd.f32 %v3401_v59, %v8537_v8 }
 0x934   :  { %9844 = vst [vmem:[#allocation85_spill] sm:$0xff] %v8540_v56  ;;  %4203 = vadd.xlane.f32.xlu1 %v8540_v56 }
 0x939   :  { %v3404_v28 = vpop.f32.mrf.mxu0 }
 0x93a   :  { %v8546_v2 = vadd.f32 %v3404_v28, %v8543_v35 }
 0x93c   :  { %9846 = vst [vmem:[#allocation86_spill] sm:$0xff] %v8546_v2  ;;  %4205 = vadd.xlane.f32.xlu2 %v8546_v2 }
 0x941   :  { %v3424_v16 = vpop.f32.mrf.mxu0 }
 0x942   :  { %v8550_v46 = vadd.f32 %v3424_v16, %v9847_v43 }
 0x944   :  { %9848 = vst [vmem:[#allocation47_spill] sm:$0xff] %v8550_v46  ;;  %v8556_v52 = vmul.f32 0.70710677, %v8550_v46 }
 0x946   :  { %v3504_v57 = vmul.f32 %v8556_v52, %v8556_v52 }
 0x948   :  { %v8579_v41 = vmin.f32 %v3504_v57, 16.0 }
 0x949   :  { %v3427_v55 = vpop.f32.mrf.mxu0 }
 0x94a   :  { %v8553_v9 = vadd.f32 %v3427_v55, %v9849_v30  ;;  %v3506_v40 = vmul.f32 2.1237322e-06, %v8579_v41 }
 0x94c   :  { %v8559_v17 = vmul.f32 0.70710677, %v8553_v9  ;;  %v3507_v4 = vadd.f32 0.00028619796, %v3506_v40 }
 0x94e   :  { %v3544_v27 = vmul.f32 %v8559_v17, %v8559_v17  ;;  %v3508_v21 = vmul.f32 %v3507_v4, %v8579_v41 }
 0x950   :  { %v8589_v47 = vmin.f32 %v3544_v27, 16.0  ;;  %v3509_v59 = vadd.f32 0.0036580483, %v3508_v21 }
 0x951   :  { %v3430_v54 = vpop.f32.mrf.mxu0 }
 0x952   :  { %v8567_v42 = vadd.f32 %v3430_v54, %v9851_v33  ;;  %v3546_v25 = vmul.f32 2.1237322e-06, %v8589_v47 }
 0x954   :  { %v8582_v49 = vmul.f32 0.70710677, %v8567_v42  ;;  %v3547_v0 = vadd.f32 0.00028619796, %v3546_v25 }
 0x956   :  { %v3584_v45 = vmul.f32 %v8582_v49, %v8582_v49  ;;  %v3548_v32 = vmul.f32 %v3547_v0, %v8589_v47 }
 0x958   :  { %v8606_v1 = vmin.f32 %v3584_v45, 16.0  ;;  %v3549_v30 = vadd.f32 0.0036580483, %v3548_v32 }
 0x959   :  { %v3433_v3 = vpop.f32.mrf.mxu0 }
 0x95a   :  { %v8573_v20 = vadd.f32 %v3433_v3, %v9852_v22  ;;  %v3586_v58 = vmul.f32 2.1237322e-06, %v8606_v1  ;;  %v3550_v25 = vmul.f32 %v3549_v30, %v8589_v47 }
 0x95c   :  { %v8587_v13 = vmul.f32 0.70710677, %v8573_v20  ;;  %v3587_v28 = vadd.f32 0.00028619796, %v3586_v58 }
 0x95e   :  { %v3624_v51 = vmul.f32 %v8587_v13, %v8587_v13 }
 0x960   :  { %v8611_v53 = vmin.f32 %v3624_v51, 16.0 }
 0x961   :  { %v3436_v6 = vpop.f32.mrf.mxu0 }
 0x962   :  { %v8562_v26 = vadd.f32 %v3436_v6, %v9850_v39  ;;  %v3626_v36 = vmul.f32 2.1237322e-06, %v8611_v53  ;;  %v9855_v39 = vld [vmem:[#allocation12_spill] sm:$0xff] }
 0x964   :  { %v8570_v61 = vmul.f32 0.70710677, %v8562_v26  ;;  %v3627_v54 = vadd.f32 0.00028619796, %v3626_v36 }
 0x966   :  { %v3664_v31 = vmul.f32 %v8570_v61, %v8570_v61  ;;  %v3628_v40 = vmul.f32 %v3627_v54, %v8611_v53 }
 0x968   :  { %v8584_v63 = vmin.f32 %v3664_v31, 16.0  ;;  %v3510_v31 = vmul.f32 %v3509_v59, %v8579_v41  ;;  %v3629_v21 = vadd.f32 0.0036580483, %v3628_v40 }
 0x969   :  { %v3439_v50 = vpop.f32.mrf.mxu0 }
 0x96a   :  { %v3666_v10 = vmul.f32 2.1237322e-06, %v8584_v63  ;;  %v8593_v11 = vadd.f32 %v3439_v50, %v9853_v48  ;;  %v3677_v33 = vmul.f32 3.8918573e-05, %v8584_v63  ;;  %v3588_v50 = vmul.f32 %v3587_v28, %v8606_v1 }
 0x96c   :  { %v3667_v5 = vadd.f32 0.00028619796, %v3666_v10  ;;  %v8599_v12 = vmul.f32 0.70710677, %v8593_v11  ;;  %v3678_v4 = vadd.f32 0.001143296, %v3677_v33  ;;  %v3630_v33 = vmul.f32 %v3629_v21, %v8611_v53 }
 0x96e   :  { %v3704_v29 = vmul.f32 %v8599_v12, %v8599_v12  ;;  %v3668_v23 = vmul.f32 %v3667_v5, %v8584_v63  ;;  %v3679_v59 = vmul.f32 %v3678_v4, %v8584_v63 }
 0x970   :  { %v8609_v19 = vmin.f32 %v3704_v29, 16.0  ;;  %v3669_v62 = vadd.f32 0.0036580483, %v3668_v23 }
 0x971   :  { %v3442_v24 = vpop.f32.mrf.mxu0 }
 0x972   :  { %v3706_v60 = vmul.f32 2.1237322e-06, %v8609_v19  ;;  %v8615_v14 = vadd.f32 %v3442_v24, %v9854_v44  ;;  %v3717_v15 = vmul.f32 3.8918573e-05, %v8609_v19  ;;  %v3670_v16 = vmul.f32 %v3669_v62, %v8584_v63 }
 0x973   :  { %v3589_v44 = vadd.f32 0.0036580483, %v3588_v50 }
 0x974   :  { %v3707_v7 = vadd.f32 0.00028619796, %v3706_v60  ;;  %v8622_v37 = vmul.f32 0.70710677, %v8615_v14  ;;  %v3718_v34 = vadd.f32 0.001143296, %v3717_v15 }
 0x975   :  { %v3671_v10 = vadd.f32 0.05243302, %v3670_v16  ;;  %v3511_v60 = vadd.f32 0.05243302, %v3510_v31  ;;  %v3590_v30 = vmul.f32 %v3589_v44, %v8606_v1 }
 0x976   :  { %v3708_v18 = vmul.f32 %v3707_v7, %v8609_v19  ;;  %v3744_v38 = vmul.f32 %v8622_v37, %v8622_v37  ;;  %v3719_v55 = vmul.f32 %v3718_v34, %v8609_v19  ;;  %v3551_v34 = vadd.f32 0.05243302, %v3550_v25 }
 0x977   :  { %v3672_v58 = vmul.f32 %v3671_v10, %v8584_v63  ;;  %v3591_v4 = vadd.f32 0.05243302, %v3590_v30 }
 0x978   :  { %v8630_v3 = vmin.f32 %v3744_v38, 16.0  ;;  %v3709_v6 = vadd.f32 0.0036580483, %v3708_v18  ;;  %v3720_v48 = vadd.f32 0.014752088, %v3719_v55  ;;  %v9856_v18 = vld [vmem:[#allocation25_spill] sm:$0xff]  ;;  %v8670_v50 = vmul.f32 %v3551_v34, %v8589_v47 }
 0x979   :  { %v3445_v43 = vpop.f32.mrf.mxu0 }
 0x97a   :  { %v8633_v57 = vadd.f32 %v3445_v43, %v9855_v39  ;;  %v3746_v22 = vmul.f32 2.1237322e-06, %v8630_v3  ;;  %v3757_v27 = vmul.f32 3.8918573e-05, %v8630_v3  ;;  %v3710_v29 = vmul.f32 %v3709_v6, %v8609_v19 }
 0x97b   :  { %v3721_v15 = vmul.f32 %v3720_v48, %v8609_v19  ;;  %v8662_v43 = vmul.f32 %v3511_v60, %v8579_v41  ;;  %v3631_v60 = vadd.f32 0.05243302, %v3630_v33 }
 0x97c   :  { %v3747_v45 = vadd.f32 0.00028619796, %v3746_v22  ;;  %v8642_v5 = vmul.f32 0.70710677, %v8633_v57  ;;  %v3758_v51 = vadd.f32 0.001143296, %v3757_v27 }
 0x97d   :  { %v3711_v32 = vadd.f32 0.05243302, %v3710_v29  ;;  %v3722_v39 = vadd.f32 0.112945676, %v3721_v15  ;;  %v3673_v22 = vadd.f32 0.18741608, %v3672_v58 }
 0x97e   :  { %v3748_v23 = vmul.f32 %v3747_v45, %v8630_v3  ;;  %v3784_v24 = vmul.f32 %v8642_v5, %v8642_v5  ;;  %v3759_v0 = vmul.f32 %v3758_v51, %v8630_v3  ;;  %v3680_v29 = vadd.f32 0.014752088, %v3679_v59 }
 0x97f   :  { %v3712_v10 = vmul.f32 %v3711_v32, %v8609_v19  ;;  %v3674_v44 = vmul.f32 %v3673_v22, %v8584_v63  ;;  %v8697_v22 = vmul.f32 %v3631_v60, %v8611_v53 }
 0x980   :  { %v8652_v62 = vmin.f32 %v3784_v24, 16.0  ;;  %v3760_v36 = vadd.f32 0.014752088, %v3759_v0  ;;  %v3749_v28 = vadd.f32 0.0036580483, %v3748_v23  ;;  %v3723_v0 = vmul.f32 %v3722_v39, %v8609_v19 }
 0x981   :  { %v3448_v7 = vpop.f32.mrf.mxu0  ;;  %v3713_v59 = vadd.f32 0.18741608, %v3712_v10 }
 0x982   :  { %v8655_v38 = vadd.f32 %v3448_v7, %v9856_v18  ;;  %v3786_v16 = vmul.f32 2.1237322e-06, %v8652_v62  ;;  %v3797_v55 = vmul.f32 3.8918573e-05, %v8652_v62  ;;  %v3761_v54 = vmul.f32 %v3760_v36, %v8630_v3  ;;  %v9857_v36 = vld [vmem:[#allocation16_spill] sm:$0xff] }
 0x983   :  { %v3750_v45 = vmul.f32 %v3749_v28, %v8630_v3  ;;  %v3724_v33 = vadd.f32 0.4994258, %v3723_v0 }
 0x984   :  { %v8666_v6 = vmul.f32 0.70710677, %v8655_v38  ;;  %v3787_v27 = vadd.f32 0.00028619796, %v3786_v16  ;;  %v3798_v31 = vadd.f32 0.001143296, %v3797_v55  ;;  %v3681_v55 = vmul.f32 %v3680_v29, %v8584_v63 }
 0x985   :  { %v3762_v40 = vadd.f32 0.112945676, %v3761_v54  ;;  %v3751_v28 = vadd.f32 0.05243302, %v3750_v45  ;;  %v8691_v54 = vmul.f32 %v3591_v4, %v8606_v1 }
 0x986   :  { %v3824_v48 = vmul.f32 %v8666_v6, %v8666_v6  ;;  %v3788_v51 = vmul.f32 %v3787_v27, %v8652_v62  ;;  %v3799_v25 = vmul.f32 %v3798_v31, %v8652_v62  ;;  %v3675_v27 = vadd.f32 1.1283791, %v3674_v44 }
 0x987   :  { %v3763_v24 = vmul.f32 %v3762_v40, %v8630_v3  ;;  %v3752_v29 = vmul.f32 %v3751_v28, %v8630_v3  ;;  %v9858_v28 = vld [vmem:[#allocation13_spill] sm:$0xff] }
 0x988   :  { %v8678_v23 = vmin.f32 %v3824_v48, 16.0  ;;  %v3789_v15 = vadd.f32 0.0036580483, %v3788_v51  ;;  %v3800_v58 = vadd.f32 0.014752088, %v3799_v25  ;;  %v3714_v25 = vmul.f32 %v3713_v59, %v8609_v19 }
 0x989   :  { %v3451_v21 = vpop.f32.mrf.mxu0  ;;  %v3764_v18 = vadd.f32 0.4994258, %v3763_v24  ;;  %v3682_v24 = vadd.f32 0.112945676, %v3681_v55 }
 0x98a   :  { %v3826_v7 = vmul.f32 2.1237322e-06, %v8678_v23  ;;  %v8685_v34 = vadd.f32 %v3451_v21, %v9857_v36  ;;  %v3837_v32 = vmul.f32 3.8918573e-05, %v8678_v23  ;;  %v3801_v16 = vmul.f32 %v3800_v58, %v8652_v62 }
 0x98b   :  { %v3765_v10 = vmul.f32 %v3764_v18, %v8630_v3  ;;  %v3790_v48 = vmul.f32 %v3789_v15, %v8652_v62  ;;  %v3725_v15 = vmul.f32 %v3724_v33, %v8609_v19  ;;  %v8712_v21 = vmul.f32 %v3675_v27, %v8570_v61 }
 0x98c   :  { %v3827_v30 = vadd.f32 0.00028619796, %v3826_v7  ;;  %v8694_v39 = vmul.f32 0.70710677, %v8685_v34  ;;  %v3838_v31 = vadd.f32 0.001143296, %v3837_v32 }
 0x98d   :  { %v3802_v51 = vadd.f32 0.112945676, %v3801_v16  ;;  %v8714_v36 = vadd.f32 1.0, %v3765_v10  ;;  %v8717_v32 = vmul.f32 3.8918573e-05, %v8611_v53  ;;  %v8726_v10 = vadd.f32 1.0, %v3725_v15 }
 0x98e   :  { %v3828_v40 = vmul.f32 %v3827_v30, %v8678_v23  ;;  %v3864_v45 = vmul.f32 %v8694_v39, %v8694_v39  ;;  %v3839_v4 = vmul.f32 %v3838_v31, %v8678_v23  ;;  %v3791_v18 = vadd.f32 0.05243302, %v3790_v48 }
 0x98f   :  { %v3803_v44 = vmul.f32 %v3802_v51, %v8652_v62  ;;  %v3715_v30 = vadd.f32 1.1283791, %v3714_v25  ;;  %v3753_v19 = vadd.f32 0.18741608, %v3752_v29  ;;  %5027 = vrcp.f32 %v8714_v36 }
 0x990   :  { %v3829_v0 = vadd.f32 0.0036580483, %v3828_v40  ;;  %v8707_v60 = vmin.f32 %v3864_v45, 16.0  ;;  %v3840_v7 = vadd.f32 0.014752088, %v3839_v4  ;;  %v3683_v40 = vmul.f32 %v3682_v24, %v8584_v63 }
 0x991   :  { %v3454_v58 = vpop.f32.mrf.mxu0  ;;  %v3804_v33 = vadd.f32 0.4994258, %v3803_v44  ;;  %v3792_v25 = vmul.f32 %v3791_v18, %v8652_v62  ;;  %v8736_v29 = vmul.f32 0.5, %v8655_v38  ;;  %v3754_v44 = vmul.f32 %v3753_v19, %v8630_v3 }
 0x992   :  { %v3866_v59 = vmul.f32 2.1237322e-06, %v8707_v60  ;;  %v8721_v16 = vadd.f32 %v3454_v58, %v9858_v28  ;;  %v3877_v55 = vmul.f32 3.8918573e-05, %v8707_v60  ;;  %v3841_v61 = vmul.f32 %v3840_v7, %v8678_v23 }
 0x993   :  { %v3830_v27 = vmul.f32 %v3829_v0, %v8678_v23  ;;  %v3805_v51 = vmul.f32 %v3804_v33, %v8652_v62  ;;  %5029 = vrcp.f32 %v8726_v10  ;;  %v8751_v3 = vmul.f32 %v3715_v30, %v8599_v12 }
 0x994   :  { %v3867_v31 = vadd.f32 0.00028619796, %v3866_v59  ;;  %v8730_v48 = vmul.f32 0.70710677, %v8721_v16  ;;  %v3878_v45 = vadd.f32 0.001143296, %v3877_v55  ;;  %vm3772_vm0 = vweird.f32 %v8714_v36 }
 0x995   :  { %v3842_v0 = vadd.f32 0.112945676, %v3841_v61  ;;  %v8743_v58 = vadd.f32 1.0, %v3805_v51  ;;  %v3831_v7 = vadd.f32 0.05243302, %v3830_v27  ;;  %v8769_v2 = vmul.f32 0.5, %v8685_v34 }
 0x996   :  { %v3868_v4 = vmul.f32 %v3867_v31, %v8707_v60  ;;  %v3904_v24 = vmul.f32 %v8730_v48, %v8730_v48  ;;  %v3879_v15 = vmul.f32 %v3878_v45, %v8707_v60  ;;  %v3684_v55 = vadd.f32 0.4994258, %v3683_v40  ;;  %v8754_v31 = vpop.eup %5027 }
 0x997   :  { %v3843_v28 = vmul.f32 %v3842_v0, %v8678_v23  ;;  %5031 = vrcp.f32 %v8743_v58  ;;  %v3793_v19 = vadd.f32 0.18741608, %v3792_v25  ;;  %v3755_v27 = vadd.f32 1.1283791, %v3754_v44 }
 0x998   :  { %v3869_v59 = vadd.f32 0.0036580483, %v3868_v4  ;;  %v8747_v38 = vmin.f32 %v3904_v24, 16.0  ;;  %v3880_v18 = vadd.f32 0.014752088, %v3879_v15  ;;  %v3832_v0 = vmul.f32 %v3831_v7, %v8678_v23 }
 0x999   :  { %v3844_v33 = vadd.f32 0.4994258, %v3843_v28  ;;  %v8765_v44 = vpop.eup %5029  ;;  %v3794_v28 = vmul.f32 %v3793_v19, %v8652_v62  ;;  %v3768_v7 = vmul.f32 %v8754_v31, %v8714_v36  ;;  %v3778_v19 = vand.u32 2147483648, %v8714_v36 }
 0x99a   :  { %v3870_v61 = vmul.f32 %v3869_v59, %v8707_v60  ;;  %v3906_v45 = vmul.f32 2.1237322e-06, %v8747_v38  ;;  %v3917_v51 = vmul.f32 3.8918573e-05, %v8747_v38  ;;  %v3881_v4 = vmul.f32 %v3880_v18, %v8707_v60 }
 0x99b   :  { %v3845_v40 = vmul.f32 %v3844_v33, %v8678_v23  ;;  %v8763_v59 = vmul.f32 %v3684_v55, %v8584_v63  ;;  %v8778_v33 = vmul.f32 %v3755_v27, %v8622_v37  ;;  %v3833_v62 = vadd.f32 0.18741608, %v3832_v0 }
 0x99c   :  { %v3871_v24 = vadd.f32 0.05243302, %v3870_v61  ;;  %v3907_v30 = vadd.f32 0.00028619796, %v3906_v45  ;;  %v3918_v25 = vadd.f32 0.001143296, %v3917_v51  ;;  %vm3812_vm9 = vweird.f32 %v8743_v58 }
 0x99d   :  { %v3882_v15 = vadd.f32 0.112945676, %v3881_v4  ;;  %v8771_v18 = vadd.f32 1.0, %v3845_v40  ;;  %v8775_v61 = vpop.eup %5031  ;;  %v3795_v27 = vadd.f32 1.1283791, %v3794_v28  ;;  %v3769_v12 = vsub.f32 1.0, %v3768_v7 }
 0x99e   :  { %v3908_v63 = vmul.f32 %v3907_v30, %v8747_v38  ;;  %v3919_v55 = vmul.f32 %v3918_v25, %v8747_v38  ;;  %v3872_v34 = vmul.f32 %v3871_v24, %v8707_v60  ;;  %v3808_v37 = vmul.f32 %v8775_v61, %v8743_v58 }
 0x99f   :  { %v3883_v45 = vmul.f32 %v3882_v15, %v8707_v60  ;;  %5033 = vrcp.f32 %v8771_v18  ;;  %v3776_v30 = vand.u32 2147483647, %v8714_v36  ;;  %v3728_v25 = vmul.f32 %v8765_v44, %v8726_v10 }
 0x9a0   :  { %v3909_v51 = vadd.f32 0.0036580483, %v3908_v63  ;;  %v3920_v4 = vadd.f32 0.014752088, %v3919_v55  ;;  %v3809_v56 = vsub.f32 1.0, %v3808_v37  ;;  %v3834_v63 = vmul.f32 %v3833_v62, %v8678_v23 }
 0x9a1   :  { %v3884_v40 = vadd.f32 0.4994258, %v3883_v45  ;;  %v3873_v55 = vadd.f32 0.18741608, %v3872_v34  ;;  %v8796_v45 = vmul.f32 0.5, %v8721_v16  ;;  %v3779_v28 = vor.u32 1.1754944e-38, %v3778_v19 }
 0x9a2   :  { %v3910_v0 = vmul.f32 %v3909_v51, %v8747_v38  ;;  %v3921_v24 = vmul.f32 %v3920_v4, %v8747_v38  ;;  %v3810_v51 = vmul.f32 %v8775_v61, %v3809_v56  ;;  %v3796_v4 = vmul.f32 %v3795_v27, %v8642_v5 }
 0x9a3   :  { %v3885_v15 = vmul.f32 %v3884_v40, %v8707_v60  ;;  %v3816_v23 = vand.u32 2147483647, %v8743_v58  ;;  %v3770_v62 = vmul.f32 %v8754_v31, %v3769_v12  ;;  %v3818_v19 = vand.u32 2147483648, %v8743_v58 }
 0x9a4   :  { %v3911_v7 = vadd.f32 0.05243302, %v3910_v0  ;;  %v3922_v35 = vadd.f32 0.112945676, %v3921_v24  ;;  %v3835_v40 = vadd.f32 1.1283791, %v3834_v63  ;;  %v3874_v56 = vmul.f32 %v3873_v55, %v8707_v60 }
 0x9a5   :  { %v8799_v8 = vadd.f32 1.0, %v3885_v15  ;;  %v5034_v46 = vpop.eup %5033  ;;  %vm3813_vm11 = vweird.f32 %v8775_v61  ;;  %vm8813_vm2 = vcmp.eq.f32.partialorder %v3776_v30, 8.507059e+37  ;;  %v3858_v27 = vand.u32 2147483648, %v8771_v18 }
 0x9a6   :  { %v3912_v16 = vmul.f32 %v3911_v7, %v8747_v38  ;;  %v3923_v34 = vmul.f32 %v3922_v35, %v8747_v38  ;;  %v3848_v37 = vmul.f32 %v5034_v46, %v8771_v18  ;;  %v3811_v35 = vadd.f32 %v8775_v61, %v3810_v51  ;;  %vm8829_vm14 = vmor %vm3812_vm9, %vm3813_vm11 }
 0x9a7   :  { %5035 = vrcp.f32 %v8799_v8  ;;  %v3729_v0 = vsub.f32 1.0, %v3728_v25  ;;  %vm8819_vm8 = vcmp.eq.f32.partialorder %v3816_v23, 8.507059e+37  ;;  %v3771_v60 = vadd.f32 %v8754_v31, %v3770_v62 }
 0x9a8   :  { %v3924_v12 = vadd.f32 0.4994258, %v3923_v34  ;;  %v3849_v24 = vsub.f32 1.0, %v3848_v37  ;;  %vm3773_vm3 = vweird.f32 %v8754_v31  ;;  %v3913_v63 = vadd.f32 0.18741608, %v3912_v16 }
 0x9a9   :  { %vm3852_vm12 = vweird.f32 %v8771_v18  ;;  %v3819_v25 = vor.u32 1.1754944e-38, %v3818_v19  ;;  %vm3732_vm4 = vweird.f32 %v8726_v10  ;;  %vm3853_vm1 = vweird.f32 %v5034_v46  ;;  %vm8844_vm10 = vmor %vm3772_vm0, %vm3773_vm3 }
 0x9aa   :  { %v3925_v30 = vmul.f32 %v3924_v12, %v8747_v38  ;;  %v3850_v7 = vmul.f32 %v5034_v46, %v3849_v24  ;;  %v3856_v51 = vand.u32 2147483647, %v8771_v18  ;;  %v3815_v23 = vsel %vm8829_vm14, %v8775_v61, %v3811_v35  ;;  %vm3854_vm6 = vmor %vm3852_vm12, %vm3853_vm1 }
 0x9ab   :  { %v3875_v16 = vadd.f32 1.1283791, %v3874_v56  ;;  %v3859_v58 = vor.u32 1.1754944e-38, %v3858_v27  ;;  %v3730_v37 = vmul.f32 %v8765_v44, %v3729_v0  ;;  %v3896_v24 = vand.u32 2147483647, %v8799_v8 }
 0x9ac   :  { %v8838_v34 = vadd.f32 1.0, %v3925_v30  ;;  %v3851_v61 = vadd.f32 %v5034_v46, %v3850_v7  ;;  %v3775_v56 = vsel %vm8844_vm10, %v8754_v31, %v3771_v60  ;;  %v3914_v27 = vmul.f32 %v3913_v63, %v8747_v38 }
 0x9ad   :  { %v5036_v62 = vpop.eup %5035  ;;  %v3898_v36 = vand.u32 2147483648, %v8799_v8  ;;  %v3820_v35 = vsel %vm8819_vm8, %v3819_v25, %v3815_v23  ;;  %v3836_v0 = vmul.f32 %v3835_v40, %v8666_v6  ;;  %vm3857_vm13 = vcmp.eq.f32.partialorder %v3856_v51, 8.507059e+37 }
 0x9ae   :  { %v3888_v12 = vmul.f32 %v5036_v62, %v8799_v8  ;;  %5037 = vrcp.f32 %v8838_v34  ;;  %v3855_v55 = vsel %vm3854_vm6, %v5034_v46, %v3851_v61  ;;  %v3876_v31 = vmul.f32 %v3875_v16, %v8694_v39 }
 0x9af   :  { %v3860_v60 = vsel %vm3857_vm13, %v3859_v58, %v3855_v55  ;;  %v3780_v38 = vsel %vm8813_vm2, %v3779_v28, %v3775_v56  ;;  %vm3733_vm5 = vweird.f32 %v8765_v44  ;;  %vm3893_vm15 = vweird.f32 %v5036_v62 }
 0x9b0   :  { %v3889_v30 = vsub.f32 1.0, %v3888_v12  ;;  %v3821_v18 = vmul.f32 %v3820_v35, %v3796_v4  ;;  %v3731_v7 = vadd.f32 %v8765_v44, %v3730_v37  ;;  %v3915_v15 = vadd.f32 1.1283791, %v3914_v27  ;;  %vm8876_vm9 = vmor %vm3732_vm4, %vm3733_vm5 }
 0x9b1   :  { %vm3892_vm7 = vweird.f32 %v8799_v8  ;;  %vm8869_vm0 = vcmp.eq.f32.partialorder %v3896_v24, 8.507059e+37  ;;  %v3899_v46 = vor.u32 1.1754944e-38, %v3898_v36  ;;  %v3936_v39 = vand.u32 2147483647, %v8838_v34 }
 0x9b2   :  { %v3890_v63 = vmul.f32 %v5036_v62, %v3889_v30  ;;  %v3861_v5 = vmul.f32 %v3860_v60, %v3836_v0  ;;  %v8881_v4 = vadd.f32 1.0, %v8763_v59  ;;  %v3938_v8 = vand.u32 2147483648, %v8838_v34  ;;  %vm3894_vm11 = vmor %vm3892_vm7, %vm3893_vm15 }
 0x9b3   :  { %v8885_v51 = vmul.f32 %v3780_v38, %v8778_v33  ;;  %v3638_v23 = vadd.f32 0.001143296, %v8717_v32  ;;  %v3597_v16 = vmul.f32 3.8918573e-05, %v8606_v1  ;;  %v4821_v37 = vclamps-f32 %v3821_v18, 1.0 }
 0x9b4   :  { %v3891_v40 = vadd.f32 %v5036_v62, %v3890_v63  ;;  %v5038_v25 = vpop.eup %5037  ;;  %v3735_v59 = vsel %vm8876_vm9, %v8765_v44, %v3731_v7  ;;  %v3916_v12 = vmul.f32 %v3915_v15, %v8730_v48  ;;  %vm3932_vm2 = vweird.f32 %v8838_v34 }
 0x9b5   :  { %v3928_v58 = vmul.f32 %v5038_v25, %v8838_v34  ;;  %v3738_v24 = vand.u32 2147483648, %v8726_v10  ;;  %5039 = vrcp.f32 %v8881_v4  ;;  %vm8897_vm8 = vcmp.eq.f32.partialorder %v3936_v39, 8.507059e+37 }
 0x9b6   :  { %v3895_v19 = vsel %vm3894_vm11, %v5036_v62, %v3891_v40  ;;  %v4822_v61 = vclamps-f32 %v3861_v5, 1.0  ;;  %v3939_v56 = vor.u32 1.1754944e-38, %v3938_v8  ;;  %v4820_v44 = vclamps-f32 %v8885_v51, 1.0 }
 0x9b7   :  { %v3929_v33 = vsub.f32 1.0, %v3928_v58  ;;  %v3900_v62 = vsel %vm8869_vm0, %v3899_v46, %v3895_v19  ;;  %v3639_v48 = vmul.f32 %v3638_v23, %v8611_v53  ;;  %v3598_v27 = vadd.f32 0.001143296, %v3597_v16 }
 0x9b8   :  { %vm3933_vm3 = vweird.f32 %v5038_v25  ;;  %v8905_v35 = vadd.f32 1.0, %v4821_v37  ;;  %v3557_v0 = vmul.f32 3.8918573e-05, %v8589_v47  ;;  %v3901_v30 = vmul.f32 %v3900_v62, %v3876_v31 }
 0x9b9   :  { %v3930_v36 = vmul.f32 %v5038_v25, %v3929_v33  ;;  %v3739_v55 = vor.u32 1.1754944e-38, %v3738_v24  ;;  %v3640_v60 = vadd.f32 0.014752088, %v3639_v48  ;;  %v3599_v38 = vmul.f32 %v3598_v27, %v8606_v1  ;;  %vm3934_vm14 = vmor %vm3932_vm2, %vm3933_vm3 }
 0x9ba   :  { %v4152_v18 = vadd.f32 1.0, %v4822_v61  ;;  %v9873_v7 = vand.u32 2147483647, %v8726_v10  ;;  %v3558_v15 = vadd.f32 0.001143296, %v3557_v0  ;;  %vm3692_vm4 = vweird.f32 %v8881_v4 }
 0x9bb   :  { %v3931_v63 = vadd.f32 %v5038_v25, %v3930_v36  ;;  %v5040_v6 = vpop.eup %5039  ;;  %v3641_v39 = vmul.f32 %v3640_v60, %v8611_v53  ;;  %v3600_v40 = vadd.f32 0.014752088, %v3599_v38  ;;  %v3517_v31 = vmul.f32 3.8918573e-05, %v8579_v41 }
 0x9bc   :  { %vm3737_vm12 = vcmp.eq.f32.partialorder %v9873_v7, 8.507059e+37  ;;  %v3688_v28 = vmul.f32 %v5040_v6, %v8881_v4  ;;  %v3696_v8 = vand.u32 2147483647, %v8881_v4  ;;  %v4823_v23 = vclamps-f32 %v3901_v30, 1.0 }
 0x9bd   :  { %v3740_v46 = vsel %vm3737_vm12, %v3739_v55, %v3735_v59  ;;  %v3935_v5 = vsel %vm3934_vm14, %v5038_v25, %v3931_v63  ;;  %v3642_v16 = vadd.f32 0.112945676, %v3641_v39  ;;  %v3601_v34 = vmul.f32 %v3600_v40, %v8606_v1 }
 0x9be   :  { %v3940_v10 = vsel %vm8897_vm8, %v3939_v56, %v3935_v5  ;;  %v3689_v19 = vsub.f32 1.0, %v3688_v28  ;;  %v3559_v37 = vmul.f32 %v3558_v15, %v8589_v47  ;;  %v3518_v59 = vadd.f32 0.001143296, %v3517_v31 }
 0x9bf   :  { %v3941_v58 = vmul.f32 %v3940_v10, %v3916_v12  ;;  %vm3693_vm1 = vweird.f32 %v5040_v6  ;;  %v3698_v25 = vand.u32 2147483648, %v8881_v4  ;;  %v3643_v24 = vmul.f32 %v3642_v16, %v8611_v53 }
 0x9c0   :  { %v3602_v33 = vadd.f32 0.112945676, %v3601_v34  ;;  %v3690_v61 = vmul.f32 %v5040_v6, %v3689_v19  ;;  %v3560_v48 = vadd.f32 0.014752088, %v3559_v37  ;;  %v3519_v32 = vmul.f32 %v3518_v59, %v8579_v41  ;;  %vm3694_vm10 = vmor %vm3692_vm4, %vm3693_vm1 }
 0x9c1   :  { %v4824_v62 = vclamps-f32 %v3941_v58, 1.0  ;;  %v4153_v56 = vadd.f32 1.0, %v4823_v23  ;;  %v3741_v27 = vmul.f32 %v3740_v46, %v8751_v3  ;;  %v3644_v36 = vadd.f32 0.4994258, %v3643_v24 }
 0x9c2   :  { %v3603_v12 = vmul.f32 %v3602_v33, %v8606_v1  ;;  %v3691_v30 = vadd.f32 %v5040_v6, %v3690_v61  ;;  %v3561_v55 = vmul.f32 %v3560_v48, %v8589_v47  ;;  %v3520_v60 = vadd.f32 0.014752088, %v3519_v32 }
 0x9c3   :  { %v4154_v0 = vadd.f32 1.0, %v4824_v62  ;;  %vm3697_vm6 = vcmp.eq.f32.partialorder %v3696_v8, 8.507059e+37  ;;  %v3699_v38 = vor.u32 1.1754944e-38, %v3698_v25  ;;  %v3645_v63 = vmul.f32 %v3644_v36, %v8611_v53 }
 0x9c4   :  { %v3604_v7 = vadd.f32 0.4994258, %v3603_v12  ;;  %v3695_v3 = vsel %vm3694_vm10, %v5040_v6, %v3691_v30  ;;  %v3562_v46 = vadd.f32 0.112945676, %v3561_v55  ;;  %v3521_v39 = vmul.f32 %v3520_v60, %v8579_v41 }
 0x9c5   :  { %v4170_v15 = vmul.f32 %v4154_v0, %v8796_v45  ;;  %v4819_v40 = vclamps-f32 %v3741_v27, 1.0  ;;  %v3700_v31 = vsel %vm3697_vm6, %v3699_v38, %v3695_v3  ;;  %v8934_v5 = vadd.f32 1.0, %v3645_v63 }
 0x9c6   :  { %v3605_v28 = vmul.f32 %v3604_v7, %v8606_v1  ;;  %v4169_v4 = vmul.f32 %v4153_v56, %v8769_v2  ;;  %v3701_v8 = vmul.f32 %v3700_v31, %v8712_v21  ;;  %v3563_v10 = vmul.f32 %v3562_v46, %v8589_v47 }
 0x9c7   :  { %4181 = vmatpush.msrb.mxu1 %v4170_v15  ;;  %v3522_v23 = vadd.f32 0.112945676, %v3521_v39  ;;  %v3479_v45 = vmul.f32 0.5, %v8633_v57  ;;  %v4168_v6 = vmul.f32 %v4152_v18, %v8736_v29  ;;  %v4150_v16 = vadd.f32 1.0, %v4820_v44 }
 0x9c8   :  { %5041 = vrcp.f32 %v8934_v5  ;;  %v4818_v34 = vclamps-f32 %v3701_v8, 1.0  ;;  %v8945_v58 = vadd.f32 1.0, %v3605_v28  ;;  %v3564_v19 = vadd.f32 0.4994258, %v3563_v10 }
 0x9c9   :  { %4182 = vmatpush.msrb.mxu1 %v4169_v4  ;;  %v3523_v2 = vmul.f32 %v3522_v23, %v8579_v41  ;;  %v3633_v21 = vadd.f32 0.18741608, %v8697_v22  ;;  %v3478_v37 = vmul.f32 0.5, %v8615_v14  ;;  %v4167_v57 = vmul.f32 %v8905_v35, %v3479_v45 }
 0x9ca   :  { %v4149_v29 = vadd.f32 1.0, %v4819_v40  ;;  %5043 = vrcp.f32 %v8945_v58  ;;  %v3513_v51 = vadd.f32 0.18741608, %v8662_v43  ;;  %v3593_v44 = vadd.f32 0.18741608, %v8691_v54 }
 0x9cb   :  { %4183 = vmatpush.msrb.mxu1 %v4168_v6  ;;  %v3565_v18 = vmul.f32 %v3564_v19, %v8589_v47  ;;  %v3524_v59 = vadd.f32 0.4994258, %v3523_v2  ;;  %v3553_v25 = vadd.f32 0.18741608, %v8670_v50  ;;  %v3477_v24 = vmul.f32 0.5, %v8593_v11 }
 0x9cc   :  { %v4166_v22 = vmul.f32 %v4150_v16, %v3478_v37  ;;  %v4148_v14 = vadd.f32 1.0, %v4818_v34  ;;  %v3634_v35 = vmul.f32 %v3633_v21, %v8611_v53  ;;  %v3476_v43 = vmul.f32 0.5, %v8562_v26 }
 0x9cd   :  { %4184 = vmatpush.msrb.mxu1 %v4167_v57  ;;  %v8958_v62 = vadd.f32 1.0, %v3565_v18  ;;  %v3525_v61 = vmul.f32 %v3524_v59, %v8579_v41  ;;  %v4165_v54 = vmul.f32 %v4149_v29, %v3477_v24  ;;  %v3514_v50 = vmul.f32 %v3513_v51, %v8579_v41 }
 0x9ce   :  { %v5042_v33 = vpop.eup %5041  ;;  %v3594_v11 = vmul.f32 %v3593_v44, %v8606_v1  ;;  %v3554_v56 = vmul.f32 %v3553_v25, %v8589_v47  ;;  %v4164_v53 = vmul.f32 %v4148_v14, %v3476_v43  ;;  %v3635_v12 = vadd.f32 1.1283791, %v3634_v35 }
 0x9cf   :  { %4185 = vmatpush.msrb.mxu1 %v4166_v22  ;;  %v3648_v48 = vmul.f32 %v5042_v33, %v8934_v5  ;;  %5045 = vrcp.f32 %v8958_v62  ;;  %v8967_v36 = vadd.f32 1.0, %v3525_v61  ;;  %v3658_v26 = vand.u32 2147483648, %v8934_v5 }
 0x9d0   :  { %v5044_v32 = vpop.eup %5043  ;;  %vm3653_vm13 = vweird.f32 %v5042_v33  ;;  %v3656_v41 = vand.u32 2147483647, %v8934_v5  ;;  %v3515_v1 = vadd.f32 1.1283791, %v3514_v50  ;;  %v3474_v47 = vmul.f32 0.5, %v8567_v42 }
 0x9d1   :  { %4186 = vmatpush.msrb.mxu1 %v4165_v54  ;;  %v3649_v27 = vsub.f32 1.0, %v3648_v48  ;;  %v3608_v0 = vmul.f32 %v5044_v32, %v8945_v58  ;;  %5047 = vrcp.f32 %v8967_v36  ;;  %v3595_v55 = vadd.f32 1.1283791, %v3594_v11 }
 0x9d2   :  { %v3555_v38 = vadd.f32 1.1283791, %v3554_v56  ;;  %vm3652_vm5 = vweird.f32 %v8934_v5  ;;  %v3618_v7 = vand.u32 2147483648, %v8945_v58  ;;  %v3659_v3 = vor.u32 1.1754944e-38, %v3658_v26 }
 0x9d3   :  { %4187 = vmatpush.msrb.mxu1 %v4164_v53  ;;  %v3650_v30 = vmul.f32 %v5042_v33, %v3649_v27  ;;  %v3609_v60 = vsub.f32 1.0, %v3608_v0  ;;  %vm3654_vm15 = vmor %vm3652_vm5, %vm3653_vm13  ;;  %vm3613_vm7 = vweird.f32 %v5044_v32  ;;  %v3616_v39 = vand.u32 2147483647, %v8945_v58 }
 0x9d4   :  { %v3636_v40 = vmul.f32 %v3635_v12, %v8587_v13  ;;  %vm3657_vm0 = vcmp.eq.f32.partialorder %v3656_v41, 8.507059e+37  ;;  %v3596_v28 = vmul.f32 %v3595_v55, %v8582_v49  ;;  %vm3612_vm9 = vweird.f32 %v8945_v58  ;;  %v9874_v12 = vld [vmem:[#allocation47_spill] sm:$0xff] }
 0x9d5   :  { %v3651_v63 = vadd.f32 %v5042_v33, %v3650_v30  ;;  %v5046_v15 = vpop.eup %5045  ;;  %v3610_v46 = vmul.f32 %v5044_v32, %v3609_v60  ;;  %vm3614_vm11 = vmor %vm3612_vm9, %vm3613_vm7  ;;  %v3619_v23 = vor.u32 1.1754944e-38, %v3618_v7  ;;  %v3578_v6 = vand.u32 2147483648, %v8958_v62  ;;  %v5088_v30 = vld [vmem:[%s9265_s7 + $0x18] sm:$0xff]  ;;  %v9876_v60 = vld [vmem:[#allocation9_spill] sm:$0xff] }
 0x9d6   :  { %v3568_v42 = vmul.f32 %v5046_v15, %v8958_v62  ;;  %vm3617_vm2 = vcmp.eq.f32.partialorder %v3616_v39, 8.507059e+37  ;;  %v3576_v13 = vand.u32 2147483647, %v8958_v62  ;;  %vm3573_vm8 = vweird.f32 %v5046_v15  ;;  %v9875_v41 = vld [vmem:[#allocation79_spill] sm:$0xff] }
 0x9d7   :  { %v3655_v31 = vsel %vm3654_vm15, %v5042_v33, %v3651_v63  ;;  %v3611_v8 = vadd.f32 %v5044_v32, %v3610_v46  ;;  %v5048_v5 = vpop.eup %5047  ;;  %v3475_v21 = vmul.f32 0.5, %v8573_v20  ;;  %vm3572_vm3 = vweird.f32 %v8958_v62  ;;  %v9877_v63 = vld [vmem:[#allocation51_spill] sm:$0xff]  ;;  %v4206_v46 = vpop.xlane.xlu2 %4205 }
 0x9d8   :  { %v3660_v4 = vsel %vm3657_vm0, %v3659_v3, %v3655_v31  ;;  %v3569_v45 = vsub.f32 1.0, %v3568_v42  ;;  %v3528_v34 = vmul.f32 %v5048_v5, %v8967_v36  ;;  %v3579_v51 = vor.u32 1.1754944e-38, %v3578_v6  ;;  %vm3574_vm12 = vmor %vm3572_vm3, %vm3573_vm8  ;;  %v9879_v31 = vld [vmem:[#allocation86_spill] sm:$0xff] }
 0x9d9   :  { %v3661_v10 = vmul.f32 %v3660_v4, %v3636_v40  ;;  %v3615_v16 = vsel %vm3614_vm11, %v5044_v32, %v3611_v8  ;;  %v3538_v44 = vand.u32 2147483648, %v8967_v36  ;;  %vm3533_vm14 = vweird.f32 %v5048_v5  ;;  %v4845_v4 = vld [vmem:[%s9267_s9 + $0xf8] sm:$0xff]  ;;  %v4844_v8 = vld [vmem:[%s9267_s9 + $0xf0] sm:$0xff]  ;;  %v4843_v6 = vld [vmem:[%s9267_s9 + $0xe8] sm:$0xff] }
 0x9da   :  { %v3620_v2 = vsel %vm3617_vm2, %v3619_v23, %v3615_v16  ;;  %v3570_v49 = vmul.f32 %v5046_v15, %v3569_v45  ;;  %v3529_v37 = vsub.f32 1.0, %v3528_v34  ;;  %v3536_v25 = vand.u32 2147483647, %v8967_v36  ;;  %4313 = vmatpush.msra.mxu3 %v4845_v4  ;;  %v4842_v16 = vld [vmem:[%s9267_s9 + $0xe0] sm:$0xff] }
 0x9db   :  { %v4817_v19 = vclamps-f32 %v3661_v10, 1.0  ;;  %v3621_v58 = vmul.f32 %v3620_v2, %v3596_v28  ;;  %v3556_v24 = vmul.f32 %v3555_v38, %v8559_v17  ;;  %vm3577_vm4 = vcmp.eq.f32.partialorder %v3576_v13, 8.507059e+37 }
 0x9dc   :  { %v3571_v29 = vadd.f32 %v5046_v15, %v3570_v49  ;;  %v3530_v59 = vmul.f32 %v5048_v5, %v3529_v37  ;;  %vm3532_vm1 = vweird.f32 %v8967_v36  ;;  %v3539_v61 = vor.u32 1.1754944e-38, %v3538_v44  ;;  %4314 = vmatpush.msra.mxu3 %v4844_v8  ;;  %v4840_v49 = vld [vmem:[%s9267_s9 + $0xd0] sm:$0xff]  ;;  %v4838_v37 = vld [vmem:[%s9267_s9 + $0xc0] sm:$0xff] }
 0x9dd   :  { %v4147_v57 = vadd.f32 1.0, %v4817_v19  ;;  %v4816_v18 = vclamps-f32 %v3621_v58, 1.0  ;;  %vm3534_vm10 = vmor %vm3532_vm1, %vm3533_vm14  ;;  %v3516_v43 = vmul.f32 %v3515_v1, %v8556_v52  ;;  %vm3537_vm6 = vcmp.eq.f32.partialorder %v3536_v25, 8.507059e+37  ;;  %v5087_v52 = vld [vmem:[%s9265_s7 + $0x10] sm:$0xff]  ;;  %v4841_v19 = vld [vmem:[%s9267_s9 + $0xd8] sm:$0xff] }
 0x9de   :  { %v3575_v14 = vsel %vm3574_vm12, %v5046_v15, %v3571_v29  ;;  %v3531_v35 = vadd.f32 %v5048_v5, %v3530_v59  ;;  %v3473_v32 = vmul.f32 0.5, %v8553_v9  ;;  %v3472_v36 = vmul.f32 0.5, %v9874_v12  ;;  %v9878_v15 = vld [vmem:[#allocation85_spill] sm:$0xff]  ;;  %4315 = vmatpush.msra.mxu3 %v4843_v6 }
 0x9df   :  { %v4163_v22 = vmul.f32 %v4147_v57, %v3475_v21  ;;  %v4146_v20 = vadd.f32 1.0, %v4816_v18  ;;  %v3580_v33 = vsel %vm3577_vm4, %v3579_v51, %v3575_v14  ;;  %v4212_v39 = vmul.f32 %v4206_v46, %v9876_v60  ;;  %v4839_v58 = vld [vmem:[%s9267_s9 + $0xc8] sm:$0xff]  ;;  %v4837_v51 = vld [vmem:[%s9267_s9 + $0xb8] sm:$0xff]  ;;  %v4836_v18 = vld [vmem:[%s9267_s9 + $0xb0] sm:$0xff] }
 0x9e0   :  { %v3581_v62 = vmul.f32 %v3580_v33, %v3556_v24  ;;  %v3535_v48 = vsel %vm3534_vm10, %v5048_v5, %v3531_v35  ;;  %4316 = vmatpush.msra.mxu3 %v4842_v16  ;;  %v4835_v59 = vld [vmem:[%s9267_s9 + $0xa8] sm:$0xff]  ;;  %v4834_v25 = vld [vmem:[%s9267_s9 + $0xa0] sm:$0xff]  ;;  %v4833_v14 = vld [vmem:[%s9267_s9 + $0x98] sm:$0xff] }
 0x9e1   :  { %4188 = vmatpush.msrb.mxu1 %v4163_v22  ;;  %v4162_v54 = vmul.f32 %v4146_v20, %v3474_v47  ;;  %v3540_v11 = vsel %vm3537_vm6, %v3539_v61, %v3535_v48  ;;  %v4204_v47 = vpop.xlane.xlu1 %4203  ;;  %v9015_v42 = vsub.f32 %v9879_v31, %v4212_v39  ;;  %v4832_v35 = vld [vmem:[%s9267_s9 + $0x90] sm:$0xff]  ;;  %v4831_v61 = vld [vmem:[%s9267_s9 + $0x88] sm:$0xff] }
 0x9e2   :  { %v4815_v50 = vclamps-f32 %v3581_v62, 1.0  ;;  %v3541_v17 = vmul.f32 %v3540_v11, %v3516_v43  ;;  %v4211_v38 = vmul.f32 %v4204_v47, %v9876_v60  ;;  %4317 = vmatpush.msra.mxu3 %v4841_v19 }
 0x9e3   :  { %4189 = vmatpush.msrb.mxu1 %v4162_v54  ;;  %v4220_v28 = vmul.f32 %v9015_v42, %v9015_v42  ;;  %v4830_v54 = vld [vmem:[%s9267_s9 + $0x80] sm:$0xff] }
 0x9e4   :  { %v4145_v56 = vadd.f32 1.0, %v4815_v50  ;;  %v4814_v53 = vclamps-f32 %v3541_v17, 1.0  ;;  %v9009_v3 = vsub.f32 %v9878_v15, %v4211_v38  ;;  %4318 = vmatpush.msra.mxu3 %v4840_v49 }
 0x9e6   :  { %v4161_v27 = vmul.f32 %v4145_v56, %v3473_v32  ;;  %v4144_v26 = vadd.f32 1.0, %v4814_v53  ;;  %v4219_v40 = vmul.f32 %v9009_v3, %v9009_v3  ;;  %4319 = vmatpush.msra.mxu3 %v4839_v58 }
 0x9e8   :  { %4190 = vmatpush.msrb.mxu1 %v4161_v27  ;;  %v4160_v0 = vmul.f32 %v4144_v26, %v3472_v36  ;;  %4320 = vmatpush.msra.mxu3 %v4838_v37  ;;  %v5089_v36 = vld [vmem:[%s9261_s3 + $0x1] ss:$0 sm:$0xff] }
 0x9ea   :  { %4191 = vmatpush.msrb.mxu1 %v4160_v0  ;;  %4321 = vmatpush.msra.mxu3 %v4837_v51 }
 0x9eb   :  { %4192 = vmatmul.f32.vlgmr.msrb.gmra.mxu1 %v5087_v52  ;;  %v5090_v52 = vld [vmem:[%s9262_s4 + $0x1] ss:$0 sm:$0xff] }
 0x9ec   :  { %4322 = vmatpush.msra.mxu3 %v4836_v18  ;;  %v9096_v18 = vld [vmem:[%s9268_s10 + $0x1] ss:$0 sm:$0xff] }
 0x9ee   :  { %4323 = vmatpush.msra.mxu3 %v4835_v59 }
 0x9f0   :  { %4324 = vmatpush.msra.mxu3 %v4834_v25 }
 0x9f2   :  { %4325 = vmatpush.msra.mxu3 %v4833_v14 }
 0x9f3   :  { %4195 = vmatmul.f32.gmra.mxu1 %v5088_v30 }
 0x9f4   :  { %4326 = vmatpush.msra.mxu3 %v4832_v35 }
 0x9f6   :  { %4327 = vmatpush.msra.mxu3 %v4831_v61 }
 0x9f8   :  { %4328 = vmatpush.msra.mxu3 %v4830_v54 }
 0xa68   :  { %v4193_v9 = vpop.f32.mrf.mxu1 }
 0xa69   :  { %v9000_v1 = vadd.f32 %v4193_v9, %v9875_v41 }
 0xa6b   :  { %4207 = vadd.xlane.f32.xlu0 %v9000_v1 }
 0xa70   :  { %v4196_v55 = vpop.f32.mrf.mxu1 }
 0xa71   :  { %v9005_v7 = vadd.f32 %v4196_v55, %v9877_v63 }
 0xa73   :  { %4209 = vadd.xlane.f32.xlu0 %v9005_v7 }
 0xa7b   :  { %4223 = vadd.xlane.f32.xlu0 %v4219_v40 }
 0xa83   :  { %4225 = vadd.xlane.f32.xlu0 %v4220_v28 }
 0xade   :  { %v4208_v5 = vpop.xlane.xlu0 %4207 }
 0xadf   :  { %v4213_v10 = vmul.f32 %v4208_v5, %v9876_v60 }
 0xae1   :  { %v9027_v23 = vsub.f32 %v9000_v1, %v4213_v10 }
 0xae3   :  { %v4221_v45 = vmul.f32 %v9027_v23, %v9027_v23 }
 0xae5   :  { %4227 = vadd.xlane.f32.xlu2 %v4221_v45 }
 0xae6   :  { %v4210_v13 = vpop.xlane.xlu0 %4209 }
 0xae7   :  { %v4214_v34 = vmul.f32 %v4210_v13, %v9876_v60 }
 0xae9   :  { %v9042_v2 = vsub.f32 %v9005_v7, %v4214_v34 }
 0xaeb   :  { %v4222_v21 = vmul.f32 %v9042_v2, %v9042_v2 }
 0xaed   :  { %4229 = vadd.xlane.f32.xlu1 %v4222_v21 }
 0xaee   :  { %v4224_v57 = vpop.xlane.xlu0 %4223 }
 0xaef   :  { %v4231_v29 = vmul.f32 %v4224_v57, %v9876_v60 }
 0xaf1   :  { %v4235_v44 = vadd.f32 1e-05, %v4231_v29 }
 0xaf3   :  { %5049 = vrsqrt.f32 %v4235_v44  ;;  %vm4245_vm5 = vweird.f32 %v4235_v44 }
 0xaf6   :  { %v4226_v24 = vpop.xlane.xlu0 %4225 }
 0xaf7   :  { %v4232_v22 = vmul.f32 %v4226_v24, %v9876_v60 }
 0xaf9   :  { %v5050_v20 = vpop.eup %5049  ;;  %v4236_v33 = vadd.f32 1e-05, %v4232_v22 }
 0xafa   :  { %v4240_v62 = vmul.f32 %v5050_v20, %v4235_v44  ;;  %vm4246_vm13 = vweird.f32 %v5050_v20 }
 0xafb   :  { %5051 = vrsqrt.f32 %v4236_v33  ;;  %vm4247_vm15 = vmor %vm4245_vm5, %vm4246_vm13  ;;  %vm4255_vm0 = vweird.f32 %v4236_v33 }
 0xafc   :  { %v4241_v43 = vmul.f32 %v5050_v20, %v4240_v62 }
 0xafe   :  { %v4242_v48 = vmul.f32 0.5, %v4241_v43 }
 0xb00   :  { %v4243_v50 = vsub.f32 1.5, %v4242_v48 }
 0xb01   :  { %v5052_v11 = vpop.eup %5051 }
 0xb02   :  { %v4244_v17 = vmul.f32 %v5050_v20, %v4243_v50  ;;  %v4250_v32 = vmul.f32 %v5052_v11, %v4236_v33  ;;  %vm4256_vm7 = vweird.f32 %v5052_v11 }
 0xb03   :  { %vm4257_vm9 = vmor %vm4255_vm0, %vm4256_vm7 }
 0xb04   :  { %v4248_v56 = vsel %vm4247_vm15, %v5050_v20, %v4244_v17  ;;  %v4251_v53 = vmul.f32 %v5052_v11, %v4250_v32  ;;  %v4866_v17 = vld [vmem:[%s9269_s11 + $0xf8] sm:$0xff]  ;;  %v4865_v32 = vld [vmem:[%s9269_s11 + $0xf0] sm:$0xff] }
 0xb05   :  { %v4279_v27 = vmul.f32 %v4248_v56, %v9009_v3  ;;  %4540 = vmatpush.msra.mxu1 %v4866_v17 }
 0xb06   :  { %v4252_v12 = vmul.f32 0.5, %v4251_v53 }
 0xb07   :  { %v4283_v26 = vmul.f32 %v5089_v36, %v4279_v27  ;;  %v4864_v27 = vld [vmem:[%s9269_s11 + $0xe8] sm:$0xff]  ;;  %4541 = vmatpush.msra.mxu1 %v4865_v32 }
 0xb08   :  { %v4253_v0 = vsub.f32 1.5, %v4252_v12 }
 0xb09   :  { %v4287_v30 = vadd.f32 %v5090_v52, %v4283_v26  ;;  %4542 = vmatpush.msra.mxu1 %v4864_v27 }
 0xb0a   :  { %v4254_v9 = vmul.f32 %v5052_v11, %v4253_v0  ;;  %v4863_v0 = vld [vmem:[%s9269_s11 + $0xe0] sm:$0xff] }
 0xb0b   :  { %4329 = vmatmul.f32.vlgmr.msra.gmra.mxu3 %v4287_v30  ;;  %4543 = vmatpush.msra.mxu1 %v4863_v0 }
 0xb0c   :  { %v4258_v41 = vsel %vm4257_vm9, %v5052_v11, %v4254_v9  ;;  %v4862_v9 = vld [vmem:[%s9269_s11 + $0xd8] sm:$0xff] }
 0xb0d   :  { %v4280_v47 = vmul.f32 %v4258_v41, %v9015_v42  ;;  %4544 = vmatpush.msra.mxu1 %v4862_v9 }
 0xb0f   :  { %v4284_v55 = vmul.f32 %v5089_v36, %v4280_v47 }
 0xb11   :  { %v4288_v38 = vadd.f32 %v5090_v52, %v4284_v55 }
 0xb13   :  { %4332 = vmatmul.f32.gmra.mxu3 %v4288_v38  ;;  %v4861_v38 = vld [vmem:[%s9269_s11 + $0xd0] sm:$0xff] }
 0xb14   :  { %4545 = vmatpush.msra.mxu1 %v4861_v38 }
 0xb58   :  { %v4228_v63 = vpop.xlane.xlu2 %4227 }
 0xb59   :  { %v4233_v3 = vmul.f32 %v4228_v63, %v9876_v60 }
 0xb5b   :  { %v4237_v46 = vadd.f32 1e-05, %v4233_v3  ;;  %v4860_v3 = vld [vmem:[%s9269_s11 + $0xc8] sm:$0xff] }
 0xb5c   :  { %4546 = vmatpush.msra.mxu1 %v4860_v3 }
 0xb5d   :  { %5053 = vrsqrt.f32 %v4237_v46  ;;  %vm4265_vm2 = vweird.f32 %v4237_v46 }
 0xb60   :  { %v4230_v39 = vpop.xlane.xlu1 %4229 }
 0xb61   :  { %v4234_v40 = vmul.f32 %v4230_v39, %v9876_v60 }
 0xb63   :  { %v5054_v28 = vpop.eup %5053  ;;  %v4238_v4 = vadd.f32 1e-05, %v4234_v40 }
 0xb64   :  { %v4260_v8 = vmul.f32 %v5054_v28, %v4237_v46  ;;  %vm4266_vm11 = vweird.f32 %v5054_v28 }
 0xb65   :  { %5055 = vrsqrt.f32 %v4238_v4  ;;  %vm4267_vm8 = vmor %vm4265_vm2, %vm4266_vm11  ;;  %vm4275_vm12 = vweird.f32 %v4238_v4 }
 0xb66   :  { %v4261_v5 = vmul.f32 %v5054_v28, %v4260_v8 }
 0xb68   :  { %v4262_v10 = vmul.f32 0.5, %v4261_v5  ;;  %v4858_v5 = vld [vmem:[%s9269_s11 + $0xb8] sm:$0xff] }
 0xb6a   :  { %v4263_v45 = vsub.f32 1.5, %v4262_v10 }
 0xb6b   :  { %v5056_v42 = vpop.eup %5055 }
 0xb6c   :  { %v4264_v6 = vmul.f32 %v5054_v28, %v4263_v45  ;;  %v4270_v16 = vmul.f32 %v5056_v42, %v4238_v4  ;;  %vm4276_vm3 = vweird.f32 %v5056_v42 }
 0xb6d   :  { %vm4277_vm14 = vmor %vm4275_vm12, %vm4276_vm3 }
 0xb6e   :  { %v4271_v13 = vmul.f32 %v5056_v42, %v4270_v16  ;;  %v4268_v34 = vsel %vm4267_vm8, %v5054_v28, %v4264_v6  ;;  %v4859_v28 = vld [vmem:[%s9269_s11 + $0xc0] sm:$0xff]  ;;  %v4857_v16 = vld [vmem:[%s9269_s11 + $0xb0] sm:$0xff] }
 0xb6f   :  { %v4281_v19 = vmul.f32 %v4268_v34, %v9027_v23  ;;  %4547 = vmatpush.msra.mxu1 %v4859_v28 }
 0xb70   :  { %v4272_v49 = vmul.f32 0.5, %v4271_v13 }
 0xb71   :  { %v4285_v21 = vmul.f32 %v5089_v36, %v4281_v19  ;;  %4548 = vmatpush.msra.mxu1 %v4858_v5 }
 0xb72   :  { %v4273_v60 = vsub.f32 1.5, %v4272_v49  ;;  %v4856_v49 = vld [vmem:[%s9269_s11 + $0xa8] sm:$0xff] }
 0xb73   :  { %v4289_v58 = vadd.f32 %v5090_v52, %v4285_v21  ;;  %4549 = vmatpush.msra.mxu1 %v4857_v16 }
 0xb74   :  { %v4274_v37 = vmul.f32 %v5056_v42, %v4273_v60 }
 0xb75   :  { %4335 = vmatmul.f32.gmra.mxu3 %v4289_v58  ;;  %4550 = vmatpush.msra.mxu1 %v4856_v49 }
 0xb76   :  { %v4278_v57 = vsel %vm4277_vm14, %v5056_v42, %v4274_v37 }
 0xb77   :  { %v4282_v29 = vmul.f32 %v4278_v57, %v9042_v2 }
 0xb79   :  { %v4286_v51 = vmul.f32 %v5089_v36, %v4282_v29  ;;  %v4855_v29 = vld [vmem:[%s9269_s11 + $0xa0] sm:$0xff] }
 0xb7a   :  { %4551 = vmatpush.msra.mxu1 %v4855_v29 }
 0xb7b   :  { %v4290_v44 = vadd.f32 %v5090_v52, %v4286_v51 }
 0xb7d   :  { %4338 = vmatmul.f32.gmra.mxu3 %v4290_v44 }
 0xb8e   :  { %v4330_v23 = vpop.f32.mrf.mxu3 }
 0xb8f   :  { %v9099_v59 = vadd.f32 %v9096_v18, %v4330_v23 }
 0xb91   :  { %v9102_v25 = vmul.f32 0.70710677, %v9099_v59  ;;  %v4342_v32 = vmul.f32 0.5, %v9099_v59 }
 0xb93   :  { %v4350_v24 = vmul.f32 %v9102_v25, %v9102_v25 }
 0xb95   :  { %v4351_v22 = vmin.f32 %v4350_v24, 16.0  ;;  %v4854_v24 = vld [vmem:[%s9269_s11 + $0x98] sm:$0xff] }
 0xb96   :  { %v4333_v11 = vpop.f32.mrf.mxu3  ;;  %4552 = vmatpush.msra.mxu1 %v4854_v24 }
 0xb97   :  { %v4352_v2 = vmul.f32 2.1237322e-06, %v4351_v22  ;;  %v4363_v14 = vmul.f32 3.8918573e-05, %v4351_v22  ;;  %v9113_v53 = vadd.f32 %v9096_v18, %v4333_v11 }
 0xb99   :  { %v4353_v20 = vadd.f32 0.00028619796, %v4352_v2  ;;  %v4364_v33 = vadd.f32 0.001143296, %v4363_v14  ;;  %v9119_v26 = vmul.f32 0.70710677, %v9113_v53 }
 0xb9b   :  { %v4354_v35 = vmul.f32 %v4353_v20, %v4351_v22  ;;  %v4365_v62 = vmul.f32 %v4364_v33, %v4351_v22  ;;  %v4390_v30 = vmul.f32 %v9119_v26, %v9119_v26  ;;  %v4853_v33 = vld [vmem:[%s9269_s11 + $0x90] sm:$0xff] }
 0xb9c   :  { %4553 = vmatpush.msra.mxu1 %v4853_v33 }
 0xb9d   :  { %v4355_v61 = vadd.f32 0.0036580483, %v4354_v35  ;;  %v4366_v43 = vadd.f32 0.014752088, %v4365_v62  ;;  %v9129_v55 = vmin.f32 %v4390_v30, 16.0 }
 0xb9f   :  { %v4367_v54 = vmul.f32 %v4366_v43, %v4351_v22  ;;  %v4356_v48 = vmul.f32 %v4355_v61, %v4351_v22  ;;  %v4392_v63 = vmul.f32 2.1237322e-06, %v9129_v55  ;;  %v4403_v46 = vmul.f32 3.8918573e-05, %v9129_v55 }
 0xba1   :  { %v4368_v50 = vadd.f32 0.112945676, %v4367_v54  ;;  %v4357_v12 = vadd.f32 0.05243302, %v4356_v48  ;;  %v4393_v40 = vadd.f32 0.00028619796, %v4392_v63 }
 0xba2   :  { %v4404_v4 = vadd.f32 0.001143296, %v4403_v46  ;;  %v4852_v54 = vld [vmem:[%s9269_s11 + $0x88] sm:$0xff] }
 0xba3   :  { %v4369_v56 = vmul.f32 %v4368_v50, %v4351_v22  ;;  %v4358_v41 = vmul.f32 %v4357_v12, %v4351_v22  ;;  %v4394_v8 = vmul.f32 %v4393_v40, %v9129_v55  ;;  %4554 = vmatpush.msra.mxu1 %v4852_v54 }
 0xba4   :  { %v4405_v10 = vmul.f32 %v4404_v4, %v9129_v55 }
 0xba5   :  { %v4370_v36 = vadd.f32 0.4994258, %v4369_v56  ;;  %v4359_v39 = vadd.f32 0.18741608, %v4358_v41  ;;  %v4395_v34 = vadd.f32 0.0036580483, %v4394_v8 }
 0xba6   :  { %v4406_v13 = vadd.f32 0.014752088, %v4405_v10 }
 0xba7   :  { %v4371_v52 = vmul.f32 %v4370_v36, %v4351_v22  ;;  %v4360_v42 = vmul.f32 %v4359_v39, %v4351_v22  ;;  %v4396_v44 = vmul.f32 %v4395_v34, %v9129_v55 }
 0xba8   :  { %v4407_v21 = vmul.f32 %v4406_v13, %v9129_v55 }
 0xba9   :  { %v4372_v47 = vadd.f32 1.0, %v4371_v52  ;;  %v4361_v60 = vadd.f32 1.1283791, %v4360_v42  ;;  %v4397_v61 = vadd.f32 0.05243302, %v4396_v44 }
 0xbaa   :  { %v4408_v51 = vadd.f32 0.112945676, %v4407_v21 }
 0xbab   :  { %5057 = vrcp.f32 %v4372_v47  ;;  %v4384_v58 = vand.u32 2147483648, %v4372_v47  ;;  %v4382_v57 = vand.u32 2147483647, %v4372_v47  ;;  %vm4378_vm1 = vweird.f32 %v4372_v47 }
 0xbac   :  { %v4409_v22 = vmul.f32 %v4408_v51, %v9129_v55  ;;  %v4362_v14 = vmul.f32 %v4361_v60, %v9102_v25  ;;  %v4851_v25 = vld [vmem:[%s9269_s11 + $0x80] sm:$0xff]  ;;  %v4398_v17 = vmul.f32 %v4397_v61, %v9129_v55 }
 0xbad   :  { %v4385_v2 = vor.u32 1.1754944e-38, %v4384_v58  ;;  %vm4383_vm6 = vcmp.eq.f32.partialorder %v4382_v57, 8.507059e+37  ;;  %4555 = vmatpush.msra.mxu1 %v4851_v25 }
 0xbae   :  { %v4410_v35 = vadd.f32 0.4994258, %v4409_v22  ;;  %v4399_v12 = vadd.f32 0.18741608, %v4398_v17 }
 0xbb0   :  { %v4411_v48 = vmul.f32 %v4410_v35, %v9129_v55  ;;  %v4400_v0 = vmul.f32 %v4399_v12, %v9129_v55  ;;  %v4343_v55 = vmul.f32 0.5, %v9113_v53 }
 0xbb1   :  { %v5058_v45 = vpop.eup %5057 }
 0xbb2   :  { %v4374_v6 = vmul.f32 %v5058_v45, %v4372_v47  ;;  %vm4379_vm4 = vweird.f32 %v5058_v45  ;;  %v4412_v11 = vadd.f32 1.0, %v4411_v48  ;;  %v4401_v41 = vadd.f32 1.1283791, %v4400_v0 }
 0xbb3   :  { %vm4380_vm10 = vmor %vm4378_vm1, %vm4379_vm4  ;;  %vm4596_vm1 = vcmask 1040384  }
 0xbb4   :  { %v4375_v19 = vsub.f32 1.0, %v4374_v6  ;;  %5059 = vrcp.f32 %v4412_v11  ;;  %v4424_v9 = vand.u32 2147483648, %v4412_v11  ;;  %v4422_v38 = vand.u32 2147483647, %v4412_v11 }
 0xbb5   :  { %vm4418_vm5 = vweird.f32 %v4412_v11  ;;  %v4402_v3 = vmul.f32 %v4401_v41, %v9119_v26 }
 0xbb6   :  { %v4376_v37 = vmul.f32 %v5058_v45, %v4375_v19  ;;  %v4425_v59 = vor.u32 1.1754944e-38, %v4424_v9  ;;  %vm4423_vm7 = vcmp.eq.f32.partialorder %v4422_v38, 8.507059e+37 }
 0xbb8   :  { %v4377_v23 = vadd.f32 %v5058_v45, %v4376_v37 }
 0xbba   :  { %v4381_v20 = vsel %vm4380_vm10, %v5058_v45, %v4377_v23  ;;  %v5060_v36 = vpop.eup %5059  ;;  %vm4638_vm10 = vcmask 74752  }
 0xbbb   :  { %v4386_v62 = vsel %vm4383_vm6, %v4385_v2, %v4381_v20  ;;  %v4414_v52 = vmul.f32 %v5060_v36, %v4412_v11  ;;  %vm4419_vm13 = vweird.f32 %v5060_v36 }
 0xbbc   :  { %v4387_v43 = vmul.f32 %v4386_v62, %v4362_v14  ;;  %vm4420_vm15 = vmor %vm4418_vm5, %vm4419_vm13 }
 0xbbd   :  { %v4415_v30 = vsub.f32 1.0, %v4414_v52 }
 0xbbe   :  { %v4847_v50 = vclamps-f32 %v4387_v43, 1.0 }
 0xbbf   :  { %v4416_v47 = vmul.f32 %v5060_v36, %v4415_v30 }
 0xbc0   :  { %v4510_v56 = vadd.f32 1.0, %v4847_v50 }
 0xbc1   :  { %v4417_v63 = vadd.f32 %v5060_v36, %v4416_v47 }
 0xbc2   :  { %v4514_v27 = vmul.f32 %v4510_v56, %v4342_v32 }
 0xbc3   :  { %v4421_v46 = vsel %vm4420_vm15, %v5060_v36, %v4417_v63 }
 0xbc4   :  { %4556 = vmatmul.f32.vlgmr.msra.gmra.mxu1 %v4514_v27  ;;  %v4426_v39 = vsel %vm4423_vm7, %v4425_v59, %v4421_v46 }
 0xbc5   :  { %v4427_v40 = vmul.f32 %v4426_v39, %v4402_v3 }
 0xbc7   :  { %v4848_v28 = vclamps-f32 %v4427_v40, 1.0 }
 0xbc9   :  { %v4511_v4 = vadd.f32 1.0, %v4848_v28 }
 0xbcb   :  { %v4515_v8 = vmul.f32 %v4511_v4, %v4343_v55 }
 0xbcd   :  { %4559 = vmatmul.f32.gmra.mxu1 %v4515_v8 }
 0xbf8   :  { %v4336_v5 = vpop.f32.mrf.mxu3 }
 0xbf9   :  { %v9179_v10 = vadd.f32 %v9096_v18, %v4336_v5 }
 0xbfb   :  { %v4348_v45 = vmul.f32 0.70710677, %v9179_v10 }
 0xbfd   :  { %v4430_v42 = vmul.f32 %v4348_v45, %v4348_v45 }
 0xbff   :  { %v4431_v6 = vmin.f32 %v4430_v42, 16.0 }
 0xc00   :  { %v4339_v16 = vpop.f32.mrf.mxu3 }
 0xc01   :  { %v4432_v26 = vmul.f32 2.1237322e-06, %v4431_v6  ;;  %v9183_v13 = vadd.f32 %v9096_v18, %v4339_v16  ;;  %v4443_v34 = vmul.f32 3.8918573e-05, %v4431_v6 }
 0xc03   :  { %v4433_v19 = vadd.f32 0.00028619796, %v4432_v26  ;;  %v9186_v53 = vmul.f32 0.70710677, %v9183_v13  ;;  %v4444_v49 = vadd.f32 0.001143296, %v4443_v34 }
 0xc04   :  { %v4344_v26 = vmul.f32 0.5, %v9179_v10 }
 0xc05   :  { %v4434_v21 = vmul.f32 %v4433_v19, %v4431_v6  ;;  %v4470_v60 = vmul.f32 %v9186_v53, %v9186_v53  ;;  %v4445_v58 = vmul.f32 %v4444_v49, %v4431_v6 }
 0xc07   :  { %v4471_v37 = vmin.f32 %v4470_v60, 16.0  ;;  %v4435_v57 = vadd.f32 0.0036580483, %v4434_v21  ;;  %v4446_v29 = vadd.f32 0.014752088, %v4445_v58 }
 0xc09   :  { %v4472_v51 = vmul.f32 2.1237322e-06, %v4471_v37  ;;  %v4447_v44 = vmul.f32 %v4446_v29, %v4431_v6  ;;  %v4436_v23 = vmul.f32 %v4435_v57, %v4431_v6  ;;  %v4483_v2 = vmul.f32 3.8918573e-05, %v4471_v37 }
 0xc0b   :  { %v4448_v24 = vadd.f32 0.112945676, %v4447_v44  ;;  %v4473_v18 = vadd.f32 0.00028619796, %v4472_v51  ;;  %v4437_v14 = vadd.f32 0.05243302, %v4436_v23 }
 0xc0c   :  { %v4484_v33 = vadd.f32 0.001143296, %v4483_v2  ;;  %v4613_v2 = vld [vmem:[%s9271_s13 + $0x78] sm:$0xff] }
 0xc0d   :  { %v4449_v22 = vmul.f32 %v4448_v24, %v4431_v6  ;;  %v4474_v35 = vmul.f32 %v4473_v18, %v4471_v37  ;;  %v4438_v43 = vmul.f32 %v4437_v14, %v4431_v6  ;;  %v4345_v24 = vmul.f32 0.5, %v9183_v13  ;;  %4618 = vmatpush.msrb.mxu3 %v4613_v2  ;;  %v4612_v14 = vld [vmem:[%s9271_s13 + $0x70] sm:$0xff]  ;;  %v4610_v13 = vld [vmem:[%s9271_s13 + $0x60] sm:$0xff] }
 0xc0e   :  { %v4485_v61 = vmul.f32 %v4484_v33, %v4471_v37 }
 0xc0f   :  { %v4450_v20 = vadd.f32 0.4994258, %v4449_v22  ;;  %v4475_v50 = vadd.f32 0.0036580483, %v4474_v35  ;;  %v4439_v11 = vadd.f32 0.18741608, %v4438_v43  ;;  %4619 = vmatpush.msrb.mxu3 %v4612_v14 }
 0xc10   :  { %v4486_v48 = vadd.f32 0.014752088, %v4485_v61 }
 0xc11   :  { %v4451_v62 = vmul.f32 %v4450_v20, %v4431_v6  ;;  %v4476_v32 = vmul.f32 %v4475_v50, %v4471_v37  ;;  %v4440_v12 = vmul.f32 %v4439_v11, %v4431_v6  ;;  %v4609_v20 = vld [vmem:[%s9271_s13 + $0x58] sm:$0xff]  ;;  %v4608_v50 = vld [vmem:[%s9271_s13 + $0x50] sm:$0xff] }
 0xc12   :  { %v4487_v25 = vmul.f32 %v4486_v48, %v4471_v37  ;;  %v9881_v11 = vld [vmem:[#allocation34_spill] sm:$0xff] }
 0xc13   :  { %v4452_v54 = vadd.f32 1.0, %v4451_v62  ;;  %v4477_v52 = vadd.f32 0.05243302, %v4476_v32  ;;  %v4441_v41 = vadd.f32 1.1283791, %v4440_v12 }
 0xc14   :  { %v4488_v17 = vadd.f32 0.112945676, %v4487_v25  ;;  %v4885_v62 = vld [vmem:[%s9270_s12 + $0x1] ss:$0 sm:$0xff]  ;;  %v4607_v25 = vld [vmem:[%s9271_s13 + $0x48] sm:$0xff] }
 0xc15   :  { %5061 = vrcp.f32 %v4452_v54  ;;  %v4464_v47 = vand.u32 2147483648, %v4452_v54  ;;  %v4462_v63 = vand.u32 2147483647, %v4452_v54  ;;  %v4478_v3 = vmul.f32 %v4477_v52, %v4471_v37 }
 0xc16   :  { %v4489_v56 = vmul.f32 %v4488_v17, %v4471_v37  ;;  %vm4458_vm9 = vweird.f32 %v4452_v54  ;;  %v4442_v40 = vmul.f32 %v4441_v41, %v4348_v45  ;;  %v4199_v17 = vadd.f32 %v9878_v15, %v9881_v11  ;;  %v4603_v15 = vld [vmem:[%s9271_s13 + $0x28] sm:$0xff] }
 0xc17   :  { %v4465_v39 = vor.u32 1.1754944e-38, %v4464_v47  ;;  %vm4463_vm2 = vcmp.eq.f32.partialorder %v4462_v63, 8.507059e+37  ;;  %v4479_v55 = vadd.f32 0.18741608, %v4478_v3  ;;  %v5119_v52 = vmov 16.0   ;;  %v4601_v47 = vld [vmem:[%s9271_s13 + $0x18] sm:$0xff] }
 0xc18   :  { %v4490_v0 = vadd.f32 0.4994258, %v4489_v56  ;;  %v4606_v56 = vld [vmem:[%s9271_s13 + $0x40] sm:$0xff] }
 0xc19   :  { %v4480_v6 = vmul.f32 %v4479_v55, %v4471_v37 }
 0xc1a   :  { %v4491_v9 = vmul.f32 %v4490_v0, %v4471_v37  ;;  %v4604_v0 = vld [vmem:[%s9271_s13 + $0x30] sm:$0xff] }
 0xc1b   :  { %v5062_v27 = vpop.eup %5061  ;;  %v4481_v60 = vadd.f32 1.1283791, %v4480_v6 }
 0xc1c   :  { %v4454_v36 = vmul.f32 %v5062_v27, %v4452_v54  ;;  %vm4459_vm0 = vweird.f32 %v5062_v27  ;;  %v4492_v59 = vadd.f32 1.0, %v4491_v9  ;;  %v9880_v54 = vld [vmem:[#allocation11_spill] sm:$0xff]  ;;  %v4602_v9 = vld [vmem:[%s9271_s13 + $0x20] sm:$0xff] }
 0xc1d   :  { %vm4460_vm11 = vmor %vm4458_vm9, %vm4459_vm0  ;;  %v4482_v51 = vmul.f32 %v4481_v60, %v9186_v53  ;;  %v4611_v53 = vld [vmem:[%s9271_s13 + $0x68] sm:$0xff]  ;;  %v4200_v48 = vadd.f32 %v9879_v31, %v9880_v54  ;;  %v4605_v31 = vld [vmem:[%s9271_s13 + $0x38] sm:$0xff] }
 0xc1e   :  { %v4455_v30 = vsub.f32 1.0, %v4454_v36  ;;  %5063 = vrcp.f32 %v4492_v59  ;;  %v4504_v21 = vand.u32 2147483648, %v4492_v59  ;;  %v4502_v57 = vand.u32 2147483647, %v4492_v59  ;;  %4620 = vmatpush.msrb.mxu3 %v4611_v53 }
 0xc1f   :  { %vm4498_vm3 = vweird.f32 %v4492_v59  ;;  %5065 = vrcp.f32 %v5119_v52 }
 0xc20   :  { %v4456_v38 = vmul.f32 %v5062_v27, %v4455_v30  ;;  %v4505_v29 = vor.u32 1.1754944e-38, %v4504_v21  ;;  %vm4503_vm14 = vcmp.eq.f32.partialorder %v4502_v57, 8.507059e+37  ;;  %4621 = vmatpush.msrb.mxu3 %v4610_v13 }
 0xc22   :  { %v4457_v46 = vadd.f32 %v5062_v27, %v4456_v38  ;;  %4622 = vmatpush.msrb.mxu3 %v4609_v20 }
 0xc24   :  { %v4461_v28 = vsel %vm4460_vm11, %v5062_v27, %v4457_v46  ;;  %v5064_v5 = vpop.eup %5063  ;;  %4623 = vmatpush.msrb.mxu3 %v4608_v50 }
 0xc25   :  { %v4466_v4 = vsel %vm4463_vm2, %v4465_v39, %v4461_v28  ;;  %v4494_v16 = vmul.f32 %v5064_v5, %v4492_v59  ;;  %vm4499_vm8 = vweird.f32 %v5064_v5  ;;  %v5066_v41 = vpop.eup %5065  ;;  %v4600_v59 = vld [vmem:[%s9271_s13 + $0x10] sm:$0xff]  ;;  %v9883_v28 = vld [vmem:[#allocation24_spill] sm:$0xff] }
 0xc26   :  { %v4467_v8 = vmul.f32 %v4466_v4, %v4442_v40  ;;  %vm4500_vm12 = vmor %vm4498_vm3, %vm4499_vm8  ;;  %4624 = vmatpush.msrb.mxu3 %v4607_v25  ;;  %v4581_v46 = vmul.f32 16.0, %v5066_v41  ;;  %v9882_v39 = vld [vmem:[#allocation19_spill] sm:$0xff]  ;;  %v4202_v55 = vadd.f32 %v9005_v7, %v9883_v28  ;;  %vm4585_vm4 = vweird.f32 %v5066_v41 }
 0xc27   :  { %v4495_v19 = vsub.f32 1.0, %v4494_v16  ;;  %v4201_v40 = vadd.f32 %v9000_v1, %v9882_v39  ;;  %v4598_v16 = vld [vmem:[%s9271_s13] sm:$0xff] }
 0xc28   :  { %v4849_v42 = vclamps-f32 %v4467_v8, 1.0  ;;  %4625 = vmatpush.msrb.mxu3 %v4606_v56  ;;  %v4599_v8 = vld [vmem:[%s9271_s13 + $0x8] sm:$0xff] }
 0xc29   :  { %v4496_v58 = vmul.f32 %v5064_v5, %v4495_v19 }
 0xc2a   :  { %v4512_v34 = vadd.f32 1.0, %v4849_v42  ;;  %4626 = vmatpush.msrb.mxu3 %v4605_v31 }
 0xc2b   :  { %v4497_v45 = vadd.f32 %v5064_v5, %v4496_v58 }
 0xc2c   :  { %v4516_v49 = vmul.f32 %v4512_v34, %v4344_v26  ;;  %4627 = vmatpush.msrb.mxu3 %v4604_v0  ;;  %v4582_v26 = vsub.f32 1.0, %v4581_v46 }
 0xc2d   :  { %v4501_v44 = vsel %vm4500_vm12, %v5064_v5, %v4497_v45 }
 0xc2e   :  { %4562 = vmatmul.f32.gmra.mxu1 %v4516_v49  ;;  %v4506_v37 = vsel %vm4503_vm14, %v4505_v29, %v4501_v44  ;;  %4628 = vmatpush.msrb.mxu3 %v4603_v15  ;;  %v4583_v7 = vmul.f32 %v5066_v41, %v4582_v26 }
 0xc2f   :  { %v4507_v23 = vmul.f32 %v4506_v37, %v4482_v51 }
 0xc30   :  { %4629 = vmatpush.msrb.mxu3 %v4602_v9  ;;  %v4584_v58 = vadd.f32 %v5066_v41, %v4583_v7 }
 0xc31   :  { %v4850_v10 = vclamps-f32 %v4507_v23, 1.0 }
 0xc32   :  { %4630 = vmatpush.msrb.mxu3 %v4601_v47  ;;  %v4586_v51 = vsel %vm4585_vm4, %v5066_v41, %v4584_v58 }
 0xc33   :  { %v4513_v18 = vadd.f32 1.0, %v4850_v10 }
 0xc34   :  { %4631 = vmatpush.msrb.mxu3 %v4600_v59 }
 0xc35   :  { %v4517_v22 = vmul.f32 %v4513_v18, %v4345_v24  ;;  %v4886_v24 = vld [vmem:[%s9272_s14] ss:$0 sm:$0xff] }
 0xc36   :  { %4632 = vmatpush.msrb.mxu3 %v4599_v8 }
 0xc37   :  { %4565 = vmatmul.f32.gmra.mxu1 %v4517_v22 }
 0xc38   :  { %4633 = vmatpush.msrb.mxu3 %v4598_v16 }
 0xc41   :  { %v4557_v33 = vpop.f32.mrf.mxu1 }
 0xc42   :  { %v4558_v43 = vadd.f32 %v4885_v62, %v4557_v33 }
 0xc44   :  { %v4569_v27 = vadd.f32 %v4558_v43, %v4199_v17 }
 0xc4a   :  { %v4560_v35 = vpop.f32.mrf.mxu1 }
 0xc4b   :  { %v4561_v61 = vadd.f32 %v4885_v62, %v4560_v35 }
 0xc4d   :  { %v4570_v32 = vadd.f32 %v4561_v61, %v4200_v48 }
 0xc4f   :  { %v4573_v36 = vadd.f32 %v4570_v32, %v4569_v27 }
 0xc51   :  { %v4574_v30 = vrot.slane %v4573_v36, 4 }
 0xc53   :  { %v4575_v38 = vadd.f32 %v4574_v30, %v4573_v36 }
 0xc55   :  { %v4576_v5 = vrot.slane %v4575_v38, 2 }
 0xc57   :  { %v4577_v1 = vadd.f32 %v4576_v5, %v4575_v38 }
 0xc59   :  { %v4578_v21 = vrot.slane %v4577_v1, 1 }
 0xc5b   :  { %v4579_v45 = vadd.f32 %v4578_v21, %v4577_v1 }
 0xc5d   :  { %v4587_v37 = vmul.f32 %v4586_v51, %v4579_v45 }
 0xcab   :  { %v4563_v12 = vpop.f32.mrf.mxu1 }
 0xcac   :  { %v4564_v63 = vadd.f32 %v4885_v62, %v4563_v12 }
 0xcae   :  { %v4571_v42 = vadd.f32 %v4564_v63, %v4201_v40 }
 0xcb4   :  { %v4566_v3 = vpop.f32.mrf.mxu1 }
 0xcb5   :  { %v4567_v4 = vadd.f32 %v4885_v62, %v4566_v3 }
 0xcb7   :  { %v4572_v6 = vadd.f32 %v4567_v4, %v4202_v55 }
 0xcb9   :  { %v4588_v34 = vadd.f32 %v4572_v6, %v4571_v42 }
 0xcbb   :  { %v4589_v19 = vrot.slane %v4588_v34, 4 }
 0xcbd   :  { %v4590_v49 = vadd.f32 %v4589_v19, %v4588_v34 }
 0xcbf   :  { %v4591_v60 = vrot.slane %v4590_v49, 2 }
 0xcc1   :  { %v4592_v57 = vadd.f32 %v4591_v60, %v4590_v49 }
 0xcc3   :  { %v4593_v29 = vrot.slane %v4592_v57, 1 }
 0xcc5   :  { %v4594_v44 = vadd.f32 %v4593_v29, %v4592_v57 }
 0xcc7   :  { %v4595_v23 = vmul.f32 %v4594_v44, %v4586_v51 }
 0xcc9   :  { %v4597_v10 = vsel %vm4596_vm1, %v4587_v37, %v4595_v23 }
 0xcca   :  { %4634 = vmatmul.f32.vlgmr.msrb.gmra.mxu3 %v4597_v10 }
 0xd4d   :  { %v4635_v18 = vpop.f32.mrf.mxu3 }
 0xd4e   :  { %v4636_v22 = vadd.f32 %v4886_v24, %v4635_v18 }
 0xd50   :  { %4639 = vst.msk [vmem:[#allocation2] sm:$0x3] %vm4638_vm10, %v4636_v22 }
 0xd51   :  { %4650 = dma.vmem_to_hbm [thread:$0]  %s4646_s29, 32, %s4648_s16, [#allocation3]  }
 0xd52   :  { %5115 = dma.done.wait [#allocation3], 32  }
 0xd53   :  { %5116 = vsyncadd [#allocation3], 4294967264 }
 0xd54   :  { %4655 = vsyncpa [#allocation3], 1 }

</bundles_post_ra>
